<compile_context>
chip_gen: v5e
topology: v5e:2x2
jax: 0.10.0
libtpu: 0.0.40
codegen_flags: <defaults>
</compile_context>

<pallas_src>
import jax
import jax.numpy as jnp
from jax.experimental import pallas as pl
from jax.experimental.pallas import tpu as pltpu

BN_EPS = 1e-5


# ----------------------------- Pallas kernels ------------------------------

def _conv1_bn_relu_kernel(x_ref, w_ref, g_ref, b_ref, o_ref):
    """ConvTranspose2d(z,64,7,1,0) on a 1x1 input == (N,z) @ (z, 49*64),
    fused with training-mode BatchNorm (batch stats, biased var) and ReLU.

    Column order of w_ref / o_ref is (hw, co): 49 spatial positions x 64 ch.
    """
    C = g_ref.shape[1]                                   # 64 output channels
    acc = jnp.dot(x_ref[...], w_ref[...],
                  preferred_element_type=jnp.float32)    # (N, 49*C) f32
    G = acc.shape[1] // C                                # 49 spatial positions
    cnt = float(G * acc.shape[0])                        # N*49 elems / channel

    # Per-channel sums: reduce rows once, then fold the G column groups.
    col_s = jnp.sum(acc, axis=0, keepdims=True)          # (1, G*C)
    col_q = jnp.sum(acc * acc, axis=0, keepdims=True)    # (1, G*C)
    ch_s = col_s[:, 0:C]
    ch_q = col_q[:, 0:C]
    for p in range(1, G):
        ch_s = ch_s + col_s[:, p * C:(p + 1) * C]
        ch_q = ch_q + col_q[:, p * C:(p + 1) * C]

    mean = ch_s / cnt
    var = ch_q / cnt - mean * mean                       # single-pass variance
    scale = g_ref[...] * jax.lax.rsqrt(var + BN_EPS)     # (1, C)
    shift = b_ref[...] - mean * scale

    for p in range(G):
        blk = acc[:, p * C:(p + 1) * C]
        o_ref[:, p * C:(p + 1) * C] = jnp.maximum(
            blk * scale + shift, 0.0).astype(o_ref.dtype)


def _conv2_bn_relu_kernel(p_ref, w_ref, g_ref, b_ref, o_ref):
    """Polyphase ConvTranspose2d(64,32,4,2,1) + BN(32) + ReLU.

    p_ref: (M, 4*Kq) bf16 -- dense 2x2 patches, one column block per phase.
    w_ref: (4*Kq, Cout) bf16 -- matching per-phase row blocks (Kq = 2*2*Cin).
    o_ref: (M, 4*Cout) bf16 -- phase-major output columns (q = py*2 + px).
    """
    Cout = w_ref.shape[1]
    Kq = w_ref.shape[0] // 4

    accs = []
    for q in range(4):
        a = jnp.dot(p_ref[:, q * Kq:(q + 1) * Kq],
                    w_ref[q * Kq:(q + 1) * Kq, :],
                    preferred_element_type=jnp.float32)  # (M, Cout) f32
        accs.append(a)

    # BatchNorm stats over all N*14*14 output positions (= M rows x 4 phases).
    tot = accs[0] + accs[1] + accs[2] + accs[3]
    tot2 = (accs[0] * accs[0] + accs[1] * accs[1]
            + accs[2] * accs[2] + accs[3] * accs[3])
    cnt = float(4 * tot.shape[0])
    mean = jnp.sum(tot, axis=0, keepdims=True) / cnt      # (1, Cout)
    var = jnp.sum(tot2, axis=0, keepdims=True) / cnt - mean * mean
    scale = g_ref[...] * jax.lax.rsqrt(var + BN_EPS)
    shift = b_ref[...] - mean * scale

    for q in range(4):
        o_ref[:, q * Cout:(q + 1) * Cout] = jnp.maximum(
            accs[q] * scale + shift, 0.0).astype(o_ref.dtype)


def _conv3_tanh_kernel(w_ref, p_ref, o_ref):
    """Polyphase ConvTranspose2d(32,1,4,2,1) + tanh, transposed for lane density.

    w_ref: (4, 4*Kq) bf16 -- per-phase weights laid out block-diagonally over
           the K axis (Cout == 1, so each phase is a length-Kq row segment).
    p_ref: (4*Kq, M) bf16 -- per-phase patch matrices stacked along rows.
    o_ref: (4, M) f32    -- one row per output phase, M = N*14*14 lanes.
    """
    y = jnp.dot(w_ref[...], p_ref[...], preferred_element_type=jnp.float32)
    o_ref[...] = jnp.tanh(y)


# ------------------------- pallas_call wrappers -----------------------------

def _call_fused(kernel, out_shape, args):
    # Everything here is tiny (<< VMEM), so each layer is one whole-array block.
    return pl.pallas_call(
        kernel,
        out_shape=out_shape,
        grid=(1,),
        in_specs=[pl.BlockSpec(a.shape, lambda i: (0, 0)) for a in args],
        out_specs=pl.BlockSpec(out_shape.shape, lambda i: (0, 0)),
        compiler_params=pltpu.CompilerParams(
            dimension_semantics=("arbitrary",)),
    )(*args)


def conv1_bn_relu(x, w, gamma, beta):
    N, K = x.shape[0], w.shape[1]
    out = jax.ShapeDtypeStruct((N, K), jnp.bfloat16)
    return _call_fused(_conv1_bn_relu_kernel, out,
                       (x, w, gamma.reshape(1, -1), beta.reshape(1, -1)))


def conv2_bn_relu(pcat, wcat, gamma, beta):
    M, Cout = pcat.shape[0], wcat.shape[1]
    out = jax.ShapeDtypeStruct((M, 4 * Cout), jnp.bfloat16)
    return _call_fused(_conv2_bn_relu_kernel, out,
                       (pcat, wcat, gamma.reshape(1, -1), beta.reshape(1, -1)))


def conv3_tanh(wbd, pcatT):
    out = jax.ShapeDtypeStruct((4, pcatT.shape[1]), jnp.float32)
    return _call_fused(_conv3_tanh_kernel, out, (wbd, pcatT))


# --------------------- plain-JAX layout glue (no compute) -------------------

def _t_conv1_weight_matrix(w_t):
    """(z, 64, 7, 7) ConvTranspose2d weight -> (z, 7*7*64), columns (hw, co)."""
    z, C, KH, KW = w_t.shape
    return jnp.transpose(w_t, (0, 2, 3, 1)).reshape(z, KH * KW * C)


def _t_conv_s2_phase_weights(w_t):
    """ConvTranspose2d(Cin,Cout,4,4,stride=2,pad=1) weight -> (4, 2*2*Cin, Cout)
    dense 2x2 conv weights, one per output phase q = py*2+px (pixel parity).
    Rows of each phase block are ordered (dy, dx, ci)."""
    Cin, Cout = w_t.shape[0], w_t.shape[1]
    tap = jnp.array([[3, 1], [2, 0]])           # [parity, d] -> kernel tap index
    w = jnp.transpose(w_t, (2, 3, 0, 1))        # (ky, kx, ci, co)
    w = w[tap]                                   # (py, dy, kx, ci, co)
    w = w[:, :, tap]                             # (py, dy, px, dx, ci, co)
    w = jnp.transpose(w, (0, 2, 1, 3, 4, 5))     # (py, px, dy, dx, ci, co)
    return w.reshape(4, 4 * Cin, Cout)


def _phase_patches(f_nhwc):
    """Dense 2x2 patches of the zero-padded NHWC map, one matrix per phase.

    Returns a list of 4 matrices (q = py*2+px), each (N*H*W, 2*2*C) with rows
    (n, u, v) and columns (dy, dx, ci).  Output pixel (2u+py, 2v+px) of the
    stride-2/k4/p1 transposed conv equals patches[q][(n,u,v), :] @ W_phase[q]."""
    N, H, W, C = f_nhwc.shape
    fp = jnp.pad(f_nhwc, ((0, 0), (1, 1), (1, 1), (0, 0)))
    out = []
    for py in (0, 1):
        for px in (0, 1):
            slabs = [fp[:, py + dy:py + dy + H, px + dx:px + dx + W, :]
                     for dy in (0, 1) for dx in (0, 1)]
            out.append(jnp.concatenate(slabs, axis=-1).reshape(N * H * W, 4 * C))
    return out


def _pixel_shuffle_nhwc(y, N, H, C):
    """(N*H*H, 4*C) with columns (py, px, co)  ->  (N, 2H, 2H, C)."""
    t = y.reshape(N, H, H, 2, 2, C)
    t = jnp.transpose(t, (0, 1, 3, 2, 4, 5))
    return t.reshape(N, 2 * H, 2 * H, C)


def _pixel_shuffle_t(y, N, H):
    """(4, N*H*H) with rows (py, px)  ->  (N, 2H, 2H)."""
    t = y.reshape(2, 2, N, H, H)
    t = jnp.transpose(t, (2, 3, 0, 4, 1))
    return t.reshape(N, 2 * H, 2 * H)


# ------------------------------ Generator ----------------------------------

def init_params(key, z_dim, gan_type="DCGAN", num_classes=10):
    if gan_type in ("CGAN", "ACGAN"):
        z_dim += num_classes
    ks = jax.random.split(key, 7)
    return {
        "w1": 0.1 * jax.random.normal(ks[0], (z_dim, 64, 7, 7), jnp.float32),
        "w2": 0.1 * jax.random.normal(ks[1], (64, 32, 4, 4), jnp.float32),
        "w3": 0.1 * jax.random.normal(ks[2], (32, 1, 4, 4), jnp.float32),
        "bn1_g": 1.0 + 0.1 * jax.random.normal(ks[3], (64,), jnp.float32),
        "bn1_b": 0.1 * jax.random.normal(ks[4], (64,), jnp.float32),
        "bn2_g": 1.0 + 0.1 * jax.random.normal(ks[5], (32,), jnp.float32),
        "bn2_b": 0.1 * jax.random.normal(ks[6], (32,), jnp.float32),
    }


def generator_forward(params, x_nchw):
    N, z, hin, win = x_nchw.shape
    assert hin == 1 and win == 1, "Generator expects a (N, z, 1, 1) latent."
    x = x_nchw.reshape(N, z).astype(jnp.float32)

    # --- layer 1: ConvTranspose2d(z, 64, 7, 1, 0) + BN + ReLU   (1x1 -> 7x7)
    w1m = _t_conv1_weight_matrix(params["w1"])                     # (z, 3136)
    y1 = conv1_bn_relu(x.astype(jnp.bfloat16), w1m.astype(jnp.bfloat16),
                       params["bn1_g"], params["bn1_b"])           # (N, 3136) bf16
    f1 = y1.reshape(N, 7, 7, 64)                                   # NHWC

    # --- layer 2: ConvTranspose2d(64, 32, 4, 2, 1) + BN + ReLU  (7x7 -> 14x14)
    p2cat = jnp.concatenate(_phase_patches(f1), axis=1)            # (N*49, 4*256)
    w2cat = _t_conv_s2_phase_weights(params["w2"]).reshape(4 * 256, 32)
    y2 = conv2_bn_relu(p2cat, w2cat.astype(jnp.bfloat16),
                       params["bn2_g"], params["bn2_b"])           # (N*49, 128) bf16
    f2 = _pixel_shuffle_nhwc(y2, N, 7, 32)                         # (N, 14, 14, 32)

    # --- layer 3: ConvTranspose2d(32, 1, 4, 2, 1) + tanh        (14x14 -> 28x28)
    p3catT = jnp.concatenate([p.T for p in _phase_patches(f2)], axis=0)  # (512, N*196)
    w3 = _t_conv_s2_phase_weights(params["w3"])[:, :, 0]           # (4, 128)
    w3bd = (jnp.eye(4, dtype=w3.dtype)[:, :, None]
            * w3[:, None, :]).reshape(4, 4 * 128)                  # block-diag (4, 512)
    y3 = conv3_tanh(w3bd.astype(jnp.bfloat16), p3catT)             # (4, N*196) f32
    img = _pixel_shuffle_t(y3, N, 14)                              # (N, 28, 28)

    return img.reshape(N, 1, 28, 28)                               # NCHW


# ---------------------------- pure-JAX reference ----------------------------

def _ref_conv_transpose(x, w_t, stride, padding):
    C_in, C_out, KH, KW = w_t.shape
    w_conv = jnp.transpose(w_t[:, :, ::-1, ::-1], (1, 0, 2, 3))  # (Cout, Cin, KH, KW)
    return jax.lax.conv_general_dilated(
        x, w_conv, window_strides=(1, 1),
        padding=[(KH - 1 - padding,) * 2, (KW - 1 - padding,) * 2],
        lhs_dilation=(stride, stride),
        dimension_numbers=("NCHW", "OIHW", "NCHW"))


def _ref_bn_relu(x, g, b):
    mean = jnp.mean(x, axis=(0, 2, 3), keepdims=True)
    var = jnp.mean((x - mean) ** 2, axis=(0, 2, 3), keepdims=True)
    xhat = (x - mean) * jax.lax.rsqrt(var + BN_EPS)
    return jnp.maximum(xhat * g.reshape(1, -1, 1, 1) + b.reshape(1, -1, 1, 1), 0.0)


def generator_reference(params, x):
    x = _ref_bn_relu(_ref_conv_transpose(x, params["w1"], 1, 0),
                     params["bn1_g"], params["bn1_b"])
    x = _ref_bn_relu(_ref_conv_transpose(x, params["w2"], 2, 1),
                     params["bn2_g"], params["bn2_b"])
    return jnp.tanh(_ref_conv_transpose(x, params["w3"], 2, 1))


# --------------------------------- main -------------------------------------

if __name__ == "__main__":
    key = jax.random.PRNGKey(0)
    k_param, k_x = jax.random.split(key)

    N, z_dim = 2, 32
    params = init_params(k_param, z_dim, gan_type="DCGAN")
    x = jax.random.normal(k_x, (N, z_dim, 1, 1), jnp.float32)   # latent, NCHW

    fwd = jax.jit(generator_forward)
    y = jax.block_until_ready(fwd(params, x))
    assert y.shape == (N, 1, 28, 28), y.shape

    y_ref = jax.block_until_ready(generator_reference(params, x))
    assert jnp.all(jnp.isfinite(y))
    # bf16 MXU operands (f32 accumulation / BN math) => slightly looser tolerance.
    assert jnp.allclose(y, y_ref, atol=4e-2, rtol=4e-2), \
        float(jnp.max(jnp.abs(y - y_ref)))

    print("KERNEL_OK")
</pallas_src>

<mosaic_0001>
module attributes {stable_mosaic.version = 11 : i64} {
  func.func @_conv1_bn_relu_kernel(%arg0: i32, %arg1: memref<2x32xbf16, #tpu.memory_space<vmem>>, %arg2: memref<32x3136xbf16, #tpu.memory_space<vmem>>, %arg3: memref<1x64xf32, #tpu.memory_space<vmem>>, %arg4: memref<1x64xf32, #tpu.memory_space<vmem>>, %arg5: memref<2x3136xbf16, #tpu.memory_space<vmem>>) attributes {dimension_semantics = [#tpu.dimension_semantics<arbitrary>], iteration_bounds = array<i64: 1>, scalar_prefetch = 0 : i64, scratch_operands = 0 : i64, tpu.core_type = #tpu.core_type<tc>, window_params = [{pipeline_mode = #tpu.pipeline_mode<synchronous>, transform_indices = @transform_0, window_bounds = array<i64: 2, 32>}, {pipeline_mode = #tpu.pipeline_mode<synchronous>, transform_indices = @transform_1, window_bounds = array<i64: 32, 3136>}, {pipeline_mode = #tpu.pipeline_mode<synchronous>, transform_indices = @transform_2, window_bounds = array<i64: 1, 64>}, {pipeline_mode = #tpu.pipeline_mode<synchronous>, transform_indices = @transform_3, window_bounds = array<i64: 1, 64>}, {pipeline_mode = #tpu.pipeline_mode<synchronous>, transform_indices = @transform_4, window_bounds = array<i64: 2, 3136>}]} {
    %c0 = arith.constant 0 : index
    %c0_0 = arith.constant 0 : index
    %0 = vector.load %arg1[%c0, %c0_0] : memref<2x32xbf16, #tpu.memory_space<vmem>>, vector<2x32xbf16>
    %c0_1 = arith.constant 0 : index
    %c0_2 = arith.constant 0 : index
    %1 = vector.load %arg2[%c0_1, %c0_2] : memref<32x3136xbf16, #tpu.memory_space<vmem>>, vector<32x3136xbf16>
    %cst = arith.constant dense<0.000000e+00> : vector<2x3136xf32>
    %2 = tpu.matmul %0, %1, %cst {dimension_numbers = #tpu.dot_dimension_numbers<[1], [0], [0], [1], [0, 0, 1, 1], [], []>} : vector<2x32xbf16>, vector<32x3136xbf16>, vector<2x3136xf32> -> vector<2x3136xf32>
    %cst_3 = arith.constant dense<0.000000e+00> : vector<3136xf32>
    %3 = vector.multi_reduction <add>, %2, %cst_3 [0] : vector<2x3136xf32> to vector<3136xf32>
    %4 = vector.shape_cast %3 : vector<3136xf32> to vector<1x3136xf32>
    %5 = arith.mulf %2, %2 : vector<2x3136xf32>
    %cst_4 = arith.constant dense<0.000000e+00> : vector<3136xf32>
    %6 = vector.multi_reduction <add>, %5, %cst_4 [0] : vector<2x3136xf32> to vector<3136xf32>
    %7 = vector.shape_cast %6 : vector<3136xf32> to vector<1x3136xf32>
    %8 = vector.extract_strided_slice %4 {offsets = [0, 0], sizes = [1, 64], strides = [1, 1]} : vector<1x3136xf32> to vector<1x64xf32>
    %9 = vector.extract_strided_slice %7 {offsets = [0, 0], sizes = [1, 64], strides = [1, 1]} : vector<1x3136xf32> to vector<1x64xf32>
    %10 = vector.extract_strided_slice %4 {offsets = [0, 64], sizes = [1, 64], strides = [1, 1]} : vector<1x3136xf32> to vector<1x64xf32>
    %11 = arith.addf %8, %10 : vector<1x64xf32>
    %12 = vector.extract_strided_slice %7 {offsets = [0, 64], sizes = [1, 64], strides = [1, 1]} : vector<1x3136xf32> to vector<1x64xf32>
    %13 = arith.addf %9, %12 : vector<1x64xf32>
    %14 = vector.extract_strided_slice %4 {offsets = [0, 128], sizes = [1, 64], strides = [1, 1]} : vector<1x3136xf32> to vector<1x64xf32>
    %15 = arith.addf %11, %14 : vector<1x64xf32>
    %16 = vector.extract_strided_slice %7 {offsets = [0, 128], sizes = [1, 64], strides = [1, 1]} : vector<1x3136xf32> to vector<1x64xf32>
    %17 = arith.addf %13, %16 : vector<1x64xf32>
    %18 = vector.extract_strided_slice %4 {offsets = [0, 192], sizes = [1, 64], strides = [1, 1]} : vector<1x3136xf32> to vector<1x64xf32>
    %19 = arith.addf %15, %18 : vector<1x64xf32>
    %20 = vector.extract_strided_slice %7 {offsets = [0, 192], sizes = [1, 64], strides = [1, 1]} : vector<1x3136xf32> to vector<1x64xf32>
    %21 = arith.addf %17, %20 : vector<1x64xf32>
    %22 = vector.extract_strided_slice %4 {offsets = [0, 256], sizes = [1, 64], strides = [1, 1]} : vector<1x3136xf32> to vector<1x64xf32>
    %23 = arith.addf %19, %22 : vector<1x64xf32>
    %24 = vector.extract_strided_slice %7 {offsets = [0, 256], sizes = [1, 64], strides = [1, 1]} : vector<1x3136xf32> to vector<1x64xf32>
    %25 = arith.addf %21, %24 : vector<1x64xf32>
    %26 = vector.extract_strided_slice %4 {offsets = [0, 320], sizes = [1, 64], strides = [1, 1]} : vector<1x3136xf32> to vector<1x64xf32>
    %27 = arith.addf %23, %26 : vector<1x64xf32>
    %28 = vector.extract_strided_slice %7 {offsets = [0, 320], sizes = [1, 64], strides = [1, 1]} : vector<1x3136xf32> to vector<1x64xf32>
    %29 = arith.addf %25, %28 : vector<1x64xf32>
    %30 = vector.extract_strided_slice %4 {offsets = [0, 384], sizes = [1, 64], strides = [1, 1]} : vector<1x3136xf32> to vector<1x64xf32>
    %31 = arith.addf %27, %30 : vector<1x64xf32>
    %32 = vector.extract_strided_slice %7 {offsets = [0, 384], sizes = [1, 64], strides = [1, 1]} : vector<1x3136xf32> to vector<1x64xf32>
    %33 = arith.addf %29, %32 : vector<1x64xf32>
    %34 = vector.extract_strided_slice %4 {offsets = [0, 448], sizes = [1, 64], strides = [1, 1]} : vector<1x3136xf32> to vector<1x64xf32>
    %35 = arith.addf %31, %34 : vector<1x64xf32>
    %36 = vector.extract_strided_slice %7 {offsets = [0, 448], sizes = [1, 64], strides = [1, 1]} : vector<1x3136xf32> to vector<1x64xf32>
    %37 = arith.addf %33, %36 : vector<1x64xf32>
    %38 = vector.extract_strided_slice %4 {offsets = [0, 512], sizes = [1, 64], strides = [1, 1]} : vector<1x3136xf32> to vector<1x64xf32>
    %39 = arith.addf %35, %38 : vector<1x64xf32>
    %40 = vector.extract_strided_slice %7 {offsets = [0, 512], sizes = [1, 64], strides = [1, 1]} : vector<1x3136xf32> to vector<1x64xf32>
    %41 = arith.addf %37, %40 : vector<1x64xf32>
    %42 = vector.extract_strided_slice %4 {offsets = [0, 576], sizes = [1, 64], strides = [1, 1]} : vector<1x3136xf32> to vector<1x64xf32>
    %43 = arith.addf %39, %42 : vector<1x64xf32>
    %44 = vector.extract_strided_slice %7 {offsets = [0, 576], sizes = [1, 64], strides = [1, 1]} : vector<1x3136xf32> to vector<1x64xf32>
    %45 = arith.addf %41, %44 : vector<1x64xf32>
    %46 = vector.extract_strided_slice %4 {offsets = [0, 640], sizes = [1, 64], strides = [1, 1]} : vector<1x3136xf32> to vector<1x64xf32>
    %47 = arith.addf %43, %46 : vector<1x64xf32>
    %48 = vector.extract_strided_slice %7 {offsets = [0, 640], sizes = [1, 64], strides = [1, 1]} : vector<1x3136xf32> to vector<1x64xf32>
    %49 = arith.addf %45, %48 : vector<1x64xf32>
    %50 = vector.extract_strided_slice %4 {offsets = [0, 704], sizes = [1, 64], strides = [1, 1]} : vector<1x3136xf32> to vector<1x64xf32>
    %51 = arith.addf %47, %50 : vector<1x64xf32>
    %52 = vector.extract_strided_slice %7 {offsets = [0, 704], sizes = [1, 64], strides = [1, 1]} : vector<1x3136xf32> to vector<1x64xf32>
    %53 = arith.addf %49, %52 : vector<1x64xf32>
    %54 = vector.extract_strided_slice %4 {offsets = [0, 768], sizes = [1, 64], strides = [1, 1]} : vector<1x3136xf32> to vector<1x64xf32>
    %55 = arith.addf %51, %54 : vector<1x64xf32>
    %56 = vector.extract_strided_slice %7 {offsets = [0, 768], sizes = [1, 64], strides = [1, 1]} : vector<1x3136xf32> to vector<1x64xf32>
    %57 = arith.addf %53, %56 : vector<1x64xf32>
    %58 = vector.extract_strided_slice %4 {offsets = [0, 832], sizes = [1, 64], strides = [1, 1]} : vector<1x3136xf32> to vector<1x64xf32>
    %59 = arith.addf %55, %58 : vector<1x64xf32>
    %60 = vector.extract_strided_slice %7 {offsets = [0, 832], sizes = [1, 64], strides = [1, 1]} : vector<1x3136xf32> to vector<1x64xf32>
    %61 = arith.addf %57, %60 : vector<1x64xf32>
    %62 = vector.extract_strided_slice %4 {offsets = [0, 896], sizes = [1, 64], strides = [1, 1]} : vector<1x3136xf32> to vector<1x64xf32>
    %63 = arith.addf %59, %62 : vector<1x64xf32>
    %64 = vector.extract_strided_slice %7 {offsets = [0, 896], sizes = [1, 64], strides = [1, 1]} : vector<1x3136xf32> to vector<1x64xf32>
    %65 = arith.addf %61, %64 : vector<1x64xf32>
    %66 = vector.extract_strided_slice %4 {offsets = [0, 960], sizes = [1, 64], strides = [1, 1]} : vector<1x3136xf32> to vector<1x64xf32>
    %67 = arith.addf %63, %66 : vector<1x64xf32>
    %68 = vector.extract_strided_slice %7 {offsets = [0, 960], sizes = [1, 64], strides = [1, 1]} : vector<1x3136xf32> to vector<1x64xf32>
    %69 = arith.addf %65, %68 : vector<1x64xf32>
    %70 = vector.extract_strided_slice %4 {offsets = [0, 1024], sizes = [1, 64], strides = [1, 1]} : vector<1x3136xf32> to vector<1x64xf32>
    %71 = arith.addf %67, %70 : vector<1x64xf32>
    %72 = vector.extract_strided_slice %7 {offsets = [0, 1024], sizes = [1, 64], strides = [1, 1]} : vector<1x3136xf32> to vector<1x64xf32>
    %73 = arith.addf %69, %72 : vector<1x64xf32>
    %74 = vector.extract_strided_slice %4 {offsets = [0, 1088], sizes = [1, 64], strides = [1, 1]} : vector<1x3136xf32> to vector<1x64xf32>
    %75 = arith.addf %71, %74 : vector<1x64xf32>
    %76 = vector.extract_strided_slice %7 {offsets = [0, 1088], sizes = [1, 64], strides = [1, 1]} : vector<1x3136xf32> to vector<1x64xf32>
    %77 = arith.addf %73, %76 : vector<1x64xf32>
    %78 = vector.extract_strided_slice %4 {offsets = [0, 1152], sizes = [1, 64], strides = [1, 1]} : vector<1x3136xf32> to vector<1x64xf32>
    %79 = arith.addf %75, %78 : vector<1x64xf32>
    %80 = vector.extract_strided_slice %7 {offsets = [0, 1152], sizes = [1, 64], strides = [1, 1]} : vector<1x3136xf32> to vector<1x64xf32>
    %81 = arith.addf %77, %80 : vector<1x64xf32>
    %82 = vector.extract_strided_slice %4 {offsets = [0, 1216], sizes = [1, 64], strides = [1, 1]} : vector<1x3136xf32> to vector<1x64xf32>
    %83 = arith.addf %79, %82 : vector<1x64xf32>
    %84 = vector.extract_strided_slice %7 {offsets = [0, 1216], sizes = [1, 64], strides = [1, 1]} : vector<1x3136xf32> to vector<1x64xf32>
    %85 = arith.addf %81, %84 : vector<1x64xf32>
    %86 = vector.extract_strided_slice %4 {offsets = [0, 1280], sizes = [1, 64], strides = [1, 1]} : vector<1x3136xf32> to vector<1x64xf32>
    %87 = arith.addf %83, %86 : vector<1x64xf32>
    %88 = vector.extract_strided_slice %7 {offsets = [0, 1280], sizes = [1, 64], strides = [1, 1]} : vector<1x3136xf32> to vector<1x64xf32>
    %89 = arith.addf %85, %88 : vector<1x64xf32>
    %90 = vector.extract_strided_slice %4 {offsets = [0, 1344], sizes = [1, 64], strides = [1, 1]} : vector<1x3136xf32> to vector<1x64xf32>
    %91 = arith.addf %87, %90 : vector<1x64xf32>
    %92 = vector.extract_strided_slice %7 {offsets = [0, 1344], sizes = [1, 64], strides = [1, 1]} : vector<1x3136xf32> to vector<1x64xf32>
    %93 = arith.addf %89, %92 : vector<1x64xf32>
    %94 = vector.extract_strided_slice %4 {offsets = [0, 1408], sizes = [1, 64], strides = [1, 1]} : vector<1x3136xf32> to vector<1x64xf32>
    %95 = arith.addf %91, %94 : vector<1x64xf32>
    %96 = vector.extract_strided_slice %7 {offsets = [0, 1408], sizes = [1, 64], strides = [1, 1]} : vector<1x3136xf32> to vector<1x64xf32>
    %97 = arith.addf %93, %96 : vector<1x64xf32>
    %98 = vector.extract_strided_slice %4 {offsets = [0, 1472], sizes = [1, 64], strides = [1, 1]} : vector<1x3136xf32> to vector<1x64xf32>
    %99 = arith.addf %95, %98 : vector<1x64xf32>
    %100 = vector.extract_strided_slice %7 {offsets = [0, 1472], sizes = [1, 64], strides = [1, 1]} : vector<1x3136xf32> to vector<1x64xf32>
    %101 = arith.addf %97, %100 : vector<1x64xf32>
    %102 = vector.extract_strided_slice %4 {offsets = [0, 1536], sizes = [1, 64], strides = [1, 1]} : vector<1x3136xf32> to vector<1x64xf32>
    %103 = arith.addf %99, %102 : vector<1x64xf32>
    %104 = vector.extract_strided_slice %7 {offsets = [0, 1536], sizes = [1, 64], strides = [1, 1]} : vector<1x3136xf32> to vector<1x64xf32>
    %105 = arith.addf %101, %104 : vector<1x64xf32>
    %106 = vector.extract_strided_slice %4 {offsets = [0, 1600], sizes = [1, 64], strides = [1, 1]} : vector<1x3136xf32> to vector<1x64xf32>
    %107 = arith.addf %103, %106 : vector<1x64xf32>
    %108 = vector.extract_strided_slice %7 {offsets = [0, 1600], sizes = [1, 64], strides = [1, 1]} : vector<1x3136xf32> to vector<1x64xf32>
    %109 = arith.addf %105, %108 : vector<1x64xf32>
    %110 = vector.extract_strided_slice %4 {offsets = [0, 1664], sizes = [1, 64], strides = [1, 1]} : vector<1x3136xf32> to vector<1x64xf32>
    %111 = arith.addf %107, %110 : vector<1x64xf32>
    %112 = vector.extract_strided_slice %7 {offsets = [0, 1664], sizes = [1, 64], strides = [1, 1]} : vector<1x3136xf32> to vector<1x64xf32>
    %113 = arith.addf %109, %112 : vector<1x64xf32>
    %114 = vector.extract_strided_slice %4 {offsets = [0, 1728], sizes = [1, 64], strides = [1, 1]} : vector<1x3136xf32> to vector<1x64xf32>
    %115 = arith.addf %111, %114 : vector<1x64xf32>
    %116 = vector.extract_strided_slice %7 {offsets = [0, 1728], sizes = [1, 64], strides = [1, 1]} : vector<1x3136xf32> to vector<1x64xf32>
    %117 = arith.addf %113, %116 : vector<1x64xf32>
    %118 = vector.extract_strided_slice %4 {offsets = [0, 1792], sizes = [1, 64], strides = [1, 1]} : vector<1x3136xf32> to vector<1x64xf32>
    %119 = arith.addf %115, %118 : vector<1x64xf32>
    %120 = vector.extract_strided_slice %7 {offsets = [0, 1792], sizes = [1, 64], strides = [1, 1]} : vector<1x3136xf32> to vector<1x64xf32>
    %121 = arith.addf %117, %120 : vector<1x64xf32>
    %122 = vector.extract_strided_slice %4 {offsets = [0, 1856], sizes = [1, 64], strides = [1, 1]} : vector<1x3136xf32> to vector<1x64xf32>
    %123 = arith.addf %119, %122 : vector<1x64xf32>
    %124 = vector.extract_strided_slice %7 {offsets = [0, 1856], sizes = [1, 64], strides = [1, 1]} : vector<1x3136xf32> to vector<1x64xf32>
    %125 = arith.addf %121, %124 : vector<1x64xf32>
    %126 = vector.extract_strided_slice %4 {offsets = [0, 1920], sizes = [1, 64], strides = [1, 1]} : vector<1x3136xf32> to vector<1x64xf32>
    %127 = arith.addf %123, %126 : vector<1x64xf32>
    %128 = vector.extract_strided_slice %7 {offsets = [0, 1920], sizes = [1, 64], strides = [1, 1]} : vector<1x3136xf32> to vector<1x64xf32>
    %129 = arith.addf %125, %128 : vector<1x64xf32>
    %130 = vector.extract_strided_slice %4 {offsets = [0, 1984], sizes = [1, 64], strides = [1, 1]} : vector<1x3136xf32> to vector<1x64xf32>
    %131 = arith.addf %127, %130 : vector<1x64xf32>
    %132 = vector.extract_strided_slice %7 {offsets = [0, 1984], sizes = [1, 64], strides = [1, 1]} : vector<1x3136xf32> to vector<1x64xf32>
    %133 = arith.addf %129, %132 : vector<1x64xf32>
    %134 = vector.extract_strided_slice %4 {offsets = [0, 2048], sizes = [1, 64], strides = [1, 1]} : vector<1x3136xf32> to vector<1x64xf32>
    %135 = arith.addf %131, %134 : vector<1x64xf32>
    %136 = vector.extract_strided_slice %7 {offsets = [0, 2048], sizes = [1, 64], strides = [1, 1]} : vector<1x3136xf32> to vector<1x64xf32>
    %137 = arith.addf %133, %136 : vector<1x64xf32>
    %138 = vector.extract_strided_slice %4 {offsets = [0, 2112], sizes = [1, 64], strides = [1, 1]} : vector<1x3136xf32> to vector<1x64xf32>
    %139 = arith.addf %135, %138 : vector<1x64xf32>
    %140 = vector.extract_strided_slice %7 {offsets = [0, 2112], sizes = [1, 64], strides = [1, 1]} : vector<1x3136xf32> to vector<1x64xf32>
    %141 = arith.addf %137, %140 : vector<1x64xf32>
    %142 = vector.extract_strided_slice %4 {offsets = [0, 2176], sizes = [1, 64], strides = [1, 1]} : vector<1x3136xf32> to vector<1x64xf32>
    %143 = arith.addf %139, %142 : vector<1x64xf32>
    %144 = vector.extract_strided_slice %7 {offsets = [0, 2176], sizes = [1, 64], strides = [1, 1]} : vector<1x3136xf32> to vector<1x64xf32>
    %145 = arith.addf %141, %144 : vector<1x64xf32>
    %146 = vector.extract_strided_slice %4 {offsets = [0, 2240], sizes = [1, 64], strides = [1, 1]} : vector<1x3136xf32> to vector<1x64xf32>
    %147 = arith.addf %143, %146 : vector<1x64xf32>
    %148 = vector.extract_strided_slice %7 {offsets = [0, 2240], sizes = [1, 64], strides = [1, 1]} : vector<1x3136xf32> to vector<1x64xf32>
    %149 = arith.addf %145, %148 : vector<1x64xf32>
    %150 = vector.extract_strided_slice %4 {offsets = [0, 2304], sizes = [1, 64], strides = [1, 1]} : vector<1x3136xf32> to vector<1x64xf32>
    %151 = arith.addf %147, %150 : vector<1x64xf32>
    %152 = vector.extract_strided_slice %7 {offsets = [0, 2304], sizes = [1, 64], strides = [1, 1]} : vector<1x3136xf32> to vector<1x64xf32>
    %153 = arith.addf %149, %152 : vector<1x64xf32>
    %154 = vector.extract_strided_slice %4 {offsets = [0, 2368], sizes = [1, 64], strides = [1, 1]} : vector<1x3136xf32> to vector<1x64xf32>
    %155 = arith.addf %151, %154 : vector<1x64xf32>
    %156 = vector.extract_strided_slice %7 {offsets = [0, 2368], sizes = [1, 64], strides = [1, 1]} : vector<1x3136xf32> to vector<1x64xf32>
    %157 = arith.addf %153, %156 : vector<1x64xf32>
    %158 = vector.extract_strided_slice %4 {offsets = [0, 2432], sizes = [1, 64], strides = [1, 1]} : vector<1x3136xf32> to vector<1x64xf32>
    %159 = arith.addf %155, %158 : vector<1x64xf32>
    %160 = vector.extract_strided_slice %7 {offsets = [0, 2432], sizes = [1, 64], strides = [1, 1]} : vector<1x3136xf32> to vector<1x64xf32>
    %161 = arith.addf %157, %160 : vector<1x64xf32>
    %162 = vector.extract_strided_slice %4 {offsets = [0, 2496], sizes = [1, 64], strides = [1, 1]} : vector<1x3136xf32> to vector<1x64xf32>
    %163 = arith.addf %159, %162 : vector<1x64xf32>
    %164 = vector.extract_strided_slice %7 {offsets = [0, 2496], sizes = [1, 64], strides = [1, 1]} : vector<1x3136xf32> to vector<1x64xf32>
    %165 = arith.addf %161, %164 : vector<1x64xf32>
    %166 = vector.extract_strided_slice %4 {offsets = [0, 2560], sizes = [1, 64], strides = [1, 1]} : vector<1x3136xf32> to vector<1x64xf32>
    %167 = arith.addf %163, %166 : vector<1x64xf32>
    %168 = vector.extract_strided_slice %7 {offsets = [0, 2560], sizes = [1, 64], strides = [1, 1]} : vector<1x3136xf32> to vector<1x64xf32>
    %169 = arith.addf %165, %168 : vector<1x64xf32>
    %170 = vector.extract_strided_slice %4 {offsets = [0, 2624], sizes = [1, 64], strides = [1, 1]} : vector<1x3136xf32> to vector<1x64xf32>
    %171 = arith.addf %167, %170 : vector<1x64xf32>
    %172 = vector.extract_strided_slice %7 {offsets = [0, 2624], sizes = [1, 64], strides = [1, 1]} : vector<1x3136xf32> to vector<1x64xf32>
    %173 = arith.addf %169, %172 : vector<1x64xf32>
    %174 = vector.extract_strided_slice %4 {offsets = [0, 2688], sizes = [1, 64], strides = [1, 1]} : vector<1x3136xf32> to vector<1x64xf32>
    %175 = arith.addf %171, %174 : vector<1x64xf32>
    %176 = vector.extract_strided_slice %7 {offsets = [0, 2688], sizes = [1, 64], strides = [1, 1]} : vector<1x3136xf32> to vector<1x64xf32>
    %177 = arith.addf %173, %176 : vector<1x64xf32>
    %178 = vector.extract_strided_slice %4 {offsets = [0, 2752], sizes = [1, 64], strides = [1, 1]} : vector<1x3136xf32> to vector<1x64xf32>
    %179 = arith.addf %175, %178 : vector<1x64xf32>
    %180 = vector.extract_strided_slice %7 {offsets = [0, 2752], sizes = [1, 64], strides = [1, 1]} : vector<1x3136xf32> to vector<1x64xf32>
    %181 = arith.addf %177, %180 : vector<1x64xf32>
    %182 = vector.extract_strided_slice %4 {offsets = [0, 2816], sizes = [1, 64], strides = [1, 1]} : vector<1x3136xf32> to vector<1x64xf32>
    %183 = arith.addf %179, %182 : vector<1x64xf32>
    %184 = vector.extract_strided_slice %7 {offsets = [0, 2816], sizes = [1, 64], strides = [1, 1]} : vector<1x3136xf32> to vector<1x64xf32>
    %185 = arith.addf %181, %184 : vector<1x64xf32>
    %186 = vector.extract_strided_slice %4 {offsets = [0, 2880], sizes = [1, 64], strides = [1, 1]} : vector<1x3136xf32> to vector<1x64xf32>
    %187 = arith.addf %183, %186 : vector<1x64xf32>
    %188 = vector.extract_strided_slice %7 {offsets = [0, 2880], sizes = [1, 64], strides = [1, 1]} : vector<1x3136xf32> to vector<1x64xf32>
    %189 = arith.addf %185, %188 : vector<1x64xf32>
    %190 = vector.extract_strided_slice %4 {offsets = [0, 2944], sizes = [1, 64], strides = [1, 1]} : vector<1x3136xf32> to vector<1x64xf32>
    %191 = arith.addf %187, %190 : vector<1x64xf32>
    %192 = vector.extract_strided_slice %7 {offsets = [0, 2944], sizes = [1, 64], strides = [1, 1]} : vector<1x3136xf32> to vector<1x64xf32>
    %193 = arith.addf %189, %192 : vector<1x64xf32>
    %194 = vector.extract_strided_slice %4 {offsets = [0, 3008], sizes = [1, 64], strides = [1, 1]} : vector<1x3136xf32> to vector<1x64xf32>
    %195 = arith.addf %191, %194 : vector<1x64xf32>
    %196 = vector.extract_strided_slice %7 {offsets = [0, 3008], sizes = [1, 64], strides = [1, 1]} : vector<1x3136xf32> to vector<1x64xf32>
    %197 = arith.addf %193, %196 : vector<1x64xf32>
    %198 = vector.extract_strided_slice %4 {offsets = [0, 3072], sizes = [1, 64], strides = [1, 1]} : vector<1x3136xf32> to vector<1x64xf32>
    %199 = arith.addf %195, %198 : vector<1x64xf32>
    %200 = vector.extract_strided_slice %7 {offsets = [0, 3072], sizes = [1, 64], strides = [1, 1]} : vector<1x3136xf32> to vector<1x64xf32>
    %201 = arith.addf %197, %200 : vector<1x64xf32>
    %cst_5 = arith.constant 9.800000e+01 : f32
    %202 = vector.broadcast %cst_5 : f32 to vector<1x64xf32>
    %203 = arith.divf %199, %202 : vector<1x64xf32>
    %cst_6 = arith.constant 9.800000e+01 : f32
    %204 = vector.broadcast %cst_6 : f32 to vector<1x64xf32>
    %205 = arith.divf %201, %204 : vector<1x64xf32>
    %206 = arith.mulf %203, %203 : vector<1x64xf32>
    %207 = arith.subf %205, %206 : vector<1x64xf32>
    %c0_7 = arith.constant 0 : index
    %c0_8 = arith.constant 0 : index
    %208 = vector.load %arg3[%c0_7, %c0_8] : memref<1x64xf32, #tpu.memory_space<vmem>>, vector<1x64xf32>
    %cst_9 = arith.constant 9.99999974E-6 : f32
    %209 = vector.broadcast %cst_9 : f32 to vector<1x64xf32>
    %210 = arith.addf %207, %209 : vector<1x64xf32>
    %211 = math.rsqrt %210 : vector<1x64xf32>
    %212 = arith.mulf %208, %211 : vector<1x64xf32>
    %c0_10 = arith.constant 0 : index
    %c0_11 = arith.constant 0 : index
    %213 = vector.load %arg4[%c0_10, %c0_11] : memref<1x64xf32, #tpu.memory_space<vmem>>, vector<1x64xf32>
    %214 = arith.mulf %203, %212 : vector<1x64xf32>
    %215 = arith.subf %213, %214 : vector<1x64xf32>
    %216 = vector.extract_strided_slice %2 {offsets = [0, 0], sizes = [2, 64], strides = [1, 1]} : vector<2x3136xf32> to vector<2x64xf32>
    %217 = vector.broadcast %212 : vector<1x64xf32> to vector<2x64xf32>
    %218 = arith.mulf %216, %217 : vector<2x64xf32>
    %219 = vector.broadcast %215 : vector<1x64xf32> to vector<2x64xf32>
    %220 = arith.addf %218, %219 : vector<2x64xf32>
    %cst_12 = arith.constant 0.000000e+00 : f32
    %221 = vector.broadcast %cst_12 : f32 to vector<2x64xf32>
    %222 = arith.maximumf %220, %221 : vector<2x64xf32>
    %223 = arith.truncf %222 : vector<2x64xf32> to vector<2x64xbf16>
    %c0_13 = arith.constant 0 : index
    %c0_14 = arith.constant 0 : index
    %224 = vector.load %arg5[%c0_13, %c0_14] : memref<2x3136xbf16, #tpu.memory_space<vmem>>, vector<2x64xbf16>
    tpu.vector_store %arg5[%c0_13, %c0_14], %223 {strides = array<i32>} : memref<2x3136xbf16, #tpu.memory_space<vmem>>, vector<2x64xbf16>,
    %225 = vector.extract_strided_slice %2 {offsets = [0, 64], sizes = [2, 64], strides = [1, 1]} : vector<2x3136xf32> to vector<2x64xf32>
    %226 = vector.broadcast %212 : vector<1x64xf32> to vector<2x64xf32>
    %227 = arith.mulf %225, %226 : vector<2x64xf32>
    %228 = vector.broadcast %215 : vector<1x64xf32> to vector<2x64xf32>
    %229 = arith.addf %227, %228 : vector<2x64xf32>
    %cst_15 = arith.constant 0.000000e+00 : f32
    %230 = vector.broadcast %cst_15 : f32 to vector<2x64xf32>
    %231 = arith.maximumf %229, %230 : vector<2x64xf32>
    %232 = arith.truncf %231 : vector<2x64xf32> to vector<2x64xbf16>
    %c0_16 = arith.constant 0 : index
    %c64 = arith.constant 64 : index
    %233 = vector.load %arg5[%c0_16, %c64] : memref<2x3136xbf16, #tpu.memory_space<vmem>>, vector<2x64xbf16>
    tpu.vector_store %arg5[%c0_16, %c64], %232 {strides = array<i32>} : memref<2x3136xbf16, #tpu.memory_space<vmem>>, vector<2x64xbf16>,
    %234 = vector.extract_strided_slice %2 {offsets = [0, 128], sizes = [2, 64], strides = [1, 1]} : vector<2x3136xf32> to vector<2x64xf32>
    %235 = vector.broadcast %212 : vector<1x64xf32> to vector<2x64xf32>
    %236 = arith.mulf %234, %235 : vector<2x64xf32>
    %237 = vector.broadcast %215 : vector<1x64xf32> to vector<2x64xf32>
    %238 = arith.addf %236, %237 : vector<2x64xf32>
    %cst_17 = arith.constant 0.000000e+00 : f32
    %239 = vector.broadcast %cst_17 : f32 to vector<2x64xf32>
    %240 = arith.maximumf %238, %239 : vector<2x64xf32>
    %241 = arith.truncf %240 : vector<2x64xf32> to vector<2x64xbf16>
    %c0_18 = arith.constant 0 : index
    %c128 = arith.constant 128 : index
    %242 = vector.load %arg5[%c0_18, %c128] : memref<2x3136xbf16, #tpu.memory_space<vmem>>, vector<2x64xbf16>
    tpu.vector_store %arg5[%c0_18, %c128], %241 {strides = array<i32>} : memref<2x3136xbf16, #tpu.memory_space<vmem>>, vector<2x64xbf16>,
    %243 = vector.extract_strided_slice %2 {offsets = [0, 192], sizes = [2, 64], strides = [1, 1]} : vector<2x3136xf32> to vector<2x64xf32>
    %244 = vector.broadcast %212 : vector<1x64xf32> to vector<2x64xf32>
    %245 = arith.mulf %243, %244 : vector<2x64xf32>
    %246 = vector.broadcast %215 : vector<1x64xf32> to vector<2x64xf32>
    %247 = arith.addf %245, %246 : vector<2x64xf32>
    %cst_19 = arith.constant 0.000000e+00 : f32
    %248 = vector.broadcast %cst_19 : f32 to vector<2x64xf32>
    %249 = arith.maximumf %247, %248 : vector<2x64xf32>
    %250 = arith.truncf %249 : vector<2x64xf32> to vector<2x64xbf16>
    %c0_20 = arith.constant 0 : index
    %c192 = arith.constant 192 : index
    %251 = vector.load %arg5[%c0_20, %c192] : memref<2x3136xbf16, #tpu.memory_space<vmem>>, vector<2x64xbf16>
    tpu.vector_store %arg5[%c0_20, %c192], %250 {strides = array<i32>} : memref<2x3136xbf16, #tpu.memory_space<vmem>>, vector<2x64xbf16>,
    %252 = vector.extract_strided_slice %2 {offsets = [0, 256], sizes = [2, 64], strides = [1, 1]} : vector<2x3136xf32> to vector<2x64xf32>
    %253 = vector.broadcast %212 : vector<1x64xf32> to vector<2x64xf32>
    %254 = arith.mulf %252, %253 : vector<2x64xf32>
    %255 = vector.broadcast %215 : vector<1x64xf32> to vector<2x64xf32>
    %256 = arith.addf %254, %255 : vector<2x64xf32>
    %cst_21 = arith.constant 0.000000e+00 : f32
    %257 = vector.broadcast %cst_21 : f32 to vector<2x64xf32>
    %258 = arith.maximumf %256, %257 : vector<2x64xf32>
    %259 = arith.truncf %258 : vector<2x64xf32> to vector<2x64xbf16>
    %c0_22 = arith.constant 0 : index
    %c256 = arith.constant 256 : index
    %260 = vector.load %arg5[%c0_22, %c256] : memref<2x3136xbf16, #tpu.memory_space<vmem>>, vector<2x64xbf16>
    tpu.vector_store %arg5[%c0_22, %c256], %259 {strides = array<i32>} : memref<2x3136xbf16, #tpu.memory_space<vmem>>, vector<2x64xbf16>,
    %261 = vector.extract_strided_slice %2 {offsets = [0, 320], sizes = [2, 64], strides = [1, 1]} : vector<2x3136xf32> to vector<2x64xf32>
    %262 = vector.broadcast %212 : vector<1x64xf32> to vector<2x64xf32>
    %263 = arith.mulf %261, %262 : vector<2x64xf32>
    %264 = vector.broadcast %215 : vector<1x64xf32> to vector<2x64xf32>
    %265 = arith.addf %263, %264 : vector<2x64xf32>
    %cst_23 = arith.constant 0.000000e+00 : f32
    %266 = vector.broadcast %cst_23 : f32 to vector<2x64xf32>
    %267 = arith.maximumf %265, %266 : vector<2x64xf32>
    %268 = arith.truncf %267 : vector<2x64xf32> to vector<2x64xbf16>
    %c0_24 = arith.constant 0 : index
    %c320 = arith.constant 320 : index
    %269 = vector.load %arg5[%c0_24, %c320] : memref<2x3136xbf16, #tpu.memory_space<vmem>>, vector<2x64xbf16>
    tpu.vector_store %arg5[%c0_24, %c320], %268 {strides = array<i32>} : memref<2x3136xbf16, #tpu.memory_space<vmem>>, vector<2x64xbf16>,
    %270 = vector.extract_strided_slice %2 {offsets = [0, 384], sizes = [2, 64], strides = [1, 1]} : vector<2x3136xf32> to vector<2x64xf32>
    %271 = vector.broadcast %212 : vector<1x64xf32> to vector<2x64xf32>
    %272 = arith.mulf %270, %271 : vector<2x64xf32>
    %273 = vector.broadcast %215 : vector<1x64xf32> to vector<2x64xf32>
    %274 = arith.addf %272, %273 : vector<2x64xf32>
    %cst_25 = arith.constant 0.000000e+00 : f32
    %275 = vector.broadcast %cst_25 : f32 to vector<2x64xf32>
    %276 = arith.maximumf %274, %275 : vector<2x64xf32>
    %277 = arith.truncf %276 : vector<2x64xf32> to vector<2x64xbf16>
    %c0_26 = arith.constant 0 : index
    %c384 = arith.constant 384 : index
    %278 = vector.load %arg5[%c0_26, %c384] : memref<2x3136xbf16, #tpu.memory_space<vmem>>, vector<2x64xbf16>
    tpu.vector_store %arg5[%c0_26, %c384], %277 {strides = array<i32>} : memref<2x3136xbf16, #tpu.memory_space<vmem>>, vector<2x64xbf16>,
    %279 = vector.extract_strided_slice %2 {offsets = [0, 448], sizes = [2, 64], strides = [1, 1]} : vector<2x3136xf32> to vector<2x64xf32>
    %280 = vector.broadcast %212 : vector<1x64xf32> to vector<2x64xf32>
    %281 = arith.mulf %279, %280 : vector<2x64xf32>
    %282 = vector.broadcast %215 : vector<1x64xf32> to vector<2x64xf32>
    %283 = arith.addf %281, %282 : vector<2x64xf32>
    %cst_27 = arith.constant 0.000000e+00 : f32
    %284 = vector.broadcast %cst_27 : f32 to vector<2x64xf32>
    %285 = arith.maximumf %283, %284 : vector<2x64xf32>
    %286 = arith.truncf %285 : vector<2x64xf32> to vector<2x64xbf16>
    %c0_28 = arith.constant 0 : index
    %c448 = arith.constant 448 : index
    %287 = vector.load %arg5[%c0_28, %c448] : memref<2x3136xbf16, #tpu.memory_space<vmem>>, vector<2x64xbf16>
    tpu.vector_store %arg5[%c0_28, %c448], %286 {strides = array<i32>} : memref<2x3136xbf16, #tpu.memory_space<vmem>>, vector<2x64xbf16>,
    %288 = vector.extract_strided_slice %2 {offsets = [0, 512], sizes = [2, 64], strides = [1, 1]} : vector<2x3136xf32> to vector<2x64xf32>
    %289 = vector.broadcast %212 : vector<1x64xf32> to vector<2x64xf32>
    %290 = arith.mulf %288, %289 : vector<2x64xf32>
    %291 = vector.broadcast %215 : vector<1x64xf32> to vector<2x64xf32>
    %292 = arith.addf %290, %291 : vector<2x64xf32>
    %cst_29 = arith.constant 0.000000e+00 : f32
    %293 = vector.broadcast %cst_29 : f32 to vector<2x64xf32>
    %294 = arith.maximumf %292, %293 : vector<2x64xf32>
    %295 = arith.truncf %294 : vector<2x64xf32> to vector<2x64xbf16>
    %c0_30 = arith.constant 0 : index
    %c512 = arith.constant 512 : index
    %296 = vector.load %arg5[%c0_30, %c512] : memref<2x3136xbf16, #tpu.memory_space<vmem>>, vector<2x64xbf16>
    tpu.vector_store %arg5[%c0_30, %c512], %295 {strides = array<i32>} : memref<2x3136xbf16, #tpu.memory_space<vmem>>, vector<2x64xbf16>,
    %297 = vector.extract_strided_slice %2 {offsets = [0, 576], sizes = [2, 64], strides = [1, 1]} : vector<2x3136xf32> to vector<2x64xf32>
    %298 = vector.broadcast %212 : vector<1x64xf32> to vector<2x64xf32>
    %299 = arith.mulf %297, %298 : vector<2x64xf32>
    %300 = vector.broadcast %215 : vector<1x64xf32> to vector<2x64xf32>
    %301 = arith.addf %299, %300 : vector<2x64xf32>
    %cst_31 = arith.constant 0.000000e+00 : f32
    %302 = vector.broadcast %cst_31 : f32 to vector<2x64xf32>
    %303 = arith.maximumf %301, %302 : vector<2x64xf32>
    %304 = arith.truncf %303 : vector<2x64xf32> to vector<2x64xbf16>
    %c0_32 = arith.constant 0 : index
    %c576 = arith.constant 576 : index
    %305 = vector.load %arg5[%c0_32, %c576] : memref<2x3136xbf16, #tpu.memory_space<vmem>>, vector<2x64xbf16>
    tpu.vector_store %arg5[%c0_32, %c576], %304 {strides = array<i32>} : memref<2x3136xbf16, #tpu.memory_space<vmem>>, vector<2x64xbf16>,
    %306 = vector.extract_strided_slice %2 {offsets = [0, 640], sizes = [2, 64], strides = [1, 1]} : vector<2x3136xf32> to vector<2x64xf32>
    %307 = vector.broadcast %212 : vector<1x64xf32> to vector<2x64xf32>
    %308 = arith.mulf %306, %307 : vector<2x64xf32>
    %309 = vector.broadcast %215 : vector<1x64xf32> to vector<2x64xf32>
    %310 = arith.addf %308, %309 : vector<2x64xf32>
    %cst_33 = arith.constant 0.000000e+00 : f32
    %311 = vector.broadcast %cst_33 : f32 to vector<2x64xf32>
    %312 = arith.maximumf %310, %311 : vector<2x64xf32>
    %313 = arith.truncf %312 : vector<2x64xf32> to vector<2x64xbf16>
    %c0_34 = arith.constant 0 : index
    %c640 = arith.constant 640 : index
    %314 = vector.load %arg5[%c0_34, %c640] : memref<2x3136xbf16, #tpu.memory_space<vmem>>, vector<2x64xbf16>
    tpu.vector_store %arg5[%c0_34, %c640], %313 {strides = array<i32>} : memref<2x3136xbf16, #tpu.memory_space<vmem>>, vector<2x64xbf16>,
    %315 = vector.extract_strided_slice %2 {offsets = [0, 704], sizes = [2, 64], strides = [1, 1]} : vector<2x3136xf32> to vector<2x64xf32>
    %316 = vector.broadcast %212 : vector<1x64xf32> to vector<2x64xf32>
    %317 = arith.mulf %315, %316 : vector<2x64xf32>
    %318 = vector.broadcast %215 : vector<1x64xf32> to vector<2x64xf32>
    %319 = arith.addf %317, %318 : vector<2x64xf32>
    %cst_35 = arith.constant 0.000000e+00 : f32
    %320 = vector.broadcast %cst_35 : f32 to vector<2x64xf32>
    %321 = arith.maximumf %319, %320 : vector<2x64xf32>
    %322 = arith.truncf %321 : vector<2x64xf32> to vector<2x64xbf16>
    %c0_36 = arith.constant 0 : index
    %c704 = arith.constant 704 : index
    %323 = vector.load %arg5[%c0_36, %c704] : memref<2x3136xbf16, #tpu.memory_space<vmem>>, vector<2x64xbf16>
    tpu.vector_store %arg5[%c0_36, %c704], %322 {strides = array<i32>} : memref<2x3136xbf16, #tpu.memory_space<vmem>>, vector<2x64xbf16>,
    %324 = vector.extract_strided_slice %2 {offsets = [0, 768], sizes = [2, 64], strides = [1, 1]} : vector<2x3136xf32> to vector<2x64xf32>
    %325 = vector.broadcast %212 : vector<1x64xf32> to vector<2x64xf32>
    %326 = arith.mulf %324, %325 : vector<2x64xf32>
    %327 = vector.broadcast %215 : vector<1x64xf32> to vector<2x64xf32>
    %328 = arith.addf %326, %327 : vector<2x64xf32>
    %cst_37 = arith.constant 0.000000e+00 : f32
    %329 = vector.broadcast %cst_37 : f32 to vector<2x64xf32>
    %330 = arith.maximumf %328, %329 : vector<2x64xf32>
    %331 = arith.truncf %330 : vector<2x64xf32> to vector<2x64xbf16>
    %c0_38 = arith.constant 0 : index
    %c768 = arith.constant 768 : index
    %332 = vector.load %arg5[%c0_38, %c768] : memref<2x3136xbf16, #tpu.memory_space<vmem>>, vector<2x64xbf16>
    tpu.vector_store %arg5[%c0_38, %c768], %331 {strides = array<i32>} : memref<2x3136xbf16, #tpu.memory_space<vmem>>, vector<2x64xbf16>,
    %333 = vector.extract_strided_slice %2 {offsets = [0, 832], sizes = [2, 64], strides = [1, 1]} : vector<2x3136xf32> to vector<2x64xf32>
    %334 = vector.broadcast %212 : vector<1x64xf32> to vector<2x64xf32>
    %335 = arith.mulf %333, %334 : vector<2x64xf32>
    %336 = vector.broadcast %215 : vector<1x64xf32> to vector<2x64xf32>
    %337 = arith.addf %335, %336 : vector<2x64xf32>
    %cst_39 = arith.constant 0.000000e+00 : f32
    %338 = vector.broadcast %cst_39 : f32 to vector<2x64xf32>
    %339 = arith.maximumf %337, %338 : vector<2x64xf32>
    %340 = arith.truncf %339 : vector<2x64xf32> to vector<2x64xbf16>
    %c0_40 = arith.constant 0 : index
    %c832 = arith.constant 832 : index
    %341 = vector.load %arg5[%c0_40, %c832] : memref<2x3136xbf16, #tpu.memory_space<vmem>>, vector<2x64xbf16>
    tpu.vector_store %arg5[%c0_40, %c832], %340 {strides = array<i32>} : memref<2x3136xbf16, #tpu.memory_space<vmem>>, vector<2x64xbf16>,
    %342 = vector.extract_strided_slice %2 {offsets = [0, 896], sizes = [2, 64], strides = [1, 1]} : vector<2x3136xf32> to vector<2x64xf32>
    %343 = vector.broadcast %212 : vector<1x64xf32> to vector<2x64xf32>
    %344 = arith.mulf %342, %343 : vector<2x64xf32>
    %345 = vector.broadcast %215 : vector<1x64xf32> to vector<2x64xf32>
    %346 = arith.addf %344, %345 : vector<2x64xf32>
    %cst_41 = arith.constant 0.000000e+00 : f32
    %347 = vector.broadcast %cst_41 : f32 to vector<2x64xf32>
    %348 = arith.maximumf %346, %347 : vector<2x64xf32>
    %349 = arith.truncf %348 : vector<2x64xf32> to vector<2x64xbf16>
    %c0_42 = arith.constant 0 : index
    %c896 = arith.constant 896 : index
    %350 = vector.load %arg5[%c0_42, %c896] : memref<2x3136xbf16, #tpu.memory_space<vmem>>, vector<2x64xbf16>
    tpu.vector_store %arg5[%c0_42, %c896], %349 {strides = array<i32>} : memref<2x3136xbf16, #tpu.memory_space<vmem>>, vector<2x64xbf16>,
    %351 = vector.extract_strided_slice %2 {offsets = [0, 960], sizes = [2, 64], strides = [1, 1]} : vector<2x3136xf32> to vector<2x64xf32>
    %352 = vector.broadcast %212 : vector<1x64xf32> to vector<2x64xf32>
    %353 = arith.mulf %351, %352 : vector<2x64xf32>
    %354 = vector.broadcast %215 : vector<1x64xf32> to vector<2x64xf32>
    %355 = arith.addf %353, %354 : vector<2x64xf32>
    %cst_43 = arith.constant 0.000000e+00 : f32
    %356 = vector.broadcast %cst_43 : f32 to vector<2x64xf32>
    %357 = arith.maximumf %355, %356 : vector<2x64xf32>
    %358 = arith.truncf %357 : vector<2x64xf32> to vector<2x64xbf16>
    %c0_44 = arith.constant 0 : index
    %c960 = arith.constant 960 : index
    %359 = vector.load %arg5[%c0_44, %c960] : memref<2x3136xbf16, #tpu.memory_space<vmem>>, vector<2x64xbf16>
    tpu.vector_store %arg5[%c0_44, %c960], %358 {strides = array<i32>} : memref<2x3136xbf16, #tpu.memory_space<vmem>>, vector<2x64xbf16>,
    %360 = vector.extract_strided_slice %2 {offsets = [0, 1024], sizes = [2, 64], strides = [1, 1]} : vector<2x3136xf32> to vector<2x64xf32>
    %361 = vector.broadcast %212 : vector<1x64xf32> to vector<2x64xf32>
    %362 = arith.mulf %360, %361 : vector<2x64xf32>
    %363 = vector.broadcast %215 : vector<1x64xf32> to vector<2x64xf32>
    %364 = arith.addf %362, %363 : vector<2x64xf32>
    %cst_45 = arith.constant 0.000000e+00 : f32
    %365 = vector.broadcast %cst_45 : f32 to vector<2x64xf32>
    %366 = arith.maximumf %364, %365 : vector<2x64xf32>
    %367 = arith.truncf %366 : vector<2x64xf32> to vector<2x64xbf16>
    %c0_46 = arith.constant 0 : index
    %c1024 = arith.constant 1024 : index
    %368 = vector.load %arg5[%c0_46, %c1024] : memref<2x3136xbf16, #tpu.memory_space<vmem>>, vector<2x64xbf16>
    tpu.vector_store %arg5[%c0_46, %c1024], %367 {strides = array<i32>} : memref<2x3136xbf16, #tpu.memory_space<vmem>>, vector<2x64xbf16>,
    %369 = vector.extract_strided_slice %2 {offsets = [0, 1088], sizes = [2, 64], strides = [1, 1]} : vector<2x3136xf32> to vector<2x64xf32>
    %370 = vector.broadcast %212 : vector<1x64xf32> to vector<2x64xf32>
    %371 = arith.mulf %369, %370 : vector<2x64xf32>
    %372 = vector.broadcast %215 : vector<1x64xf32> to vector<2x64xf32>
    %373 = arith.addf %371, %372 : vector<2x64xf32>
    %cst_47 = arith.constant 0.000000e+00 : f32
    %374 = vector.broadcast %cst_47 : f32 to vector<2x64xf32>
    %375 = arith.maximumf %373, %374 : vector<2x64xf32>
    %376 = arith.truncf %375 : vector<2x64xf32> to vector<2x64xbf16>
    %c0_48 = arith.constant 0 : index
    %c1088 = arith.constant 1088 : index
    %377 = vector.load %arg5[%c0_48, %c1088] : memref<2x3136xbf16, #tpu.memory_space<vmem>>, vector<2x64xbf16>
    tpu.vector_store %arg5[%c0_48, %c1088], %376 {strides = array<i32>} : memref<2x3136xbf16, #tpu.memory_space<vmem>>, vector<2x64xbf16>,
    %378 = vector.extract_strided_slice %2 {offsets = [0, 1152], sizes = [2, 64], strides = [1, 1]} : vector<2x3136xf32> to vector<2x64xf32>
    %379 = vector.broadcast %212 : vector<1x64xf32> to vector<2x64xf32>
    %380 = arith.mulf %378, %379 : vector<2x64xf32>
    %381 = vector.broadcast %215 : vector<1x64xf32> to vector<2x64xf32>
    %382 = arith.addf %380, %381 : vector<2x64xf32>
    %cst_49 = arith.constant 0.000000e+00 : f32
    %383 = vector.broadcast %cst_49 : f32 to vector<2x64xf32>
    %384 = arith.maximumf %382, %383 : vector<2x64xf32>
    %385 = arith.truncf %384 : vector<2x64xf32> to vector<2x64xbf16>
    %c0_50 = arith.constant 0 : index
    %c1152 = arith.constant 1152 : index
    %386 = vector.load %arg5[%c0_50, %c1152] : memref<2x3136xbf16, #tpu.memory_space<vmem>>, vector<2x64xbf16>
    tpu.vector_store %arg5[%c0_50, %c1152], %385 {strides = array<i32>} : memref<2x3136xbf16, #tpu.memory_space<vmem>>, vector<2x64xbf16>,
    %387 = vector.extract_strided_slice %2 {offsets = [0, 1216], sizes = [2, 64], strides = [1, 1]} : vector<2x3136xf32> to vector<2x64xf32>
    %388 = vector.broadcast %212 : vector<1x64xf32> to vector<2x64xf32>
    %389 = arith.mulf %387, %388 : vector<2x64xf32>
    %390 = vector.broadcast %215 : vector<1x64xf32> to vector<2x64xf32>
    %391 = arith.addf %389, %390 : vector<2x64xf32>
    %cst_51 = arith.constant 0.000000e+00 : f32
    %392 = vector.broadcast %cst_51 : f32 to vector<2x64xf32>
    %393 = arith.maximumf %391, %392 : vector<2x64xf32>
    %394 = arith.truncf %393 : vector<2x64xf32> to vector<2x64xbf16>
    %c0_52 = arith.constant 0 : index
    %c1216 = arith.constant 1216 : index
    %395 = vector.load %arg5[%c0_52, %c1216] : memref<2x3136xbf16, #tpu.memory_space<vmem>>, vector<2x64xbf16>
    tpu.vector_store %arg5[%c0_52, %c1216], %394 {strides = array<i32>} : memref<2x3136xbf16, #tpu.memory_space<vmem>>, vector<2x64xbf16>,
    %396 = vector.extract_strided_slice %2 {offsets = [0, 1280], sizes = [2, 64], strides = [1, 1]} : vector<2x3136xf32> to vector<2x64xf32>
    %397 = vector.broadcast %212 : vector<1x64xf32> to vector<2x64xf32>
    %398 = arith.mulf %396, %397 : vector<2x64xf32>
    %399 = vector.broadcast %215 : vector<1x64xf32> to vector<2x64xf32>
    %400 = arith.addf %398, %399 : vector<2x64xf32>
    %cst_53 = arith.constant 0.000000e+00 : f32
    %401 = vector.broadcast %cst_53 : f32 to vector<2x64xf32>
    %402 = arith.maximumf %400, %401 : vector<2x64xf32>
    %403 = arith.truncf %402 : vector<2x64xf32> to vector<2x64xbf16>
    %c0_54 = arith.constant 0 : index
    %c1280 = arith.constant 1280 : index
    %404 = vector.load %arg5[%c0_54, %c1280] : memref<2x3136xbf16, #tpu.memory_space<vmem>>, vector<2x64xbf16>
    tpu.vector_store %arg5[%c0_54, %c1280], %403 {strides = array<i32>} : memref<2x3136xbf16, #tpu.memory_space<vmem>>, vector<2x64xbf16>,
    %405 = vector.extract_strided_slice %2 {offsets = [0, 1344], sizes = [2, 64], strides = [1, 1]} : vector<2x3136xf32> to vector<2x64xf32>
    %406 = vector.broadcast %212 : vector<1x64xf32> to vector<2x64xf32>
    %407 = arith.mulf %405, %406 : vector<2x64xf32>
    %408 = vector.broadcast %215 : vector<1x64xf32> to vector<2x64xf32>
    %409 = arith.addf %407, %408 : vector<2x64xf32>
    %cst_55 = arith.constant 0.000000e+00 : f32
    %410 = vector.broadcast %cst_55 : f32 to vector<2x64xf32>
    %411 = arith.maximumf %409, %410 : vector<2x64xf32>
    %412 = arith.truncf %411 : vector<2x64xf32> to vector<2x64xbf16>
    %c0_56 = arith.constant 0 : index
    %c1344 = arith.constant 1344 : index
    %413 = vector.load %arg5[%c0_56, %c1344] : memref<2x3136xbf16, #tpu.memory_space<vmem>>, vector<2x64xbf16>
    tpu.vector_store %arg5[%c0_56, %c1344], %412 {strides = array<i32>} : memref<2x3136xbf16, #tpu.memory_space<vmem>>, vector<2x64xbf16>,
    %414 = vector.extract_strided_slice %2 {offsets = [0, 1408], sizes = [2, 64], strides = [1, 1]} : vector<2x3136xf32> to vector<2x64xf32>
    %415 = vector.broadcast %212 : vector<1x64xf32> to vector<2x64xf32>
    %416 = arith.mulf %414, %415 : vector<2x64xf32>
    %417 = vector.broadcast %215 : vector<1x64xf32> to vector<2x64xf32>
    %418 = arith.addf %416, %417 : vector<2x64xf32>
    %cst_57 = arith.constant 0.000000e+00 : f32
    %419 = vector.broadcast %cst_57 : f32 to vector<2x64xf32>
    %420 = arith.maximumf %418, %419 : vector<2x64xf32>
    %421 = arith.truncf %420 : vector<2x64xf32> to vector<2x64xbf16>
    %c0_58 = arith.constant 0 : index
    %c1408 = arith.constant 1408 : index
    %422 = vector.load %arg5[%c0_58, %c1408] : memref<2x3136xbf16, #tpu.memory_space<vmem>>, vector<2x64xbf16>
    tpu.vector_store %arg5[%c0_58, %c1408], %421 {strides = array<i32>} : memref<2x3136xbf16, #tpu.memory_space<vmem>>, vector<2x64xbf16>,
    %423 = vector.extract_strided_slice %2 {offsets = [0, 1472], sizes = [2, 64], strides = [1, 1]} : vector<2x3136xf32> to vector<2x64xf32>
    %424 = vector.broadcast %212 : vector<1x64xf32> to vector<2x64xf32>
    %425 = arith.mulf %423, %424 : vector<2x64xf32>
    %426 = vector.broadcast %215 : vector<1x64xf32> to vector<2x64xf32>
    %427 = arith.addf %425, %426 : vector<2x64xf32>
    %cst_59 = arith.constant 0.000000e+00 : f32
    %428 = vector.broadcast %cst_59 : f32 to vector<2x64xf32>
    %429 = arith.maximumf %427, %428 : vector<2x64xf32>
    %430 = arith.truncf %429 : vector<2x64xf32> to vector<2x64xbf16>
    %c0_60 = arith.constant 0 : index
    %c1472 = arith.constant 1472 : index
    %431 = vector.load %arg5[%c0_60, %c1472] : memref<2x3136xbf16, #tpu.memory_space<vmem>>, vector<2x64xbf16>
    tpu.vector_store %arg5[%c0_60, %c1472], %430 {strides = array<i32>} : memref<2x3136xbf16, #tpu.memory_space<vmem>>, vector<2x64xbf16>,
    %432 = vector.extract_strided_slice %2 {offsets = [0, 1536], sizes = [2, 64], strides = [1, 1]} : vector<2x3136xf32> to vector<2x64xf32>
    %433 = vector.broadcast %212 : vector<1x64xf32> to vector<2x64xf32>
    %434 = arith.mulf %432, %433 : vector<2x64xf32>
    %435 = vector.broadcast %215 : vector<1x64xf32> to vector<2x64xf32>
    %436 = arith.addf %434, %435 : vector<2x64xf32>
    %cst_61 = arith.constant 0.000000e+00 : f32
    %437 = vector.broadcast %cst_61 : f32 to vector<2x64xf32>
    %438 = arith.maximumf %436, %437 : vector<2x64xf32>
    %439 = arith.truncf %438 : vector<2x64xf32> to vector<2x64xbf16>
    %c0_62 = arith.constant 0 : index
    %c1536 = arith.constant 1536 : index
    %440 = vector.load %arg5[%c0_62, %c1536] : memref<2x3136xbf16, #tpu.memory_space<vmem>>, vector<2x64xbf16>
    tpu.vector_store %arg5[%c0_62, %c1536], %439 {strides = array<i32>} : memref<2x3136xbf16, #tpu.memory_space<vmem>>, vector<2x64xbf16>,
    %441 = vector.extract_strided_slice %2 {offsets = [0, 1600], sizes = [2, 64], strides = [1, 1]} : vector<2x3136xf32> to vector<2x64xf32>
    %442 = vector.broadcast %212 : vector<1x64xf32> to vector<2x64xf32>
    %443 = arith.mulf %441, %442 : vector<2x64xf32>
    %444 = vector.broadcast %215 : vector<1x64xf32> to vector<2x64xf32>
    %445 = arith.addf %443, %444 : vector<2x64xf32>
    %cst_63 = arith.constant 0.000000e+00 : f32
    %446 = vector.broadcast %cst_63 : f32 to vector<2x64xf32>
    %447 = arith.maximumf %445, %446 : vector<2x64xf32>
    %448 = arith.truncf %447 : vector<2x64xf32> to vector<2x64xbf16>
    %c0_64 = arith.constant 0 : index
    %c1600 = arith.constant 1600 : index
    %449 = vector.load %arg5[%c0_64, %c1600] : memref<2x3136xbf16, #tpu.memory_space<vmem>>, vector<2x64xbf16>
    tpu.vector_store %arg5[%c0_64, %c1600], %448 {strides = array<i32>} : memref<2x3136xbf16, #tpu.memory_space<vmem>>, vector<2x64xbf16>,
    %450 = vector.extract_strided_slice %2 {offsets = [0, 1664], sizes = [2, 64], strides = [1, 1]} : vector<2x3136xf32> to vector<2x64xf32>
    %451 = vector.broadcast %212 : vector<1x64xf32> to vector<2x64xf32>
    %452 = arith.mulf %450, %451 : vector<2x64xf32>
    %453 = vector.broadcast %215 : vector<1x64xf32> to vector<2x64xf32>
    %454 = arith.addf %452, %453 : vector<2x64xf32>
    %cst_65 = arith.constant 0.000000e+00 : f32
    %455 = vector.broadcast %cst_65 : f32 to vector<2x64xf32>
    %456 = arith.maximumf %454, %455 : vector<2x64xf32>
    %457 = arith.truncf %456 : vector<2x64xf32> to vector<2x64xbf16>
    %c0_66 = arith.constant 0 : index
    %c1664 = arith.constant 1664 : index
    %458 = vector.load %arg5[%c0_66, %c1664] : memref<2x3136xbf16, #tpu.memory_space<vmem>>, vector<2x64xbf16>
    tpu.vector_store %arg5[%c0_66, %c1664], %457 {strides = array<i32>} : memref<2x3136xbf16, #tpu.memory_space<vmem>>, vector<2x64xbf16>,
    %459 = vector.extract_strided_slice %2 {offsets = [0, 1728], sizes = [2, 64], strides = [1, 1]} : vector<2x3136xf32> to vector<2x64xf32>
    %460 = vector.broadcast %212 : vector<1x64xf32> to vector<2x64xf32>
    %461 = arith.mulf %459, %460 : vector<2x64xf32>
    %462 = vector.broadcast %215 : vector<1x64xf32> to vector<2x64xf32>
    %463 = arith.addf %461, %462 : vector<2x64xf32>
    %cst_67 = arith.constant 0.000000e+00 : f32
    %464 = vector.broadcast %cst_67 : f32 to vector<2x64xf32>
    %465 = arith.maximumf %463, %464 : vector<2x64xf32>
    %466 = arith.truncf %465 : vector<2x64xf32> to vector<2x64xbf16>
    %c0_68 = arith.constant 0 : index
    %c1728 = arith.constant 1728 : index
    %467 = vector.load %arg5[%c0_68, %c1728] : memref<2x3136xbf16, #tpu.memory_space<vmem>>, vector<2x64xbf16>
    tpu.vector_store %arg5[%c0_68, %c1728], %466 {strides = array<i32>} : memref<2x3136xbf16, #tpu.memory_space<vmem>>, vector<2x64xbf16>,
    %468 = vector.extract_strided_slice %2 {offsets = [0, 1792], sizes = [2, 64], strides = [1, 1]} : vector<2x3136xf32> to vector<2x64xf32>
    %469 = vector.broadcast %212 : vector<1x64xf32> to vector<2x64xf32>
    %470 = arith.mulf %468, %469 : vector<2x64xf32>
    %471 = vector.broadcast %215 : vector<1x64xf32> to vector<2x64xf32>
    %472 = arith.addf %470, %471 : vector<2x64xf32>
    %cst_69 = arith.constant 0.000000e+00 : f32
    %473 = vector.broadcast %cst_69 : f32 to vector<2x64xf32>
    %474 = arith.maximumf %472, %473 : vector<2x64xf32>
    %475 = arith.truncf %474 : vector<2x64xf32> to vector<2x64xbf16>
    %c0_70 = arith.constant 0 : index
    %c1792 = arith.constant 1792 : index
    %476 = vector.load %arg5[%c0_70, %c1792] : memref<2x3136xbf16, #tpu.memory_space<vmem>>, vector<2x64xbf16>
    tpu.vector_store %arg5[%c0_70, %c1792], %475 {strides = array<i32>} : memref<2x3136xbf16, #tpu.memory_space<vmem>>, vector<2x64xbf16>,
    %477 = vector.extract_strided_slice %2 {offsets = [0, 1856], sizes = [2, 64], strides = [1, 1]} : vector<2x3136xf32> to vector<2x64xf32>
    %478 = vector.broadcast %212 : vector<1x64xf32> to vector<2x64xf32>
    %479 = arith.mulf %477, %478 : vector<2x64xf32>
    %480 = vector.broadcast %215 : vector<1x64xf32> to vector<2x64xf32>
    %481 = arith.addf %479, %480 : vector<2x64xf32>
    %cst_71 = arith.constant 0.000000e+00 : f32
    %482 = vector.broadcast %cst_71 : f32 to vector<2x64xf32>
    %483 = arith.maximumf %481, %482 : vector<2x64xf32>
    %484 = arith.truncf %483 : vector<2x64xf32> to vector<2x64xbf16>
    %c0_72 = arith.constant 0 : index
    %c1856 = arith.constant 1856 : index
    %485 = vector.load %arg5[%c0_72, %c1856] : memref<2x3136xbf16, #tpu.memory_space<vmem>>, vector<2x64xbf16>
    tpu.vector_store %arg5[%c0_72, %c1856], %484 {strides = array<i32>} : memref<2x3136xbf16, #tpu.memory_space<vmem>>, vector<2x64xbf16>,
    %486 = vector.extract_strided_slice %2 {offsets = [0, 1920], sizes = [2, 64], strides = [1, 1]} : vector<2x3136xf32> to vector<2x64xf32>
    %487 = vector.broadcast %212 : vector<1x64xf32> to vector<2x64xf32>
    %488 = arith.mulf %486, %487 : vector<2x64xf32>
    %489 = vector.broadcast %215 : vector<1x64xf32> to vector<2x64xf32>
    %490 = arith.addf %488, %489 : vector<2x64xf32>
    %cst_73 = arith.constant 0.000000e+00 : f32
    %491 = vector.broadcast %cst_73 : f32 to vector<2x64xf32>
    %492 = arith.maximumf %490, %491 : vector<2x64xf32>
    %493 = arith.truncf %492 : vector<2x64xf32> to vector<2x64xbf16>
    %c0_74 = arith.constant 0 : index
    %c1920 = arith.constant 1920 : index
    %494 = vector.load %arg5[%c0_74, %c1920] : memref<2x3136xbf16, #tpu.memory_space<vmem>>, vector<2x64xbf16>
    tpu.vector_store %arg5[%c0_74, %c1920], %493 {strides = array<i32>} : memref<2x3136xbf16, #tpu.memory_space<vmem>>, vector<2x64xbf16>,
    %495 = vector.extract_strided_slice %2 {offsets = [0, 1984], sizes = [2, 64], strides = [1, 1]} : vector<2x3136xf32> to vector<2x64xf32>
    %496 = vector.broadcast %212 : vector<1x64xf32> to vector<2x64xf32>
    %497 = arith.mulf %495, %496 : vector<2x64xf32>
    %498 = vector.broadcast %215 : vector<1x64xf32> to vector<2x64xf32>
    %499 = arith.addf %497, %498 : vector<2x64xf32>
    %cst_75 = arith.constant 0.000000e+00 : f32
    %500 = vector.broadcast %cst_75 : f32 to vector<2x64xf32>
    %501 = arith.maximumf %499, %500 : vector<2x64xf32>
    %502 = arith.truncf %501 : vector<2x64xf32> to vector<2x64xbf16>
    %c0_76 = arith.constant 0 : index
    %c1984 = arith.constant 1984 : index
    %503 = vector.load %arg5[%c0_76, %c1984] : memref<2x3136xbf16, #tpu.memory_space<vmem>>, vector<2x64xbf16>
    tpu.vector_store %arg5[%c0_76, %c1984], %502 {strides = array<i32>} : memref<2x3136xbf16, #tpu.memory_space<vmem>>, vector<2x64xbf16>,
    %504 = vector.extract_strided_slice %2 {offsets = [0, 2048], sizes = [2, 64], strides = [1, 1]} : vector<2x3136xf32> to vector<2x64xf32>
    %505 = vector.broadcast %212 : vector<1x64xf32> to vector<2x64xf32>
    %506 = arith.mulf %504, %505 : vector<2x64xf32>
    %507 = vector.broadcast %215 : vector<1x64xf32> to vector<2x64xf32>
    %508 = arith.addf %506, %507 : vector<2x64xf32>
    %cst_77 = arith.constant 0.000000e+00 : f32
    %509 = vector.broadcast %cst_77 : f32 to vector<2x64xf32>
    %510 = arith.maximumf %508, %509 : vector<2x64xf32>
    %511 = arith.truncf %510 : vector<2x64xf32> to vector<2x64xbf16>
    %c0_78 = arith.constant 0 : index
    %c2048 = arith.constant 2048 : index
    %512 = vector.load %arg5[%c0_78, %c2048] : memref<2x3136xbf16, #tpu.memory_space<vmem>>, vector<2x64xbf16>
    tpu.vector_store %arg5[%c0_78, %c2048], %511 {strides = array<i32>} : memref<2x3136xbf16, #tpu.memory_space<vmem>>, vector<2x64xbf16>,
    %513 = vector.extract_strided_slice %2 {offsets = [0, 2112], sizes = [2, 64], strides = [1, 1]} : vector<2x3136xf32> to vector<2x64xf32>
    %514 = vector.broadcast %212 : vector<1x64xf32> to vector<2x64xf32>
    %515 = arith.mulf %513, %514 : vector<2x64xf32>
    %516 = vector.broadcast %215 : vector<1x64xf32> to vector<2x64xf32>
    %517 = arith.addf %515, %516 : vector<2x64xf32>
    %cst_79 = arith.constant 0.000000e+00 : f32
    %518 = vector.broadcast %cst_79 : f32 to vector<2x64xf32>
    %519 = arith.maximumf %517, %518 : vector<2x64xf32>
    %520 = arith.truncf %519 : vector<2x64xf32> to vector<2x64xbf16>
    %c0_80 = arith.constant 0 : index
    %c2112 = arith.constant 2112 : index
    %521 = vector.load %arg5[%c0_80, %c2112] : memref<2x3136xbf16, #tpu.memory_space<vmem>>, vector<2x64xbf16>
    tpu.vector_store %arg5[%c0_80, %c2112], %520 {strides = array<i32>} : memref<2x3136xbf16, #tpu.memory_space<vmem>>, vector<2x64xbf16>,
    %522 = vector.extract_strided_slice %2 {offsets = [0, 2176], sizes = [2, 64], strides = [1, 1]} : vector<2x3136xf32> to vector<2x64xf32>
    %523 = vector.broadcast %212 : vector<1x64xf32> to vector<2x64xf32>
    %524 = arith.mulf %522, %523 : vector<2x64xf32>
    %525 = vector.broadcast %215 : vector<1x64xf32> to vector<2x64xf32>
    %526 = arith.addf %524, %525 : vector<2x64xf32>
    %cst_81 = arith.constant 0.000000e+00 : f32
    %527 = vector.broadcast %cst_81 : f32 to vector<2x64xf32>
    %528 = arith.maximumf %526, %527 : vector<2x64xf32>
    %529 = arith.truncf %528 : vector<2x64xf32> to vector<2x64xbf16>
    %c0_82 = arith.constant 0 : index
    %c2176 = arith.constant 2176 : index
    %530 = vector.load %arg5[%c0_82, %c2176] : memref<2x3136xbf16, #tpu.memory_space<vmem>>, vector<2x64xbf16>
    tpu.vector_store %arg5[%c0_82, %c2176], %529 {strides = array<i32>} : memref<2x3136xbf16, #tpu.memory_space<vmem>>, vector<2x64xbf16>,
    %531 = vector.extract_strided_slice %2 {offsets = [0, 2240], sizes = [2, 64], strides = [1, 1]} : vector<2x3136xf32> to vector<2x64xf32>
    %532 = vector.broadcast %212 : vector<1x64xf32> to vector<2x64xf32>
    %533 = arith.mulf %531, %532 : vector<2x64xf32>
    %534 = vector.broadcast %215 : vector<1x64xf32> to vector<2x64xf32>
    %535 = arith.addf %533, %534 : vector<2x64xf32>
    %cst_83 = arith.constant 0.000000e+00 : f32
    %536 = vector.broadcast %cst_83 : f32 to vector<2x64xf32>
    %537 = arith.maximumf %535, %536 : vector<2x64xf32>
    %538 = arith.truncf %537 : vector<2x64xf32> to vector<2x64xbf16>
    %c0_84 = arith.constant 0 : index
    %c2240 = arith.constant 2240 : index
    %539 = vector.load %arg5[%c0_84, %c2240] : memref<2x3136xbf16, #tpu.memory_space<vmem>>, vector<2x64xbf16>
    tpu.vector_store %arg5[%c0_84, %c2240], %538 {strides = array<i32>} : memref<2x3136xbf16, #tpu.memory_space<vmem>>, vector<2x64xbf16>,
    %540 = vector.extract_strided_slice %2 {offsets = [0, 2304], sizes = [2, 64], strides = [1, 1]} : vector<2x3136xf32> to vector<2x64xf32>
    %541 = vector.broadcast %212 : vector<1x64xf32> to vector<2x64xf32>
    %542 = arith.mulf %540, %541 : vector<2x64xf32>
    %543 = vector.broadcast %215 : vector<1x64xf32> to vector<2x64xf32>
    %544 = arith.addf %542, %543 : vector<2x64xf32>
    %cst_85 = arith.constant 0.000000e+00 : f32
    %545 = vector.broadcast %cst_85 : f32 to vector<2x64xf32>
    %546 = arith.maximumf %544, %545 : vector<2x64xf32>
    %547 = arith.truncf %546 : vector<2x64xf32> to vector<2x64xbf16>
    %c0_86 = arith.constant 0 : index
    %c2304 = arith.constant 2304 : index
    %548 = vector.load %arg5[%c0_86, %c2304] : memref<2x3136xbf16, #tpu.memory_space<vmem>>, vector<2x64xbf16>
    tpu.vector_store %arg5[%c0_86, %c2304], %547 {strides = array<i32>} : memref<2x3136xbf16, #tpu.memory_space<vmem>>, vector<2x64xbf16>,
    %549 = vector.extract_strided_slice %2 {offsets = [0, 2368], sizes = [2, 64], strides = [1, 1]} : vector<2x3136xf32> to vector<2x64xf32>
    %550 = vector.broadcast %212 : vector<1x64xf32> to vector<2x64xf32>
    %551 = arith.mulf %549, %550 : vector<2x64xf32>
    %552 = vector.broadcast %215 : vector<1x64xf32> to vector<2x64xf32>
    %553 = arith.addf %551, %552 : vector<2x64xf32>
    %cst_87 = arith.constant 0.000000e+00 : f32
    %554 = vector.broadcast %cst_87 : f32 to vector<2x64xf32>
    %555 = arith.maximumf %553, %554 : vector<2x64xf32>
    %556 = arith.truncf %555 : vector<2x64xf32> to vector<2x64xbf16>
    %c0_88 = arith.constant 0 : index
    %c2368 = arith.constant 2368 : index
    %557 = vector.load %arg5[%c0_88, %c2368] : memref<2x3136xbf16, #tpu.memory_space<vmem>>, vector<2x64xbf16>
    tpu.vector_store %arg5[%c0_88, %c2368], %556 {strides = array<i32>} : memref<2x3136xbf16, #tpu.memory_space<vmem>>, vector<2x64xbf16>,
    %558 = vector.extract_strided_slice %2 {offsets = [0, 2432], sizes = [2, 64], strides = [1, 1]} : vector<2x3136xf32> to vector<2x64xf32>
    %559 = vector.broadcast %212 : vector<1x64xf32> to vector<2x64xf32>
    %560 = arith.mulf %558, %559 : vector<2x64xf32>
    %561 = vector.broadcast %215 : vector<1x64xf32> to vector<2x64xf32>
    %562 = arith.addf %560, %561 : vector<2x64xf32>
    %cst_89 = arith.constant 0.000000e+00 : f32
    %563 = vector.broadcast %cst_89 : f32 to vector<2x64xf32>
    %564 = arith.maximumf %562, %563 : vector<2x64xf32>
    %565 = arith.truncf %564 : vector<2x64xf32> to vector<2x64xbf16>
    %c0_90 = arith.constant 0 : index
    %c2432 = arith.constant 2432 : index
    %566 = vector.load %arg5[%c0_90, %c2432] : memref<2x3136xbf16, #tpu.memory_space<vmem>>, vector<2x64xbf16>
    tpu.vector_store %arg5[%c0_90, %c2432], %565 {strides = array<i32>} : memref<2x3136xbf16, #tpu.memory_space<vmem>>, vector<2x64xbf16>,
    %567 = vector.extract_strided_slice %2 {offsets = [0, 2496], sizes = [2, 64], strides = [1, 1]} : vector<2x3136xf32> to vector<2x64xf32>
    %568 = vector.broadcast %212 : vector<1x64xf32> to vector<2x64xf32>
    %569 = arith.mulf %567, %568 : vector<2x64xf32>
    %570 = vector.broadcast %215 : vector<1x64xf32> to vector<2x64xf32>
    %571 = arith.addf %569, %570 : vector<2x64xf32>
    %cst_91 = arith.constant 0.000000e+00 : f32
    %572 = vector.broadcast %cst_91 : f32 to vector<2x64xf32>
    %573 = arith.maximumf %571, %572 : vector<2x64xf32>
    %574 = arith.truncf %573 : vector<2x64xf32> to vector<2x64xbf16>
    %c0_92 = arith.constant 0 : index
    %c2496 = arith.constant 2496 : index
    %575 = vector.load %arg5[%c0_92, %c2496] : memref<2x3136xbf16, #tpu.memory_space<vmem>>, vector<2x64xbf16>
    tpu.vector_store %arg5[%c0_92, %c2496], %574 {strides = array<i32>} : memref<2x3136xbf16, #tpu.memory_space<vmem>>, vector<2x64xbf16>,
    %576 = vector.extract_strided_slice %2 {offsets = [0, 2560], sizes = [2, 64], strides = [1, 1]} : vector<2x3136xf32> to vector<2x64xf32>
    %577 = vector.broadcast %212 : vector<1x64xf32> to vector<2x64xf32>
    %578 = arith.mulf %576, %577 : vector<2x64xf32>
    %579 = vector.broadcast %215 : vector<1x64xf32> to vector<2x64xf32>
    %580 = arith.addf %578, %579 : vector<2x64xf32>
    %cst_93 = arith.constant 0.000000e+00 : f32
    %581 = vector.broadcast %cst_93 : f32 to vector<2x64xf32>
    %582 = arith.maximumf %580, %581 : vector<2x64xf32>
    %583 = arith.truncf %582 : vector<2x64xf32> to vector<2x64xbf16>
    %c0_94 = arith.constant 0 : index
    %c2560 = arith.constant 2560 : index
    %584 = vector.load %arg5[%c0_94, %c2560] : memref<2x3136xbf16, #tpu.memory_space<vmem>>, vector<2x64xbf16>
    tpu.vector_store %arg5[%c0_94, %c2560], %583 {strides = array<i32>} : memref<2x3136xbf16, #tpu.memory_space<vmem>>, vector<2x64xbf16>,
    %585 = vector.extract_strided_slice %2 {offsets = [0, 2624], sizes = [2, 64], strides = [1, 1]} : vector<2x3136xf32> to vector<2x64xf32>
    %586 = vector.broadcast %212 : vector<1x64xf32> to vector<2x64xf32>
    %587 = arith.mulf %585, %586 : vector<2x64xf32>
    %588 = vector.broadcast %215 : vector<1x64xf32> to vector<2x64xf32>
    %589 = arith.addf %587, %588 : vector<2x64xf32>
    %cst_95 = arith.constant 0.000000e+00 : f32
    %590 = vector.broadcast %cst_95 : f32 to vector<2x64xf32>
    %591 = arith.maximumf %589, %590 : vector<2x64xf32>
    %592 = arith.truncf %591 : vector<2x64xf32> to vector<2x64xbf16>
    %c0_96 = arith.constant 0 : index
    %c2624 = arith.constant 2624 : index
    %593 = vector.load %arg5[%c0_96, %c2624] : memref<2x3136xbf16, #tpu.memory_space<vmem>>, vector<2x64xbf16>
    tpu.vector_store %arg5[%c0_96, %c2624], %592 {strides = array<i32>} : memref<2x3136xbf16, #tpu.memory_space<vmem>>, vector<2x64xbf16>,
    %594 = vector.extract_strided_slice %2 {offsets = [0, 2688], sizes = [2, 64], strides = [1, 1]} : vector<2x3136xf32> to vector<2x64xf32>
    %595 = vector.broadcast %212 : vector<1x64xf32> to vector<2x64xf32>
    %596 = arith.mulf %594, %595 : vector<2x64xf32>
    %597 = vector.broadcast %215 : vector<1x64xf32> to vector<2x64xf32>
    %598 = arith.addf %596, %597 : vector<2x64xf32>
    %cst_97 = arith.constant 0.000000e+00 : f32
    %599 = vector.broadcast %cst_97 : f32 to vector<2x64xf32>
    %600 = arith.maximumf %598, %599 : vector<2x64xf32>
    %601 = arith.truncf %600 : vector<2x64xf32> to vector<2x64xbf16>
    %c0_98 = arith.constant 0 : index
    %c2688 = arith.constant 2688 : index
    %602 = vector.load %arg5[%c0_98, %c2688] : memref<2x3136xbf16, #tpu.memory_space<vmem>>, vector<2x64xbf16>
    tpu.vector_store %arg5[%c0_98, %c2688], %601 {strides = array<i32>} : memref<2x3136xbf16, #tpu.memory_space<vmem>>, vector<2x64xbf16>,
    %603 = vector.extract_strided_slice %2 {offsets = [0, 2752], sizes = [2, 64], strides = [1, 1]} : vector<2x3136xf32> to vector<2x64xf32>
    %604 = vector.broadcast %212 : vector<1x64xf32> to vector<2x64xf32>
    %605 = arith.mulf %603, %604 : vector<2x64xf32>
    %606 = vector.broadcast %215 : vector<1x64xf32> to vector<2x64xf32>
    %607 = arith.addf %605, %606 : vector<2x64xf32>
    %cst_99 = arith.constant 0.000000e+00 : f32
    %608 = vector.broadcast %cst_99 : f32 to vector<2x64xf32>
    %609 = arith.maximumf %607, %608 : vector<2x64xf32>
    %610 = arith.truncf %609 : vector<2x64xf32> to vector<2x64xbf16>
    %c0_100 = arith.constant 0 : index
    %c2752 = arith.constant 2752 : index
    %611 = vector.load %arg5[%c0_100, %c2752] : memref<2x3136xbf16, #tpu.memory_space<vmem>>, vector<2x64xbf16>
    tpu.vector_store %arg5[%c0_100, %c2752], %610 {strides = array<i32>} : memref<2x3136xbf16, #tpu.memory_space<vmem>>, vector<2x64xbf16>,
    %612 = vector.extract_strided_slice %2 {offsets = [0, 2816], sizes = [2, 64], strides = [1, 1]} : vector<2x3136xf32> to vector<2x64xf32>
    %613 = vector.broadcast %212 : vector<1x64xf32> to vector<2x64xf32>
    %614 = arith.mulf %612, %613 : vector<2x64xf32>
    %615 = vector.broadcast %215 : vector<1x64xf32> to vector<2x64xf32>
    %616 = arith.addf %614, %615 : vector<2x64xf32>
    %cst_101 = arith.constant 0.000000e+00 : f32
    %617 = vector.broadcast %cst_101 : f32 to vector<2x64xf32>
    %618 = arith.maximumf %616, %617 : vector<2x64xf32>
    %619 = arith.truncf %618 : vector<2x64xf32> to vector<2x64xbf16>
    %c0_102 = arith.constant 0 : index
    %c2816 = arith.constant 2816 : index
    %620 = vector.load %arg5[%c0_102, %c2816] : memref<2x3136xbf16, #tpu.memory_space<vmem>>, vector<2x64xbf16>
    tpu.vector_store %arg5[%c0_102, %c2816], %619 {strides = array<i32>} : memref<2x3136xbf16, #tpu.memory_space<vmem>>, vector<2x64xbf16>,
    %621 = vector.extract_strided_slice %2 {offsets = [0, 2880], sizes = [2, 64], strides = [1, 1]} : vector<2x3136xf32> to vector<2x64xf32>
    %622 = vector.broadcast %212 : vector<1x64xf32> to vector<2x64xf32>
    %623 = arith.mulf %621, %622 : vector<2x64xf32>
    %624 = vector.broadcast %215 : vector<1x64xf32> to vector<2x64xf32>
    %625 = arith.addf %623, %624 : vector<2x64xf32>
    %cst_103 = arith.constant 0.000000e+00 : f32
    %626 = vector.broadcast %cst_103 : f32 to vector<2x64xf32>
    %627 = arith.maximumf %625, %626 : vector<2x64xf32>
    %628 = arith.truncf %627 : vector<2x64xf32> to vector<2x64xbf16>
    %c0_104 = arith.constant 0 : index
    %c2880 = arith.constant 2880 : index
    %629 = vector.load %arg5[%c0_104, %c2880] : memref<2x3136xbf16, #tpu.memory_space<vmem>>, vector<2x64xbf16>
    tpu.vector_store %arg5[%c0_104, %c2880], %628 {strides = array<i32>} : memref<2x3136xbf16, #tpu.memory_space<vmem>>, vector<2x64xbf16>,
    %630 = vector.extract_strided_slice %2 {offsets = [0, 2944], sizes = [2, 64], strides = [1, 1]} : vector<2x3136xf32> to vector<2x64xf32>
    %631 = vector.broadcast %212 : vector<1x64xf32> to vector<2x64xf32>
    %632 = arith.mulf %630, %631 : vector<2x64xf32>
    %633 = vector.broadcast %215 : vector<1x64xf32> to vector<2x64xf32>
    %634 = arith.addf %632, %633 : vector<2x64xf32>
    %cst_105 = arith.constant 0.000000e+00 : f32
    %635 = vector.broadcast %cst_105 : f32 to vector<2x64xf32>
    %636 = arith.maximumf %634, %635 : vector<2x64xf32>
    %637 = arith.truncf %636 : vector<2x64xf32> to vector<2x64xbf16>
    %c0_106 = arith.constant 0 : index
    %c2944 = arith.constant 2944 : index
    %638 = vector.load %arg5[%c0_106, %c2944] : memref<2x3136xbf16, #tpu.memory_space<vmem>>, vector<2x64xbf16>
    tpu.vector_store %arg5[%c0_106, %c2944], %637 {strides = array<i32>} : memref<2x3136xbf16, #tpu.memory_space<vmem>>, vector<2x64xbf16>,
    %639 = vector.extract_strided_slice %2 {offsets = [0, 3008], sizes = [2, 64], strides = [1, 1]} : vector<2x3136xf32> to vector<2x64xf32>
    %640 = vector.broadcast %212 : vector<1x64xf32> to vector<2x64xf32>
    %641 = arith.mulf %639, %640 : vector<2x64xf32>
    %642 = vector.broadcast %215 : vector<1x64xf32> to vector<2x64xf32>
    %643 = arith.addf %641, %642 : vector<2x64xf32>
    %cst_107 = arith.constant 0.000000e+00 : f32
    %644 = vector.broadcast %cst_107 : f32 to vector<2x64xf32>
    %645 = arith.maximumf %643, %644 : vector<2x64xf32>
    %646 = arith.truncf %645 : vector<2x64xf32> to vector<2x64xbf16>
    %c0_108 = arith.constant 0 : index
    %c3008 = arith.constant 3008 : index
    %647 = vector.load %arg5[%c0_108, %c3008] : memref<2x3136xbf16, #tpu.memory_space<vmem>>, vector<2x64xbf16>
    tpu.vector_store %arg5[%c0_108, %c3008], %646 {strides = array<i32>} : memref<2x3136xbf16, #tpu.memory_space<vmem>>, vector<2x64xbf16>,
    %648 = vector.extract_strided_slice %2 {offsets = [0, 3072], sizes = [2, 64], strides = [1, 1]} : vector<2x3136xf32> to vector<2x64xf32>
    %649 = vector.broadcast %212 : vector<1x64xf32> to vector<2x64xf32>
    %650 = arith.mulf %648, %649 : vector<2x64xf32>
    %651 = vector.broadcast %215 : vector<1x64xf32> to vector<2x64xf32>
    %652 = arith.addf %650, %651 : vector<2x64xf32>
    %cst_109 = arith.constant 0.000000e+00 : f32
    %653 = vector.broadcast %cst_109 : f32 to vector<2x64xf32>
    %654 = arith.maximumf %652, %653 : vector<2x64xf32>
    %655 = arith.truncf %654 : vector<2x64xf32> to vector<2x64xbf16>
    %c0_110 = arith.constant 0 : index
    %c3072 = arith.constant 3072 : index
    %656 = vector.load %arg5[%c0_110, %c3072] : memref<2x3136xbf16, #tpu.memory_space<vmem>>, vector<2x64xbf16>
    tpu.vector_store %arg5[%c0_110, %c3072], %655 {strides = array<i32>} : memref<2x3136xbf16, #tpu.memory_space<vmem>>, vector<2x64xbf16>,
    return
  }
  func.func @transform_0(%arg0: i32) -> (i32, i32) {
    %c0_i32 = arith.constant 0 : i32
    %c0_i32_0 = arith.constant 0 : i32
    %c0_i32_1 = arith.constant 0 : i32
    return %c0_i32, %c0_i32_0 : i32, i32
  }
  func.func @transform_1(%arg0: i32) -> (i32, i32) {
    %c0_i32 = arith.constant 0 : i32
    %c0_i32_0 = arith.constant 0 : i32
    %c0_i32_1 = arith.constant 0 : i32
    return %c0_i32, %c0_i32_0 : i32, i32
  }
  func.func @transform_2(%arg0: i32) -> (i32, i32) {
    %c0_i32 = arith.constant 0 : i32
    %c0_i32_0 = arith.constant 0 : i32
    %c0_i32_1 = arith.constant 0 : i32
    return %c0_i32, %c0_i32_0 : i32, i32
  }
  func.func @transform_3(%arg0: i32) -> (i32, i32) {
    %c0_i32 = arith.constant 0 : i32
    %c0_i32_0 = arith.constant 0 : i32
    %c0_i32_1 = arith.constant 0 : i32
    return %c0_i32, %c0_i32_0 : i32, i32
  }
  func.func @transform_4(%arg0: i32) -> (i32, i32) {
    %c0_i32 = arith.constant 0 : i32
    %c0_i32_0 = arith.constant 0 : i32
    %c0_i32_1 = arith.constant 0 : i32
    return %c0_i32, %c0_i32_0 : i32, i32
  }
}

module attributes {stable_mosaic.version = 11 : i64} {
  func.func @_conv2_bn_relu_kernel(%arg0: i32, %arg1: memref<98x1024xbf16, #tpu.memory_space<vmem>>, %arg2: memref<1024x32xbf16, #tpu.memory_space<vmem>>, %arg3: memref<1x32xf32, #tpu.memory_space<vmem>>, %arg4: memref<1x32xf32, #tpu.memory_space<vmem>>, %arg5: memref<98x128xbf16, #tpu.memory_space<vmem>>) attributes {dimension_semantics = [#tpu.dimension_semantics<arbitrary>], iteration_bounds = array<i64: 1>, scalar_prefetch = 0 : i64, scratch_operands = 0 : i64, tpu.core_type = #tpu.core_type<tc>, window_params = [{pipeline_mode = #tpu.pipeline_mode<synchronous>, transform_indices = @transform_0, window_bounds = array<i64: 98, 1024>}, {pipeline_mode = #tpu.pipeline_mode<synchronous>, transform_indices = @transform_1, window_bounds = array<i64: 1024, 32>}, {pipeline_mode = #tpu.pipeline_mode<synchronous>, transform_indices = @transform_2, window_bounds = array<i64: 1, 32>}, {pipeline_mode = #tpu.pipeline_mode<synchronous>, transform_indices = @transform_3, window_bounds = array<i64: 1, 32>}, {pipeline_mode = #tpu.pipeline_mode<synchronous>, transform_indices = @transform_4, window_bounds = array<i64: 98, 128>}]} {
    %c0 = arith.constant 0 : index
    %c0_0 = arith.constant 0 : index
    %0 = vector.load %arg1[%c0, %c0_0] : memref<98x1024xbf16, #tpu.memory_space<vmem>>, vector<98x256xbf16>
    %c0_1 = arith.constant 0 : index
    %c0_2 = arith.constant 0 : index
    %1 = vector.load %arg2[%c0_1, %c0_2] : memref<1024x32xbf16, #tpu.memory_space<vmem>>, vector<256x32xbf16>
    %cst = arith.constant dense<0.000000e+00> : vector<98x32xf32>
    %2 = tpu.matmul %0, %1, %cst {dimension_numbers = #tpu.dot_dimension_numbers<[1], [0], [0], [1], [0, 0, 1, 1], [], []>} : vector<98x256xbf16>, vector<256x32xbf16>, vector<98x32xf32> -> vector<98x32xf32>
    %c0_3 = arith.constant 0 : index
    %c256 = arith.constant 256 : index
    %3 = vector.load %arg1[%c0_3, %c256] : memref<98x1024xbf16, #tpu.memory_space<vmem>>, vector<98x256xbf16>
    %c256_4 = arith.constant 256 : index
    %c0_5 = arith.constant 0 : index
    %4 = vector.load %arg2[%c256_4, %c0_5] : memref<1024x32xbf16, #tpu.memory_space<vmem>>, vector<256x32xbf16>
    %cst_6 = arith.constant dense<0.000000e+00> : vector<98x32xf32>
    %5 = tpu.matmul %3, %4, %cst_6 {dimension_numbers = #tpu.dot_dimension_numbers<[1], [0], [0], [1], [0, 0, 1, 1], [], []>} : vector<98x256xbf16>, vector<256x32xbf16>, vector<98x32xf32> -> vector<98x32xf32>
    %c0_7 = arith.constant 0 : index
    %c512 = arith.constant 512 : index
    %6 = vector.load %arg1[%c0_7, %c512] : memref<98x1024xbf16, #tpu.memory_space<vmem>>, vector<98x256xbf16>
    %c512_8 = arith.constant 512 : index
    %c0_9 = arith.constant 0 : index
    %7 = vector.load %arg2[%c512_8, %c0_9] : memref<1024x32xbf16, #tpu.memory_space<vmem>>, vector<256x32xbf16>
    %cst_10 = arith.constant dense<0.000000e+00> : vector<98x32xf32>
    %8 = tpu.matmul %6, %7, %cst_10 {dimension_numbers = #tpu.dot_dimension_numbers<[1], [0], [0], [1], [0, 0, 1, 1], [], []>} : vector<98x256xbf16>, vector<256x32xbf16>, vector<98x32xf32> -> vector<98x32xf32>
    %c0_11 = arith.constant 0 : index
    %c768 = arith.constant 768 : index
    %9 = vector.load %arg1[%c0_11, %c768] : memref<98x1024xbf16, #tpu.memory_space<vmem>>, vector<98x256xbf16>
    %c768_12 = arith.constant 768 : index
    %c0_13 = arith.constant 0 : index
    %10 = vector.load %arg2[%c768_12, %c0_13] : memref<1024x32xbf16, #tpu.memory_space<vmem>>, vector<256x32xbf16>
    %cst_14 = arith.constant dense<0.000000e+00> : vector<98x32xf32>
    %11 = tpu.matmul %9, %10, %cst_14 {dimension_numbers = #tpu.dot_dimension_numbers<[1], [0], [0], [1], [0, 0, 1, 1], [], []>} : vector<98x256xbf16>, vector<256x32xbf16>, vector<98x32xf32> -> vector<98x32xf32>
    %12 = arith.addf %2, %5 : vector<98x32xf32>
    %13 = arith.addf %12, %8 : vector<98x32xf32>
    %14 = arith.addf %13, %11 : vector<98x32xf32>
    %15 = arith.mulf %2, %2 : vector<98x32xf32>
    %16 = arith.mulf %5, %5 : vector<98x32xf32>
    %17 = arith.addf %15, %16 : vector<98x32xf32>
    %18 = arith.mulf %8, %8 : vector<98x32xf32>
    %19 = arith.addf %17, %18 : vector<98x32xf32>
    %20 = arith.mulf %11, %11 : vector<98x32xf32>
    %21 = arith.addf %19, %20 : vector<98x32xf32>
    %cst_15 = arith.constant dense<0.000000e+00> : vector<32xf32>
    %22 = vector.multi_reduction <add>, %14, %cst_15 [0] : vector<98x32xf32> to vector<32xf32>
    %23 = vector.shape_cast %22 : vector<32xf32> to vector<1x32xf32>
    %cst_16 = arith.constant 3.920000e+02 : f32
    %24 = vector.broadcast %cst_16 : f32 to vector<1x32xf32>
    %25 = arith.divf %23, %24 : vector<1x32xf32>
    %cst_17 = arith.constant dense<0.000000e+00> : vector<32xf32>
    %26 = vector.multi_reduction <add>, %21, %cst_17 [0] : vector<98x32xf32> to vector<32xf32>
    %27 = vector.shape_cast %26 : vector<32xf32> to vector<1x32xf32>
    %cst_18 = arith.constant 3.920000e+02 : f32
    %28 = vector.broadcast %cst_18 : f32 to vector<1x32xf32>
    %29 = arith.divf %27, %28 : vector<1x32xf32>
    %30 = arith.mulf %25, %25 : vector<1x32xf32>
    %31 = arith.subf %29, %30 : vector<1x32xf32>
    %c0_19 = arith.constant 0 : index
    %c0_20 = arith.constant 0 : index
    %32 = vector.load %arg3[%c0_19, %c0_20] : memref<1x32xf32, #tpu.memory_space<vmem>>, vector<1x32xf32>
    %cst_21 = arith.constant 9.99999974E-6 : f32
    %33 = vector.broadcast %cst_21 : f32 to vector<1x32xf32>
    %34 = arith.addf %31, %33 : vector<1x32xf32>
    %35 = math.rsqrt %34 : vector<1x32xf32>
    %36 = arith.mulf %32, %35 : vector<1x32xf32>
    %c0_22 = arith.constant 0 : index
    %c0_23 = arith.constant 0 : index
    %37 = vector.load %arg4[%c0_22, %c0_23] : memref<1x32xf32, #tpu.memory_space<vmem>>, vector<1x32xf32>
    %38 = arith.mulf %25, %36 : vector<1x32xf32>
    %39 = arith.subf %37, %38 : vector<1x32xf32>
    %40 = vector.broadcast %36 : vector<1x32xf32> to vector<98x32xf32>
    %41 = arith.mulf %2, %40 : vector<98x32xf32>
    %42 = vector.broadcast %39 : vector<1x32xf32> to vector<98x32xf32>
    %43 = arith.addf %41, %42 : vector<98x32xf32>
    %cst_24 = arith.constant 0.000000e+00 : f32
    %44 = vector.broadcast %cst_24 : f32 to vector<98x32xf32>
    %45 = arith.maximumf %43, %44 : vector<98x32xf32>
    %46 = arith.truncf %45 : vector<98x32xf32> to vector<98x32xbf16>
    %c0_25 = arith.constant 0 : index
    %c0_26 = arith.constant 0 : index
    %47 = vector.load %arg5[%c0_25, %c0_26] : memref<98x128xbf16, #tpu.memory_space<vmem>>, vector<98x32xbf16>
    tpu.vector_store %arg5[%c0_25, %c0_26], %46 {strides = array<i32>} : memref<98x128xbf16, #tpu.memory_space<vmem>>, vector<98x32xbf16>,
    %48 = vector.broadcast %36 : vector<1x32xf32> to vector<98x32xf32>
    %49 = arith.mulf %5, %48 : vector<98x32xf32>
    %50 = vector.broadcast %39 : vector<1x32xf32> to vector<98x32xf32>
    %51 = arith.addf %49, %50 : vector<98x32xf32>
    %cst_27 = arith.constant 0.000000e+00 : f32
    %52 = vector.broadcast %cst_27 : f32 to vector<98x32xf32>
    %53 = arith.maximumf %51, %52 : vector<98x32xf32>
    %54 = arith.truncf %53 : vector<98x32xf32> to vector<98x32xbf16>
    %c0_28 = arith.constant 0 : index
    %c32 = arith.constant 32 : index
    %55 = vector.load %arg5[%c0_28, %c32] : memref<98x128xbf16, #tpu.memory_space<vmem>>, vector<98x32xbf16>
    tpu.vector_store %arg5[%c0_28, %c32], %54 {strides = array<i32>} : memref<98x128xbf16, #tpu.memory_space<vmem>>, vector<98x32xbf16>,
    %56 = vector.broadcast %36 : vector<1x32xf32> to vector<98x32xf32>
    %57 = arith.mulf %8, %56 : vector<98x32xf32>
    %58 = vector.broadcast %39 : vector<1x32xf32> to vector<98x32xf32>
    %59 = arith.addf %57, %58 : vector<98x32xf32>
    %cst_29 = arith.constant 0.000000e+00 : f32
    %60 = vector.broadcast %cst_29 : f32 to vector<98x32xf32>
    %61 = arith.maximumf %59, %60 : vector<98x32xf32>
    %62 = arith.truncf %61 : vector<98x32xf32> to vector<98x32xbf16>
    %c0_30 = arith.constant 0 : index
    %c64 = arith.constant 64 : index
    %63 = vector.load %arg5[%c0_30, %c64] : memref<98x128xbf16, #tpu.memory_space<vmem>>, vector<98x32xbf16>
    tpu.vector_store %arg5[%c0_30, %c64], %62 {strides = array<i32>} : memref<98x128xbf16, #tpu.memory_space<vmem>>, vector<98x32xbf16>,
    %64 = vector.broadcast %36 : vector<1x32xf32> to vector<98x32xf32>
    %65 = arith.mulf %11, %64 : vector<98x32xf32>
    %66 = vector.broadcast %39 : vector<1x32xf32> to vector<98x32xf32>
    %67 = arith.addf %65, %66 : vector<98x32xf32>
    %cst_31 = arith.constant 0.000000e+00 : f32
    %68 = vector.broadcast %cst_31 : f32 to vector<98x32xf32>
    %69 = arith.maximumf %67, %68 : vector<98x32xf32>
    %70 = arith.truncf %69 : vector<98x32xf32> to vector<98x32xbf16>
    %c0_32 = arith.constant 0 : index
    %c96 = arith.constant 96 : index
    %71 = vector.load %arg5[%c0_32, %c96] : memref<98x128xbf16, #tpu.memory_space<vmem>>, vector<98x32xbf16>
    tpu.vector_store %arg5[%c0_32, %c96], %70 {strides = array<i32>} : memref<98x128xbf16, #tpu.memory_space<vmem>>, vector<98x32xbf16>,
    return
  }
  func.func @transform_0(%arg0: i32) -> (i32, i32) {
    %c0_i32 = arith.constant 0 : i32
    %c0_i32_0 = arith.constant 0 : i32
    %c0_i32_1 = arith.constant 0 : i32
    return %c0_i32, %c0_i32_0 : i32, i32
  }
  func.func @transform_1(%arg0: i32) -> (i32, i32) {
    %c0_i32 = arith.constant 0 : i32
    %c0_i32_0 = arith.constant 0 : i32
    %c0_i32_1 = arith.constant 0 : i32
    return %c0_i32, %c0_i32_0 : i32, i32
  }
  func.func @transform_2(%arg0: i32) -> (i32, i32) {
    %c0_i32 = arith.constant 0 : i32
    %c0_i32_0 = arith.constant 0 : i32
    %c0_i32_1 = arith.constant 0 : i32
    return %c0_i32, %c0_i32_0 : i32, i32
  }
  func.func @transform_3(%arg0: i32) -> (i32, i32) {
    %c0_i32 = arith.constant 0 : i32
    %c0_i32_0 = arith.constant 0 : i32
    %c0_i32_1 = arith.constant 0 : i32
    return %c0_i32, %c0_i32_0 : i32, i32
  }
  func.func @transform_4(%arg0: i32) -> (i32, i32) {
    %c0_i32 = arith.constant 0 : i32
    %c0_i32_0 = arith.constant 0 : i32
    %c0_i32_1 = arith.constant 0 : i32
    return %c0_i32, %c0_i32_0 : i32, i32
  }
}

module attributes {stable_mosaic.version = 11 : i64} {
  func.func @_conv3_tanh_kernel(%arg0: i32, %arg1: memref<4x512xbf16, #tpu.memory_space<vmem>>, %arg2: memref<512x392xbf16, #tpu.memory_space<vmem>>, %arg3: memref<4x392xf32, #tpu.memory_space<vmem>>) attributes {dimension_semantics = [#tpu.dimension_semantics<arbitrary>], iteration_bounds = array<i64: 1>, scalar_prefetch = 0 : i64, scratch_operands = 0 : i64, tpu.core_type = #tpu.core_type<tc>, window_params = [{pipeline_mode = #tpu.pipeline_mode<synchronous>, transform_indices = @transform_0, window_bounds = array<i64: 4, 512>}, {pipeline_mode = #tpu.pipeline_mode<synchronous>, transform_indices = @transform_1, window_bounds = array<i64: 512, 392>}, {pipeline_mode = #tpu.pipeline_mode<synchronous>, transform_indices = @transform_2, window_bounds = array<i64: 4, 392>}]} {
    %c0 = arith.constant 0 : index
    %c0_0 = arith.constant 0 : index
    %0 = vector.load %arg1[%c0, %c0_0] : memref<4x512xbf16, #tpu.memory_space<vmem>>, vector<4x512xbf16>
    %c0_1 = arith.constant 0 : index
    %c0_2 = arith.constant 0 : index
    %1 = vector.load %arg2[%c0_1, %c0_2] : memref<512x392xbf16, #tpu.memory_space<vmem>>, vector<512x392xbf16>
    %cst = arith.constant dense<0.000000e+00> : vector<4x392xf32>
    %2 = tpu.matmul %0, %1, %cst {dimension_numbers = #tpu.dot_dimension_numbers<[1], [0], [0], [1], [0, 0, 1, 1], [], []>} : vector<4x512xbf16>, vector<512x392xbf16>, vector<4x392xf32> -> vector<4x392xf32>
    %3 = math.tanh %2 : vector<4x392xf32>
    %c0_3 = arith.constant 0 : index
    %c0_4 = arith.constant 0 : index
    %4 = vector.load %arg3[%c0_3, %c0_4] : memref<4x392xf32, #tpu.memory_space<vmem>>, vector<4x392xf32>
    tpu.vector_store %arg3[%c0_3, %c0_4], %3 {strides = array<i32>} : memref<4x392xf32, #tpu.memory_space<vmem>>, vector<4x392xf32>,
    return
  }
  func.func @transform_0(%arg0: i32) -> (i32, i32) {
    %c0_i32 = arith.constant 0 : i32
    %c0_i32_0 = arith.constant 0 : i32
    %c0_i32_1 = arith.constant 0 : i32
    return %c0_i32, %c0_i32_0 : i32, i32
  }
  func.func @transform_1(%arg0: i32) -> (i32, i32) {
    %c0_i32 = arith.constant 0 : i32
    %c0_i32_0 = arith.constant 0 : i32
    %c0_i32_1 = arith.constant 0 : i32
    return %c0_i32, %c0_i32_0 : i32, i32
  }
  func.func @transform_2(%arg0: i32) -> (i32, i32) {
    %c0_i32 = arith.constant 0 : i32
    %c0_i32_0 = arith.constant 0 : i32
    %c0_i32_1 = arith.constant 0 : i32
    return %c0_i32, %c0_i32_0 : i32, i32
  }
}

</mosaic_0001>

<bundles_post_ra>
// kernel: generator_forward.3
= control target key start
LH: loop header
LB: loop body
LE: loop exit
PB: predicated region body
PF: predicated region fallthrough
CT: control target
= control target key end

     0   :  { %vm323_vm0 = vcmask 261120   ;;  %vm652_vm1 = vcmask 1041408   ;;  %s1888_s21 = smov 64   ;;  %vm821_vm2 = vcmask 517120   ;;  %vm1354_vm7 = vcmask 516096   ;;  %s3047_s1 = inlined_call_operand.vmem [shape: bf16[32,3136], index: 1, kind: input, shape index: {}]   ;;  %s3048_s0 = inlined_call_operand.vmem [shape: bf16[2,32], index: 0, kind: input, shape index: {}]   ;;  %s3049_s2 = inlined_call_operand.vmem [shape: f32[1,64], index: 2, kind: input, shape index: {}]   ;;  %s3050_s3 = inlined_call_operand.vmem [shape: f32[1,64], index: 3, kind: input, shape index: {}]   ;;  %s3051_s4 = inlined_call_operand.vmem [shape: bf16[2,3136], index: 4, kind: output, shape index: {}]  }
   0x1   :  { %v1709_v0 = vld [vmem:[%s3047_s1 + $0xc8] sm:$0xf]  ;;  %v1869_v1 = vld [vmem:[%s3047_s1 + $0x128] sm:$0xf0]  ;;  %v1711_v4 = vld [vmem:[%s3047_s1 + $0x12c] sm:$0xf0] }
   0x2   :  { %v1857_v2 = vld [vmem:[%s3047_s1 + $0xcc] sm:$0xf]  ;;  %v1710_v3 = vor.u32 %v1869_v1, %v1709_v0  ;;  %v1717_v5 = vld [vmem:[%s3047_s1 + $0xd0] sm:$0xf]  ;;  %v1870_v6 = vld [vmem:[%s3047_s1 + $0x130] sm:$0xf0] }
   0x3   :  { %v1714_v7 = vor.u32 %v1857_v2, %v1711_v4  ;;  %v1718_v8 = vor.u32 %v1870_v6, %v1717_v5  ;;  %v1858_v9 = vld [vmem:[%s3047_s1 + $0xd4] sm:$0xf]  ;;  %v1719_v10 = vld [vmem:[%s3047_s1 + $0x134] sm:$0xf0]  ;;  %v1609_v11 = vld [vmem:[%s3047_s1] sm:$0xf] }
   0x4   :  { %333 = vmatpush.bf16.msra.mxu0 %v1710_v3  ;;  %v1722_v12 = vor.u32 %v1858_v9, %v1719_v10  ;;  %v1844_v13 = vld [vmem:[%s3047_s1 + $0x60] sm:$0xf0]  ;;  %v1611_v15 = vld [vmem:[%s3047_s1 + $0x64] sm:$0xf0]  ;;  %v1845_v19 = vld [vmem:[%s3047_s1 + $0x68] sm:$0xf0] }
   0x5   :  { %v1832_v14 = vld [vmem:[%s3047_s1 + $0x4] sm:$0xf]  ;;  %346 = vmatpush.bf16.msra.mxu1 %v1714_v7  ;;  %359 = vmatpush.bf16.msra.mxu2 %v1718_v8  ;;  %v1610_v16 = vor.u32 %v1844_v13, %v1609_v11  ;;  %v1617_v18 = vld [vmem:[%s3047_s1 + $0x8] sm:$0xf]  ;;  %v1833_v20 = vld [vmem:[%s3047_s1 + $0xc] sm:$0xf] }
   0x6   :  { %v1614_v17 = vor.u32 %v1832_v14, %v1611_v15  ;;  %372 = vmatpush.bf16.msra.mxu3 %v1722_v12  ;;  %v1618_v21 = vor.u32 %v1845_v19, %v1617_v18  ;;  %v1619_v22 = vld [vmem:[%s3047_s1 + $0x6c] sm:$0xf0]  ;;  %v1966_v23 = vld [vmem:[%s3048_s0] sm:$0x1]  ;;  %v1725_v24 = vld [vmem:[%s3047_s1 + $0xd8] sm:$0xf] }
   0x7   :  { %v1622_v25 = vor.u32 %v1833_v20, %v1619_v22  ;;  %v1871_v26 = vld [vmem:[%s3047_s1 + $0x138] sm:$0xf0]  ;;  %v1727_v28 = vld [vmem:[%s3047_s1 + $0x13c] sm:$0xf0]  ;;  %v1872_v32 = vld [vmem:[%s3047_s1 + $0x140] sm:$0xf0] }
   0x8   :  { %v1859_v27 = vld [vmem:[%s3047_s1 + $0xdc] sm:$0xf]  ;;  %334 = vmatpush.bf16.msra.mxu0 %v1610_v16  ;;  %v1726_v29 = vor.u32 %v1871_v26, %v1725_v24  ;;  %v1733_v31 = vld [vmem:[%s3047_s1 + $0xe0] sm:$0xf]  ;;  %v1625_v33 = vld [vmem:[%s3047_s1 + $0x10] sm:$0xf] }
   0x9   :  { %v1730_v30 = vor.u32 %v1859_v27, %v1727_v28  ;;  %347 = vmatpush.bf16.msra.mxu1 %v1614_v17  ;;  %360 = vmatpush.bf16.msra.mxu2 %v1618_v21  ;;  %v1734_v34 = vor.u32 %v1872_v32, %v1733_v31  ;;  %v1846_v35 = vld [vmem:[%s3047_s1 + $0x70] sm:$0xf0]  ;;  %v1627_v37 = vld [vmem:[%s3047_s1 + $0x74] sm:$0xf0]  ;;  %v1847_v40 = vld [vmem:[%s3047_s1 + $0x78] sm:$0xf0] }
   0xa   :  { %v1834_v36 = vld [vmem:[%s3047_s1 + $0x14] sm:$0xf]  ;;  %373 = vmatpush.bf16.msra.mxu3 %v1622_v25  ;;  %v1626_v38 = vor.u32 %v1846_v35, %v1625_v33  ;;  %v1633_v39 = vld [vmem:[%s3047_s1 + $0x18] sm:$0xf]  ;;  %v1860_v41 = vld [vmem:[%s3047_s1 + $0xe4] sm:$0xf] }
   0xb   :  { %1807 = vmatmul.msk.bf16.vlgmr.msra.gmra.mxu0 %vm323_vm0, %v1966_v23  ;;  %v1630_v42 = vor.u32 %v1834_v36, %v1627_v37  ;;  %v1735_v43 = vld [vmem:[%s3047_s1 + $0x144] sm:$0xf0]  ;;  %v1835_v44 = vld [vmem:[%s3047_s1 + $0x1c] sm:$0xf]  ;;  %v1635_v45 = vld [vmem:[%s3047_s1 + $0x7c] sm:$0xf0]  ;;  %v1634_v50 = vor.u32 %v1847_v40, %v1633_v39 }
   0xc   :  { %385 = vmatpush.bf16.msrb.mxu0 %v1726_v29  ;;  %1808 = vmatmul.msk.bf16.vlgmr.msra.gmra.mxu1 %vm323_vm0, %v1966_v23  ;;  %v1738_v46 = vor.u32 %v1860_v41, %v1735_v43  ;;  %v1741_v47 = vld [vmem:[%s3047_s1 + $0xe8] sm:$0xf]  ;;  %v1873_v48 = vld [vmem:[%s3047_s1 + $0x148] sm:$0xf0]  ;;  %v1641_v49 = vld [vmem:[%s3047_s1 + $0x20] sm:$0xf]  ;;  %v1638_v55 = vor.u32 %v1835_v44, %v1635_v45 }
   0xd   :  { %398 = vmatpush.bf16.msrb.mxu1 %v1730_v30  ;;  %1809 = vmatmul.msk.bf16.vlgmr.msra.gmra.mxu2 %vm323_vm0, %v1966_v23  ;;  %v1742_v51 = vor.u32 %v1873_v48, %v1741_v47  ;;  %v1848_v52 = vld [vmem:[%s3047_s1 + $0x80] sm:$0xf0]  ;;  %v1861_v53 = vld [vmem:[%s3047_s1 + $0xec] sm:$0xf]  ;;  %v1743_v54 = vld [vmem:[%s3047_s1 + $0x14c] sm:$0xf0] }
   0xe   :  { %1810 = vmatmul.msk.bf16.vlgmr.msra.gmra.mxu3 %vm323_vm0, %v1966_v23  ;;  %411 = vmatpush.bf16.msrb.mxu2 %v1734_v34  ;;  %v1746_v56 = vor.u32 %v1861_v53, %v1743_v54  ;;  %v1749_v57 = vld [vmem:[%s3047_s1 + $0xf0] sm:$0xf]  ;;  %v1874_v58 = vld [vmem:[%s3047_s1 + $0x150] sm:$0xf0]  ;;  %v1642_v60 = vor.u32 %v1848_v52, %v1641_v49  ;;  %v1751_v62 = vld [vmem:[%s3047_s1 + $0x154] sm:$0xf0] }
   0xf   :  { %424 = vmatpush.bf16.msrb.mxu3 %v1738_v46  ;;  %v1862_v59 = vld [vmem:[%s3047_s1 + $0xf4] sm:$0xf]  ;;  %v1750_v61 = vor.u32 %v1874_v58, %v1749_v57  ;;  %v1836_v63 = vld [vmem:[%s3047_s1 + $0x24] sm:$0xf]  ;;  %v1643_v0 = vld [vmem:[%s3047_s1 + $0x84] sm:$0xf0] }
  0x10   :  { %386 = vmatpush.bf16.msrb.mxu0 %v1626_v38  ;;  %v1754_v1 = vor.u32 %v1862_v59, %v1751_v62  ;;  %v1646_v2 = vor.u32 %v1836_v63, %v1643_v0  ;;  %v1649_v3 = vld [vmem:[%s3047_s1 + $0x28] sm:$0xf]  ;;  %v1849_v4 = vld [vmem:[%s3047_s1 + $0x88] sm:$0xf0]  ;;  %v1651_v6 = vld [vmem:[%s3047_s1 + $0x8c] sm:$0xf0] }
  0x11   :  { %399 = vmatpush.bf16.msrb.mxu1 %v1630_v42  ;;  %v1837_v5 = vld [vmem:[%s3047_s1 + $0x2c] sm:$0xf]  ;;  %v1650_v7 = vor.u32 %v1849_v4, %v1649_v3  ;;  %v1757_v9 = vld [vmem:[%s3047_s1 + $0xf8] sm:$0xf]  ;;  %v1875_v10 = vld [vmem:[%s3047_s1 + $0x158] sm:$0xf0] }
  0x12   :  { %412 = vmatpush.bf16.msrb.mxu2 %v1634_v50  ;;  %v1654_v8 = vor.u32 %v1837_v5, %v1651_v6  ;;  %v1765_v11 = vld [vmem:[%s3047_s1 + $0x100] sm:$0xf]  ;;  %v1876_v12 = vld [vmem:[%s3047_s1 + $0x160] sm:$0xf0]  ;;  %v1863_v13 = vld [vmem:[%s3047_s1 + $0xfc] sm:$0xf]  ;;  %v1758_v15 = vor.u32 %v1875_v10, %v1757_v9 }
  0x13   :  { %425 = vmatpush.bf16.msrb.mxu3 %v1638_v55  ;;  %v1759_v14 = vld [vmem:[%s3047_s1 + $0x15c] sm:$0xf0]  ;;  %v1766_v16 = vor.u32 %v1876_v12, %v1765_v11  ;;  %v1657_v17 = vld [vmem:[%s3047_s1 + $0x30] sm:$0xf]  ;;  %v1850_v18 = vld [vmem:[%s3047_s1 + $0x90] sm:$0xf0] }
  0x14   :  { %437 = vmatpush.bf16.msra.mxu0 %v1742_v51  ;;  %v1762_v19 = vor.u32 %v1863_v13, %v1759_v14  ;;  %v1665_v20 = vld [vmem:[%s3047_s1 + $0x38] sm:$0xf]  ;;  %v1851_v21 = vld [vmem:[%s3047_s1 + $0x98] sm:$0xf0]  ;;  %v1864_v22 = vld [vmem:[%s3047_s1 + $0x104] sm:$0xf]  ;;  %v1658_v27 = vor.u32 %v1850_v18, %v1657_v17 }
  0x15   :  { %450 = vmatpush.bf16.msra.mxu1 %v1746_v56  ;;  %v1767_v24 = vld [vmem:[%s3047_s1 + $0x164] sm:$0xf0]  ;;  %v1838_v25 = vld [vmem:[%s3047_s1 + $0x34] sm:$0xf]  ;;  %v1659_v26 = vld [vmem:[%s3047_s1 + $0x94] sm:$0xf0]  ;;  %v1666_v31 = vor.u32 %v1851_v21, %v1665_v20 }
  0x16   :  { %463 = vmatpush.bf16.msra.mxu2 %v1750_v61  ;;  %v1770_v28 = vor.u32 %v1864_v22, %v1767_v24  ;;  %v1839_v29 = vld [vmem:[%s3047_s1 + $0x3c] sm:$0xf]  ;;  %v1667_v30 = vld [vmem:[%s3047_s1 + $0x9c] sm:$0xf0]  ;;  %v1662_v32 = vor.u32 %v1838_v25, %v1659_v26  ;;  %v1773_v34 = vld [vmem:[%s3047_s1 + $0x108] sm:$0xf] }
  0x17   :  { %476 = vmatpush.bf16.msra.mxu3 %v1754_v1  ;;  %v1670_v33 = vor.u32 %v1839_v29, %v1667_v30  ;;  %v1877_v35 = vld [vmem:[%s3047_s1 + $0x168] sm:$0xf0]  ;;  %v1775_v37 = vld [vmem:[%s3047_s1 + $0x16c] sm:$0xf0]  ;;  %v1878_v39 = vld [vmem:[%s3047_s1 + $0x170] sm:$0xf0] }
  0x18   :  { %438 = vmatpush.bf16.msra.mxu0 %v1642_v60  ;;  %v1865_v36 = vld [vmem:[%s3047_s1 + $0x10c] sm:$0xf]  ;;  %v1781_v38 = vld [vmem:[%s3047_s1 + $0x110] sm:$0xf]  ;;  %v1774_v40 = vor.u32 %v1877_v35, %v1773_v34  ;;  %v1673_v43 = vld [vmem:[%s3047_s1 + $0x40] sm:$0xf] }
  0x19   :  { %451 = vmatpush.bf16.msra.mxu1 %v1646_v2  ;;  %v1778_v41 = vor.u32 %v1865_v36, %v1775_v37  ;;  %v1782_v42 = vor.u32 %v1878_v39, %v1781_v38  ;;  %v1852_v44 = vld [vmem:[%s3047_s1 + $0xa0] sm:$0xf0]  ;;  %v1675_v46 = vld [vmem:[%s3047_s1 + $0xa4] sm:$0xf0]  ;;  %v1853_v48 = vld [vmem:[%s3047_s1 + $0xa8] sm:$0xf0] }
  0x1a   :  { %464 = vmatpush.bf16.msra.mxu2 %v1650_v7  ;;  %v1840_v45 = vld [vmem:[%s3047_s1 + $0x44] sm:$0xf]  ;;  %v1681_v47 = vld [vmem:[%s3047_s1 + $0x48] sm:$0xf]  ;;  %v1866_v49 = vld [vmem:[%s3047_s1 + $0x114] sm:$0xf]  ;;  %v1674_v51 = vor.u32 %v1852_v44, %v1673_v43 }
  0x1b   :  { %477 = vmatpush.bf16.msra.mxu3 %v1654_v8  ;;  %1811 = vmatmul.msk.bf16.vlgmr.msrb.gmra.mxu0 %vm323_vm0, %v1966_v23  ;;  %v1783_v50 = vld [vmem:[%s3047_s1 + $0x174] sm:$0xf0]  ;;  %v1841_v53 = vld [vmem:[%s3047_s1 + $0x4c] sm:$0xf]  ;;  %v1683_v54 = vld [vmem:[%s3047_s1 + $0xac] sm:$0xf0]  ;;  %v1678_v55 = vor.u32 %v1840_v45, %v1675_v46  ;;  %v1682_v56 = vor.u32 %v1853_v48, %v1681_v47 }
  0x1c   :  { %1812 = vmatmul.msk.bf16.vlgmr.msrb.gmra.mxu1 %vm323_vm0, %v1966_v23  ;;  %489 = vmatpush.bf16.msrb.mxu0 %v1758_v15  ;;  %v1786_v52 = vor.u32 %v1866_v49, %v1783_v50  ;;  %v1686_v57 = vor.u32 %v1841_v53, %v1683_v54  ;;  %v1789_v58 = vld [vmem:[%s3047_s1 + $0x118] sm:$0xf]  ;;  %v1879_v59 = vld [vmem:[%s3047_s1 + $0x178] sm:$0xf0]  ;;  %v1791_v61 = vld [vmem:[%s3047_s1 + $0x17c] sm:$0xf0] }
  0x1d   :  { %1813 = vmatmul.msk.bf16.vlgmr.msrb.gmra.mxu2 %vm323_vm0, %v1966_v23  ;;  %502 = vmatpush.bf16.msrb.mxu1 %v1762_v19  ;;  %v1867_v60 = vld [vmem:[%s3047_s1 + $0x11c] sm:$0xf]  ;;  %v1797_v62 = vld [vmem:[%s3047_s1 + $0x120] sm:$0xf]  ;;  %v1880_v63 = vld [vmem:[%s3047_s1 + $0x180] sm:$0xf0]  ;;  %v1790_v0 = vor.u32 %v1879_v59, %v1789_v58 }
  0x1e   :  { %1814 = vmatmul.msk.bf16.vlgmr.msrb.gmra.mxu3 %vm323_vm0, %v1966_v23  ;;  %515 = vmatpush.bf16.msrb.mxu2 %v1766_v16  ;;  %v1689_v1 = vld [vmem:[%s3047_s1 + $0x50] sm:$0xf]  ;;  %v1854_v2 = vld [vmem:[%s3047_s1 + $0xb0] sm:$0xf0]  ;;  %v1794_v3 = vor.u32 %v1867_v60, %v1791_v61  ;;  %v1798_v4 = vor.u32 %v1880_v63, %v1797_v62  ;;  %v1868_v5 = vld [vmem:[%s3047_s1 + $0x124] sm:$0xf] }
  0x1f   :  { %528 = vmatpush.bf16.msrb.mxu3 %v1770_v28  ;;  %v1799_v6 = vld [vmem:[%s3047_s1 + $0x184] sm:$0xf0]  ;;  %v1842_v7 = vld [vmem:[%s3047_s1 + $0x54] sm:$0xf]  ;;  %v1691_v9 = vld [vmem:[%s3047_s1 + $0xb4] sm:$0xf0]  ;;  %v1690_v12 = vor.u32 %v1854_v2, %v1689_v1 }
  0x20   :  { %490 = vmatpush.bf16.msrb.mxu0 %v1658_v27  ;;  %v1802_v8 = vor.u32 %v1868_v5, %v1799_v6  ;;  %v1697_v10 = vld [vmem:[%s3047_s1 + $0x58] sm:$0xf]  ;;  %v1855_v11 = vld [vmem:[%s3047_s1 + $0xb8] sm:$0xf0]  ;;  %v1699_v14 = vld [vmem:[%s3047_s1 + $0xbc] sm:$0xf0]  ;;  %v1694_v15 = vor.u32 %v1842_v7, %v1691_v9 }
  0x21   :  { %503 = vmatpush.bf16.msrb.mxu1 %v1662_v32  ;;  %v1843_v13 = vld [vmem:[%s3047_s1 + $0x5c] sm:$0xf]  ;;  %v1698_v16 = vor.u32 %v1855_v11, %v1697_v10  ;;  %vm1366_vm8 = vcmask 1040896  }
  0x22   :  { %516 = vmatpush.bf16.msrb.mxu2 %v1666_v31  ;;  %v1702_v17 = vor.u32 %v1843_v13, %v1699_v14 }
  0x23   :  { %529 = vmatpush.bf16.msrb.mxu3 %v1670_v33 }
  0x2b   :  { %1815 = vmatmul.msk.bf16.vlgmr.msra.gmra.mxu0 %vm323_vm0, %v1966_v23 }
  0x2c   :  { %1816 = vmatmul.msk.bf16.vlgmr.msra.gmra.mxu1 %vm323_vm0, %v1966_v23  ;;  %541 = vmatpush.bf16.msra.mxu0 %v1774_v40 }
  0x2d   :  { %1817 = vmatmul.msk.bf16.vlgmr.msra.gmra.mxu2 %vm323_vm0, %v1966_v23  ;;  %554 = vmatpush.bf16.msra.mxu1 %v1778_v41 }
  0x2e   :  { %1818 = vmatmul.msk.bf16.vlgmr.msra.gmra.mxu3 %vm323_vm0, %v1966_v23  ;;  %567 = vmatpush.bf16.msra.mxu2 %v1782_v42 }
  0x2f   :  { %580 = vmatpush.bf16.msra.mxu3 %v1786_v52 }
  0x30   :  { %542 = vmatpush.bf16.msra.mxu0 %v1674_v51 }
  0x31   :  { %555 = vmatpush.bf16.msra.mxu1 %v1678_v55 }
  0x32   :  { %568 = vmatpush.bf16.msra.mxu2 %v1682_v56 }
  0x33   :  { %581 = vmatpush.bf16.msra.mxu3 %v1686_v57 }
  0x3b   :  { %1819 = vmatmul.msk.bf16.vlgmr.msrb.gmra.mxu0 %vm323_vm0, %v1966_v23 }
  0x3c   :  { %1820 = vmatmul.msk.bf16.vlgmr.msrb.gmra.mxu1 %vm323_vm0, %v1966_v23  ;;  %593 = vmatpush.bf16.msrb.mxu0 %v1790_v0 }
  0x3d   :  { %1821 = vmatmul.msk.bf16.vlgmr.msrb.gmra.mxu2 %vm323_vm0, %v1966_v23  ;;  %606 = vmatpush.bf16.msrb.mxu1 %v1794_v3 }
  0x3e   :  { %1822 = vmatmul.msk.bf16.vlgmr.msrb.gmra.mxu3 %vm323_vm0, %v1966_v23  ;;  %619 = vmatpush.bf16.msrb.mxu2 %v1798_v4 }
  0x3f   :  { %632 = vmatpush.bf16.msrb.mxu3 %v1802_v8 }
  0x40   :  { %594 = vmatpush.bf16.msrb.mxu0 %v1690_v12 }
  0x41   :  { %607 = vmatpush.bf16.msrb.mxu1 %v1694_v15 }
  0x42   :  { %620 = vmatpush.bf16.msrb.mxu2 %v1698_v16 }
  0x43   :  { %633 = vmatpush.bf16.msrb.mxu3 %v1702_v17 }
  0x4b   :  { %1823 = vmatmul.msk.bf16.vlgmr.msra.gmra.mxu0 %vm323_vm0, %v1966_v23 }
  0x4c   :  { %1824 = vmatmul.msk.bf16.vlgmr.msra.gmra.mxu1 %vm323_vm0, %v1966_v23 }
  0x4d   :  { %1825 = vmatmul.msk.bf16.vlgmr.msra.gmra.mxu2 %vm323_vm0, %v1966_v23 }
  0x4e   :  { %1826 = vmatmul.msk.bf16.vlgmr.msra.gmra.mxu3 %vm323_vm0, %v1966_v23 }
  0x5b   :  { %1827 = vmatmul.msk.bf16.vlgmr.msrb.gmra.mxu0 %vm323_vm0, %v1966_v23 }
  0x5c   :  { %1828 = vmatmul.msk.bf16.vlgmr.msrb.gmra.mxu1 %vm323_vm0, %v1966_v23 }
  0x5d   :  { %1829 = vmatmul.msk.bf16.vlgmr.msrb.gmra.mxu2 %vm323_vm0, %v1966_v23 }
  0x5e   :  { %1830 = vmatmul.msk.bf16.vlgmr.msrb.gmra.mxu3 %vm323_vm0, %v1966_v23 }
  0x88   :  { %v2256_v18 = vpop.f32.mrf.mxu0 }
  0x89   :  { %3104 = vst [vmem:[#allocation2_spill] sm:$0xff] %v2256_v18  ;;  %v653_v19 = vsel %vm652_vm1, %v2256_v18, 0.0  ;;  %v829_v20 = vmul.f32 %v2256_v18, %v2256_v18  ;;  %v2262_v21 = vpop.f32.mrf.mxu1 }
  0x8a   :  { %3105 = vst [vmem:[#allocation3_spill] sm:$0xff] %v2262_v21  ;;  %v654_v22 = vrot.slane %v653_v19, 4  ;;  %v660_v24 = vsel %vm652_vm1, %v2262_v21, 0.0  ;;  %v830_v25 = vmul.f32 %v2262_v21, %v2262_v21 }
  0x8b   :  { %v854_v26 = vsel %vm652_vm1, %v829_v20, 0.0  ;;  %v661_v27 = vrot.slane %v660_v24, 4 }
  0x8c   :  { %v855_v28 = vrot.slane %v854_v26, 4  ;;  %v861_v29 = vsel %vm652_vm1, %v830_v25, 0.0  ;;  %v655_v30 = vadd.f32 %v654_v22, %v653_v19 }
  0x8d   :  { %v862_v31 = vrot.slane %v861_v29, 4  ;;  %v662_v32 = vadd.f32 %v661_v27, %v660_v24 }
  0x8e   :  { %v656_v33 = vrot.slane %v655_v30, 2  ;;  %v856_v34 = vadd.f32 %v855_v28, %v854_v26 }
  0x8f   :  { %v663_v36 = vrot.slane %v662_v32, 2  ;;  %v863_v37 = vadd.f32 %v862_v31, %v861_v29 }
  0x90   :  { %v2270_v35 = vpop.f32.mrf.mxu2  ;;  %v338_v40 = vpop.f32.mrf.mxu0  ;;  %v657_v42 = vadd.f32 %v656_v33, %v655_v30  ;;  %v857_v43 = vrot.slane %v856_v34, 2 }
  0x91   :  { %3106 = vst [vmem:[#allocation4_spill] sm:$0xff] %v2270_v35  ;;  %v667_v38 = vsel %vm652_vm1, %v2270_v35, 0.0  ;;  %v831_v39 = vmul.f32 %v2270_v35, %v2270_v35  ;;  %v2276_v41 = vpop.f32.mrf.mxu3  ;;  %v351_v45 = vpop.f32.mrf.mxu1  ;;  %v664_v48 = vadd.f32 %v663_v36, %v662_v32  ;;  %v864_v52 = vrot.slane %v863_v37, 2 }
  0x92   :  { %3107 = vst [vmem:[#allocation5_spill] sm:$0xff] %v2276_v41  ;;  %v668_v44 = vrot.slane %v667_v38, 4  ;;  %v674_v46 = vsel %vm652_vm1, %v2276_v41, 0.0  ;;  %v832_v47 = vmul.f32 %v2276_v41, %v2276_v41  ;;  %v658_v51 = vrot.slane %v657_v42, 1 }
  0x93   :  { %v868_v49 = vsel %vm652_vm1, %v831_v39, 0.0  ;;  %v675_v50 = vrot.slane %v674_v46, 4  ;;  %v665_v55 = vrot.slane %v664_v48, 1  ;;  %v865_v60 = vadd.f32 %v864_v52, %v863_v37 }
  0x94   :  { %v869_v53 = vrot.slane %v868_v49, 4  ;;  %v875_v54 = vsel %vm652_vm1, %v832_v47, 0.0  ;;  %v669_v56 = vadd.f32 %v668_v44, %v667_v38  ;;  %v2284_v59 = vadd.f32 %v658_v51, %v657_v42 }
  0x95   :  { %v676_v57 = vadd.f32 %v675_v50, %v674_v46  ;;  %v876_v58 = vrot.slane %v875_v54, 4  ;;  %v2286_v61 = vadd.f32 %v665_v55, %v664_v48  ;;  %v858_v63 = vadd.f32 %v857_v43, %v856_v34 }
  0x96   :  { %v670_v62 = vrot.slane %v669_v56, 2  ;;  %v870_v0 = vadd.f32 %v869_v53, %v868_v49  ;;  %1030 = vrot.lane.b32.xlu0 %v2284_v59, %s1888_s21  ;;  %v866_v8 = vrot.slane %v865_v60, 1 }
  0x97   :  { %v877_v1 = vadd.f32 %v876_v58, %v875_v54  ;;  %v677_v2 = vrot.slane %v676_v57, 2  ;;  %1042 = vrot.lane.b32.xlu1 %v2286_v61, %s1888_s21  ;;  %v859_v9 = vrot.slane %v858_v63, 1 }
  0x98   :  { %v364_v3 = vpop.f32.mrf.mxu2  ;;  %v671_v4 = vadd.f32 %v670_v62, %v669_v56  ;;  %v871_v5 = vrot.slane %v870_v0, 2  ;;  %v2292_v7 = vpop.f32.mrf.mxu0  ;;  %v2312_v31 = vadd.f32 %v866_v8, %v865_v60 }
  0x99   :  { %v377_v6 = vpop.f32.mrf.mxu3  ;;  %3108 = vst [vmem:[#allocation6_spill] sm:$0xff] %v2292_v7  ;;  %v681_v10 = vsel %vm652_vm1, %v2292_v7, 0.0  ;;  %v833_v11 = vmul.f32 %v2292_v7, %v2292_v7  ;;  %v2298_v12 = vpop.f32.mrf.mxu1  ;;  %v878_v14 = vrot.slane %v877_v1, 2  ;;  %v678_v19 = vadd.f32 %v677_v2, %v676_v57 }
  0x9a   :  { %3109 = vst [vmem:[#allocation7_spill] sm:$0xff] %v2298_v12  ;;  %v672_v13 = vrot.slane %v671_v4, 1  ;;  %v682_v15 = vrot.slane %v681_v10, 4  ;;  %v688_v16 = vsel %vm652_vm1, %v2298_v12, 0.0  ;;  %v834_v17 = vmul.f32 %v2298_v12, %v2298_v12 }
  0x9b   :  { %v882_v20 = vsel %vm652_vm1, %v833_v11, 0.0  ;;  %v689_v22 = vrot.slane %v688_v16, 4  ;;  %v872_v25 = vadd.f32 %v871_v5, %v870_v0  ;;  %v2308_v29 = vadd.f32 %v859_v9, %v858_v63 }
  0x9c   :  { %v2305_v24 = vadd.f32 %v672_v13, %v671_v4  ;;  %v683_v26 = vadd.f32 %v682_v15, %v681_v10  ;;  %v883_v27 = vrot.slane %v882_v20, 4  ;;  %v889_v28 = vsel %vm652_vm1, %v834_v17, 0.0 }
  0x9d   :  { %v690_v30 = vadd.f32 %v689_v22, %v688_v16  ;;  %v879_v32 = vadd.f32 %v878_v14, %v877_v1  ;;  %v890_v34 = vrot.slane %v889_v28, 4  ;;  %v873_v37 = vrot.slane %v872_v25, 1 }
  0x9e   :  { %1054 = vrot.lane.b32.xlu2 %v2305_v24, %s1888_s21  ;;  %1035 = vrot.lane.b32.xlu0 %v2308_v29, %s1888_s21  ;;  %v884_v33 = vadd.f32 %v883_v27, %v882_v20  ;;  %v684_v38 = vrot.slane %v683_v26, 2  ;;  %v679_v44 = vrot.slane %v678_v19, 1 }
  0x9f   :  { %1047 = vrot.lane.b32.xlu1 %v2312_v31, %s1888_s21  ;;  %v880_v49 = vrot.slane %v879_v32, 1  ;;  %v691_v50 = vrot.slane %v690_v30, 2  ;;  %v2329_v53 = vadd.f32 %v873_v37, %v872_v25  ;;  %v891_v55 = vadd.f32 %v890_v34, %v889_v28 }
  0xa0   :  { %v2318_v36 = vpop.f32.mrf.mxu2  ;;  %v390_v39 = vpop.f32.mrf.mxu0  ;;  %v885_v45 = vrot.slane %v884_v33, 2  ;;  %v685_v54 = vadd.f32 %v684_v38, %v683_v26  ;;  %v2333_v58 = vadd.f32 %v679_v44, %v678_v19 }
  0xa1   :  { %3110 = vst [vmem:[#allocation8_spill] sm:$0xff] %v2318_v36  ;;  %v695_v40 = vsel %vm652_vm1, %v2318_v36, 0.0  ;;  %v835_v42 = vmul.f32 %v2318_v36, %v2318_v36  ;;  %v2324_v43 = vpop.f32.mrf.mxu3  ;;  %v403_v47 = vpop.f32.mrf.mxu1  ;;  %v2338_v63 = vadd.f32 %v880_v49, %v879_v32  ;;  %v692_v0 = vadd.f32 %v691_v50, %v690_v30 }
  0xa2   :  { %3111 = vst [vmem:[#allocation9_spill] sm:$0xff] %v2324_v43  ;;  %v696_v46 = vrot.slane %v695_v40, 4  ;;  %v836_v48 = vmul.f32 %v2324_v43, %v2324_v43  ;;  %v702_v57 = vsel %vm652_vm1, %v2324_v43, 0.0  ;;  %v886_v60 = vadd.f32 %v885_v45, %v884_v33 }
  0xa3   :  { %v896_v51 = vsel %vm652_vm1, %v835_v42, 0.0  ;;  %v703_v2 = vrot.slane %v702_v57, 4  ;;  %v686_v4 = vrot.slane %v685_v54, 1  ;;  %v892_v5 = vrot.slane %v891_v55, 2 }
  0xa4   :  { %v897_v52 = vrot.slane %v896_v51, 4  ;;  %v697_v56 = vadd.f32 %v696_v46, %v695_v40  ;;  %v903_v62 = vsel %vm652_vm1, %v836_v48, 0.0  ;;  %v887_v10 = vrot.slane %v886_v60, 1 }
  0xa5   :  { %v904_v6 = vrot.slane %v903_v62, 4  ;;  %v693_v15 = vrot.slane %v692_v0, 1  ;;  %v704_v22 = vadd.f32 %v703_v2, %v702_v57  ;;  %v2354_v25 = vadd.f32 %v686_v4, %v685_v54 }
  0xa6   :  { %1059 = vrot.lane.b32.xlu2 %v2329_v53, %s1888_s21  ;;  %v898_v1 = vadd.f32 %v897_v52, %v896_v51  ;;  %1066 = vrot.lane.b32.xlu0 %v2333_v58, %s1888_s21  ;;  %v698_v11 = vrot.slane %v697_v56, 2  ;;  %v893_v26 = vadd.f32 %v892_v5, %v891_v55  ;;  %v2357_v28 = vadd.f32 %v887_v10, %v886_v60 }
  0xa7   :  { %1071 = vrot.lane.b32.xlu1 %v2338_v63, %s1888_s21  ;;  %v905_v32 = vadd.f32 %v904_v6, %v903_v62  ;;  %v2361_v34 = vadd.f32 %v693_v15, %v692_v0  ;;  %v705_v45 = vrot.slane %v704_v22, 2 }
  0xa8   :  { %v416_v3 = vpop.f32.mrf.mxu2  ;;  %v2344_v8 = vpop.f32.mrf.mxu0  ;;  %v899_v17 = vrot.slane %v898_v1, 2  ;;  %v699_v30 = vadd.f32 %v698_v11, %v697_v56  ;;  %v894_v42 = vrot.slane %v893_v26, 1 }
  0xa9   :  { %3112 = vst [vmem:[#allocation10_spill] sm:$0xff] %v2344_v8  ;;  %v429_v9 = vpop.f32.mrf.mxu3  ;;  %v709_v13 = vsel %vm652_vm1, %v2344_v8, 0.0  ;;  %v837_v14 = vmul.f32 %v2344_v8, %v2344_v8  ;;  %v2350_v16 = vpop.f32.mrf.mxu1  ;;  %v906_v51 = vrot.slane %v905_v32, 2  ;;  %v706_v62 = vadd.f32 %v705_v45, %v704_v22 }
  0xaa   :  { %3113 = vst [vmem:[#allocation11_spill] sm:$0xff] %v2350_v16  ;;  %v710_v19 = vrot.slane %v709_v13, 4  ;;  %v838_v20 = vmul.f32 %v2350_v16, %v2350_v16  ;;  %v716_v37 = vsel %vm652_vm1, %v2350_v16, 0.0  ;;  %v900_v38 = vadd.f32 %v899_v17, %v898_v1 }
  0xab   :  { %v910_v27 = vsel %vm652_vm1, %v837_v14, 0.0  ;;  %v717_v46 = vrot.slane %v716_v37, 4  ;;  %v700_v49 = vrot.slane %v699_v30, 1  ;;  %v2376_v57 = vadd.f32 %v894_v42, %v893_v26 }
  0xac   :  { %v711_v33 = vadd.f32 %v710_v19, %v709_v13  ;;  %v917_v39 = vsel %vm652_vm1, %v838_v20, 0.0  ;;  %v911_v40 = vrot.slane %v910_v27, 4  ;;  %v901_v54 = vrot.slane %v900_v38, 1 }
  0xad   :  { %v918_v52 = vrot.slane %v917_v39, 4  ;;  %v718_v1 = vadd.f32 %v717_v46, %v716_v37  ;;  %v2381_v3 = vadd.f32 %v700_v49, %v699_v30  ;;  %v907_v4 = vadd.f32 %v906_v51, %v905_v32 }
  0xae   :  { %1078 = vrot.lane.b32.xlu2 %v2354_v25, %s1888_s21  ;;  %1083 = vrot.lane.b32.xlu0 %v2357_v28, %s1888_s21  ;;  %v712_v56 = vrot.slane %v711_v33, 2  ;;  %v912_v0 = vadd.f32 %v911_v40, %v910_v27  ;;  %v2385_v5 = vadd.f32 %v901_v54, %v900_v38  ;;  %v707_v15 = vrot.slane %v706_v62, 1 }
  0xaf   :  { %1090 = vrot.lane.b32.xlu1 %v2361_v34, %s1888_s21  ;;  %v919_v10 = vadd.f32 %v918_v52, %v917_v39  ;;  %v908_v22 = vrot.slane %v907_v4, 1  ;;  %v719_v30 = vrot.slane %v718_v1, 2 }
  0xb0   :  { %v2370_v44 = vpop.f32.mrf.mxu2  ;;  %v442_v47 = vpop.f32.mrf.mxu0  ;;  %v713_v9 = vadd.f32 %v712_v56, %v711_v33  ;;  %v913_v19 = vrot.slane %v912_v0, 2  ;;  %v2402_v42 = vadd.f32 %v707_v15, %v706_v62 }
  0xb1   :  { %3114 = vst [vmem:[#allocation12_spill] sm:$0xff] %v2370_v44  ;;  %v839_v48 = vmul.f32 %v2370_v44, %v2370_v44  ;;  %v2374_v50 = vpop.f32.mrf.mxu3  ;;  %v455_v55 = vpop.f32.mrf.mxu1  ;;  %v723_v60 = vsel %vm652_vm1, %v2370_v44, 0.0  ;;  %v920_v38 = vrot.slane %v919_v10, 2  ;;  %v720_v49 = vadd.f32 %v719_v30, %v718_v1 }
  0xb2   :  { %3115 = vst [vmem:[#allocation13_spill] sm:$0xff] %v2374_v50  ;;  %v730_v6 = vsel %vm652_vm1, %v2374_v50, 0.0  ;;  %v724_v11 = vrot.slane %v723_v60, 4  ;;  %v840_v14 = vmul.f32 %v2374_v50, %v2374_v50  ;;  %v714_v32 = vrot.slane %v713_v9, 1 }
  0xb3   :  { %v924_v2 = vsel %vm652_vm1, %v839_v48, 0.0  ;;  %v731_v20 = vrot.slane %v730_v6, 4  ;;  %v914_v45 = vadd.f32 %v913_v19, %v912_v0  ;;  %v2404_v48 = vadd.f32 %v908_v22, %v907_v4 }
  0xb4   :  { %v925_v13 = vrot.slane %v924_v2, 4  ;;  %v725_v39 = vadd.f32 %v724_v11, %v723_v60  ;;  %v931_v40 = vsel %vm652_vm1, %v840_v14, 0.0  ;;  %v2408_v51 = vadd.f32 %v714_v32, %v713_v9 }
  0xb5   :  { %v732_v47 = vadd.f32 %v731_v20, %v730_v6  ;;  %v921_v55 = vadd.f32 %v920_v38, %v919_v10  ;;  %v932_v56 = vrot.slane %v931_v40, 4  ;;  %v915_v62 = vrot.slane %v914_v45, 1 }
  0xb6   :  { %1095 = vrot.lane.b32.xlu2 %v2376_v57, %s1888_s21  ;;  %1102 = vrot.lane.b32.xlu0 %v2381_v3, %s1888_s21  ;;  %v926_v46 = vadd.f32 %v925_v13, %v924_v2  ;;  %v726_v60 = vrot.slane %v725_v39, 2  ;;  %v721_v9 = vrot.slane %v720_v49, 1 }
  0xb7   :  { %1107 = vrot.lane.b32.xlu1 %v2385_v5, %s1888_s21  ;;  %v922_v13 = vrot.slane %v921_v55, 1  ;;  %v733_v15 = vrot.slane %v732_v47, 2  ;;  %v933_v19 = vadd.f32 %v932_v56, %v931_v40  ;;  %v2423_v20 = vadd.f32 %v915_v62, %v914_v45 }
  0xb8   :  { %v468_v17 = vpop.f32.mrf.mxu2  ;;  %v2395_v26 = vpop.f32.mrf.mxu0  ;;  %v927_v1 = vrot.slane %v926_v46, 2 }
  0xb9   :  { %3116 = vst [vmem:[#allocation14_spill] sm:$0xff] %v2395_v26  ;;  %v481_v27 = vpop.f32.mrf.mxu3  ;;  %v841_v33 = vmul.f32 %v2395_v26, %v2395_v26  ;;  %v2399_v37 = vpop.f32.mrf.mxu1  ;;  %v737_v52 = vsel %vm652_vm1, %v2395_v26, 0.0  ;;  %v727_v17 = vadd.f32 %v726_v60, %v725_v39 }
  0xba   :  { %3117 = vst [vmem:[#allocation15_spill] sm:$0xff] %v2399_v37  ;;  %v738_v2 = vrot.slane %v737_v52, 4  ;;  %v842_v6 = vmul.f32 %v2399_v37, %v2399_v37  ;;  %v744_v22 = vsel %vm652_vm1, %v2399_v37, 0.0  ;;  %v928_v27 = vadd.f32 %v927_v1, %v926_v46 }
  0xbb   :  { %v938_v54 = vsel %vm652_vm1, %v841_v33, 0.0  ;;  %v2428_v33 = vadd.f32 %v721_v9, %v720_v49  ;;  %v745_v39 = vrot.slane %v744_v22, 4  ;;  %v728_v45 = vrot.slane %v727_v17, 1 }
  0xbc   :  { %v939_v4 = vrot.slane %v938_v54, 4  ;;  %v739_v30 = vadd.f32 %v738_v2, %v737_v52  ;;  %v945_v32 = vsel %vm652_vm1, %v842_v6, 0.0  ;;  %v934_v46 = vrot.slane %v933_v19, 2 }
  0xbd   :  { %v946_v52 = vrot.slane %v945_v32, 4  ;;  %v929_v49 = vrot.slane %v928_v27, 1  ;;  %v746_v37 = vadd.f32 %v745_v39, %v744_v22 }
  0xbe   :  { %1114 = vrot.lane.b32.xlu2 %v2402_v42, %s1888_s21  ;;  %1119 = vrot.lane.b32.xlu0 %v2404_v48, %s1888_s21  ;;  %v940_v38 = vadd.f32 %v939_v4, %v938_v54  ;;  %v740_v62 = vrot.slane %v739_v30, 2 }
  0xbf   :  { %1126 = vrot.lane.b32.xlu1 %v2408_v51, %s1888_s21  ;;  %v2456_v26 = vadd.f32 %v929_v49, %v928_v27  ;;  %v947_v50 = vadd.f32 %v946_v52, %v945_v32  ;;  %v747_v39 = vrot.slane %v746_v37, 2 }
  0xc0   :  { %v2417_v0 = vpop.f32.mrf.mxu2  ;;  %v494_v11 = vpop.f32.mrf.mxu0  ;;  %v941_v60 = vrot.slane %v940_v38, 2 }
  0xc1   :  { %3118 = vst [vmem:[#allocation16_spill] sm:$0xff] %v2417_v0  ;;  %v2421_v10 = vpop.f32.mrf.mxu3  ;;  %v507_v14 = vpop.f32.mrf.mxu1  ;;  %v2432_v11 = vadd.f32 %v922_v13, %v921_v55  ;;  %v751_v40 = vsel %vm652_vm1, %v2417_v0, 0.0  ;;  %v1805_v55 = vld [vmem:[%s3047_s1 + $0x128] sm:$0xf]  ;;  %v843_v56 = vmul.f32 %v2417_v0, %v2417_v0  ;;  %v935_v0 = vadd.f32 %v934_v46, %v933_v19 }
  0xc2   :  { %3119 = vst [vmem:[#allocation17_spill] sm:$0xff] %v2421_v10  ;;  %v734_v14 = vadd.f32 %v733_v15, %v732_v47  ;;  %v1881_v47 = vld [vmem:[%s3047_s1 + $0x188] sm:$0xf0]  ;;  %v752_v6 = vrot.slane %v751_v40, 4  ;;  %v2452_v15 = vadd.f32 %v728_v45, %v727_v17  ;;  %v948_v45 = vrot.slane %v947_v50, 2 }
  0xc3   :  { %v1806_v4 = vor.u32 %v1881_v47, %v1805_v55  ;;  %v952_v44 = vsel %vm652_vm1, %v843_v56, 0.0  ;;  %v758_v55 = vsel %vm652_vm1, %v2421_v10, 0.0  ;;  %v942_v47 = vadd.f32 %v941_v60, %v940_v38 }
  0xc4   :  { %v735_v9 = vrot.slane %v734_v14, 1  ;;  %v753_v16 = vadd.f32 %v752_v6, %v751_v40  ;;  %v953_v19 = vrot.slane %v952_v44, 4  ;;  %v759_v27 = vrot.slane %v758_v55, 4 }
  0xc5   :  { %645 = vmatpush.bf16.msra.mxu0 %v1806_v4  ;;  %v936_v32 = vrot.slane %v935_v0, 1  ;;  %v1856_v4 = vld [vmem:[%s3047_s1 + $0xc0] sm:$0xf0]  ;;  %v949_v43 = vadd.f32 %v948_v45, %v947_v50 }
  0xc6   :  { %1131 = vrot.lane.b32.xlu2 %v2423_v20, %s1888_s21  ;;  %1138 = vrot.lane.b32.xlu0 %v2428_v33, %s1888_s21  ;;  %v2463_v17 = vadd.f32 %v735_v9, %v734_v14  ;;  %v754_v56 = vrot.slane %v753_v16, 2  ;;  %v760_v6 = vadd.f32 %v759_v27, %v758_v55 }
  0xc7   :  { %1143 = vrot.lane.b32.xlu1 %v2432_v11, %s1888_s21  ;;  %v2482_v9 = vadd.f32 %v936_v32, %v935_v0 }
  0xc8   :  { %v520_v54 = vpop.f32.mrf.mxu2  ;;  %v2448_v1 = vpop.f32.mrf.mxu0  ;;  %v755_v12 = vadd.f32 %v754_v56, %v753_v16 }
  0xc9   :  { %3120 = vst [vmem:[#allocation18_spill] sm:$0xff] %v2448_v1  ;;  %v533_v2 = vpop.f32.mrf.mxu3  ;;  %v2450_v13 = vpop.f32.mrf.mxu1  ;;  %v844_v54 = vmul.f32 %v2421_v10, %v2421_v10  ;;  %v845_v49 = vmul.f32 %v2448_v1, %v2448_v1 }
  0xca   :  { %3121 = vst [vmem:[#allocation19_spill] sm:$0xff] %v2450_v13  ;;  %v741_v2 = vadd.f32 %v740_v62, %v739_v30  ;;  %v943_v30 = vrot.slane %v942_v47, 1  ;;  %v1705_v62 = vld [vmem:[%s3047_s1 + $0x60] sm:$0xf]  ;;  %v846_v16 = vmul.f32 %v2450_v13, %v2450_v13 }
  0xcb   :  { %v959_v22 = vsel %vm652_vm1, %v844_v54, 0.0  ;;  %v748_v54 = vadd.f32 %v747_v39, %v746_v37  ;;  %v966_v36 = vsel %vm652_vm1, %v845_v49, 0.0  ;;  %v1706_v55 = vor.u32 %v1856_v4, %v1705_v62 }
  0xcc   :  { %v742_v40 = vrot.slane %v741_v2, 1  ;;  %v960_v52 = vrot.slane %v959_v22, 4  ;;  %v2484_v10 = vadd.f32 %v943_v30, %v942_v47  ;;  %v756_v30 = vrot.slane %v755_v12, 1 }
  0xcd   :  { %v749_v0 = vrot.slane %v748_v54, 1  ;;  %646 = vmatpush.bf16.msra.mxu0 %v1706_v55  ;;  %v973_v4 = vsel %vm652_vm1, %v846_v16, 0.0 }
  0xce   :  { %1150 = vrot.lane.b32.xlu2 %v2452_v15, %s1888_s21  ;;  %1155 = vrot.lane.b32.xlu0 %v2456_v26, %s1888_s21  ;;  %v2486_v8 = vadd.f32 %v742_v40, %v741_v2  ;;  %v961_v7 = vadd.f32 %v960_v52, %v959_v22  ;;  %v967_v2 = vrot.slane %v966_v36, 4  ;;  %v950_v22 = vrot.slane %v949_v43, 1 }
  0xcf   :  { %1162 = vrot.lane.b32.xlu1 %v2463_v17, %s1888_s21  ;;  %v2509_v56 = vadd.f32 %v749_v0, %v748_v54 }
  0xd0   :  { %v2470_v38 = vpop.f32.mrf.mxu2  ;;  %v546_v46 = vpop.f32.mrf.mxu0  ;;  %v962_v40 = vrot.slane %v961_v7, 2  ;;  %1831 = vmatmul.msk.bf16.vlgmr.msra.gmra.mxu0 %vm323_vm0, %v1966_v23  ;;  %v2512_v55 = vadd.f32 %v950_v22, %v949_v43 }
  0xd1   :  { %3122 = vst [vmem:[#allocation20_spill] sm:$0xff] %v2470_v38  ;;  %v2472_v14 = vpop.f32.mrf.mxu3  ;;  %v559_v60 = vpop.f32.mrf.mxu1  ;;  %v954_v46 = vadd.f32 %v953_v19, %v952_v44  ;;  %v772_v44 = vsel %vm652_vm1, %v2450_v13, 0.0  ;;  %v761_v19 = vrot.slane %v760_v6, 2  ;;  %v847_v52 = vmul.f32 %v2470_v38, %v2470_v38 }
  0xd2   :  { %3123 = vst [vmem:[#allocation21_spill] sm:$0xff] %v2472_v14  ;;  %v765_v60 = vsel %vm652_vm1, %v2448_v1, 0.0  ;;  %v773_v39 = vrot.slane %v772_v44, 4  ;;  %v2516_v1 = vadd.f32 %v756_v30, %v755_v12  ;;  %v779_v41 = vsel %vm652_vm1, %v2470_v38, 0.0 }
  0xd3   :  { %v766_v37 = vrot.slane %v765_v60, 4  ;;  %v955_v50 = vrot.slane %v954_v46, 2  ;;  %v963_v23 = vadd.f32 %v962_v40, %v961_v7  ;;  %v980_v54 = vsel %vm652_vm1, %v847_v52, 0.0 }
  0xd4   :  { %v774_v13 = vadd.f32 %v773_v39, %v772_v44  ;;  %v981_v7 = vrot.slane %v980_v54, 4  ;;  %v786_v52 = vsel %vm652_vm1, %v2472_v14, 0.0 }
  0xd5   :  { %v767_v49 = vadd.f32 %v766_v37, %v765_v60  ;;  %v956_v62 = vadd.f32 %v955_v50, %v954_v46  ;;  %v974_v46 = vrot.slane %v973_v4, 4  ;;  %v780_v60 = vrot.slane %v779_v41, 4 }
  0xd6   :  { %1167 = vrot.lane.b32.xlu2 %v2482_v9, %s1888_s21  ;;  %1174 = vrot.lane.b32.xlu0 %v2486_v8, %s1888_s21  ;;  %v848_v50 = vmul.f32 %v2472_v14, %v2472_v14  ;;  %v775_v16 = vrot.slane %v774_v13, 2 }
  0xd7   :  { %1179 = vrot.lane.b32.xlu1 %v2484_v10, %s1888_s21  ;;  %v768_v43 = vrot.slane %v767_v49, 2  ;;  %v975_v30 = vadd.f32 %v974_v46, %v973_v4  ;;  %v781_v40 = vadd.f32 %v780_v60, %v779_v41 }
  0xd8   :  { %v572_v47 = vpop.f32.mrf.mxu2  ;;  %v2501_v27 = vpop.f32.mrf.mxu0  ;;  %v987_v35 = vsel %vm652_vm1, %v848_v50, 0.0  ;;  %v776_v18 = vadd.f32 %v775_v16, %v774_v13 }
  0xd9   :  { %3124 = vst [vmem:[#allocation22_spill] sm:$0xff] %v2501_v27  ;;  %v585_v32 = vpop.f32.mrf.mxu3  ;;  %v2503_v45 = vpop.f32.mrf.mxu1  ;;  %v762_v47 = vadd.f32 %v761_v19, %v760_v6  ;;  %v769_v39 = vadd.f32 %v768_v43, %v767_v49  ;;  %v793_v41 = vsel %vm652_vm1, %v2501_v27, 0.0  ;;  %v787_v49 = vrot.slane %v786_v52, 4 }
  0xda   :  { %3125 = vst [vmem:[#allocation23_spill] sm:$0xff] %v2503_v45  ;;  %v968_v32 = vadd.f32 %v967_v2, %v966_v36  ;;  %v957_v36 = vrot.slane %v956_v62, 1  ;;  %v964_v2 = vrot.slane %v963_v23, 1  ;;  %v976_v4 = vrot.slane %v975_v30, 2 }
  0xdb   :  { %v763_v12 = vrot.slane %v762_v47, 1  ;;  %v782_v13 = vrot.slane %v781_v40, 2  ;;  %v777_v43 = vrot.slane %v776_v18, 1 }
  0xdc   :  { %v969_v44 = vrot.slane %v968_v32, 2  ;;  %v2531_v19 = vadd.f32 %v957_v36, %v956_v62  ;;  %v2540_v21 = vadd.f32 %v964_v2, %v963_v23  ;;  %v770_v62 = vrot.slane %v769_v39, 1 }
  0xdd   :  { %v2535_v38 = vadd.f32 %v763_v12, %v762_v47  ;;  %v849_v23 = vmul.f32 %v2501_v27, %v2501_v27  ;;  %v794_v36 = vrot.slane %v793_v41, 4  ;;  %v850_v12 = vmul.f32 %v2503_v45, %v2503_v45 }
  0xde   :  { %1186 = vrot.lane.b32.xlu2 %v2509_v56, %s1888_s21  ;;  %1191 = vrot.lane.b32.xlu0 %v2512_v55, %s1888_s21  ;;  %3129 = vst [vmem:[#allocation27_spill] sm:$0xff] %v2540_v21  ;;  %v977_v50 = vadd.f32 %v976_v4, %v975_v30 }
  0xdf   :  { %1198 = vrot.lane.b32.xlu1 %v2516_v1, %s1888_s21  ;;  %3128 = vst [vmem:[#allocation26_spill] sm:$0xff] %v2535_v38  ;;  %v994_v2 = vsel %vm652_vm1, %v849_v23, 0.0  ;;  %v795_v27 = vadd.f32 %v794_v36, %v793_v41 }
  0xe0   :  { %v2525_v6 = vpop.f32.mrf.mxu2  ;;  %v598_v37 = vpop.f32.mrf.mxu0  ;;  %v995_v30 = vrot.slane %v994_v2, 4 }
  0xe1   :  { %3126 = vst [vmem:[#allocation24_spill] sm:$0xff] %v2525_v6  ;;  %v2527_v0 = vpop.f32.mrf.mxu3  ;;  %v611_v22 = vpop.f32.mrf.mxu1  ;;  %v970_v37 = vadd.f32 %v969_v44, %v968_v32  ;;  %v988_v32 = vrot.slane %v987_v35, 4  ;;  %v788_v44 = vadd.f32 %v787_v49, %v786_v52  ;;  %v851_v49 = vmul.f32 %v2525_v6, %v2525_v6 }
  0xe2   :  { %3127 = vst [vmem:[#allocation25_spill] sm:$0xff] %v2527_v0  ;;  %v982_v22 = vadd.f32 %v981_v7, %v980_v54  ;;  %v2552_v7 = vadd.f32 %v770_v62, %v769_v39  ;;  %v1001_v39 = vsel %vm652_vm1, %v850_v12, 0.0  ;;  %v996_v23 = vadd.f32 %v995_v30, %v994_v2 }
  0xe3   :  { %v971_v46 = vrot.slane %v970_v37, 1  ;;  %v989_v14 = vadd.f32 %v988_v32, %v987_v35  ;;  %v978_v35 = vrot.slane %v977_v50, 1 }
  0xe4   :  { %v983_v60 = vrot.slane %v982_v22, 2  ;;  %v997_v2 = vrot.slane %v996_v23, 2 }
  0xe5   :  { %v2555_v16 = vadd.f32 %v971_v46, %v970_v37  ;;  %v990_v41 = vrot.slane %v989_v14, 2  ;;  %v2570_v4 = vadd.f32 %v978_v35, %v977_v50 }
  0xe6   :  { %1203 = vrot.lane.b32.xlu2 %v2531_v19, %s1888_s21  ;;  %1210 = vrot.lane.b32.xlu0 %v2535_v38, %s1888_s21  ;;  %v800_v38 = vsel %vm652_vm1, %v2503_v45, 0.0 }
  0xe7   :  { %1215 = vrot.lane.b32.xlu1 %v2540_v21, %s1888_s21  ;;  %3130 = vst [vmem:[#allocation28_spill] sm:$0xff] %v2555_v16  ;;  %v984_v21 = vadd.f32 %v983_v60, %v982_v22  ;;  %v801_v52 = vrot.slane %v800_v38, 4  ;;  %v796_v22 = vrot.slane %v795_v27, 2  ;;  %v1008_v60 = vsel %vm652_vm1, %v851_v49, 0.0 }
  0xe8   :  { %v624_v47 = vpop.f32.mrf.mxu2 }
  0xe9   :  { %v637_v54 = vpop.f32.mrf.mxu3  ;;  %v783_v47 = vadd.f32 %v782_v13, %v781_v40  ;;  %v789_v40 = vrot.slane %v788_v44, 2  ;;  %v985_v62 = vrot.slane %v984_v21, 1  ;;  %v802_v46 = vadd.f32 %v801_v52, %v800_v38 }
  0xea   :  { %v2559_v54 = vadd.f32 %v777_v43, %v776_v18  ;;  %v1002_v18 = vrot.slane %v1001_v39, 4  ;;  %v807_v13 = vsel %vm652_vm1, %v2525_v6, 0.0  ;;  %v991_v43 = vadd.f32 %v990_v41, %v989_v14 }
  0xeb   :  { %v784_v37 = vrot.slane %v783_v47, 1  ;;  %v790_v32 = vadd.f32 %v789_v40, %v788_v44  ;;  %v2579_v12 = vadd.f32 %v985_v62, %v984_v21  ;;  %v797_v45 = vadd.f32 %v796_v22, %v795_v27 }
  0xec   :  { %v814_v38 = vsel %vm652_vm1, %v2527_v0, 0.0  ;;  %v808_v50 = vrot.slane %v807_v13, 4  ;;  %v852_v21 = vmul.f32 %v2527_v0, %v2527_v0  ;;  %v992_v27 = vrot.slane %v991_v43, 1 }
  0xed   :  { %v2574_v36 = vadd.f32 %v784_v37, %v783_v47  ;;  %v791_v14 = vrot.slane %v790_v32, 1  ;;  %v1009_v47 = vrot.slane %v1008_v60, 4  ;;  %v815_v30 = vrot.slane %v814_v38, 4 }
  0xee   :  { %1222 = vrot.lane.b32.xlu2 %v2552_v7, %s1888_s21  ;;  %1227 = vrot.lane.b32.xlu0 %v2555_v16, %s1888_s21  ;;  %v1003_v16 = vadd.f32 %v1002_v18, %v1001_v39  ;;  %v803_v39 = vrot.slane %v802_v46, 2  ;;  %v798_v35 = vrot.slane %v797_v45, 1  ;;  %v809_v52 = vadd.f32 %v808_v50, %v807_v13 }
  0xef   :  { %1234 = vrot.lane.b32.xlu1 %v2559_v54, %s1888_s21  ;;  %3131 = vst [vmem:[#allocation29_spill] sm:$0xff] %v2574_v36  ;;  %v2591_v37 = vadd.f32 %v791_v14, %v790_v32  ;;  %v998_v41 = vadd.f32 %v997_v2, %v996_v23  ;;  %v1015_v18 = vsel %vm652_vm1, %v852_v21, 0.0  ;;  %v2594_v49 = vadd.f32 %v992_v27, %v991_v43 }
  0xf0   :  { %v1004_v40 = vrot.slane %v1003_v16, 2  ;;  %v804_v62 = vadd.f32 %v803_v39, %v802_v46  ;;  %v1010_v22 = vadd.f32 %v1009_v47, %v1008_v60  ;;  %v816_v6 = vadd.f32 %v815_v30, %v814_v38 }
  0xf1   :  { %v2598_v0 = vadd.f32 %v798_v35, %v797_v45  ;;  %v1016_v13 = vrot.slane %v1015_v18, 4  ;;  %v999_v23 = vrot.slane %v998_v41, 1  ;;  %v810_v43 = vrot.slane %v809_v52, 2 }
  0xf2   :  { %v805_v50 = vrot.slane %v804_v62, 1  ;;  %v1011_v46 = vrot.slane %v1010_v22, 2  ;;  %v817_v38 = vrot.slane %v816_v6, 2 }
  0xf3   :  { %v2604_v14 = vadd.f32 %v999_v23, %v998_v41  ;;  %v811_v2 = vadd.f32 %v810_v43, %v809_v52  ;;  %v1017_v45 = vadd.f32 %v1016_v13, %v1015_v18 }
  0xf4   :  { %v2606_v47 = vadd.f32 %v805_v50, %v804_v62  ;;  %v818_v27 = vadd.f32 %v817_v38, %v816_v6 }
  0xf5   :  { %v812_v30 = vrot.slane %v811_v2, 1  ;;  %v1018_v35 = vrot.slane %v1017_v45, 2 }
  0xf6   :  { %1239 = vrot.lane.b32.xlu2 %v2570_v4, %s1888_s21  ;;  %1246 = vrot.lane.b32.xlu0 %v2574_v36, %s1888_s21  ;;  %v1005_v36 = vadd.f32 %v1004_v40, %v1003_v16  ;;  %v1012_v16 = vadd.f32 %v1011_v46, %v1010_v22  ;;  %v819_v62 = vrot.slane %v818_v27, 1 }
  0xf7   :  { %1251 = vrot.lane.b32.xlu1 %v2579_v12, %s1888_s21  ;;  %v1019_v6 = vadd.f32 %v1018_v35, %v1017_v45 }
  0xf8   :  { %v2585_v44 = vpop.permute.xlu2 %1054  ;;  %v1006_v60 = vrot.slane %v1005_v36, 1  ;;  %v1013_v52 = vrot.slane %v1012_v16, 1  ;;  %v2624_v43 = vadd.f32 %v819_v62, %v818_v27 }
  0xfa   :  { %v2610_v21 = vadd.f32 %v1006_v60, %v1005_v36  ;;  %v2618_v36 = vadd.f32 %v812_v30, %v811_v2  ;;  %v2620_v13 = vadd.f32 %v1013_v52, %v1012_v16 }
  0xfe   :  { %1258 = vrot.lane.b32.xlu2 %v2591_v37, %s1888_s21  ;;  %1263 = vrot.lane.b32.xlu0 %v2594_v49, %s1888_s21 }
  0xff   :  { %1270 = vrot.lane.b32.xlu1 %v2598_v0, %s1888_s21 }
 0x100   :  { %v1060_v32 = vpop.permute.xlu2 %1059 }
 0x106   :  { %1275 = vrot.lane.b32.xlu2 %v2604_v14, %s1888_s21  ;;  %1282 = vrot.lane.b32.xlu0 %v2606_v47, %s1888_s21 }
 0x107   :  { %1287 = vrot.lane.b32.xlu1 %v2610_v21, %s1888_s21 }
 0x108   :  { %v1079_v39 = vpop.permute.xlu2 %1078  ;;  %v1031_v40 = vpop.permute.xlu0 %1030 }
 0x109   :  { %v1043_v41 = vpop.permute.xlu1 %1042  ;;  %v1033_v18 = vadd.f32 %v1031_v40, %v2284_v59  ;;  %v1020_v59 = vrot.slane %v1019_v6, 1 }
 0x10b   :  { %v1039_v22 = vadd.f32 %v1033_v18, %v2286_v61  ;;  %v2633_v45 = vadd.f32 %v1020_v59, %v1019_v6 }
 0x10d   :  { %v1045_v23 = vadd.f32 %v1043_v41, %v1039_v22 }
 0x10e   :  { %1294 = vrot.lane.b32.xlu2 %v2618_v36, %s1888_s21  ;;  %1299 = vrot.lane.b32.xlu0 %v2620_v13, %s1888_s21 }
 0x10f   :  { %1306 = vrot.lane.b32.xlu1 %v2624_v43, %s1888_s21  ;;  %v1051_v61 = vadd.f32 %v1045_v23, %v2305_v24 }
 0x110   :  { %v1096_v50 = vpop.permute.xlu2 %1095  ;;  %v1036_v46 = vpop.permute.xlu0 %1035 }
 0x111   :  { %v1048_v60 = vpop.permute.xlu1 %1047  ;;  %v1038_v38 = vadd.f32 %v1036_v46, %v2308_v29  ;;  %v1057_v16 = vadd.f32 %v2585_v44, %v1051_v61 }
 0x113   :  { %v1040_v2 = vadd.f32 %v1038_v38, %v2312_v31  ;;  %v1063_v40 = vadd.f32 %v1057_v16, %v2333_v58 }
 0x115   :  { %v1050_v27 = vadd.f32 %v1048_v60, %v1040_v2 }
 0x116   :  { %1311 = vrot.lane.b32.xlu2 %v2633_v45, %s1888_s21 }
 0x117   :  { %v1052_v35 = vadd.f32 %v1050_v27, %v2329_v53 }
 0x118   :  { %v1115_v30 = vpop.permute.xlu2 %1114  ;;  %v1067_v24 = vpop.permute.xlu0 %1066 }
 0x119   :  { %v1072_v52 = vpop.permute.xlu1 %1071  ;;  %v1062_v41 = vadd.f32 %v1060_v32, %v1052_v35  ;;  %v1069_v18 = vadd.f32 %v1067_v24, %v1063_v40 }
 0x11b   :  { %v1064_v29 = vadd.f32 %v1062_v41, %v2338_v63  ;;  %v1075_v31 = vadd.f32 %v1069_v18, %v2354_v25 }
 0x11d   :  { %v1074_v62 = vadd.f32 %v1072_v52, %v1064_v29  ;;  %v1081_v22 = vadd.f32 %v1079_v39, %v1075_v31 }
 0x11f   :  { %v1087_v44 = vadd.f32 %v1081_v22, %v2361_v34  ;;  %v1076_v6 = vadd.f32 %v1074_v62, %v2357_v28 }
 0x120   :  { %v1132_v23 = vpop.permute.xlu2 %1131  ;;  %v1084_v59 = vpop.permute.xlu0 %1083 }
 0x121   :  { %v1091_v61 = vpop.permute.xlu1 %1090  ;;  %v1086_v53 = vadd.f32 %v1084_v59, %v1076_v6 }
 0x122   :  { %v1093_v46 = vadd.f32 %v1091_v61, %v1087_v44 }
 0x123   :  { %v1088_v58 = vadd.f32 %v1086_v53, %v2376_v57 }
 0x124   :  { %v1099_v63 = vadd.f32 %v1093_v46, %v2381_v3 }
 0x125   :  { %v1098_v60 = vadd.f32 %v1096_v50, %v1088_v58 }
 0x127   :  { %v1100_v32 = vadd.f32 %v1098_v60, %v2385_v5 }
 0x128   :  { %v1103_v38 = vpop.permute.xlu0 %1102  ;;  %v1151_v39 = vpop.permute.xlu2 %1150 }
 0x129   :  { %v1108_v25 = vpop.permute.xlu1 %1107  ;;  %v1105_v2 = vadd.f32 %v1103_v38, %v1099_v63 }
 0x12a   :  { %v1110_v16 = vadd.f32 %v1108_v25, %v1100_v32 }
 0x12b   :  { %v1111_v34 = vadd.f32 %v1105_v2, %v2402_v42 }
 0x12c   :  { %v1112_v27 = vadd.f32 %v1110_v16, %v2404_v48 }
 0x12d   :  { %v1117_v28 = vadd.f32 %v1115_v30, %v1111_v34  ;;  %v3132_v34 = vld [vmem:[#allocation27_spill] sm:$0xff] }
 0x12f   :  { %v1123_v35 = vadd.f32 %v1117_v28, %v2408_v51 }
 0x130   :  { %v1120_v40 = vpop.permute.xlu0 %1119  ;;  %v1168_v52 = vpop.permute.xlu2 %1167 }
 0x131   :  { %v1122_v24 = vadd.f32 %v1120_v40, %v1112_v27  ;;  %v1127_v57 = vpop.permute.xlu1 %1126  ;;  %v3133_v27 = vld [vmem:[#allocation26_spill] sm:$0xff] }
 0x132   :  { %v1129_v5 = vadd.f32 %v1127_v57, %v1123_v35 }
 0x133   :  { %v1124_v50 = vadd.f32 %v1122_v24, %v2423_v20 }
 0x134   :  { %v1135_v41 = vadd.f32 %v1129_v5, %v2428_v33 }
 0x135   :  { %v1134_v3 = vadd.f32 %v1132_v23, %v1124_v50 }
 0x137   :  { %v1136_v18 = vadd.f32 %v1134_v3, %v2432_v11  ;;  %v3134_v3 = vld [vmem:[#allocation28_spill] sm:$0xff] }
 0x138   :  { %v1139_v29 = vpop.permute.xlu0 %1138  ;;  %v1187_v51 = vpop.permute.xlu2 %1186 }
 0x139   :  { %v1141_v31 = vadd.f32 %v1139_v29, %v1135_v41  ;;  %v1144_v42 = vpop.permute.xlu1 %1143 }
 0x13a   :  { %v1146_v48 = vadd.f32 %v1144_v42, %v1136_v18 }
 0x13b   :  { %v1147_v30 = vadd.f32 %v1141_v31, %v2452_v15 }
 0x13c   :  { %v1148_v22 = vadd.f32 %v1146_v48, %v2456_v26 }
 0x13d   :  { %v1153_v62 = vadd.f32 %v1151_v39, %v1147_v30 }
 0x13f   :  { %v1159_v44 = vadd.f32 %v1153_v62, %v2463_v17 }
 0x140   :  { %v1156_v20 = vpop.permute.xlu0 %1155  ;;  %v1204_v46 = vpop.permute.xlu2 %1203 }
 0x141   :  { %v1158_v6 = vadd.f32 %v1156_v20, %v1148_v22  ;;  %v1163_v59 = vpop.permute.xlu1 %1162  ;;  %v3135_v22 = vld [vmem:[#allocation29_spill] sm:$0xff] }
 0x142   :  { %v1165_v33 = vadd.f32 %v1163_v59, %v1159_v44  ;;  %v1889_v59 = vmov 98.0  }
 0x143   :  { %v1160_v23 = vadd.f32 %v1158_v6, %v2482_v9  ;;  %1884 = vrcp.f32 %v1889_v59 }
 0x144   :  { %v1171_v53 = vadd.f32 %v1165_v33, %v2486_v8 }
 0x145   :  { %v1170_v61 = vadd.f32 %v1168_v52, %v1160_v23 }
 0x147   :  { %v1172_v11 = vadd.f32 %v1170_v61, %v2484_v10 }
 0x148   :  { %v1175_v15 = vpop.permute.xlu0 %1174  ;;  %v1223_v39 = vpop.permute.xlu2 %1222 }
 0x149   :  { %v1180_v58 = vpop.permute.xlu1 %1179  ;;  %v1177_v60 = vadd.f32 %v1175_v15, %v1171_v53  ;;  %v1885_v15 = vpop.eup %1884 }
 0x14a   :  { %v1182_v32 = vadd.f32 %v1180_v58, %v1172_v11  ;;  %vm1322_vm3 = vweird.f32 %v1885_v15 }
 0x14b   :  { %v1183_v26 = vadd.f32 %v1177_v60, %v2509_v56 }
 0x14c   :  { %v1184_v38 = vadd.f32 %v1182_v32, %v2512_v55 }
 0x14d   :  { %v1189_v63 = vadd.f32 %v1187_v51, %v1183_v26  ;;  %v2665_v40 = vpop.f32.mrf.mxu0 }
 0x14f   :  { %v1195_v17 = vadd.f32 %v1189_v63, %v2516_v1 }
 0x150   :  { %v1192_v25 = vpop.permute.xlu0 %1191  ;;  %v1240_v50 = vpop.permute.xlu2 %1239 }
 0x151   :  { %v1199_v9 = vpop.permute.xlu1 %1198  ;;  %v1194_v2 = vadd.f32 %v1192_v25, %v1184_v38 }
 0x152   :  { %v1201_v16 = vadd.f32 %v1199_v9, %v1195_v17 }
 0x153   :  { %v1196_v10 = vadd.f32 %v1194_v2, %v2531_v19 }
 0x154   :  { %v1207_v35 = vadd.f32 %v1201_v16, %v3133_v27 }
 0x155   :  { %v1206_v8 = vadd.f32 %v1204_v46, %v1196_v10  ;;  %v650_v19 = vpop.f32.mrf.mxu0 }
 0x157   :  { %v1208_v28 = vadd.f32 %v1206_v8, %v3132_v34 }
 0x158   :  { %v1211_v56 = vpop.permute.xlu0 %1210  ;;  %v1259_v62 = vpop.permute.xlu2 %1258 }
 0x159   :  { %v1216_v24 = vpop.permute.xlu1 %1215  ;;  %v1213_v57 = vadd.f32 %v1211_v56, %v1207_v35 }
 0x15a   :  { %v1218_v1 = vadd.f32 %v1216_v24, %v1208_v28 }
 0x15b   :  { %v1219_v55 = vadd.f32 %v1213_v57, %v2552_v7 }
 0x15c   :  { %v1220_v41 = vadd.f32 %v1218_v1, %v3134_v3 }
 0x15d   :  { %v1225_v5 = vadd.f32 %v1223_v39, %v1219_v55 }
 0x15f   :  { %v1231_v52 = vadd.f32 %v1225_v5, %v2559_v54  ;;  %v853_v54 = vmul.f32 %v2665_v40, %v2665_v40 }
 0x160   :  { %v1228_v18 = vpop.permute.xlu0 %1227  ;;  %v1276_v58 = vpop.permute.xlu2 %1275 }
 0x161   :  { %v1235_v29 = vpop.permute.xlu1 %1234  ;;  %v1230_v31 = vadd.f32 %v1228_v18, %v1220_v41  ;;  %v1022_v53 = vsel %vm821_vm2, %v853_v54, 0.0 }
 0x162   :  { %v1237_v42 = vadd.f32 %v1235_v29, %v1231_v52  ;;  %v1023_v32 = vrot.slane %v1022_v53, 4 }
 0x163   :  { %v1232_v30 = vadd.f32 %v1230_v31, %v2570_v4  ;;  %v822_v4 = vsel %vm821_vm2, %v2665_v40, 0.0 }
 0x164   :  { %v1243_v44 = vadd.f32 %v1237_v42, %v3135_v22  ;;  %v823_v11 = vrot.slane %v822_v4, 4  ;;  %v1024_v9 = vadd.f32 %v1023_v32, %v1022_v53  ;;  %v3137_v32 = vld [vmem:[#allocation3_spill] sm:$0xff] }
 0x165   :  { %v1242_v48 = vadd.f32 %v1240_v50, %v1232_v30 }
 0x166   :  { %v824_v17 = vadd.f32 %v823_v11, %v822_v4  ;;  %v1025_v8 = vrot.slane %v1024_v9, 2 }
 0x167   :  { %v1244_v51 = vadd.f32 %v1242_v48, %v2579_v12 }
 0x168   :  { %v1247_v7 = vpop.permute.xlu0 %1246  ;;  %v825_v39 = vrot.slane %v824_v17, 2  ;;  %v1295_v27 = vpop.permute.xlu2 %1294  ;;  %v1026_v57 = vadd.f32 %v1025_v8, %v1024_v9  ;;  %v3144_v8 = vld [vmem:[#allocation10_spill] sm:$0xff] }
 0x169   :  { %v1252_v20 = vpop.permute.xlu1 %1251  ;;  %v1249_v6 = vadd.f32 %v1247_v7, %v1243_v44 }
 0x16a   :  { %v1254_v23 = vadd.f32 %v1252_v20, %v1244_v51  ;;  %v826_v35 = vadd.f32 %v825_v39, %v824_v17  ;;  %v1027_v52 = vrot.slane %v1026_v57, 1 }
 0x16b   :  { %v1255_v33 = vadd.f32 %v1249_v6, %v2591_v37  ;;  %v1318_v37 = vmul.f32 98.0, %v1885_v15 }
 0x16c   :  { %v1256_v12 = vadd.f32 %v1254_v23, %v2594_v49  ;;  %v827_v55 = vrot.slane %v826_v35, 1  ;;  %v1028_v30 = vadd.f32 %v1027_v52, %v1026_v57  ;;  %v3151_v52 = vld [vmem:[#allocation17_spill] sm:$0xff] }
 0x16d   :  { %v1261_v61 = vadd.f32 %v1259_v62, %v1255_v33  ;;  %v1319_v10 = vsub.f32 1.0, %v1318_v37  ;;  %v3140_v37 = vld [vmem:[#allocation6_spill] sm:$0xff] }
 0x16e   :  { %v828_v19 = vadd.f32 %v827_v55, %v826_v35  ;;  %v3146_v35 = vld [vmem:[#allocation12_spill] sm:$0xff] }
 0x16f   :  { %v1267_v46 = vadd.f32 %v1261_v61, %v2598_v0  ;;  %v1341_v61 = vld [vmem:[%s3050_s3] sm:$0x1] }
 0x170   :  { %v1264_v60 = vpop.permute.xlu0 %1263  ;;  %v1312_v31 = vpop.permute.xlu2 %1311 }
 0x171   :  { %v1266_v26 = vadd.f32 %v1264_v60, %v1256_v12  ;;  %v1271_v63 = vpop.permute.xlu1 %1270 }
 0x172   :  { %v1273_v25 = vadd.f32 %v1271_v63, %v1267_v46  ;;  %v3138_v63 = vld [vmem:[#allocation4_spill] sm:$0xff] }
 0x173   :  { %v1268_v38 = vadd.f32 %v1266_v26, %v2604_v14  ;;  %v1320_v14 = vmul.f32 %v1885_v15, %v1319_v10  ;;  %v3143_v10 = vld [vmem:[#allocation9_spill] sm:$0xff] }
 0x174   :  { %v1279_v16 = vadd.f32 %v1273_v25, %v2606_v47 }
 0x175   :  { %v1278_v2 = vadd.f32 %v1276_v58, %v1268_v38  ;;  %v1321_v5 = vadd.f32 %v1885_v15, %v1320_v14  ;;  %v3136_v58 = vld [vmem:[#allocation2_spill] sm:$0xff]  ;;  %v3139_v38 = vld [vmem:[#allocation5_spill] sm:$0xff] }
 0x177   :  { %v1280_v49 = vadd.f32 %v1278_v2, %v2610_v21 }
 0x178   :  { %v1283_v0 = vpop.permute.xlu0 %1282 }
 0x179   :  { %v1285_v34 = vadd.f32 %v1283_v0, %v1279_v16  ;;  %v1288_v28 = vpop.permute.xlu1 %1287  ;;  %v3142_v16 = vld [vmem:[#allocation8_spill] sm:$0xff] }
 0x17a   :  { %v1290_v24 = vadd.f32 %v1288_v28, %v1280_v49  ;;  %v3145_v28 = vld [vmem:[#allocation11_spill] sm:$0xff] }
 0x17b   :  { %v1291_v56 = vadd.f32 %v1285_v34, %v2618_v36  ;;  %v1323_v36 = vsel %vm1322_vm3, %v1885_v15, %v1321_v5 }
 0x17c   :  { %v1292_v50 = vadd.f32 %v1290_v24, %v2620_v13  ;;  %v3147_v24 = vld [vmem:[#allocation13_spill] sm:$0xff] }
 0x17d   :  { %v1297_v1 = vadd.f32 %v1295_v27, %v1291_v56 }
 0x17f   :  { %v1303_v47 = vadd.f32 %v1297_v1, %v2624_v43  ;;  %v3148_v1 = vld [vmem:[#allocation14_spill] sm:$0xff] }
 0x180   :  { %v1300_v21 = vpop.permute.xlu0 %1299 }
 0x181   :  { %v1302_v3 = vadd.f32 %v1300_v21, %v1292_v50  ;;  %v1307_v41 = vpop.permute.xlu1 %1306  ;;  %v3149_v50 = vld [vmem:[#allocation15_spill] sm:$0xff] }
 0x182   :  { %v1309_v18 = vadd.f32 %v1307_v41, %v1303_v47  ;;  %v3150_v47 = vld [vmem:[#allocation16_spill] sm:$0xff] }
 0x183   :  { %v1304_v29 = vadd.f32 %v1302_v3, %v2633_v45  ;;  %v1328_v45 = vld [vmem:[%s3049_s2] sm:$0x1] }
 0x184   :  { %v1315_v42 = vadd.f32 %v1309_v18, %v828_v19 }
 0x185   :  { %v1314_v48 = vadd.f32 %v1312_v31, %v1304_v29 }
 0x186   :  { %v1324_v62 = vmul.f32 %v1323_v36, %v1315_v42 }
 0x187   :  { %v1316_v51 = vadd.f32 %v1314_v48, %v1028_v30 }
 0x188   :  { %v1326_v22 = vmul.f32 %v1324_v62, %v1324_v62 }
 0x189   :  { %v1325_v13 = vmul.f32 %v1323_v36, %v1316_v51 }
 0x18b   :  { %v1327_v44 = vsub.f32 %v1325_v13, %v1326_v22 }
 0x18d   :  { %v1329_v43 = vadd.f32 1e-05, %v1327_v44 }
 0x18f   :  { %1886 = vrsqrt.f32 %v1329_v43  ;;  %vm1336_vm5 = vweird.f32 %v1329_v43 }
 0x195   :  { %v1887_v7 = vpop.eup %1886 }
 0x196   :  { %v1331_v20 = vmul.f32 %v1887_v7, %v1329_v43  ;;  %vm1337_vm4 = vweird.f32 %v1887_v7 }
 0x197   :  { %vm1338_vm6 = vmor %vm1336_vm5, %vm1337_vm4 }
 0x198   :  { %v1332_v6 = vmul.f32 %v1887_v7, %v1331_v20 }
 0x19a   :  { %v1333_v54 = vmul.f32 0.5, %v1332_v6 }
 0x19c   :  { %v1334_v59 = vsub.f32 1.5, %v1333_v54 }
 0x19e   :  { %v1335_v23 = vmul.f32 %v1887_v7, %v1334_v59  ;;  %v3152_v59 = vld [vmem:[#allocation18_spill] sm:$0xff] }
 0x1a0   :  { %v1339_v33 = vsel %vm1338_vm6, %v1887_v7, %v1335_v23 }
 0x1a1   :  { %v1340_v4 = vmul.f32 %v1339_v33, %v1328_v45 }
 0x1a3   :  { %v1342_v11 = vmul.f32 %v1340_v4, %v1324_v62  ;;  %v2692_v53 = vperm.slane %v1340_v4, 0 }
 0x1a5   :  { %v1343_v12 = vsub.f32 %v1341_v61, %v1342_v11  ;;  %1356 = vrot.lane.b32.xlu0 %v2692_v53, %s1888_s21  ;;  %v1598_v15 = vmul.f32 %v2692_v53, %v2665_v40  ;;  %v1347_v60 = vmul.f32 %v2692_v53, %v3136_v58  ;;  %v1368_v26 = vmul.f32 %v2692_v53, %v3137_v32  ;;  %v3141_v40 = vld [vmem:[#allocation7_spill] sm:$0xff] }
 0x1a6   :  { %v1378_v17 = vmul.f32 %v2692_v53, %v3138_v63  ;;  %v1388_v25 = vmul.f32 %v2692_v53, %v3139_v38  ;;  %v1398_v9 = vmul.f32 %v2692_v53, %v3140_v37  ;;  %v1408_v39 = vmul.f32 %v2692_v53, %v3141_v40 }
 0x1a7   :  { %v2696_v46 = vperm.slane %v1343_v12, 0  ;;  %v1418_v49 = vmul.f32 %v2692_v53, %v3142_v16  ;;  %v1428_v0 = vmul.f32 %v2692_v53, %v3143_v10  ;;  %v1438_v34 = vmul.f32 %v2692_v53, %v3144_v8 }
 0x1a8   :  { %v1448_v27 = vmul.f32 %v2692_v53, %v3145_v28  ;;  %v1458_v56 = vmul.f32 %v2692_v53, %v3146_v35  ;;  %v1468_v14 = vmul.f32 %v2692_v53, %v3147_v24  ;;  %v1478_v55 = vmul.f32 %v2692_v53, %v3148_v1 }
 0x1a9   :  { %v1599_v2 = vadd.f32 %v1598_v15, %v2696_v46  ;;  %1360 = vrot.lane.b32.xlu1 %v2696_v46, %s1888_s21  ;;  %v1488_v5 = vmul.f32 %v2692_v53, %v3149_v50  ;;  %v1498_v21 = vmul.f32 %v2692_v53, %v3150_v47  ;;  %v1508_v3 = vmul.f32 %v2692_v53, %v3151_v52 }
 0x1aa   :  { %v1351_v41 = vadd.f32 %v2696_v46, %v1347_v60  ;;  %v1369_v19 = vadd.f32 %v1368_v26, %v2696_v46  ;;  %v1379_v18 = vadd.f32 %v1378_v17, %v2696_v46  ;;  %v1389_v36 = vadd.f32 %v1388_v25, %v2696_v46 }
 0x1ab   :  { %v1600_v57 = vmax.f32 %v1599_v2, 0.0  ;;  %v1399_v31 = vadd.f32 %v1398_v9, %v2696_v46  ;;  %v1409_v42 = vadd.f32 %v1408_v39, %v2696_v46  ;;  %v1419_v51 = vadd.f32 %v1418_v49, %v2696_v46 }
 0x1ac   :  { %v1352_v30 = vmax.f32 %v1351_v41, 0.0  ;;  %v1370_v48 = vmax.f32 %v1369_v19, 0.0  ;;  %v1380_v62 = vmax.f32 %v1379_v18, 0.0  ;;  %v1390_v13 = vmax.f32 %v1389_v36, 0.0  ;;  %v3156_v18 = vld [vmem:[#allocation22_spill] sm:$0xff] }
 0x1ad   :  { %v1601_v29 = vpack.c.bf16 %v1600_v57, %v1600_v57  ;;  %v1400_v22 = vmax.f32 %v1399_v31, 0.0  ;;  %v1410_v44 = vmax.f32 %v1409_v42, 0.0  ;;  %v1429_v43 = vadd.f32 %v1428_v0, %v2696_v46  ;;  %v3153_v0 = vld [vmem:[#allocation19_spill] sm:$0xff]  ;;  %v3154_v57 = vld [vmem:[#allocation20_spill] sm:$0xff] }
 0x1ae   :  { %v1353_v7 = vpack.c.bf16 %v1352_v30, %v1352_v30  ;;  %v1371_v20 = vpack.c.bf16 %v1370_v48, %v1370_v48  ;;  %v1381_v6 = vpack.c.bf16 %v1380_v62, %v1380_v62  ;;  %v1420_v54 = vmax.f32 %v1419_v51, 0.0  ;;  %v3157_v51 = vld [vmem:[#allocation23_spill] sm:$0xff] }
 0x1af   :  { %1602 = vst.msk [vmem:[%s3051_s4 + $0x18] sm:$0x1] %vm1354_vm7, %v1601_v29  ;;  %v1518_v45 = vmul.f32 %v2692_v53, %v3152_v59  ;;  %v1391_v23 = vpack.c.bf16 %v1390_v13, %v1390_v13  ;;  %v1401_v33 = vpack.c.bf16 %v1400_v22, %v1400_v22  ;;  %v1430_v4 = vmax.f32 %v1429_v43, 0.0 }
 0x1b0   :  { %1355 = vst.msk [vmem:[%s3051_s4] sm:$0x1] %vm1354_vm7, %v1353_v7  ;;  %v1411_v61 = vpack.c.bf16 %v1410_v44, %v1410_v44  ;;  %v1439_v11 = vadd.f32 %v1438_v34, %v2696_v46  ;;  %v1449_v12 = vadd.f32 %v1448_v27, %v2696_v46  ;;  %v1459_v15 = vadd.f32 %v1458_v56, %v2696_v46  ;;  %v3158_v7 = vld [vmem:[#allocation24_spill] sm:$0xff] }
 0x1b1   :  { %1372 = vst.msk [vmem:[%s3051_s4 + $0x1] sm:$0x1] %vm1354_vm7, %v1371_v20  ;;  %v1421_v60 = vpack.c.bf16 %v1420_v54, %v1420_v54  ;;  %v1469_v26 = vadd.f32 %v1468_v14, %v2696_v46  ;;  %v1479_v17 = vadd.f32 %v1478_v55, %v2696_v46  ;;  %v1489_v25 = vadd.f32 %v1488_v5, %v2696_v46  ;;  %v3155_v5 = vld [vmem:[#allocation21_spill] sm:$0xff] }
 0x1b2   :  { %1382 = vst.msk [vmem:[%s3051_s4 + $0x2] sm:$0x1] %vm1354_vm7, %v1381_v6  ;;  %v1440_v9 = vmax.f32 %v1439_v11, 0.0  ;;  %v1450_v2 = vmax.f32 %v1449_v12, 0.0  ;;  %v1460_v39 = vmax.f32 %v1459_v15, 0.0  ;;  %v1499_v49 = vadd.f32 %v1498_v21, %v2696_v46 }
 0x1b3   :  { %v1528_v34 = vmul.f32 %v2692_v53, %v3153_v0  ;;  %1392 = vst.msk [vmem:[%s3051_s4 + $0x3] sm:$0x1] %vm1354_vm7, %v1391_v23  ;;  %v1431_v27 = vpack.c.bf16 %v1430_v4, %v1430_v4  ;;  %v1470_v56 = vmax.f32 %v1469_v26, 0.0  ;;  %v1509_v14 = vadd.f32 %v1508_v3, %v2696_v46  ;;  %v3159_v23 = vld [vmem:[#allocation25_spill] sm:$0xff] }
 0x1b4   :  { %v1538_v55 = vmul.f32 %v2692_v53, %v3154_v57  ;;  %v1548_v41 = vmul.f32 %v2692_v53, %v3155_v5  ;;  %1402 = vst.msk [vmem:[%s3051_s4 + $0x4] sm:$0x1] %vm1354_vm7, %v1401_v33  ;;  %v1441_v21 = vpack.c.bf16 %v1440_v9, %v1440_v9  ;;  %v1480_v19 = vmax.f32 %v1479_v17, 0.0 }
 0x1b5   :  { %v1558_v29 = vmul.f32 %v2692_v53, %v3156_v18  ;;  %1412 = vst.msk [vmem:[%s3051_s4 + $0x5] sm:$0x1] %vm1354_vm7, %v1411_v61  ;;  %v1451_v3 = vpack.c.bf16 %v1450_v2, %v1450_v2  ;;  %v1461_v36 = vpack.c.bf16 %v1460_v39, %v1460_v39  ;;  %v1490_v31 = vmax.f32 %v1489_v25, 0.0 }
 0x1b6   :  { %1422 = vst.msk [vmem:[%s3051_s4 + $0x6] sm:$0x1] %vm1354_vm7, %v1421_v60  ;;  %v1500_v42 = vmax.f32 %v1499_v49, 0.0  ;;  %v1519_v30 = vadd.f32 %v1518_v45, %v2696_v46  ;;  %v1529_v48 = vadd.f32 %v1528_v34, %v2696_v46  ;;  %v1539_v62 = vadd.f32 %v1538_v55, %v2696_v46 }
 0x1b7   :  { %v1568_v13 = vmul.f32 %v2692_v53, %v3157_v51  ;;  %1432 = vst.msk [vmem:[%s3051_s4 + $0x7] sm:$0x1] %vm1354_vm7, %v1431_v27  ;;  %v1471_v22 = vpack.c.bf16 %v1470_v56, %v1470_v56  ;;  %v1510_v44 = vmax.f32 %v1509_v14, 0.0  ;;  %v1549_v43 = vadd.f32 %v1548_v41, %v2696_v46 }
 0x1b8   :  { %v1578_v20 = vmul.f32 %v2692_v53, %v3158_v7  ;;  %1442 = vst.msk [vmem:[%s3051_s4 + $0x8] sm:$0x1] %vm1354_vm7, %v1441_v21  ;;  %v1481_v6 = vpack.c.bf16 %v1480_v19, %v1480_v19  ;;  %v1520_v54 = vmax.f32 %v1519_v30, 0.0  ;;  %v1559_v45 = vadd.f32 %v1558_v29, %v2696_v46 }
 0x1b9   :  { %v1588_v33 = vmul.f32 %v2692_v53, %v3159_v23  ;;  %1452 = vst.msk [vmem:[%s3051_s4 + $0x9] sm:$0x1] %vm1354_vm7, %v1451_v3  ;;  %v1491_v4 = vpack.c.bf16 %v1490_v31, %v1490_v31  ;;  %v1530_v61 = vmax.f32 %v1529_v48, 0.0  ;;  %v1569_v11 = vadd.f32 %v1568_v13, %v2696_v46 }
 0x1ba   :  { %1462 = vst.msk [vmem:[%s3051_s4 + $0xa] sm:$0x1] %vm1354_vm7, %v1461_v36  ;;  %v1501_v12 = vpack.c.bf16 %v1500_v42, %v1500_v42  ;;  %v1540_v15 = vmax.f32 %v1539_v62, 0.0  ;;  %v1579_v60 = vadd.f32 %v1578_v20, %v2696_v46  ;;  %v1511_v53 = vpack.c.bf16 %v1510_v44, %v1510_v44 }
 0x1bb   :  { %1472 = vst.msk [vmem:[%s3051_s4 + $0xb] sm:$0x1] %vm1354_vm7, %v1471_v22  ;;  %v1550_v26 = vmax.f32 %v1549_v43, 0.0  ;;  %v1589_v17 = vadd.f32 %v1588_v33, %v2696_v46  ;;  %v1521_v25 = vpack.c.bf16 %v1520_v54, %v1520_v54  ;;  %v1560_v9 = vmax.f32 %v1559_v45, 0.0 }
 0x1bc   :  { %1482 = vst.msk [vmem:[%s3051_s4 + $0xc] sm:$0x1] %vm1354_vm7, %v1481_v6  ;;  %v1531_v2 = vpack.c.bf16 %v1530_v61, %v1530_v61  ;;  %v1570_v39 = vmax.f32 %v1569_v11, 0.0  ;;  %v1541_v46 = vpack.c.bf16 %v1540_v15, %v1540_v15  ;;  %v1580_v49 = vmax.f32 %v1579_v60, 0.0 }
 0x1bd   :  { %1492 = vst.msk [vmem:[%s3051_s4 + $0xd] sm:$0x1] %vm1354_vm7, %v1491_v4  ;;  %v1551_v34 = vpack.c.bf16 %v1550_v26, %v1550_v26  ;;  %v1590_v27 = vmax.f32 %v1589_v17, 0.0  ;;  %v1561_v56 = vpack.c.bf16 %v1560_v9, %v1560_v9 }
 0x1be   :  { %1502 = vst.msk [vmem:[%s3051_s4 + $0xe] sm:$0x1] %vm1354_vm7, %v1501_v12  ;;  %v1571_v14 = vpack.c.bf16 %v1570_v39, %v1570_v39  ;;  %v1581_v55 = vpack.c.bf16 %v1580_v49, %v1580_v49 }
 0x1bf   :  { %1512 = vst.msk [vmem:[%s3051_s4 + $0xf] sm:$0x1] %vm1354_vm7, %v1511_v53  ;;  %v1591_v41 = vpack.c.bf16 %v1590_v27, %v1590_v27 }
 0x1c0   :  { %1522 = vst.msk [vmem:[%s3051_s4 + $0x10] sm:$0x1] %vm1354_vm7, %v1521_v25 }
 0x1c1   :  { %1532 = vst.msk [vmem:[%s3051_s4 + $0x11] sm:$0x1] %vm1354_vm7, %v1531_v2 }
 0x1c2   :  { %1542 = vst.msk [vmem:[%s3051_s4 + $0x12] sm:$0x1] %vm1354_vm7, %v1541_v46 }
 0x1c3   :  { %1552 = vst.msk [vmem:[%s3051_s4 + $0x13] sm:$0x1] %vm1354_vm7, %v1551_v34 }
 0x1c4   :  { %1562 = vst.msk [vmem:[%s3051_s4 + $0x14] sm:$0x1] %vm1354_vm7, %v1561_v56 }
 0x1c5   :  { %1572 = vst.msk [vmem:[%s3051_s4 + $0x15] sm:$0x1] %vm1354_vm7, %v1571_v14 }
 0x1c6   :  { %1582 = vst.msk [vmem:[%s3051_s4 + $0x16] sm:$0x1] %vm1354_vm7, %v1581_v55 }
 0x1c7   :  { %1592 = vst.msk [vmem:[%s3051_s4 + $0x17] sm:$0x1] %vm1354_vm7, %v1591_v41 }
 0x217   :  { %v2875_v21 = vpop.permute.xlu0 %1356 }
 0x218   :  { %v1359_v19 = vmul.f32 %v2875_v21, %v3136_v58  ;;  %v1373_v29 = vmul.f32 %v2875_v21, %v3137_v32  ;;  %v1383_v3 = vmul.f32 %v2875_v21, %v3138_v63  ;;  %v1393_v36 = vmul.f32 %v2875_v21, %v3139_v38 }
 0x219   :  { %v1403_v31 = vmul.f32 %v2875_v21, %v3140_v37  ;;  %v1413_v42 = vmul.f32 %v2875_v21, %v3141_v40  ;;  %v1423_v58 = vmul.f32 %v2875_v21, %v3142_v16  ;;  %v1433_v32 = vmul.f32 %v2875_v21, %v3143_v10 }
 0x21a   :  { %v1443_v63 = vmul.f32 %v2875_v21, %v3144_v8  ;;  %v1453_v38 = vmul.f32 %v2875_v21, %v3145_v28  ;;  %v1463_v37 = vmul.f32 %v2875_v21, %v3146_v35  ;;  %v1473_v40 = vmul.f32 %v2875_v21, %v3147_v24 }
 0x21b   :  { %v2889_v30 = vpop.permute.xlu1 %1360  ;;  %v1483_v48 = vmul.f32 %v2875_v21, %v3148_v1  ;;  %v1493_v16 = vmul.f32 %v2875_v21, %v3149_v50  ;;  %v1503_v20 = vmul.f32 %v2875_v21, %v3150_v47  ;;  %v1513_v6 = vmul.f32 %v2875_v21, %v3151_v52 }
 0x21c   :  { %v1363_v10 = vadd.f32 %v2889_v30, %v1359_v19  ;;  %v1374_v62 = vadd.f32 %v1373_v29, %v2889_v30  ;;  %v1384_v8 = vadd.f32 %v1383_v3, %v2889_v30  ;;  %v1394_v28 = vadd.f32 %v1393_v36, %v2889_v30 }
 0x21d   :  { %v1404_v13 = vadd.f32 %v1403_v31, %v2889_v30  ;;  %v1414_v35 = vadd.f32 %v1413_v42, %v2889_v30  ;;  %v1424_v24 = vadd.f32 %v1423_v58, %v2889_v30  ;;  %v1434_v22 = vadd.f32 %v1433_v32, %v2889_v30 }
 0x21e   :  { %v1364_v1 = vmax.f32 %v1363_v10, 0.0  ;;  %v1375_v44 = vmax.f32 %v1374_v62, 0.0  ;;  %v1385_v43 = vmax.f32 %v1384_v8, 0.0  ;;  %v1395_v50 = vmax.f32 %v1394_v28, 0.0 }
 0x21f   :  { %v1405_v54 = vmax.f32 %v1404_v13, 0.0  ;;  %v1415_v45 = vmax.f32 %v1414_v35, 0.0  ;;  %v1425_v11 = vmax.f32 %v1424_v24, 0.0  ;;  %v1523_v12 = vmul.f32 %v2875_v21, %v3152_v59 }
 0x220   :  { %v1365_v33 = vpack.c.bf16 %v1364_v1, %v1364_v1  ;;  %v1376_v4 = vpack.c.bf16 %v1375_v44, %v1375_v44  ;;  %v1386_v61 = vpack.c.bf16 %v1385_v43, %v1385_v43  ;;  %v1396_v15 = vpack.c.bf16 %v1395_v50, %v1395_v50 }
 0x221   :  { %v1406_v60 = vpack.c.bf16 %v1405_v54, %v1405_v54  ;;  %v1435_v53 = vmax.f32 %v1434_v22, 0.0  ;;  %v1444_v47 = vadd.f32 %v1443_v63, %v2889_v30  ;;  %v1454_v52 = vadd.f32 %v1453_v38, %v2889_v30 }
 0x222   :  { %1367 = vst.msk [vmem:[%s3051_s4] sm:$0x1] %vm1366_vm8, %v1365_v33  ;;  %v1464_v26 = vadd.f32 %v1463_v37, %v2889_v30  ;;  %v1474_v17 = vadd.f32 %v1473_v40, %v2889_v30  ;;  %v1416_v59 = vpack.c.bf16 %v1415_v45, %v1415_v45  ;;  %v1484_v25 = vadd.f32 %v1483_v48, %v2889_v30 }
 0x223   :  { %1377 = vst.msk [vmem:[%s3051_s4 + $0x1] sm:$0x1] %vm1366_vm8, %v1376_v4  ;;  %v1494_v9 = vadd.f32 %v1493_v16, %v2889_v30  ;;  %v1504_v2 = vadd.f32 %v1503_v20, %v2889_v30  ;;  %v1426_v39 = vpack.c.bf16 %v1425_v11, %v1425_v11  ;;  %v1445_v46 = vmax.f32 %v1444_v47, 0.0 }
 0x224   :  { %1387 = vst.msk [vmem:[%s3051_s4 + $0x2] sm:$0x1] %vm1366_vm8, %v1386_v61  ;;  %v1455_v49 = vmax.f32 %v1454_v52, 0.0  ;;  %v1465_v34 = vmax.f32 %v1464_v26, 0.0  ;;  %v1533_v27 = vmul.f32 %v2875_v21, %v3153_v0  ;;  %v1436_v56 = vpack.c.bf16 %v1435_v53, %v1435_v53 }
 0x225   :  { %1397 = vst.msk [vmem:[%s3051_s4 + $0x3] sm:$0x1] %vm1366_vm8, %v1396_v15  ;;  %v1475_v14 = vmax.f32 %v1474_v17, 0.0  ;;  %v1514_v55 = vadd.f32 %v1513_v6, %v2889_v30  ;;  %v1543_v41 = vmul.f32 %v2875_v21, %v3154_v57  ;;  %v1553_v19 = vmul.f32 %v2875_v21, %v3155_v5 }
 0x226   :  { %1407 = vst.msk [vmem:[%s3051_s4 + $0x4] sm:$0x1] %vm1366_vm8, %v1406_v60  ;;  %v1446_v0 = vpack.c.bf16 %v1445_v46, %v1445_v46  ;;  %v1485_v29 = vmax.f32 %v1484_v25, 0.0  ;;  %v1563_v3 = vmul.f32 %v2875_v21, %v3156_v18  ;;  %v1456_v36 = vpack.c.bf16 %v1455_v49, %v1455_v49 }
 0x227   :  { %1417 = vst.msk [vmem:[%s3051_s4 + $0x5] sm:$0x1] %vm1366_vm8, %v1416_v59  ;;  %v1495_v57 = vmax.f32 %v1494_v9, 0.0  ;;  %v1505_v31 = vmax.f32 %v1504_v2, 0.0  ;;  %v1466_v5 = vpack.c.bf16 %v1465_v34, %v1465_v34  ;;  %v1524_v42 = vadd.f32 %v1523_v12, %v2889_v30 }
 0x228   :  { %1427 = vst.msk [vmem:[%s3051_s4 + $0x6] sm:$0x1] %vm1366_vm8, %v1426_v39  ;;  %v1534_v58 = vadd.f32 %v1533_v27, %v2889_v30  ;;  %v1544_v18 = vadd.f32 %v1543_v41, %v2889_v30  ;;  %v1573_v32 = vmul.f32 %v2875_v21, %v3157_v51  ;;  %v1476_v63 = vpack.c.bf16 %v1475_v14, %v1475_v14 }
 0x229   :  { %1437 = vst.msk [vmem:[%s3051_s4 + $0x7] sm:$0x1] %vm1366_vm8, %v1436_v56  ;;  %v1515_v38 = vmax.f32 %v1514_v55, 0.0  ;;  %v1554_v37 = vadd.f32 %v1553_v19, %v2889_v30  ;;  %v1583_v40 = vmul.f32 %v2875_v21, %v3158_v7  ;;  %v1486_v48 = vpack.c.bf16 %v1485_v29, %v1485_v29 }
 0x22a   :  { %1447 = vst.msk [vmem:[%s3051_s4 + $0x8] sm:$0x1] %vm1366_vm8, %v1446_v0  ;;  %v1525_v16 = vmax.f32 %v1524_v42, 0.0  ;;  %v1564_v51 = vadd.f32 %v1563_v3, %v2889_v30  ;;  %v1593_v10 = vmul.f32 %v2875_v21, %v3159_v23  ;;  %v1496_v62 = vpack.c.bf16 %v1495_v57, %v1495_v57 }
 0x22b   :  { %1457 = vst.msk [vmem:[%s3051_s4 + $0x9] sm:$0x1] %vm1366_vm8, %v1456_v36  ;;  %v1535_v8 = vmax.f32 %v1534_v58, 0.0  ;;  %v1574_v7 = vadd.f32 %v1573_v32, %v2889_v30  ;;  %v1506_v28 = vpack.c.bf16 %v1505_v31, %v1505_v31  ;;  %v1545_v13 = vmax.f32 %v1544_v18, 0.0 }
 0x22c   :  { %1467 = vst.msk [vmem:[%s3051_s4 + $0xa] sm:$0x1] %vm1366_vm8, %v1466_v5  ;;  %v1584_v35 = vadd.f32 %v1583_v40, %v2889_v30  ;;  %v1516_v23 = vpack.c.bf16 %v1515_v38, %v1515_v38  ;;  %v1555_v21 = vmax.f32 %v1554_v37, 0.0  ;;  %v1594_v24 = vadd.f32 %v1593_v10, %v2889_v30 }
 0x22d   :  { %1477 = vst.msk [vmem:[%s3051_s4 + $0xb] sm:$0x1] %vm1366_vm8, %v1476_v63  ;;  %v1526_v22 = vpack.c.bf16 %v1525_v16, %v1525_v16  ;;  %v1565_v1 = vmax.f32 %v1564_v51, 0.0  ;;  %v1536_v44 = vpack.c.bf16 %v1535_v8, %v1535_v8  ;;  %v1575_v43 = vmax.f32 %v1574_v7, 0.0 }
 0x22e   :  { %1487 = vst.msk [vmem:[%s3051_s4 + $0xc] sm:$0x1] %vm1366_vm8, %v1486_v48  ;;  %v1546_v30 = vpack.c.bf16 %v1545_v13, %v1545_v13  ;;  %v1585_v50 = vmax.f32 %v1584_v35, 0.0  ;;  %v1556_v20 = vpack.c.bf16 %v1555_v21, %v1555_v21  ;;  %v1595_v6 = vmax.f32 %v1594_v24, 0.0 }
 0x22f   :  { %1497 = vst.msk [vmem:[%s3051_s4 + $0xd] sm:$0x1] %vm1366_vm8, %v1496_v62  ;;  %v1566_v54 = vpack.c.bf16 %v1565_v1, %v1565_v1  ;;  %v1576_v45 = vpack.c.bf16 %v1575_v43, %v1575_v43 }
 0x230   :  { %1507 = vst.msk [vmem:[%s3051_s4 + $0xe] sm:$0x1] %vm1366_vm8, %v1506_v28  ;;  %v1586_v33 = vpack.c.bf16 %v1585_v50, %v1585_v50  ;;  %v1596_v4 = vpack.c.bf16 %v1595_v6, %v1595_v6 }
 0x231   :  { %1517 = vst.msk [vmem:[%s3051_s4 + $0xf] sm:$0x1] %vm1366_vm8, %v1516_v23 }
 0x232   :  { %1527 = vst.msk [vmem:[%s3051_s4 + $0x10] sm:$0x1] %vm1366_vm8, %v1526_v22 }
 0x233   :  { %1537 = vst.msk [vmem:[%s3051_s4 + $0x11] sm:$0x1] %vm1366_vm8, %v1536_v44 }
 0x234   :  { %1547 = vst.msk [vmem:[%s3051_s4 + $0x12] sm:$0x1] %vm1366_vm8, %v1546_v30 }
 0x235   :  { %1557 = vst.msk [vmem:[%s3051_s4 + $0x13] sm:$0x1] %vm1366_vm8, %v1556_v20 }
 0x236   :  { %1567 = vst.msk [vmem:[%s3051_s4 + $0x14] sm:$0x1] %vm1366_vm8, %v1566_v54 }
 0x237   :  { %1577 = vst.msk [vmem:[%s3051_s4 + $0x15] sm:$0x1] %vm1366_vm8, %v1576_v45 }
 0x238   :  { %1587 = vst.msk [vmem:[%s3051_s4 + $0x16] sm:$0x1] %vm1366_vm8, %v1586_v33 }
 0x239   :  { %1597 = vst.msk [vmem:[%s3051_s4 + $0x17] sm:$0x1] %vm1366_vm8, %v1596_v4 }

// kernel: generator_forward.4
= control target key start
LH: loop header
LB: loop body
LE: loop exit
PB: predicated region body
PF: predicated region fallthrough
CT: control target
= control target key end

     0   :  { %vm1323_vm0 = vcmask 261120   ;;  %vm1347_vm1 = vcmask 254976   ;;  %vm1472_vm6 = vcmask 257024   ;;  %vm1485_vm7 = vcmask 253952   ;;  %s2418_s26 = smov 64   ;;  %s2419_s27 = smov 96   ;;  %s3768_s1 = inlined_call_operand.vmem [shape: bf16[1024,32], index: 1, kind: input, shape index: {}]   ;;  %s3769_s0 = inlined_call_operand.vmem [shape: bf16[98,1024], index: 0, kind: input, shape index: {}]   ;;  %s3770_s2 = inlined_call_operand.vmem [shape: f32[1,32], index: 2, kind: input, shape index: {}]   ;;  %s3771_s3 = inlined_call_operand.vmem [shape: f32[1,32], index: 3, kind: input, shape index: {}]   ;;  %s3772_s4 = inlined_call_operand.vmem [shape: bf16[98,128], index: 4, kind: output, shape index: {}]  }
   0x1   :  { %v2315_v0 = vld [vmem:[%s3768_s1 + $0x38] sm:$0xff]  ;;  %v2314_v4 = vld [vmem:[%s3768_s1 + $0x30] sm:$0xff]  ;;  %v2313_v8 = vld [vmem:[%s3768_s1 + $0x28] sm:$0xff]  ;;  %vm1591_vm8 = vcmask 519424   ;;  %vm1710_vm9 = vcmask 781824   ;;  %vm1604_vm10 = vcmask 516352  }
   0x2   :  { %v2323_v1 = vld [vmem:[%s3768_s1 + $0x78] sm:$0xff]  ;;  %225 = vmatpush.bf16.msra.mxu0 %v2315_v0  ;;  %v2322_v5 = vld [vmem:[%s3768_s1 + $0x70] sm:$0xff]  ;;  %v2321_v9 = vld [vmem:[%s3768_s1 + $0x68] sm:$0xff]  ;;  %vm1829_vm11 = vcmask 1044224   ;;  %vm1723_vm12 = vcmask 778752   ;;  %vm1842_vm13 = vcmask 1041152  }
   0x3   :  { %v2343_v2 = vld [vmem:[%s3768_s1 + $0xb8] sm:$0xff]  ;;  %268 = vmatpush.bf16.msra.mxu1 %v2323_v1  ;;  %v2342_v6 = vld [vmem:[%s3768_s1 + $0xb0] sm:$0xff]  ;;  %v2341_v10 = vld [vmem:[%s3768_s1 + $0xa8] sm:$0xff] }
   0x4   :  { %v2351_v3 = vld [vmem:[%s3768_s1 + $0xf8] sm:$0xff]  ;;  %519 = vmatpush.bf16.msra.mxu2 %v2343_v2  ;;  %v2350_v7 = vld [vmem:[%s3768_s1 + $0xf0] sm:$0xff]  ;;  %v2349_v11 = vld [vmem:[%s3768_s1 + $0xe8] sm:$0xff] }
   0x5   :  { %562 = vmatpush.bf16.msra.mxu3 %v2351_v3  ;;  %v2312_v12 = vld [vmem:[%s3768_s1 + $0x20] sm:$0xff]  ;;  %v2311_v16 = vld [vmem:[%s3768_s1 + $0x18] sm:$0xff]  ;;  %v2310_v20 = vld [vmem:[%s3768_s1 + $0x10] sm:$0xff] }
   0x6   :  { %226 = vmatpush.bf16.msra.mxu0 %v2314_v4  ;;  %v2320_v13 = vld [vmem:[%s3768_s1 + $0x60] sm:$0xff]  ;;  %v2319_v17 = vld [vmem:[%s3768_s1 + $0x58] sm:$0xff]  ;;  %v2318_v21 = vld [vmem:[%s3768_s1 + $0x50] sm:$0xff] }
   0x7   :  { %269 = vmatpush.bf16.msra.mxu1 %v2322_v5  ;;  %v2340_v14 = vld [vmem:[%s3768_s1 + $0xa0] sm:$0xff]  ;;  %v2339_v18 = vld [vmem:[%s3768_s1 + $0x98] sm:$0xff]  ;;  %v2338_v22 = vld [vmem:[%s3768_s1 + $0x90] sm:$0xff] }
   0x8   :  { %520 = vmatpush.bf16.msra.mxu2 %v2342_v6  ;;  %v2348_v15 = vld [vmem:[%s3768_s1 + $0xe0] sm:$0xff]  ;;  %v2347_v19 = vld [vmem:[%s3768_s1 + $0xd8] sm:$0xff]  ;;  %v2346_v23 = vld [vmem:[%s3768_s1 + $0xd0] sm:$0xff] }
   0x9   :  { %563 = vmatpush.bf16.msra.mxu3 %v2350_v7  ;;  %v2309_v24 = vld [vmem:[%s3768_s1 + $0x8] sm:$0xff]  ;;  %v2308_v28 = vld [vmem:[%s3768_s1] sm:$0xff]  ;;  %v2399_v40 = vld [vmem:[%s3768_s1 + $0x1b8] sm:$0xff] }
   0xa   :  { %227 = vmatpush.bf16.msra.mxu0 %v2313_v8  ;;  %v2317_v25 = vld [vmem:[%s3768_s1 + $0x48] sm:$0xff]  ;;  %v2316_v29 = vld [vmem:[%s3768_s1 + $0x40] sm:$0xff]  ;;  %v2407_v41 = vld [vmem:[%s3768_s1 + $0x1f8] sm:$0xff] }
   0xb   :  { %270 = vmatpush.bf16.msra.mxu1 %v2321_v9  ;;  %v2337_v26 = vld [vmem:[%s3768_s1 + $0x88] sm:$0xff]  ;;  %v2336_v30 = vld [vmem:[%s3768_s1 + $0x80] sm:$0xff]  ;;  %v2371_v46 = vld [vmem:[%s3768_s1 + $0x138] sm:$0xff] }
   0xc   :  { %521 = vmatpush.bf16.msra.mxu2 %v2341_v10  ;;  %v2345_v27 = vld [vmem:[%s3768_s1 + $0xc8] sm:$0xff]  ;;  %v2344_v31 = vld [vmem:[%s3768_s1 + $0xc0] sm:$0xff]  ;;  %v2379_v47 = vld [vmem:[%s3768_s1 + $0x178] sm:$0xff] }
   0xd   :  { %564 = vmatpush.bf16.msra.mxu3 %v2349_v11  ;;  %v1850_v32 = vld [vmem:[%s3769_s0] sm:$0xf]  ;;  %v2296_v34 = vld [vmem:[%s3769_s0 + $0x4] sm:$0xf]  ;;  %v1962_v36 = vld [vmem:[%s3769_s0 + $0x8] sm:$0xf] }
   0xe   :  { %228 = vmatpush.bf16.msra.mxu0 %v2312_v12  ;;  %v2297_v33 = vld [vmem:[%s3769_s0 + $0x1c] sm:$0xf0]  ;;  %v1852_v35 = vld [vmem:[%s3769_s0 + $0x20] sm:$0xf0]  ;;  %v2325_v37 = vld [vmem:[%s3769_s0 + $0x24] sm:$0xf0] }
   0xf   :  { %271 = vmatpush.bf16.msra.mxu1 %v2320_v13  ;;  %v2324_v38 = vld [vmem:[%s3769_s0 + $0xc] sm:$0xf]  ;;  %v1851_v42 = vor.u32 %v2297_v33, %v1850_v32  ;;  %v1855_v43 = vor.u32 %v2296_v34, %v1852_v35  ;;  %v1963_v44 = vor.u32 %v2325_v37, %v1962_v36  ;;  %v2398_v48 = vld [vmem:[%s3768_s1 + $0x1b0] sm:$0xff]  ;;  %v1858_v56 = vld [vmem:[%s3769_s0 + $0x40] sm:$0xf] }
  0x10   :  { %522 = vmatpush.bf16.msra.mxu2 %v2340_v14  ;;  %v1964_v39 = vld [vmem:[%s3769_s0 + $0x28] sm:$0xf0]  ;;  %v2406_v49 = vld [vmem:[%s3768_s1 + $0x1f0] sm:$0xff]  ;;  %v2396_v57 = vld [vmem:[%s3768_s1 + $0x1a0] sm:$0xff] }
  0x11   :  { %565 = vmatpush.bf16.msra.mxu3 %v2348_v15  ;;  %v1967_v45 = vor.u32 %v2324_v38, %v1964_v39  ;;  %v2370_v50 = vld [vmem:[%s3768_s1 + $0x130] sm:$0xff]  ;;  %v2397_v52 = vld [vmem:[%s3768_s1 + $0x1a8] sm:$0xff]  ;;  %v2404_v58 = vld [vmem:[%s3768_s1 + $0x1e0] sm:$0xff] }
  0x12   :  { %229 = vmatpush.bf16.msra.mxu0 %v2311_v16  ;;  %v2378_v51 = vld [vmem:[%s3768_s1 + $0x170] sm:$0xff]  ;;  %v2405_v53 = vld [vmem:[%s3768_s1 + $0x1e8] sm:$0xff]  ;;  %v2299_v59 = vld [vmem:[%s3769_s0 + $0x5c] sm:$0xf0] }
  0x13   :  { %272 = vmatpush.bf16.msra.mxu1 %v2319_v17  ;;  %v2369_v54 = vld [vmem:[%s3768_s1 + $0x128] sm:$0xff]  ;;  %v2298_v60 = vld [vmem:[%s3769_s0 + $0x44] sm:$0xf]  ;;  %v1859_v4 = vor.u32 %v2299_v59, %v1858_v56  ;;  %v2395_v8 = vld [vmem:[%s3768_s1 + $0x198] sm:$0xff] }
  0x14   :  { %523 = vmatpush.bf16.msra.mxu2 %v2339_v18  ;;  %v2377_v55 = vld [vmem:[%s3768_s1 + $0x168] sm:$0xff]  ;;  %v1860_v61 = vld [vmem:[%s3769_s0 + $0x60] sm:$0xf0]  ;;  %v2403_v9 = vld [vmem:[%s3768_s1 + $0x1d8] sm:$0xff] }
  0x15   :  { %566 = vmatpush.bf16.msra.mxu3 %v2347_v19  ;;  %v1970_v62 = vld [vmem:[%s3769_s0 + $0x48] sm:$0xf]  ;;  %v2326_v0 = vld [vmem:[%s3769_s0 + $0x4c] sm:$0xf]  ;;  %v2368_v2 = vld [vmem:[%s3768_s1 + $0x120] sm:$0xff]  ;;  %v1863_v5 = vor.u32 %v2298_v60, %v1860_v61 }
  0x16   :  { %230 = vmatpush.bf16.msra.mxu0 %v2310_v20  ;;  %v2327_v63 = vld [vmem:[%s3769_s0 + $0x64] sm:$0xf0]  ;;  %v1972_v1 = vld [vmem:[%s3769_s0 + $0x68] sm:$0xf0]  ;;  %v2376_v3 = vld [vmem:[%s3768_s1 + $0x160] sm:$0xff] }
  0x17   :  { %273 = vmatpush.bf16.msra.mxu1 %v2318_v21  ;;  %v1971_v6 = vor.u32 %v2327_v63, %v1970_v62  ;;  %v1975_v7 = vor.u32 %v2326_v0, %v1972_v1  ;;  %v2367_v10 = vld [vmem:[%s3768_s1 + $0x118] sm:$0xff]  ;;  %v1866_v12 = vld [vmem:[%s3769_s0 + $0x80] sm:$0xf]  ;;  %v2300_v14 = vld [vmem:[%s3769_s0 + $0x84] sm:$0xf] }
  0x18   :  { %524 = vmatpush.bf16.msra.mxu2 %v2338_v22  ;;  %v2375_v11 = vld [vmem:[%s3768_s1 + $0x158] sm:$0xff]  ;;  %v2301_v13 = vld [vmem:[%s3769_s0 + $0x9c] sm:$0xf0]  ;;  %v1868_v15 = vld [vmem:[%s3769_s0 + $0xa0] sm:$0xf0] }
  0x19   :  { %567 = vmatpush.bf16.msra.mxu3 %v2346_v23  ;;  %v1978_v16 = vld [vmem:[%s3769_s0 + $0x88] sm:$0xf]  ;;  %v2328_v18 = vld [vmem:[%s3769_s0 + $0x8c] sm:$0xf]  ;;  %v1867_v20 = vor.u32 %v2301_v13, %v1866_v12  ;;  %v1871_v21 = vor.u32 %v2300_v14, %v1868_v15  ;;  %v2392_v56 = vld [vmem:[%s3768_s1 + $0x180] sm:$0xff] }
  0x1a   :  { %231 = vmatpush.bf16.msra.mxu0 %v2309_v24  ;;  %v2329_v17 = vld [vmem:[%s3769_s0 + $0xa4] sm:$0xf0]  ;;  %v1980_v19 = vld [vmem:[%s3769_s0 + $0xa8] sm:$0xf0]  ;;  %v2394_v24 = vld [vmem:[%s3768_s1 + $0x190] sm:$0xff] }
  0x1b   :  { %274 = vmatpush.bf16.msra.mxu1 %v2317_v25  ;;  %v1979_v22 = vor.u32 %v2329_v17, %v1978_v16  ;;  %v1983_v23 = vor.u32 %v2328_v18, %v1980_v19  ;;  %v2402_v25 = vld [vmem:[%s3768_s1 + $0x1d0] sm:$0xff]  ;;  %v1986_v32 = vld [vmem:[%s3769_s0 + $0xc8] sm:$0xf]  ;;  %v2330_v34 = vld [vmem:[%s3769_s0 + $0xcc] sm:$0xf] }
  0x1c   :  { %525 = vmatpush.bf16.msra.mxu2 %v2337_v26  ;;  %v2366_v26 = vld [vmem:[%s3768_s1 + $0x110] sm:$0xff]  ;;  %v2331_v33 = vld [vmem:[%s3769_s0 + $0xe4] sm:$0xf0]  ;;  %v1988_v35 = vld [vmem:[%s3769_s0 + $0xe8] sm:$0xf0] }
  0x1d   :  { %568 = vmatpush.bf16.msra.mxu3 %v2345_v27  ;;  %v2374_v27 = vld [vmem:[%s3768_s1 + $0x150] sm:$0xff]  ;;  %v1987_v38 = vor.u32 %v2331_v33, %v1986_v32  ;;  %v1991_v39 = vor.u32 %v2330_v34, %v1988_v35  ;;  %v2372_v59 = vld [vmem:[%s3768_s1 + $0x140] sm:$0xff]  ;;  %v2002_v0 = vld [vmem:[%s3769_s0 + $0x148] sm:$0xf] }
  0x1e   :  { %232 = vmatpush.bf16.msra.mxu0 %v2308_v28  ;;  %v1874_v28 = vld [vmem:[%s3769_s0 + $0xc0] sm:$0xf]  ;;  %v2306_v62 = vld [vmem:[%s3769_s0 + $0x144] sm:$0xf]  ;;  %v2335_v1 = vld [vmem:[%s3769_s0 + $0x164] sm:$0xf0] }
  0x1f   :  { %275 = vmatpush.bf16.msra.mxu1 %v2316_v29  ;;  %v2303_v29 = vld [vmem:[%s3769_s0 + $0xdc] sm:$0xf0]  ;;  %v1892_v63 = vld [vmem:[%s3769_s0 + $0x160] sm:$0xf0]  ;;  %v2074_v18 = vld [vmem:[%s3769_s0 + $0x10] sm:$0xf] }
  0x20   :  { %526 = vmatpush.bf16.msra.mxu2 %v2336_v30  ;;  %v2302_v30 = vld [vmem:[%s3769_s0 + $0xc4] sm:$0xf]  ;;  %v1875_v36 = vor.u32 %v2303_v29, %v1874_v28  ;;  %v1890_v60 = vld [vmem:[%s3769_s0 + $0x140] sm:$0xf]  ;;  %v2353_v19 = vld [vmem:[%s3769_s0 + $0x2c] sm:$0xf0] }
  0x21   :  { %569 = vmatpush.bf16.msra.mxu3 %v2344_v31  ;;  %233 = vmatmul.bf16.vlgmr.msra.gmra.mxu0 %v1851_v42  ;;  %v1876_v31 = vld [vmem:[%s3769_s0 + $0xe0] sm:$0xf0]  ;;  %v2365_v42 = vld [vmem:[%s3768_s1 + $0x108] sm:$0xff]  ;;  %v2307_v61 = vld [vmem:[%s3769_s0 + $0x15c] sm:$0xf0] }
  0x22   :  { %276 = vmatmul.bf16.vlgmr.msra.gmra.mxu1 %v1855_v43  ;;  %813 = vmatpush.bf16.msrb.mxu0 %v2371_v46  ;;  %v1879_v37 = vor.u32 %v2302_v30, %v1876_v31  ;;  %v2373_v43 = vld [vmem:[%s3768_s1 + $0x148] sm:$0xff]  ;;  %v2304_v46 = vld [vmem:[%s3769_s0 + $0x104] sm:$0xf]  ;;  %v2082_v30 = vld [vmem:[%s3769_s0 + $0x50] sm:$0xf] }
  0x23   :  { %527 = vmatmul.bf16.vlgmr.msra.gmra.mxu2 %v1963_v44  ;;  %856 = vmatpush.bf16.msrb.mxu1 %v2379_v47  ;;  %v1882_v44 = vld [vmem:[%s3769_s0 + $0x100] sm:$0xf]  ;;  %v1884_v47 = vld [vmem:[%s3769_s0 + $0x120] sm:$0xf0]  ;;  %v2355_v31 = vld [vmem:[%s3769_s0 + $0x6c] sm:$0xf0] }
  0x24   :  { %1107 = vmatpush.bf16.msrb.mxu2 %v2399_v40  ;;  %570 = vmatmul.bf16.vlgmr.msra.gmra.mxu3 %v1967_v45  ;;  %v2393_v40 = vld [vmem:[%s3768_s1 + $0x188] sm:$0xff]  ;;  %v2305_v45 = vld [vmem:[%s3769_s0 + $0x11c] sm:$0xf0]  ;;  %v2354_v32 = vld [vmem:[%s3769_s0 + $0x54] sm:$0xf] }
  0x25   :  { %1150 = vmatpush.bf16.msrb.mxu3 %v2407_v41  ;;  %v2401_v41 = vld [vmem:[%s3768_s1 + $0x1c8] sm:$0xff]  ;;  %v2084_v33 = vld [vmem:[%s3769_s0 + $0x70] sm:$0xf0]  ;;  %v2194_v34 = vld [vmem:[%s3769_s0 + $0x58] sm:$0xf] }
  0x26   :  { %814 = vmatpush.bf16.msrb.mxu0 %v2370_v50  ;;  %v2332_v50 = vld [vmem:[%s3769_s0 + $0x10c] sm:$0xf]  ;;  %v2383_v35 = vld [vmem:[%s3769_s0 + $0x74] sm:$0xf0] }
  0x27   :  { %857 = vmatpush.bf16.msrb.mxu1 %v2378_v51  ;;  %v1996_v51 = vld [vmem:[%s3769_s0 + $0x128] sm:$0xf0] }
  0x28   :  { %1108 = vmatpush.bf16.msrb.mxu2 %v2398_v48  ;;  %v1994_v48 = vld [vmem:[%s3769_s0 + $0x108] sm:$0xf] }
  0x29   :  { %1151 = vmatpush.bf16.msrb.mxu3 %v2406_v49  ;;  %v2333_v49 = vld [vmem:[%s3769_s0 + $0x124] sm:$0xf0] }
  0x2a   :  { %815 = vmatpush.bf16.msrb.mxu0 %v2369_v54  ;;  %v1995_v54 = vor.u32 %v2333_v49, %v1994_v48 }
  0x2b   :  { %858 = vmatpush.bf16.msrb.mxu1 %v2377_v55  ;;  %v1999_v55 = vor.u32 %v2332_v50, %v1996_v51  ;;  %v2090_v51 = vld [vmem:[%s3769_s0 + $0x90] sm:$0xf] }
  0x2c   :  { %1109 = vmatpush.bf16.msrb.mxu2 %v2397_v52  ;;  %v1883_v52 = vor.u32 %v2305_v45, %v1882_v44 }
  0x2d   :  { %1152 = vmatpush.bf16.msrb.mxu3 %v2405_v53  ;;  %v1887_v53 = vor.u32 %v2304_v46, %v1884_v47 }
  0x2e   :  { %816 = vmatpush.bf16.msrb.mxu0 %v2368_v2  ;;  %v2334_v2 = vld [vmem:[%s3769_s0 + $0x14c] sm:$0xf] }
  0x2f   :  { %859 = vmatpush.bf16.msrb.mxu1 %v2376_v3  ;;  %v2004_v3 = vld [vmem:[%s3769_s0 + $0x168] sm:$0xf0] }
  0x30   :  { %1110 = vmatpush.bf16.msrb.mxu2 %v2396_v57  ;;  %v2400_v57 = vld [vmem:[%s3768_s1 + $0x1c0] sm:$0xff] }
  0x31   :  { %1153 = vmatpush.bf16.msrb.mxu3 %v2404_v58  ;;  %238 = vmatmul.bf16.gmra.mxu0 %v1859_v4  ;;  %v2364_v58 = vld [vmem:[%s3768_s1 + $0x100] sm:$0xff]  ;;  %v1891_v4 = vor.u32 %v2307_v61, %v1890_v60 }
  0x32   :  { %281 = vmatmul.bf16.gmra.mxu1 %v1863_v5  ;;  %817 = vmatpush.bf16.msrb.mxu0 %v2367_v10  ;;  %v1895_v5 = vor.u32 %v2306_v62, %v1892_v63 }
  0x33   :  { %532 = vmatmul.bf16.gmra.mxu2 %v1971_v6  ;;  %860 = vmatpush.bf16.msrb.mxu1 %v2375_v11  ;;  %v2003_v6 = vor.u32 %v2335_v1, %v2002_v0 }
  0x34   :  { %575 = vmatmul.bf16.gmra.mxu3 %v1975_v7  ;;  %1111 = vmatpush.bf16.msrb.mxu2 %v2395_v8  ;;  %v2007_v7 = vor.u32 %v2334_v2, %v2004_v3  ;;  %v29_v8 = vld [vmem:[%s3769_s0 + $0x180] sm:$0x11] }
  0x35   :  { %1154 = vmatpush.bf16.msrb.mxu3 %v2403_v9  ;;  %v323_v9 = vld [vmem:[%s3769_s0 + $0x188] sm:$0x11]  ;;  %v99_v10 = vunpack.c.l.b16 %v29_v8  ;;  %v100_v11 = vunpack.c.h.b16 %v29_v8 }
  0x36   :  { %818 = vmatpush.bf16.msrb.mxu0 %v2366_v26  ;;  %v393_v12 = vunpack.c.l.b16 %v323_v9  ;;  %v394_v13 = vunpack.c.h.b16 %v323_v9  ;;  %v2075_v26 = vor.u32 %v2353_v19, %v2074_v18  ;;  %v2212_v18 = vld [vmem:[%s3769_s0 + $0xf8] sm:$0xf0] }
  0x37   :  { %861 = vmatpush.bf16.msrb.mxu1 %v2374_v27  ;;  %v113_v14 = vpack.c.b16 %v99_v10, %v99_v10  ;;  %v114_v15 = vpack.c.b16 %v100_v11, %v100_v11  ;;  %v2098_v11 = vld [vmem:[%s3769_s0 + $0xd0] sm:$0xf] }
  0x38   :  { %1112 = vmatpush.bf16.msrb.mxu2 %v2394_v24  ;;  %v407_v16 = vpack.c.b16 %v393_v12, %v393_v12  ;;  %v408_v17 = vpack.c.b16 %v394_v13, %v394_v13  ;;  %v2380_v24 = vld [vmem:[%s3769_s0 + $0x1c] sm:$0xf]  ;;  %v2359_v12 = vld [vmem:[%s3769_s0 + $0xec] sm:$0xf0]  ;;  %v2358_v13 = vld [vmem:[%s3769_s0 + $0xd4] sm:$0xf] }
  0x39   :  { %1155 = vmatpush.bf16.msrb.mxu3 %v2402_v25  ;;  %v2188_v25 = vld [vmem:[%s3769_s0 + $0x38] sm:$0xf0] }
  0x3a   :  { %819 = vmatpush.bf16.msrb.mxu0 %v2365_v42  ;;  %v2191_v29 = vor.u32 %v2380_v24, %v2188_v25  ;;  %v2195_v42 = vor.u32 %v2383_v35, %v2194_v34  ;;  %v2106_v35 = vld [vmem:[%s3769_s0 + $0x110] sm:$0xf] }
  0x3b   :  { %862 = vmatpush.bf16.msrb.mxu1 %v2373_v43 }
  0x3c   :  { %1113 = vmatpush.bf16.msrb.mxu2 %v2393_v40 }
  0x3d   :  { %1156 = vmatpush.bf16.msrb.mxu3 %v2401_v41 }
  0x3e   :  { %820 = vmatpush.bf16.msrb.mxu0 %v2364_v58  ;;  %v2204_v58 = vld [vmem:[%s3769_s0 + $0xb8] sm:$0xf0] }
  0x3f   :  { %863 = vmatpush.bf16.msrb.mxu1 %v2372_v59 }
  0x40   :  { %1114 = vmatpush.bf16.msrb.mxu2 %v2392_v56  ;;  %v2385_v56 = vld [vmem:[%s3769_s0 + $0xb4] sm:$0xf0] }
  0x41   :  { %243 = vmatmul.bf16.gmra.mxu0 %v1867_v20  ;;  %1157 = vmatpush.bf16.msrb.mxu3 %v2400_v57  ;;  %v2352_v20 = vld [vmem:[%s3769_s0 + $0x14] sm:$0xf]  ;;  %v2384_v57 = vld [vmem:[%s3769_s0 + $0x9c] sm:$0xf] }
  0x42   :  { %286 = vmatmul.bf16.gmra.mxu1 %v1871_v21  ;;  %v2076_v21 = vld [vmem:[%s3769_s0 + $0x30] sm:$0xf0]  ;;  %v2207_v3 = vor.u32 %v2384_v57, %v2204_v58 }
  0x43   :  { %537 = vmatmul.bf16.gmra.mxu2 %v1979_v22  ;;  %v2186_v22 = vld [vmem:[%s3769_s0 + $0x18] sm:$0xf]  ;;  %v2079_v27 = vor.u32 %v2352_v20, %v2076_v21  ;;  %v2099_v21 = vor.u32 %v2359_v12, %v2098_v11 }
  0x44   :  { %580 = vmatmul.bf16.gmra.mxu3 %v1983_v23  ;;  %v2381_v23 = vld [vmem:[%s3769_s0 + $0x34] sm:$0xf0] }
  0x45   :  { %v2187_v28 = vor.u32 %v2381_v23, %v2186_v22 }
  0x51   :  { %248 = vmatmul.bf16.gmra.mxu0 %v1875_v36  ;;  %v2382_v36 = vld [vmem:[%s3769_s0 + $0x5c] sm:$0xf] }
  0x52   :  { %291 = vmatmul.bf16.gmra.mxu1 %v1879_v37  ;;  %v2196_v37 = vld [vmem:[%s3769_s0 + $0x78] sm:$0xf0] }
  0x53   :  { %542 = vmatmul.bf16.gmra.mxu2 %v1987_v38  ;;  %v2083_v38 = vor.u32 %v2355_v31, %v2082_v30  ;;  %v2199_v43 = vor.u32 %v2382_v36, %v2196_v37  ;;  %v2361_v36 = vld [vmem:[%s3769_s0 + $0x12c] sm:$0xf0]  ;;  %v2360_v37 = vld [vmem:[%s3769_s0 + $0x114] sm:$0xf] }
  0x54   :  { %585 = vmatmul.bf16.gmra.mxu3 %v1991_v39  ;;  %v2087_v39 = vor.u32 %v2354_v32, %v2084_v33 }
  0x61   :  { %253 = vmatmul.bf16.gmra.mxu0 %v1883_v52  ;;  %v2357_v52 = vld [vmem:[%s3769_s0 + $0xac] sm:$0xf0] }
  0x62   :  { %296 = vmatmul.bf16.gmra.mxu1 %v1887_v53  ;;  %v2356_v53 = vld [vmem:[%s3769_s0 + $0x94] sm:$0xf]  ;;  %v2091_v61 = vor.u32 %v2357_v52, %v2090_v51 }
  0x63   :  { %547 = vmatmul.bf16.gmra.mxu2 %v1995_v54  ;;  %v2092_v54 = vld [vmem:[%s3769_s0 + $0xb0] sm:$0xf0] }
  0x64   :  { %590 = vmatmul.bf16.gmra.mxu3 %v1999_v55  ;;  %v2202_v55 = vld [vmem:[%s3769_s0 + $0x98] sm:$0xf]  ;;  %v2095_v62 = vor.u32 %v2356_v53, %v2092_v54 }
  0x65   :  { %v2203_v2 = vor.u32 %v2385_v56, %v2202_v55 }
  0x71   :  { %258 = vmatmul.bf16.gmra.mxu0 %v1891_v4 }
  0x72   :  { %301 = vmatmul.bf16.gmra.mxu1 %v1895_v5 }
  0x73   :  { %552 = vmatmul.bf16.gmra.mxu2 %v2003_v6 }
  0x74   :  { %595 = vmatmul.bf16.gmra.mxu3 %v2007_v7 }
  0x81   :  { %263 = vmatmul.bf16.gmra.mxu0 %v113_v14  ;;  %v2100_v14 = vld [vmem:[%s3769_s0 + $0xf0] sm:$0xf0] }
  0x82   :  { %306 = vmatmul.bf16.gmra.mxu1 %v114_v15  ;;  %v2210_v15 = vld [vmem:[%s3769_s0 + $0xd8] sm:$0xf]  ;;  %v2103_v22 = vor.u32 %v2358_v13, %v2100_v14 }
  0x83   :  { %557 = vmatmul.bf16.gmra.mxu2 %v407_v16  ;;  %v2387_v16 = vld [vmem:[%s3769_s0 + $0xf4] sm:$0xf0] }
  0x84   :  { %600 = vmatmul.bf16.gmra.mxu3 %v408_v17  ;;  %v2386_v17 = vld [vmem:[%s3769_s0 + $0xdc] sm:$0xf] }
  0x91   :  { %821 = vmatmul.bf16.vlgmr.msrb.gmra.mxu0 %v2075_v26  ;;  %v2211_v26 = vor.u32 %v2387_v16, %v2210_v15 }
  0x92   :  { %864 = vmatmul.bf16.vlgmr.msrb.gmra.mxu1 %v2079_v27  ;;  %v2215_v27 = vor.u32 %v2386_v17, %v2212_v18 }
  0x93   :  { %1115 = vmatmul.bf16.vlgmr.msrb.gmra.mxu2 %v2187_v28 }
  0x94   :  { %1158 = vmatmul.bf16.vlgmr.msrb.gmra.mxu3 %v2191_v29 }
  0x9e   :  { %v234_v40 = vpop.f32.mrf.mxu0 }
  0x9f   :  { %v277_v41 = vpop.f32.mrf.mxu1 }
  0xa0   :  { %v2835_v44 = vadd.f32 %v277_v41, %v234_v40  ;;  %v2389_v40 = vld [vmem:[%s3769_s0 + $0x134] sm:$0xf0]  ;;  %v2388_v41 = vld [vmem:[%s3769_s0 + $0x11c] sm:$0xf] }
  0xa1   :  { %826 = vmatmul.bf16.gmra.mxu0 %v2083_v38  ;;  %v2108_v38 = vld [vmem:[%s3769_s0 + $0x130] sm:$0xf0] }
  0xa2   :  { %3804 = vst [vmem:[#allocation2_spill] sm:$0xff] %v2835_v44  ;;  %869 = vmatmul.bf16.gmra.mxu1 %v2087_v39  ;;  %v2218_v39 = vld [vmem:[%s3769_s0 + $0x118] sm:$0xf] }
  0xa3   :  { %1120 = vmatmul.bf16.gmra.mxu2 %v2195_v42  ;;  %v2220_v42 = vld [vmem:[%s3769_s0 + $0x138] sm:$0xf0]  ;;  %v2219_v53 = vor.u32 %v2389_v40, %v2218_v39 }
  0xa4   :  { %1163 = vmatmul.bf16.gmra.mxu3 %v2199_v43  ;;  %v2223_v54 = vor.u32 %v2388_v41, %v2220_v42 }
  0xa6   :  { %v528_v45 = vpop.f32.mrf.mxu2  ;;  %v236_v48 = vpop.f32.mrf.mxu0 }
  0xa7   :  { %v571_v46 = vpop.f32.mrf.mxu3  ;;  %v279_v49 = vpop.f32.mrf.mxu1 }
  0xa8   :  { %v2837_v47 = vadd.f32 %v571_v46, %v528_v45  ;;  %v2839_v50 = vadd.f32 %v279_v49, %v236_v48  ;;  %v2107_v46 = vor.u32 %v2361_v36, %v2106_v35  ;;  %v2111_v48 = vor.u32 %v2360_v37, %v2108_v38 }
  0xaa   :  { %3805 = vst [vmem:[#allocation3_spill] sm:$0xff] %v2837_v47 }
  0xab   :  { %3806 = vst [vmem:[#allocation4_spill] sm:$0xff] %v2839_v50 }
  0xae   :  { %v530_v59 = vpop.f32.mrf.mxu2  ;;  %v239_v0 = vpop.f32.mrf.mxu0 }
  0xaf   :  { %v573_v60 = vpop.f32.mrf.mxu3  ;;  %v282_v1 = vpop.f32.mrf.mxu1 }
  0xb0   :  { %v2865_v63 = vadd.f32 %v573_v60, %v530_v59  ;;  %v2867_v4 = vadd.f32 %v282_v1, %v239_v0  ;;  %v2363_v0 = vld [vmem:[%s3769_s0 + $0x16c] sm:$0xf0]  ;;  %v2362_v1 = vld [vmem:[%s3769_s0 + $0x154] sm:$0xf] }
  0xb1   :  { %831 = vmatmul.bf16.gmra.mxu0 %v2091_v61 }
  0xb2   :  { %3807 = vst [vmem:[#allocation5_spill] sm:$0xff] %v2865_v63  ;;  %874 = vmatmul.bf16.gmra.mxu1 %v2095_v62  ;;  %v2114_v62 = vld [vmem:[%s3769_s0 + $0x150] sm:$0xf] }
  0xb3   :  { %3808 = vst [vmem:[#allocation6_spill] sm:$0xff] %v2867_v4  ;;  %1125 = vmatmul.bf16.gmra.mxu2 %v2203_v2  ;;  %v2116_v2 = vld [vmem:[%s3769_s0 + $0x170] sm:$0xf0]  ;;  %v2115_v12 = vor.u32 %v2363_v0, %v2114_v62 }
  0xb4   :  { %1168 = vmatmul.bf16.gmra.mxu3 %v2207_v3  ;;  %v2226_v3 = vld [vmem:[%s3769_s0 + $0x158] sm:$0xf]  ;;  %v2119_v13 = vor.u32 %v2362_v1, %v2116_v2 }
  0xb6   :  { %v533_v5 = vpop.f32.mrf.mxu2  ;;  %v241_v8 = vpop.f32.mrf.mxu0 }
  0xb7   :  { %v576_v6 = vpop.f32.mrf.mxu3  ;;  %v284_v9 = vpop.f32.mrf.mxu1 }
  0xb8   :  { %v2869_v7 = vadd.f32 %v576_v6, %v533_v5  ;;  %v2871_v10 = vadd.f32 %v284_v9, %v241_v8  ;;  %v2391_v5 = vld [vmem:[%s3769_s0 + $0x174] sm:$0xf0]  ;;  %v2390_v6 = vld [vmem:[%s3769_s0 + $0x15c] sm:$0xf] }
  0xb9   :  { %v2228_v8 = vld [vmem:[%s3769_s0 + $0x178] sm:$0xf0]  ;;  %v2227_v17 = vor.u32 %v2391_v5, %v2226_v3 }
  0xba   :  { %3809 = vst [vmem:[#allocation7_spill] sm:$0xff] %v2869_v7  ;;  %v2231_v18 = vor.u32 %v2390_v6, %v2228_v8 }
  0xbb   :  { %3810 = vst [vmem:[#allocation8_spill] sm:$0xff] %v2871_v10 }
  0xbe   :  { %v535_v19 = vpop.f32.mrf.mxu2  ;;  %v244_v24 = vpop.f32.mrf.mxu0 }
  0xbf   :  { %v578_v20 = vpop.f32.mrf.mxu3  ;;  %v287_v25 = vpop.f32.mrf.mxu1 }
  0xc0   :  { %v2897_v23 = vadd.f32 %v578_v20, %v535_v19  ;;  %v2899_v28 = vadd.f32 %v287_v25, %v244_v24 }
  0xc1   :  { %836 = vmatmul.bf16.gmra.mxu0 %v2099_v21 }
  0xc2   :  { %3811 = vst [vmem:[#allocation9_spill] sm:$0xff] %v2897_v23  ;;  %879 = vmatmul.bf16.gmra.mxu1 %v2103_v22 }
  0xc3   :  { %3812 = vst [vmem:[#allocation10_spill] sm:$0xff] %v2899_v28  ;;  %1130 = vmatmul.bf16.gmra.mxu2 %v2211_v26  ;;  %v617_v26 = vld [vmem:[%s3769_s0 + $0x190] sm:$0x11] }
  0xc4   :  { %1173 = vmatmul.bf16.gmra.mxu3 %v2215_v27 }
  0xc6   :  { %v538_v29 = vpop.f32.mrf.mxu2  ;;  %v246_v32 = vpop.f32.mrf.mxu0 }
  0xc7   :  { %v581_v30 = vpop.f32.mrf.mxu3  ;;  %v289_v33 = vpop.f32.mrf.mxu1 }
  0xc8   :  { %v2901_v31 = vadd.f32 %v581_v30, %v538_v29  ;;  %v2903_v34 = vadd.f32 %v289_v33, %v246_v32  ;;  %v911_v29 = vld [vmem:[%s3769_s0 + $0x198] sm:$0x11]  ;;  %v687_v30 = vunpack.c.l.b16 %v617_v26  ;;  %v688_v32 = vunpack.c.h.b16 %v617_v26 }
  0xc9   :  { %v981_v33 = vunpack.c.l.b16 %v911_v29  ;;  %v982_v35 = vunpack.c.h.b16 %v911_v29 }
  0xca   :  { %3813 = vst [vmem:[#allocation11_spill] sm:$0xff] %v2901_v31  ;;  %v701_v38 = vpack.c.b16 %v687_v30, %v687_v30  ;;  %v702_v39 = vpack.c.b16 %v688_v32, %v688_v32 }
  0xcb   :  { %3814 = vst [vmem:[#allocation12_spill] sm:$0xff] %v2903_v34 }
  0xce   :  { %v540_v43 = vpop.f32.mrf.mxu2  ;;  %v249_v51 = vpop.f32.mrf.mxu0 }
  0xcf   :  { %v583_v45 = vpop.f32.mrf.mxu3  ;;  %v292_v52 = vpop.f32.mrf.mxu1 }
  0xd0   :  { %v2929_v49 = vadd.f32 %v583_v45, %v540_v43  ;;  %v2931_v55 = vadd.f32 %v292_v52, %v249_v51  ;;  %v995_v43 = vpack.c.b16 %v981_v33, %v981_v33  ;;  %v996_v45 = vpack.c.b16 %v982_v35, %v982_v35 }
  0xd1   :  { %841 = vmatmul.bf16.gmra.mxu0 %v2107_v46 }
  0xd2   :  { %3815 = vst [vmem:[#allocation13_spill] sm:$0xff] %v2929_v49  ;;  %884 = vmatmul.bf16.gmra.mxu1 %v2111_v48 }
  0xd3   :  { %3816 = vst [vmem:[#allocation14_spill] sm:$0xff] %v2931_v55  ;;  %1135 = vmatmul.bf16.gmra.mxu2 %v2219_v53 }
  0xd4   :  { %1178 = vmatmul.bf16.gmra.mxu3 %v2223_v54 }
  0xd6   :  { %v543_v56 = vpop.f32.mrf.mxu2  ;;  %v251_v59 = vpop.f32.mrf.mxu0 }
  0xd7   :  { %v586_v57 = vpop.f32.mrf.mxu3  ;;  %v294_v60 = vpop.f32.mrf.mxu1 }
  0xd8   :  { %v2933_v58 = vadd.f32 %v586_v57, %v543_v56  ;;  %v2935_v61 = vadd.f32 %v294_v60, %v251_v59 }
  0xda   :  { %3817 = vst [vmem:[#allocation15_spill] sm:$0xff] %v2933_v58 }
  0xdb   :  { %3818 = vst [vmem:[#allocation16_spill] sm:$0xff] %v2935_v61 }
  0xde   :  { %v545_v9 = vpop.f32.mrf.mxu2  ;;  %v254_v15 = vpop.f32.mrf.mxu0 }
  0xdf   :  { %v588_v11 = vpop.f32.mrf.mxu3  ;;  %v297_v16 = vpop.f32.mrf.mxu1 }
  0xe0   :  { %v2961_v14 = vadd.f32 %v588_v11, %v545_v9  ;;  %v2963_v19 = vadd.f32 %v297_v16, %v254_v15 }
  0xe1   :  { %846 = vmatmul.bf16.gmra.mxu0 %v2115_v12 }
  0xe2   :  { %3819 = vst [vmem:[#allocation17_spill] sm:$0xff] %v2961_v14  ;;  %889 = vmatmul.bf16.gmra.mxu1 %v2119_v13 }
  0xe3   :  { %3820 = vst [vmem:[#allocation18_spill] sm:$0xff] %v2963_v19  ;;  %1140 = vmatmul.bf16.gmra.mxu2 %v2227_v17 }
  0xe4   :  { %1183 = vmatmul.bf16.gmra.mxu3 %v2231_v18 }
  0xe6   :  { %v548_v20 = vpop.f32.mrf.mxu2  ;;  %v256_v24 = vpop.f32.mrf.mxu0 }
  0xe7   :  { %v591_v21 = vpop.f32.mrf.mxu3  ;;  %v299_v25 = vpop.f32.mrf.mxu1 }
  0xe8   :  { %v2965_v22 = vadd.f32 %v591_v21, %v548_v20  ;;  %v2970_v27 = vadd.f32 %v299_v25, %v256_v24 }
  0xea   :  { %3821 = vst [vmem:[#allocation19_spill] sm:$0xff] %v2965_v22 }
  0xeb   :  { %3822 = vst [vmem:[#allocation20_spill] sm:$0xff] %v2970_v27 }
  0xee   :  { %v550_v36 = vpop.f32.mrf.mxu2  ;;  %v259_v41 = vpop.f32.mrf.mxu0 }
  0xef   :  { %v593_v37 = vpop.f32.mrf.mxu3  ;;  %v302_v42 = vpop.f32.mrf.mxu1 }
  0xf0   :  { %v2975_v40 = vadd.f32 %v593_v37, %v550_v36  ;;  %v2977_v46 = vadd.f32 %v302_v42, %v259_v41 }
  0xf1   :  { %851 = vmatmul.bf16.gmra.mxu0 %v701_v38 }
  0xf2   :  { %3823 = vst [vmem:[#allocation21_spill] sm:$0xff] %v2975_v40  ;;  %894 = vmatmul.bf16.gmra.mxu1 %v702_v39 }
  0xf3   :  { %3824 = vst [vmem:[#allocation22_spill] sm:$0xff] %v2977_v46  ;;  %1145 = vmatmul.bf16.gmra.mxu2 %v995_v43 }
  0xf4   :  { %1188 = vmatmul.bf16.gmra.mxu3 %v996_v45 }
  0xf6   :  { %v553_v48 = vpop.f32.mrf.mxu2  ;;  %v261_v53 = vpop.f32.mrf.mxu0 }
  0xf7   :  { %v596_v51 = vpop.f32.mrf.mxu3  ;;  %v304_v54 = vpop.f32.mrf.mxu1 }
  0xf8   :  { %v2979_v52 = vadd.f32 %v596_v51, %v553_v48  ;;  %v2981_v56 = vadd.f32 %v304_v54, %v261_v53 }
  0xfa   :  { %3825 = vst [vmem:[#allocation23_spill] sm:$0xff] %v2979_v52 }
  0xfe   :  { %v555_v57 = vpop.f32.mrf.mxu2  ;;  %v264_v62 = vpop.f32.mrf.mxu0 }
  0xff   :  { %v598_v59 = vpop.f32.mrf.mxu3  ;;  %v307_v0 = vpop.f32.mrf.mxu1 }
 0x100   :  { %v2983_v60 = vadd.f32 %v598_v59, %v555_v57  ;;  %v2985_v1 = vadd.f32 %v307_v0, %v264_v62 }
 0x102   :  { %3826 = vst [vmem:[#allocation24_spill] sm:$0xff] %v2985_v1 }
 0x106   :  { %v558_v2 = vpop.f32.mrf.mxu2  ;;  %v266_v6 = vpop.f32.mrf.mxu0 }
 0x107   :  { %v601_v3 = vpop.f32.mrf.mxu3  ;;  %v309_v8 = vpop.f32.mrf.mxu1 }
 0x108   :  { %v2987_v5 = vadd.f32 %v601_v3, %v558_v2 }
 0x10a   :  { %3827 = vst [vmem:[#allocation25_spill] sm:$0xff] %v2987_v5  ;;  %v3163_v5 = vadd.f32 %v2983_v60, %v2981_v56 }
 0x10e   :  { %v560_v9 = vpop.f32.mrf.mxu2  ;;  %v822_v12 = vpop.f32.mrf.mxu0 }
 0x10f   :  { %v603_v11 = vpop.f32.mrf.mxu3  ;;  %v865_v13 = vpop.f32.mrf.mxu1 }
 0x110   :  { %v2989_v15 = vadd.f32 %v865_v13, %v822_v12  ;;  %v1245_v13 = vmul.f32 %v2837_v47, %v2837_v47 }
 0x112   :  { %3828 = vst [vmem:[#allocation26_spill] sm:$0xff] %v2989_v15 }
 0x116   :  { %v1116_v16 = vpop.f32.mrf.mxu2  ;;  %v824_v20 = vpop.f32.mrf.mxu0 }
 0x117   :  { %v1159_v17 = vpop.f32.mrf.mxu3  ;;  %v867_v21 = vpop.f32.mrf.mxu1 }
 0x118   :  { %v2991_v18 = vadd.f32 %v1159_v17, %v1116_v16  ;;  %v2993_v24 = vadd.f32 %v867_v21, %v824_v20  ;;  %v1246_v20 = vmul.f32 %v2865_v63, %v2865_v63  ;;  %v1232_v21 = vmul.f32 %v2835_v44, %v2835_v44 }
 0x11a   :  { %3829 = vst [vmem:[#allocation27_spill] sm:$0xff] %v2991_v18 }
 0x11b   :  { %3830 = vst [vmem:[#allocation28_spill] sm:$0xff] %v2993_v24 }
 0x11e   :  { %v1118_v25 = vpop.f32.mrf.mxu2  ;;  %v827_v30 = vpop.f32.mrf.mxu0 }
 0x11f   :  { %v1161_v26 = vpop.f32.mrf.mxu3  ;;  %v870_v32 = vpop.f32.mrf.mxu1 }
 0x120   :  { %v2995_v29 = vadd.f32 %v1161_v26, %v1118_v25  ;;  %v2997_v33 = vadd.f32 %v870_v32, %v827_v30  ;;  %v1247_v25 = vmul.f32 %v2869_v7, %v2869_v7  ;;  %v1233_v26 = vmul.f32 %v2839_v50, %v2839_v50 }
 0x121   :  { %v1248_v30 = vmul.f32 %v2897_v23, %v2897_v23  ;;  %v1193_v32 = vadd.f32 %v2837_v47, %v2835_v44  ;;  %v1238_v47 = vmul.f32 %v2931_v55, %v2931_v55 }
 0x122   :  { %3831 = vst [vmem:[#allocation29_spill] sm:$0xff] %v2995_v29 }
 0x123   :  { %3832 = vst [vmem:[#allocation30_spill] sm:$0xff] %v2997_v33 }
 0x126   :  { %v1121_v35 = vpop.f32.mrf.mxu2  ;;  %v829_v38 = vpop.f32.mrf.mxu0 }
 0x127   :  { %v1164_v36 = vpop.f32.mrf.mxu3  ;;  %v872_v39 = vpop.f32.mrf.mxu1 }
 0x128   :  { %v2999_v37 = vadd.f32 %v1164_v36, %v1121_v35  ;;  %v3001_v41 = vadd.f32 %v872_v39, %v829_v38  ;;  %v1258_v35 = vadd.f32 %v1245_v13, %v1232_v21  ;;  %v1234_v36 = vmul.f32 %v2867_v4, %v2867_v4 }
 0x129   :  { %v1194_v38 = vadd.f32 %v2865_v63, %v2839_v50  ;;  %v1259_v39 = vadd.f32 %v1246_v20, %v1233_v26  ;;  %v1236_v13 = vmul.f32 %v2899_v28, %v2899_v28  ;;  %v1252_v20 = vmul.f32 %v2961_v14, %v2961_v14 }
 0x12a   :  { %3833 = vst [vmem:[#allocation31_spill] sm:$0xff] %v2999_v37  ;;  %v3079_v63 = vadd.f32 %v2929_v49, %v2903_v34 }
 0x12b   :  { %3834 = vst [vmem:[#allocation32_spill] sm:$0xff] %v3001_v41 }
 0x12e   :  { %v1123_v42 = vpop.f32.mrf.mxu2  ;;  %v832_v48 = vpop.f32.mrf.mxu0 }
 0x12f   :  { %v1166_v43 = vpop.f32.mrf.mxu3  ;;  %v875_v51 = vpop.f32.mrf.mxu1 }
 0x130   :  { %v3003_v45 = vadd.f32 %v1166_v43, %v1123_v42  ;;  %v3005_v53 = vadd.f32 %v875_v51, %v832_v48  ;;  %v1235_v42 = vmul.f32 %v2871_v10, %v2871_v10  ;;  %v1249_v43 = vmul.f32 %v2901_v31, %v2901_v31 }
 0x131   :  { %v1195_v48 = vadd.f32 %v2869_v7, %v2867_v4  ;;  %v1260_v51 = vadd.f32 %v1247_v25, %v1234_v36  ;;  %v1197_v25 = vadd.f32 %v2901_v31, %v2899_v28  ;;  %v1237_v36 = vmul.f32 %v2903_v34, %v2903_v34 }
 0x132   :  { %v1239_v31 = vmul.f32 %v2935_v61, %v2935_v61  ;;  %v3089_v28 = vadd.f32 %v2933_v58, %v2931_v55  ;;  %v1241_v34 = vmul.f32 %v2970_v27, %v2970_v27  ;;  %v1274_v55 = vmul.f32 %v3001_v41, %v3001_v41 }
 0x133   :  { %v1300_v1 = vmul.f32 %v3003_v45, %v3003_v45 }
 0x136   :  { %v1126_v54 = vpop.f32.mrf.mxu2  ;;  %v834_v62 = vpop.f32.mrf.mxu0 }
 0x137   :  { %v1169_v57 = vpop.f32.mrf.mxu3  ;;  %v877_v0 = vpop.f32.mrf.mxu1 }
 0x138   :  { %v3007_v59 = vadd.f32 %v1169_v57, %v1126_v54  ;;  %v3009_v2 = vadd.f32 %v877_v0, %v834_v62  ;;  %v1250_v54 = vmul.f32 %v2929_v49, %v2929_v49  ;;  %v1251_v57 = vmul.f32 %v2933_v58, %v2933_v58 }
 0x139   :  { %v1196_v62 = vadd.f32 %v2897_v23, %v2871_v10  ;;  %v1261_v0 = vadd.f32 %v1248_v30, %v1235_v42  ;;  %v1253_v30 = vmul.f32 %v2965_v22, %v2965_v22  ;;  %v1262_v23 = vadd.f32 %v1249_v43, %v1236_v13 }
 0x13a   :  { %v1254_v10 = vmul.f32 %v2975_v40, %v2975_v40  ;;  %v3085_v4 = vadd.f32 %v1250_v54, %v1237_v36  ;;  %v3091_v50 = vadd.f32 %v1251_v57, %v1238_v47  ;;  %v1240_v43 = vmul.f32 %v2963_v19, %v2963_v19 }
 0x13b   :  { %v3097_v13 = vadd.f32 %v2961_v14, %v2935_v61  ;;  %v3099_v49 = vadd.f32 %v1252_v20, %v1239_v31  ;;  %v1272_v54 = vmul.f32 %v2993_v24, %v2993_v24  ;;  %v3107_v36 = vadd.f32 %v2965_v22, %v2963_v19 }
 0x13c   :  { %v3109_v47 = vadd.f32 %v1253_v30, %v1240_v43  ;;  %v3113_v57 = vadd.f32 %v2975_v40, %v2970_v27  ;;  %v1242_v31 = vmul.f32 %v2977_v46, %v2977_v46  ;;  %v3117_v20 = vadd.f32 %v1254_v10, %v1241_v34 }
 0x13d   :  { %v3121_v14 = vadd.f32 %v2979_v52, %v2977_v46  ;;  %v1255_v58 = vmul.f32 %v2979_v52, %v2979_v52  ;;  %v1271_v30 = vmul.f32 %v2989_v15, %v2989_v15  ;;  %v3129_v43 = vmul.f32 %v2981_v56, %v2981_v56 }
 0x13e   :  { %v3011_v3 = vpop.f32.mrf.mxu2  ;;  %v3015_v8 = vpop.f32.mrf.mxu0  ;;  %v1207_v40 = vadd.f32 %v1194_v38, %v2993_v24  ;;  %v1298_v10 = vmul.f32 %v2995_v29, %v2995_v29  ;;  %v1273_v34 = vmul.f32 %v2997_v33, %v2997_v33  ;;  %v1206_v22 = vadd.f32 %v1193_v32, %v2989_v15 }
 0x13f   :  { %v3013_v6 = vpop.f32.mrf.mxu3  ;;  %v3017_v9 = vpop.f32.mrf.mxu1  ;;  %v1297_v52 = vmul.f32 %v2991_v18, %v2991_v18  ;;  %v1285_v46 = vadd.f32 %v1272_v54, %v1259_v39  ;;  %v1208_v38 = vadd.f32 %v1195_v48, %v2997_v33  ;;  %v1299_v24 = vmul.f32 %v2999_v37, %v2999_v37 }
 0x140   :  { %v1220_v61 = vadd.f32 %v1207_v40, %v2995_v29  ;;  %v3153_v44 = vadd.f32 %v1255_v58, %v1242_v31  ;;  %v1284_v39 = vadd.f32 %v1271_v30, %v1258_v35  ;;  %v1219_v54 = vadd.f32 %v1206_v22, %v2991_v18 }
 0x141   :  { %v1275_v40 = vmul.f32 %v3005_v53, %v3005_v53  ;;  %v1311_v29 = vadd.f32 %v1298_v10, %v1285_v46  ;;  %v1286_v48 = vadd.f32 %v1273_v34, %v1260_v51  ;;  %v1221_v33 = vadd.f32 %v1208_v38, %v2999_v37 }
 0x142   :  { %v1256_v58 = vmul.f32 %v2983_v60, %v2983_v60  ;;  %v1209_v35 = vadd.f32 %v1196_v62, %v3001_v41  ;;  %v1301_v22 = vmul.f32 %v3007_v59, %v3007_v59  ;;  %v1310_v31 = vadd.f32 %v1297_v52, %v1284_v39 }
 0x143   :  { %v1325_v46 = vsel %vm1323_vm0, %v1220_v61, 0.0  ;;  %v1312_v51 = vadd.f32 %v1299_v24, %v1286_v48  ;;  %v1287_v30 = vadd.f32 %v1274_v55, %v1261_v0  ;;  %v1210_v34 = vadd.f32 %v1197_v25, %v3005_v53 }
 0x144   :  { %v1222_v10 = vadd.f32 %v1209_v35, %v3003_v45  ;;  %v1288_v38 = vadd.f32 %v1275_v40, %v1262_v23  ;;  %v3175_v37 = vadd.f32 %v3013_v6, %v3011_v3  ;;  %v1324_v18 = vsel %vm1323_vm0, %v1219_v54, 0.0 }
 0x145   :  { %v1365_v62 = vsel %vm1323_vm0, %v1311_v29, 0.0  ;;  %v1327_v41 = vsel %vm1323_vm0, %v1221_v33, 0.0  ;;  %v1313_v52 = vadd.f32 %v1300_v1, %v1287_v30  ;;  %v1326_v39 = vadd.f32 %v1325_v46, %v1324_v18 }
 0x146   :  { %v3019_v11 = vpop.f32.mrf.mxu2  ;;  %v3025_v16 = vpop.f32.mrf.mxu0  ;;  %v1223_v61 = vadd.f32 %v1210_v34, %v3007_v59  ;;  %v1314_v55 = vadd.f32 %v1301_v22, %v1288_v38  ;;  %v1276_v24 = vmul.f32 %v3009_v2, %v3009_v2  ;;  %v1364_v25 = vsel %vm1323_vm0, %v1310_v31, 0.0 }
 0x147   :  { %v3021_v12 = vpop.f32.mrf.mxu3  ;;  %v3027_v17 = vpop.f32.mrf.mxu1  ;;  %v1367_v3 = vsel %vm1323_vm0, %v1312_v51, 0.0  ;;  %v1211_v6 = vadd.f32 %v3079_v63, %v3009_v2  ;;  %v3189_v29 = vadd.f32 %v3017_v9, %v3015_v8  ;;  %v1366_v33 = vadd.f32 %v1365_v62, %v1364_v25 }
 0x148   :  { %v1328_v54 = vadd.f32 %v1327_v41, %v1326_v39  ;;  %v1329_v40 = vsel %vm1323_vm0, %v1222_v10, 0.0  ;;  %v1302_v48 = vmul.f32 %v3175_v37, %v3175_v37  ;;  %v1369_v35 = vsel %vm1323_vm0, %v1313_v52, 0.0 }
 0x149   :  { %v1224_v22 = vadd.f32 %v1211_v6, %v3175_v37  ;;  %v3198_v63 = vadd.f32 %v3021_v12, %v3019_v11  ;;  %v3202_v8 = vadd.f32 %v3027_v17, %v3025_v16  ;;  %v1368_v9 = vadd.f32 %v1367_v3, %v1366_v33 }
 0x14a   :  { %v1331_v41 = vsel %vm1323_vm0, %v1223_v61, 0.0  ;;  %v1371_v31 = vsel %vm1323_vm0, %v1314_v55, 0.0  ;;  %v1289_v46 = vadd.f32 %v1276_v24, %v3085_v4  ;;  %v1212_v51 = vadd.f32 %v3089_v28, %v3189_v29 }
 0x14b   :  { %v1277_v30 = vmul.f32 %v3189_v29, %v3189_v29  ;;  %v3220_v16 = vadd.f32 %v1256_v58, %v3129_v43  ;;  %v1330_v17 = vadd.f32 %v1329_v40, %v1328_v54  ;;  %v1370_v10 = vadd.f32 %v1369_v35, %v1368_v9 }
 0x14c   :  { %v1315_v4 = vadd.f32 %v1302_v48, %v1289_v46  ;;  %v1333_v34 = vsel %vm1323_vm0, %v1224_v22, 0.0  ;;  %v1225_v28 = vadd.f32 %v1212_v51, %v3198_v63  ;;  %v1303_v38 = vmul.f32 %v3198_v63, %v3198_v63 }
 0x14d   :  { %v1372_v62 = vadd.f32 %v1371_v31, %v1370_v10  ;;  %v1290_v52 = vadd.f32 %v1277_v30, %v3091_v50  ;;  %v1213_v39 = vadd.f32 %v3097_v13, %v3202_v8 }
 0x14e   :  { %v3061_v21 = vpop.f32.mrf.mxu2  ;;  %v3073_v42 = vpop.f32.mrf.mxu0  ;;  %v1373_v25 = vsel %vm1323_vm0, %v1315_v4, 0.0  ;;  %v1335_v50 = vsel %vm1323_vm0, %v1225_v28, 0.0 }
 0x14f   :  { %v3063_v26 = vpop.f32.mrf.mxu3  ;;  %v3075_v7 = vpop.f32.mrf.mxu1  ;;  %v1316_v3 = vadd.f32 %v1303_v38, %v1290_v52  ;;  %v1374_v22 = vadd.f32 %v1373_v25, %v1372_v62 }
 0x150   :  { %v3213_v11 = vadd.f32 %v3063_v26, %v3061_v21  ;;  %v3217_v12 = vadd.f32 %v3075_v7, %v3073_v42  ;;  %v1278_v21 = vmul.f32 %v3202_v8, %v3202_v8  ;;  %v1332_v26 = vadd.f32 %v1331_v41, %v1330_v17 }
 0x151   :  { %v1375_v41 = vsel %vm1323_vm0, %v1316_v3, 0.0 }
 0x152   :  { %v1304_v61 = vmul.f32 %v3213_v11, %v3213_v11  ;;  %v1279_v55 = vmul.f32 %v3217_v12, %v3217_v12  ;;  %v1291_v13 = vadd.f32 %v1278_v21, %v3099_v49  ;;  %v1226_v6 = vadd.f32 %v1213_v39, %v3213_v11 }
 0x153   :  { %v1214_v33 = vadd.f32 %v3107_v36, %v3217_v12 }
 0x154   :  { %v1337_v31 = vsel %vm1323_vm0, %v1226_v6, 0.0 }
 0x156   :  { %v3139_v27 = vpop.f32.mrf.mxu2  ;;  %v3149_v32 = vpop.f32.mrf.mxu0 }
 0x157   :  { %v3141_v19 = vpop.f32.mrf.mxu3  ;;  %v3151_v15 = vpop.f32.mrf.mxu1 }
 0x158   :  { %v3230_v7 = vadd.f32 %v3141_v19, %v3139_v27  ;;  %v3234_v42 = vadd.f32 %v3151_v15, %v3149_v32  ;;  %v1334_v27 = vadd.f32 %v1333_v34, %v1332_v26 }
 0x15a   :  { %v1305_v54 = vmul.f32 %v3230_v7, %v3230_v7  ;;  %v1280_v40 = vmul.f32 %v3234_v42, %v3234_v42  ;;  %v1227_v49 = vadd.f32 %v1214_v33, %v3230_v7  ;;  %v1215_v48 = vadd.f32 %v3113_v57, %v3234_v42 }
 0x15b   :  { %v1336_v9 = vadd.f32 %v1335_v50, %v1334_v27 }
 0x15c   :  { %v1293_v51 = vadd.f32 %v1280_v40, %v3117_v20  ;;  %v1339_v20 = vsel %vm1323_vm0, %v1227_v49, 0.0 }
 0x15e   :  { %v1138_v0 = vpop.f32.mrf.mxu2  ;;  %v847_v1 = vpop.f32.mrf.mxu0 }
 0x15f   :  { %v1181_v23 = vpop.f32.mrf.mxu3  ;;  %v890_v18 = vpop.f32.mrf.mxu1 }
 0x160   :  { %v3244_v15 = vadd.f32 %v1181_v23, %v1138_v0  ;;  %v3246_v32 = vadd.f32 %v890_v18, %v847_v1  ;;  %v1317_v0 = vadd.f32 %v1304_v61, %v1291_v13  ;;  %v1292_v23 = vadd.f32 %v1279_v55, %v3109_v47  ;;  %v3835_v61 = vld [vmem:[#allocation25_spill] sm:$0xff]  ;;  %v3836_v13 = vld [vmem:[#allocation24_spill] sm:$0xff] }
 0x161   :  { %v2416_v47 = vmov 392.0   ;;  %v1257_v55 = vmul.f32 %v3835_v61, %v3835_v61  ;;  %v1244_v6 = vmul.f32 %v3836_v13, %v3836_v13  ;;  %v1205_v33 = vadd.f32 %v3835_v61, %v3836_v13 }
 0x162   :  { %v1306_v36 = vmul.f32 %v3244_v15, %v3244_v15  ;;  %v1281_v35 = vmul.f32 %v3246_v32, %v3246_v32  ;;  %2412 = vrcp.f32 %v2416_v47  ;;  %v1318_v46 = vadd.f32 %v1305_v54, %v1292_v23 }
 0x163   :  { %v1228_v30 = vadd.f32 %v1215_v48, %v3244_v15  ;;  %v1216_v10 = vadd.f32 %v3121_v14, %v3246_v32  ;;  %v1377_v26 = vsel %vm1323_vm0, %v1317_v0, 0.0 }
 0x164   :  { %v1319_v62 = vadd.f32 %v1306_v36, %v1293_v51  ;;  %v1379_v27 = vsel %vm1323_vm0, %v1318_v46, 0.0  ;;  %v1270_v36 = vadd.f32 %v1257_v55, %v1244_v6 }
 0x166   :  { %v1141_v43 = vpop.f32.mrf.mxu2  ;;  %v849_v24 = vpop.f32.mrf.mxu0  ;;  %v1381_v0 = vsel %vm1323_vm0, %v1319_v62, 0.0 }
 0x167   :  { %v1184_v58 = vpop.f32.mrf.mxu3  ;;  %v892_v19 = vpop.f32.mrf.mxu1 }
 0x168   :  { %v3258_v1 = vadd.f32 %v1184_v58, %v1141_v43  ;;  %v3260_v18 = vadd.f32 %v892_v19, %v849_v24  ;;  %v1294_v43 = vadd.f32 %v1281_v35, %v3153_v44  ;;  %v1376_v24 = vadd.f32 %v1375_v41, %v1374_v22  ;;  %v2413_v25 = vpop.eup %2412 }
 0x169   :  { %v1338_v19 = vadd.f32 %v1337_v31, %v1336_v9  ;;  %v1341_v44 = vsel %vm1323_vm0, %v1228_v30, 0.0  ;;  %v1357_v41 = vmul.f32 392.0, %v2413_v25  ;;  %vm1361_vm2 = vweird.f32 %v2413_v25 }
 0x16a   :  { %v1307_v4 = vmul.f32 %v3258_v1, %v3258_v1  ;;  %v1282_v34 = vmul.f32 %v3260_v18, %v3260_v18  ;;  %v1229_v58 = vadd.f32 %v1216_v10, %v3258_v1  ;;  %v1217_v14 = vadd.f32 %v3163_v5, %v3260_v18 }
 0x16b   :  { %v1378_v54 = vadd.f32 %v1377_v26, %v1376_v24  ;;  %v1340_v40 = vadd.f32 %v1339_v20, %v1338_v19 }
 0x16c   :  { %v1320_v3 = vadd.f32 %v1307_v4, %v1294_v43  ;;  %v1295_v50 = vadd.f32 %v1282_v34, %v3220_v16  ;;  %v1343_v23 = vsel %vm1323_vm0, %v1229_v58, 0.0  ;;  %v1358_v58 = vsub.f32 1.0, %v1357_v41 }
 0x16d   :  { %v1380_v16 = vadd.f32 %v1379_v27, %v1378_v54  ;;  %v1342_v35 = vadd.f32 %v1341_v44, %v1340_v40 }
 0x16e   :  { %v1143_v57 = vpop.f32.mrf.mxu2  ;;  %v852_v38 = vpop.f32.mrf.mxu0  ;;  %v1383_v47 = vsel %vm1323_vm0, %v1320_v3, 0.0  ;;  %v1359_v3 = vmul.f32 %v2413_v25, %v1358_v58 }
 0x16f   :  { %v1186_v17 = vpop.f32.mrf.mxu3  ;;  %v895_v21 = vpop.f32.mrf.mxu1  ;;  %v1344_v10 = vadd.f32 %v1343_v23, %v1342_v35 }
 0x170   :  { %v3279_v28 = vadd.f32 %v1186_v17, %v1143_v57  ;;  %v3289_v39 = vadd.f32 %v895_v21, %v852_v38  ;;  %v1382_v17 = vadd.f32 %v1381_v0, %v1380_v16  ;;  %v1360_v54 = vadd.f32 %v2413_v25, %v1359_v3 }
 0x172   :  { %v1308_v52 = vmul.f32 %v3279_v28, %v3279_v28  ;;  %v1230_v5 = vadd.f32 %v1217_v14, %v3279_v28  ;;  %v1283_v48 = vmul.f32 %v3289_v39, %v3289_v39  ;;  %v1218_v46 = vadd.f32 %v1205_v33, %v3289_v39 }
 0x173   :  { %v1384_v26 = vadd.f32 %v1383_v47, %v1382_v17 }
 0x174   :  { %v1321_v49 = vadd.f32 %v1308_v52, %v1295_v50  ;;  %v1345_v31 = vsel %vm1323_vm0, %v1230_v5, 0.0  ;;  %v1296_v34 = vadd.f32 %v1283_v48, %v1270_v36  ;;  %v1362_v48 = vsel %vm1361_vm2, %v2413_v25, %v1360_v54 }
 0x175   :  { %v1346_v20 = vadd.f32 %v1345_v31, %v1344_v10 }
 0x176   :  { %v1146_v22 = vpop.f32.mrf.mxu2  ;;  %v854_v30 = vpop.f32.mrf.mxu0  ;;  %v1385_v4 = vsel %vm1323_vm0, %v1321_v49, 0.0 }
 0x177   :  { %v1189_v9 = vpop.f32.mrf.mxu3  ;;  %v897_v57 = vpop.f32.mrf.mxu1  ;;  %v1386_v14 = vadd.f32 %v1385_v4, %v1384_v26  ;;  %v1398_v4 = vld [vmem:[%s3770_s2] sm:$0x1]  ;;  %s2417_s2 = smov 32  }
 0x178   :  { %v1190_v51 = vadd.f32 %v1189_v9, %v1146_v22 }
 0x17a   :  { %v1231_v38 = vadd.f32 %v1218_v46, %v1190_v51  ;;  %v1309_v21 = vmul.f32 %v1190_v51, %v1190_v51 }
 0x17c   :  { %v1322_v62 = vadd.f32 %v1309_v21, %v1296_v34  ;;  %v1348_v43 = vsel %vm1347_vm1, %v1231_v38, 0.0 }
 0x17d   :  { %v1349_v52 = vadd.f32 %v1348_v43, %v1346_v20 }
 0x17e   :  { %v1387_v55 = vsel %vm1347_vm1, %v1322_v62, 0.0  ;;  %v1148_v27 = vpop.f32.mrf.mxu2  ;;  %v1411_v62 = vld [vmem:[%s3771_s3] sm:$0x1] }
 0x17f   :  { %v1350_v24 = vrot.slane %v1349_v52, 4  ;;  %v1388_v19 = vadd.f32 %v1387_v55, %v1386_v14  ;;  %v1191_v44 = vpop.f32.mrf.mxu3 }
 0x180   :  { %v3840_v44 = vld [vmem:[#allocation6_spill] sm:$0xff] }
 0x181   :  { %v1351_v50 = vadd.f32 %v1350_v24, %v1349_v52  ;;  %v1389_v5 = vrot.slane %v1388_v19, 4  ;;  %v3837_v52 = vld [vmem:[#allocation2_spill] sm:$0xff]  ;;  %v3838_v24 = vld [vmem:[#allocation4_spill] sm:$0xff] }
 0x183   :  { %v1352_v6 = vrot.slane %v1351_v50, 2  ;;  %v1390_v33 = vadd.f32 %v1389_v5, %v1388_v19 }
 0x185   :  { %v1353_v40 = vadd.f32 %v1352_v6, %v1351_v50  ;;  %v1391_v0 = vrot.slane %v1390_v33, 2  ;;  %v3841_v50 = vld [vmem:[#allocation8_spill] sm:$0xff] }
 0x187   :  { %v1354_v23 = vrot.slane %v1353_v40, 1  ;;  %v1392_v49 = vadd.f32 %v1391_v0, %v1390_v33  ;;  %v3843_v33 = vld [vmem:[#allocation14_spill] sm:$0xff] }
 0x189   :  { %v1355_v36 = vadd.f32 %v1354_v23, %v1353_v40  ;;  %v1393_v16 = vrot.slane %v1392_v49, 1  ;;  %v3844_v40 = vld [vmem:[#allocation16_spill] sm:$0xff]  ;;  %v3845_v23 = vld [vmem:[#allocation18_spill] sm:$0xff] }
 0x18b   :  { %v1363_v35 = vmul.f32 %v1362_v48, %v1355_v36  ;;  %v1394_v22 = vadd.f32 %v1393_v16, %v1392_v49  ;;  %v3846_v16 = vld [vmem:[#allocation20_spill] sm:$0xff] }
 0x18d   :  { %v1395_v9 = vmul.f32 %v1394_v22, %v1362_v48  ;;  %v1396_v41 = vmul.f32 %v1363_v35, %v1363_v35  ;;  %v3847_v22 = vld [vmem:[#allocation22_spill] sm:$0xff] }
 0x18f   :  { %v1397_v47 = vsub.f32 %v1395_v9, %v1396_v41 }
 0x191   :  { %v1399_v31 = vadd.f32 1e-05, %v1397_v47  ;;  %v3848_v47 = vld [vmem:[#allocation5_spill] sm:$0xff] }
 0x193   :  { %2414 = vrsqrt.f32 %v1399_v31  ;;  %vm1406_vm4 = vweird.f32 %v1399_v31 }
 0x199   :  { %v2415_v46 = vpop.eup %2414 }
 0x19a   :  { %v1401_v30 = vmul.f32 %v2415_v46, %v1399_v31  ;;  %vm1407_vm3 = vweird.f32 %v2415_v46 }
 0x19b   :  { %vm1408_vm5 = vmor %vm1406_vm4, %vm1407_vm3 }
 0x19c   :  { %v1402_v57 = vmul.f32 %v2415_v46, %v1401_v30 }
 0x19e   :  { %v1403_v17 = vmul.f32 0.5, %v1402_v57  ;;  %v3850_v57 = vld [vmem:[#allocation13_spill] sm:$0xff] }
 0x1a0   :  { %v1404_v10 = vsub.f32 1.5, %v1403_v17 }
 0x1a2   :  { %v1405_v25 = vmul.f32 %v2415_v46, %v1404_v10 }
 0x1a4   :  { %v1409_v34 = vsel %vm1408_vm5, %v2415_v46, %v1405_v25  ;;  %v3849_v46 = vld [vmem:[#allocation9_spill] sm:$0xff] }
 0x1a5   :  { %v1410_v38 = vmul.f32 %v1409_v34, %v1398_v4 }
 0x1a7   :  { %v3312_v21 = vperm.slane %v1410_v38, 0  ;;  %v1412_v20 = vmul.f32 %v1410_v38, %v1363_v35  ;;  %v3851_v38 = vld [vmem:[#allocation11_spill] sm:$0xff] }
 0x1a9   :  { %v3315_v26 = vmul.f32 %v3312_v21, %v1190_v51  ;;  %v3322_v43 = vmul.f32 %v3312_v21, %v3289_v39  ;;  %v1413_v58 = vsub.f32 %v1411_v62, %v1412_v20  ;;  %v1417_v55 = vmul.f32 %v3312_v21, %v3837_v52  ;;  %v3839_v51 = vld [vmem:[#allocation10_spill] sm:$0xff]  ;;  %v3842_v39 = vld [vmem:[#allocation12_spill] sm:$0xff]  ;;  %v3852_v20 = vld [vmem:[#allocation7_spill] sm:$0xff] }
 0x1aa   :  { %v1418_v19 = vmul.f32 %v3312_v21, %v3838_v24  ;;  %v1421_v27 = vmul.f32 %v3312_v21, %v3839_v51  ;;  %v1419_v3 = vmul.f32 %v3312_v21, %v3840_v44  ;;  %v1420_v5 = vmul.f32 %v3312_v21, %v3841_v50  ;;  %v3853_v24 = vld [vmem:[#allocation3_spill] sm:$0xff] }
 0x1ab   :  { %v3324_v14 = vperm.slane %v1413_v58, 0  ;;  %v1422_v6 = vmul.f32 %v3312_v21, %v3842_v39  ;;  %v1423_v54 = vmul.f32 %v3312_v21, %v3843_v33  ;;  %v1424_v0 = vmul.f32 %v3312_v21, %v3844_v40 }
 0x1ac   :  { %v1425_v49 = vmul.f32 %v3312_v21, %v3845_v23  ;;  %v1426_v35 = vmul.f32 %v3312_v21, %v3846_v16  ;;  %v1427_v9 = vmul.f32 %v3312_v21, %v3847_v22  ;;  %v1428_v41 = vmul.f32 %v3312_v21, %v2981_v56 }
 0x1ad   :  { %v1433_v48 = vadd.f32 %v3324_v14, %v1417_v55  ;;  %v1437_v36 = vadd.f32 %v3324_v14, %v1421_v27  ;;  %v1488_v31 = vmul.f32 %v3312_v21, %v3848_v47  ;;  %v1490_v30 = vmul.f32 %v3312_v21, %v3849_v46 }
 0x1ae   :  { %v1492_v17 = vmul.f32 %v3312_v21, %v3850_v57  ;;  %v1434_v10 = vadd.f32 %v3324_v14, %v1418_v19  ;;  %v1435_v4 = vadd.f32 %v3324_v14, %v1419_v3  ;;  %v1436_v25 = vadd.f32 %v3324_v14, %v1420_v5 }
 0x1af   :  { %v1438_v34 = vadd.f32 %v3324_v14, %v1422_v6  ;;  %v1491_v56 = vmul.f32 %v3312_v21, %v3851_v38  ;;  %v1489_v62 = vmul.f32 %v3312_v21, %v3852_v20  ;;  %v1439_v58 = vadd.f32 %v3324_v14, %v1423_v54 }
 0x1b0   :  { %v1446_v52 = vmax.f32 %v1433_v48, 0.0  ;;  %v1450_v55 = vmax.f32 %v1437_v36, 0.0  ;;  %v1487_v51 = vmul.f32 %v3312_v21, %v3853_v24  ;;  %v1440_v19 = vadd.f32 %v3324_v14, %v1424_v0 }
 0x1b1   :  { %v1441_v27 = vadd.f32 %v3324_v14, %v1425_v49  ;;  %v1504_v44 = vadd.f32 %v1491_v56, %v3324_v14  ;;  %v1502_v3 = vadd.f32 %v1489_v62, %v3324_v14  ;;  %v1442_v50 = vadd.f32 %v3324_v14, %v1426_v35 }
 0x1b2   :  { %v1443_v5 = vadd.f32 %v3324_v14, %v1427_v9  ;;  %v1447_v39 = vmax.f32 %v1434_v10, 0.0  ;;  %v1500_v6 = vadd.f32 %v1487_v51, %v3324_v14  ;;  %v1448_v33 = vmax.f32 %v1435_v4, 0.0 }
 0x1b3   :  { %v1449_v54 = vmax.f32 %v1436_v25, 0.0  ;;  %v1517_v40 = vmax.f32 %v1504_v44, 0.0  ;;  %v1515_v23 = vmax.f32 %v1502_v3, 0.0  ;;  %v1451_v48 = vmax.f32 %v1438_v34, 0.0  ;;  %v3857_v44 = vld [vmem:[#allocation21_spill] sm:$0xff] }
 0x1b4   :  { %v1459_v36 = vpack.c.bf16 %v1446_v52, %v1446_v52  ;;  %v1463_v0 = vpack.c.bf16 %v1450_v55, %v1450_v55  ;;  %v1513_v16 = vmax.f32 %v1500_v6, 0.0  ;;  %v1505_v47 = vadd.f32 %v1492_v17, %v3324_v14 }
 0x1b5   :  { %v1530_v49 = vpack.c.bf16 %v1517_v40, %v1517_v40  ;;  %v1528_v22 = vpack.c.bf16 %v1515_v23, %v1515_v23  ;;  %v1503_v46 = vadd.f32 %v1490_v30, %v3324_v14  ;;  %v1452_v35 = vmax.f32 %v1439_v58, 0.0 }
 0x1b6   :  { %v1460_v57 = vpack.c.bf16 %v1447_v39, %v1447_v39  ;;  %v1526_v9 = vpack.c.bf16 %v1513_v16, %v1513_v16  ;;  %v1501_v10 = vadd.f32 %v1488_v31, %v3324_v14  ;;  %v1444_v4 = vadd.f32 %v3324_v14, %v1428_v41  ;;  %1477 = vst.msk [vmem:[%s3772_s4 + $0x10] sm:$0xf] %vm1472_vm6, %v1463_v0  ;;  %v3854_v41 = vld [vmem:[#allocation15_spill] sm:$0xff] }
 0x1b7   :  { %v1453_v25 = vmax.f32 %v1440_v19, 0.0  ;;  %v1461_v38 = vpack.c.bf16 %v1448_v33, %v1448_v33  ;;  %1560 = vrot.lane.b32.xlu2 %v1530_v49, %s2417_s2  ;;  %1556 = vrot.lane.b32.xlu1 %v1528_v22, %s2417_s2  ;;  %v1429_v17 = vmul.f32 %v3312_v21, %v3836_v13  ;;  %v1454_v34 = vmax.f32 %v1441_v27, 0.0  ;;  %1473 = vst.msk [vmem:[%s3772_s4] sm:$0xf] %vm1472_vm6, %v1459_v36  ;;  %v3855_v13 = vld [vmem:[#allocation17_spill] sm:$0xff]  ;;  %v3856_v19 = vld [vmem:[#allocation19_spill] sm:$0xff] }
 0x1b8   :  { %v1455_v30 = vmax.f32 %v1442_v50, 0.0  ;;  %v1462_v56 = vpack.c.bf16 %v1449_v54, %v1449_v54  ;;  %1552 = vrot.lane.b32.xlu0 %v1526_v9, %s2417_s2  ;;  %v1493_v31 = vmul.f32 %v3312_v21, %v3854_v41  ;;  %v1464_v20 = vpack.c.bf16 %v1451_v48, %v1451_v48  ;;  %1474 = vst.msk [vmem:[%s3772_s4 + $0x4] sm:$0xf] %vm1472_vm6, %v1460_v57 }
 0x1b9   :  { %v1518_v62 = vmax.f32 %v1505_v47, 0.0  ;;  %v1516_v58 = vmax.f32 %v1503_v46, 0.0  ;;  %v1494_v52 = vmul.f32 %v3312_v21, %v3855_v13  ;;  %v1456_v55 = vmax.f32 %v1443_v5, 0.0  ;;  %1475 = vst.msk [vmem:[%s3772_s4 + $0x8] sm:$0xf] %vm1472_vm6, %v1461_v38  ;;  %v3858_v5 = vld [vmem:[#allocation23_spill] sm:$0xff] }
 0x1ba   :  { %v1465_v24 = vpack.c.bf16 %v1452_v35, %v1452_v35  ;;  %v1514_v51 = vmax.f32 %v1501_v10, 0.0  ;;  %v1495_v27 = vmul.f32 %v3312_v21, %v3856_v19  ;;  %v1496_v3 = vmul.f32 %v3312_v21, %v3857_v44  ;;  %1476 = vst.msk [vmem:[%s3772_s4 + $0xc] sm:$0xf] %vm1472_vm6, %v1462_v56  ;;  %v3859_v47 = vld [vmem:[#allocation27_spill] sm:$0xff] }
 0x1bb   :  { %v1457_v50 = vmax.f32 %v1444_v4, 0.0  ;;  %v1466_v39 = vpack.c.bf16 %v1453_v25, %v1453_v25  ;;  %v1497_v6 = vmul.f32 %v3312_v21, %v3858_v5  ;;  %v1498_v33 = vmul.f32 %v3312_v21, %v2983_v60  ;;  %1478 = vst.msk [vmem:[%s3772_s4 + $0x14] sm:$0xf] %vm1472_vm6, %v1464_v20  ;;  %v3861_v10 = vld [vmem:[#allocation31_spill] sm:$0xff] }
 0x1bc   :  { %v1467_v54 = vpack.c.bf16 %v1454_v34, %v1454_v34  ;;  %v1468_v40 = vpack.c.bf16 %v1455_v30, %v1455_v30  ;;  %v1531_v23 = vpack.c.bf16 %v1518_v62, %v1518_v62  ;;  %v1529_v48 = vpack.c.bf16 %v1516_v58, %v1516_v58  ;;  %1479 = vst.msk [vmem:[%s3772_s4 + $0x18] sm:$0xf] %vm1472_vm6, %v1465_v24 }
 0x1bd   :  { %v1508_v36 = vadd.f32 %v1495_v27, %v3324_v14  ;;  %v1507_v0 = vadd.f32 %v1494_v52, %v3324_v14  ;;  %v1617_v60 = vmul.f32 %v3312_v21, %v3260_v18  ;;  %v1469_v16 = vpack.c.bf16 %v1456_v55, %v1456_v55  ;;  %1480 = vst.msk [vmem:[%s3772_s4 + $0x1c] sm:$0xf] %vm1472_vm6, %v1466_v39  ;;  %v3860_v18 = vld [vmem:[#allocation29_spill] sm:$0xff] }
 0x1be   :  { %v1527_v49 = vpack.c.bf16 %v1514_v51, %v1514_v51  ;;  %v1506_v22 = vadd.f32 %v1493_v31, %v3324_v14  ;;  %v1725_v46 = vmul.f32 %v3312_v21, %v3859_v47  ;;  %v1445_v35 = vadd.f32 %v3324_v14, %v1429_v17  ;;  %1481 = vst.msk [vmem:[%s3772_s4 + $0x20] sm:$0xf] %vm1472_vm6, %v1467_v54 }
 0x1bf   :  { %v1470_v57 = vpack.c.bf16 %v1457_v50, %v1457_v50  ;;  %1562 = vrot.lane.b32.xlu2 %v1531_v23, %s2417_s2  ;;  %1558 = vrot.lane.b32.xlu1 %v1529_v48, %s2417_s2  ;;  %v1726_v9 = vmul.f32 %v3312_v21, %v3860_v18  ;;  %v1727_v4 = vmul.f32 %v3312_v21, %v3861_v10  ;;  %v1521_v34 = vmax.f32 %v1508_v36, 0.0  ;;  %v3862_v48 = vld [vmem:[#allocation26_spill] sm:$0xff] }
 0x1c0   :  { %v1728_v25 = vmul.f32 %v3312_v21, %v3003_v45  ;;  %1554 = vrot.lane.b32.xlu0 %v1527_v49, %s2417_s2  ;;  %v1730_v38 = vmul.f32 %v3312_v21, %v3175_v37  ;;  %v1731_v17 = vmul.f32 %v3312_v21, %v3198_v63  ;;  %v1520_v30 = vmax.f32 %v1507_v0, 0.0  ;;  %1482 = vst.msk [vmem:[%s3772_s4 + $0x24] sm:$0xf] %vm1472_vm6, %v1468_v40  ;;  %v3863_v0 = vld [vmem:[#allocation28_spill] sm:$0xff] }
 0x1c1   :  { %v1519_v45 = vmax.f32 %v1506_v22, 0.0  ;;  %v3459_v56 = vadd.f32 %v1725_v46, %v3324_v14  ;;  %v3463_v41 = vadd.f32 %v3322_v43, %v3324_v14  ;;  %v3466_v37 = vadd.f32 %v1617_v60, %v3324_v14  ;;  %1483 = vst.msk [vmem:[%s3772_s4 + $0x28] sm:$0xf] %vm1472_vm6, %v1469_v16 }
 0x1c2   :  { %v1458_v63 = vmax.f32 %v1445_v35, 0.0  ;;  %v3473_v31 = vadd.f32 %v1728_v25, %v3324_v14  ;;  %v3476_v20 = vadd.f32 %v1727_v4, %v3324_v14  ;;  %v3479_v62 = vadd.f32 %v1726_v9, %v3324_v14  ;;  %1484 = vst.msk [vmem:[%s3772_s4 + $0x2c] sm:$0xf] %vm1472_vm6, %v1470_v57  ;;  %v3864_v9 = vld [vmem:[#allocation32_spill] sm:$0xff]  ;;  %v3865_v25 = vld [vmem:[#allocation30_spill] sm:$0xff] }
 0x1c3   :  { %v1729_v43 = vmul.f32 %v3312_v21, %v3007_v59  ;;  %v1732_v58 = vmul.f32 %v3312_v21, %v3213_v11  ;;  %v1511_v13 = vadd.f32 %v1498_v33, %v3324_v14  ;;  %v3491_v52 = vadd.f32 %v1731_v17, %v3324_v14 }
 0x1c4   :  { %v1534_v55 = vpack.c.bf16 %v1521_v34, %v1521_v34  ;;  %v1533_v24 = vpack.c.bf16 %v1520_v30, %v1520_v30  ;;  %v1510_v51 = vadd.f32 %v1497_v6, %v3324_v14  ;;  %v3495_v19 = vadd.f32 %v1730_v38, %v3324_v14 }
 0x1c5   :  { %v1733_v27 = vmul.f32 %v3312_v21, %v3230_v7  ;;  %v1734_v59 = vmul.f32 %v3312_v21, %v3244_v15  ;;  %v1532_v44 = vpack.c.bf16 %v1519_v45, %v1519_v45  ;;  %v1509_v11 = vadd.f32 %v1496_v3, %v3324_v14 }
 0x1c6   :  { %v1735_v50 = vmul.f32 %v3312_v21, %v3258_v1  ;;  %v1736_v39 = vmul.f32 %v3312_v21, %v3279_v28  ;;  %v1471_v5 = vpack.c.bf16 %v1458_v63, %v1458_v63  ;;  %v1524_v7 = vmax.f32 %v1511_v13, 0.0 }
 0x1c7   :  { %1568 = vrot.lane.b32.xlu2 %v1534_v55, %s2417_s2  ;;  %1566 = vrot.lane.b32.xlu1 %v1533_v24, %s2417_s2  ;;  %v3510_v6 = vadd.f32 %v1729_v43, %v3324_v14  ;;  %v3513_v15 = vadd.f32 %v1734_v59, %v3324_v14  ;;  %v3516_v3 = vadd.f32 %v1733_v27, %v3324_v14  ;;  %v1523_v1 = vmax.f32 %v1510_v51, 0.0 }
 0x1c8   :  { %1564 = vrot.lane.b32.xlu0 %v1532_v44, %s2417_s2  ;;  %v3519_v28 = vadd.f32 %v1732_v58, %v3324_v14  ;;  %v3523_v33 = vadd.f32 %v3315_v26, %v3324_v14  ;;  %v3526_v54 = vadd.f32 %v1736_v39, %v3324_v14  ;;  %v1522_v40 = vmax.f32 %v1509_v11, 0.0  ;;  %1486 = vst.msk [vmem:[%s3772_s4 + $0x30] sm:$0x1] %vm1485_vm7, %v1471_v5 }
 0x1c9   :  { %v3529_v23 = vadd.f32 %v1735_v50, %v3324_v14  ;;  %v1606_v36 = vmul.f32 %v3312_v21, %v3862_v48  ;;  %v1607_v60 = vmul.f32 %v3312_v21, %v3863_v0  ;;  %v1499_v16 = vmul.f32 %v3312_v21, %v3835_v61 }
 0x1ca   :  { %v1537_v26 = vpack.c.bf16 %v1524_v7, %v1524_v7  ;;  %v1536_v49 = vpack.c.bf16 %v1523_v1, %v1523_v1  ;;  %v1535_v46 = vpack.c.bf16 %v1522_v40, %v1522_v40  ;;  %v1609_v10 = vmul.f32 %v3312_v21, %v3864_v9 }
 0x1cb   :  { %v1620_v22 = vadd.f32 %v1607_v60, %v3324_v14  ;;  %v1619_v47 = vadd.f32 %v1606_v36, %v3324_v14  ;;  %v1512_v35 = vadd.f32 %v1499_v16, %v3324_v14  ;;  %v1610_v4 = vmul.f32 %v3312_v21, %v3005_v53 }
 0x1cc   :  { %v1608_v38 = vmul.f32 %v3312_v21, %v3865_v25  ;;  %v1622_v45 = vadd.f32 %v1609_v10, %v3324_v14  ;;  %v1612_v55 = vmul.f32 %v3312_v21, %v3189_v29  ;;  %v1613_v24 = vmul.f32 %v3312_v21, %v3202_v8 }
 0x1cd   :  { %v1633_v61 = vmax.f32 %v1620_v22, 0.0  ;;  %v1632_v57 = vmax.f32 %v1619_v47, 0.0  ;;  %v1525_v18 = vmax.f32 %v1512_v35, 0.0  ;;  %v1623_v30 = vadd.f32 %v1610_v4, %v3324_v14 }
 0x1ce   :  { %v1621_v43 = vadd.f32 %v1608_v38, %v3324_v14  ;;  %v1635_v58 = vmax.f32 %v1622_v45, 0.0  ;;  %v1611_v51 = vmul.f32 %v3312_v21, %v3009_v2  ;;  %v1626_v44 = vadd.f32 %v1613_v24, %v3324_v14 }
 0x1cf   :  { %1574 = vrot.lane.b32.xlu2 %v1537_v26, %s2417_s2  ;;  %1572 = vrot.lane.b32.xlu1 %v1536_v49, %s2417_s2  ;;  %v1646_v17 = vpack.c.bf16 %v1633_v61, %v1633_v61  ;;  %v1645_v34 = vpack.c.bf16 %v1632_v57, %v1632_v57  ;;  %v1538_v63 = vpack.c.bf16 %v1525_v18, %v1525_v18  ;;  %v1636_v53 = vmax.f32 %v1623_v30, 0.0 }
 0x1d0   :  { %1570 = vrot.lane.b32.xlu0 %v1535_v46, %s2417_s2  ;;  %v1634_v13 = vmax.f32 %v1621_v43, 0.0  ;;  %v1648_v59 = vpack.c.bf16 %v1635_v58, %v1635_v58  ;;  %v1625_v11 = vadd.f32 %v1612_v55, %v3324_v14  ;;  %v1624_v39 = vadd.f32 %v1611_v51, %v3324_v14 }
 0x1d1   :  { %v1649_v27 = vpack.c.bf16 %v1636_v53, %v1636_v53  ;;  %v1639_v29 = vmax.f32 %v1626_v44, 0.0  ;;  %v1615_v2 = vmul.f32 %v3312_v21, %v3234_v42  ;;  %v1616_v7 = vmul.f32 %v3312_v21, %v3246_v32 }
 0x1d2   :  { %v1647_v50 = vpack.c.bf16 %v1634_v13, %v1634_v13  ;;  %v1638_v8 = vmax.f32 %v1625_v11, 0.0  ;;  %v1637_v5 = vmax.f32 %v1624_v39, 0.0  ;;  %v1614_v1 = vmul.f32 %v3312_v21, %v3217_v12 }
 0x1d3   :  { %v1652_v40 = vpack.c.bf16 %v1639_v29, %v1639_v29  ;;  %v1629_v36 = vadd.f32 %v1616_v7, %v3324_v14  ;;  %v1628_v0 = vadd.f32 %v1615_v2, %v3324_v14  ;;  %v1644_v22 = vmax.f32 %v3463_v41, 0.0 }
 0x1d4   :  { %v1651_v48 = vpack.c.bf16 %v1638_v8, %v1638_v8  ;;  %v1650_v60 = vpack.c.bf16 %v1637_v5, %v1637_v5  ;;  %v1627_v16 = vadd.f32 %v1614_v1, %v3324_v14  ;;  %v1751_v14 = vmax.f32 %v3459_v56, 0.0 }
 0x1d5   :  { %v1642_v42 = vmax.f32 %v1629_v36, 0.0  ;;  %v1641_v32 = vmax.f32 %v1628_v0, 0.0  ;;  %v1643_v47 = vmax.f32 %v3466_v37, 0.0  ;;  %v1657_v35 = vpack.c.bf16 %v1644_v22, %v1644_v22 }
 0x1d6   :  { %v1640_v26 = vmax.f32 %v1627_v16, 0.0  ;;  %v1764_v46 = vpack.c.bf16 %v1751_v14, %v1751_v14  ;;  %v1754_v57 = vmax.f32 %v3473_v31, 0.0  ;;  %v1753_v18 = vmax.f32 %v3476_v20, 0.0 }
 0x1d7   :  { %1673 = vrot.lane.b32.xlu2 %v1646_v17, %s2418_s26  ;;  %1671 = vrot.lane.b32.xlu1 %v1645_v34, %s2418_s26  ;;  %v1655_v49 = vpack.c.bf16 %v1642_v42, %v1642_v42  ;;  %v1654_v12 = vpack.c.bf16 %v1641_v32, %v1641_v32  ;;  %v1656_v61 = vpack.c.bf16 %v1643_v47, %v1643_v47  ;;  %v1752_v56 = vmax.f32 %v3479_v62, 0.0 }
 0x1d8   :  { %1576 = vrot.lane.b32.xlu0 %v1538_v63, %s2417_s2  ;;  %v1653_v21 = vpack.c.bf16 %v1640_v26, %v1640_v26  ;;  %v1767_v9 = vpack.c.bf16 %v1754_v57, %v1754_v57  ;;  %v1766_v41 = vpack.c.bf16 %v1753_v18, %v1753_v18  ;;  %v1757_v37 = vmax.f32 %v3491_v52, 0.0 }
 0x1d9   :  { %v1765_v10 = vpack.c.bf16 %v1752_v56, %v1752_v56  ;;  %v1756_v4 = vmax.f32 %v3495_v19, 0.0  ;;  %v1755_v25 = vmax.f32 %v3510_v6, 0.0  ;;  %v1760_v62 = vmax.f32 %v3513_v15, 0.0 }
 0x1da   :  { %v1770_v31 = vpack.c.bf16 %v1757_v37, %v1757_v37  ;;  %v1759_v17 = vmax.f32 %v3516_v3, 0.0  ;;  %v1758_v34 = vmax.f32 %v3519_v28, 0.0  ;;  %v1763_v45 = vmax.f32 %v3523_v33, 0.0 }
 0x1db   :  { %v1769_v38 = vpack.c.bf16 %v1756_v4, %v1756_v4  ;;  %v1768_v20 = vpack.c.bf16 %v1755_v25, %v1755_v25  ;;  %v1773_v52 = vpack.c.bf16 %v1760_v62, %v1760_v62  ;;  %v1762_v63 = vmax.f32 %v3526_v54, 0.0 }
 0x1dc   :  { %v1772_v30 = vpack.c.bf16 %v1759_v17, %v1759_v17  ;;  %v1771_v19 = vpack.c.bf16 %v1758_v34, %v1758_v34  ;;  %v1761_v15 = vmax.f32 %v3529_v23, 0.0  ;;  %v1776_v3 = vpack.c.bf16 %v1763_v45, %v1763_v45 }
 0x1dd   :  { %v1775_v28 = vpack.c.bf16 %v1762_v63, %v1762_v63 }
 0x1de   :  { %v1774_v43 = vpack.c.bf16 %v1761_v15, %v1761_v15 }
 0x1df   :  { %1679 = vrot.lane.b32.xlu2 %v1649_v27, %s2418_s26  ;;  %1677 = vrot.lane.b32.xlu1 %v1648_v59, %s2418_s26 }
 0x1e0   :  { %1675 = vrot.lane.b32.xlu0 %v1647_v50, %s2418_s26 }
 0x1e7   :  { %1685 = vrot.lane.b32.xlu2 %v1652_v40, %s2418_s26  ;;  %1683 = vrot.lane.b32.xlu1 %v1651_v48, %s2418_s26 }
 0x1e8   :  { %1681 = vrot.lane.b32.xlu0 %v1650_v60, %s2418_s26 }
 0x1ef   :  { %1691 = vrot.lane.b32.xlu2 %v1655_v49, %s2418_s26  ;;  %1689 = vrot.lane.b32.xlu1 %v1654_v12, %s2418_s26 }
 0x1f0   :  { %1687 = vrot.lane.b32.xlu0 %v1653_v21, %s2418_s26 }
 0x1f7   :  { %1790 = vrot.lane.b32.xlu2 %v1764_v46, %s2419_s27  ;;  %1695 = vrot.lane.b32.xlu1 %v1657_v35, %s2418_s26 }
 0x1f8   :  { %1693 = vrot.lane.b32.xlu0 %v1656_v61, %s2418_s26 }
 0x1ff   :  { %1796 = vrot.lane.b32.xlu2 %v1767_v9, %s2419_s27  ;;  %1794 = vrot.lane.b32.xlu1 %v1766_v41, %s2419_s27 }
 0x200   :  { %1792 = vrot.lane.b32.xlu0 %v1765_v10, %s2419_s27 }
 0x207   :  { %1802 = vrot.lane.b32.xlu2 %v1770_v31, %s2419_s27  ;;  %1800 = vrot.lane.b32.xlu1 %v1769_v38, %s2419_s27 }
 0x208   :  { %1798 = vrot.lane.b32.xlu0 %v1768_v20, %s2419_s27 }
 0x20f   :  { %1808 = vrot.lane.b32.xlu2 %v1773_v52, %s2419_s27  ;;  %1806 = vrot.lane.b32.xlu1 %v1772_v30, %s2419_s27 }
 0x210   :  { %1804 = vrot.lane.b32.xlu0 %v1771_v19, %s2419_s27 }
 0x211   :  { %v1561_v6 = vpop.permute.xlu2 %1560 }
 0x212   :  { %1596 = vst.msk [vmem:[%s3772_s4 + $0x10] sm:$0xf] %vm1591_vm8, %v1561_v6 }
 0x217   :  { %1814 = vrot.lane.b32.xlu2 %v1776_v3, %s2419_s27  ;;  %1812 = vrot.lane.b32.xlu1 %v1775_v28, %s2419_s27 }
 0x218   :  { %1810 = vrot.lane.b32.xlu0 %v1774_v43, %s2419_s27 }
 0x219   :  { %v1563_v53 = vpop.permute.xlu2 %1562 }
 0x21a   :  { %1597 = vst.msk [vmem:[%s3772_s4 + $0x14] sm:$0xf] %vm1591_vm8, %v1563_v53 }
 0x221   :  { %v1569_v33 = vpop.permute.xlu2 %1568 }
 0x222   :  { %1600 = vst.msk [vmem:[%s3772_s4 + $0x20] sm:$0xf] %vm1591_vm8, %v1569_v33 }
 0x229   :  { %v1575_v54 = vpop.permute.xlu2 %1574  ;;  %v1557_v23 = vpop.permute.xlu1 %1556 }
 0x22a   :  { %1603 = vst.msk [vmem:[%s3772_s4 + $0x2c] sm:$0xf] %vm1591_vm8, %v1575_v54  ;;  %v1553_v58 = vpop.permute.xlu0 %1552 }
 0x22b   :  { %1594 = vst.msk [vmem:[%s3772_s4 + $0x8] sm:$0xf] %vm1591_vm8, %v1557_v23 }
 0x22c   :  { %1592 = vst.msk [vmem:[%s3772_s4] sm:$0xf] %vm1591_vm8, %v1553_v58 }
 0x231   :  { %v1674_v13 = vpop.permute.xlu2 %1673  ;;  %v1559_v55 = vpop.permute.xlu1 %1558 }
 0x232   :  { %1595 = vst.msk [vmem:[%s3772_s4 + $0xc] sm:$0xf] %vm1591_vm8, %v1559_v55  ;;  %v1555_v24 = vpop.permute.xlu0 %1554 }
 0x233   :  { %1593 = vst.msk [vmem:[%s3772_s4 + $0x4] sm:$0xf] %vm1591_vm8, %v1555_v24 }
 0x234   :  { %1712 = vst.msk [vmem:[%s3772_s4 + $0x4] sm:$0xf] %vm1710_vm9, %v1674_v13 }
 0x239   :  { %v1680_v51 = vpop.permute.xlu2 %1679  ;;  %v1567_v27 = vpop.permute.xlu1 %1566 }
 0x23a   :  { %1715 = vst.msk [vmem:[%s3772_s4 + $0x10] sm:$0xf] %vm1710_vm9, %v1680_v51  ;;  %v1565_v59 = vpop.permute.xlu0 %1564 }
 0x23b   :  { %1599 = vst.msk [vmem:[%s3772_s4 + $0x1c] sm:$0xf] %vm1591_vm8, %v1567_v27 }
 0x23c   :  { %1598 = vst.msk [vmem:[%s3772_s4 + $0x18] sm:$0xf] %vm1591_vm8, %v1565_v59 }
 0x241   :  { %v1686_v44 = vpop.permute.xlu2 %1685  ;;  %v1573_v11 = vpop.permute.xlu1 %1572 }
 0x242   :  { %1718 = vst.msk [vmem:[%s3772_s4 + $0x1c] sm:$0xf] %vm1710_vm9, %v1686_v44  ;;  %v1571_v50 = vpop.permute.xlu0 %1570 }
 0x243   :  { %1602 = vst.msk [vmem:[%s3772_s4 + $0x28] sm:$0xf] %vm1591_vm8, %v1573_v11 }
 0x244   :  { %1601 = vst.msk [vmem:[%s3772_s4 + $0x24] sm:$0xf] %vm1591_vm8, %v1571_v50 }
 0x249   :  { %v1692_v39 = vpop.permute.xlu2 %1691  ;;  %v1672_v29 = vpop.permute.xlu1 %1671 }
 0x24a   :  { %1721 = vst.msk [vmem:[%s3772_s4 + $0x28] sm:$0xf] %vm1710_vm9, %v1692_v39  ;;  %v1577_v8 = vpop.permute.xlu0 %1576 }
 0x24b   :  { %1711 = vst.msk [vmem:[%s3772_s4] sm:$0xf] %vm1710_vm9, %v1672_v29 }
 0x24c   :  { %1605 = vst.msk [vmem:[%s3772_s4 + $0x30] sm:$0x1] %vm1604_vm10, %v1577_v8 }
 0x251   :  { %v1791_v5 = vpop.permute.xlu2 %1790  ;;  %v1678_v2 = vpop.permute.xlu1 %1677 }
 0x252   :  { %1830 = vst.msk [vmem:[%s3772_s4] sm:$0xf] %vm1829_vm11, %v1791_v5  ;;  %v1676_v7 = vpop.permute.xlu0 %1675 }
 0x253   :  { %1714 = vst.msk [vmem:[%s3772_s4 + $0xc] sm:$0xf] %vm1710_vm9, %v1678_v2 }
 0x254   :  { %1713 = vst.msk [vmem:[%s3772_s4 + $0x8] sm:$0xf] %vm1710_vm9, %v1676_v7 }
 0x259   :  { %v1797_v1 = vpop.permute.xlu2 %1796  ;;  %v1684_v40 = vpop.permute.xlu1 %1683 }
 0x25a   :  { %1833 = vst.msk [vmem:[%s3772_s4 + $0xc] sm:$0xf] %vm1829_vm11, %v1797_v1  ;;  %v1682_v48 = vpop.permute.xlu0 %1681 }
 0x25b   :  { %1717 = vst.msk [vmem:[%s3772_s4 + $0x18] sm:$0xf] %vm1710_vm9, %v1684_v40 }
 0x25c   :  { %1716 = vst.msk [vmem:[%s3772_s4 + $0x14] sm:$0xf] %vm1710_vm9, %v1682_v48 }
 0x261   :  { %v1803_v36 = vpop.permute.xlu2 %1802  ;;  %v1690_v0 = vpop.permute.xlu1 %1689 }
 0x262   :  { %1836 = vst.msk [vmem:[%s3772_s4 + $0x18] sm:$0xf] %vm1829_vm11, %v1803_v36  ;;  %v1688_v60 = vpop.permute.xlu0 %1687 }
 0x263   :  { %1720 = vst.msk [vmem:[%s3772_s4 + $0x24] sm:$0xf] %vm1710_vm9, %v1690_v0 }
 0x264   :  { %1719 = vst.msk [vmem:[%s3772_s4 + $0x20] sm:$0xf] %vm1710_vm9, %v1688_v60 }
 0x269   :  { %v1809_v16 = vpop.permute.xlu2 %1808  ;;  %v1696_v42 = vpop.permute.xlu1 %1695 }
 0x26a   :  { %1839 = vst.msk [vmem:[%s3772_s4 + $0x24] sm:$0xf] %vm1829_vm11, %v1809_v16  ;;  %v1694_v32 = vpop.permute.xlu0 %1693 }
 0x26b   :  { %1724 = vst.msk [vmem:[%s3772_s4 + $0x30] sm:$0x1] %vm1723_vm12, %v1696_v42 }
 0x26c   :  { %1722 = vst.msk [vmem:[%s3772_s4 + $0x2c] sm:$0xf] %vm1710_vm9, %v1694_v32 }
 0x271   :  { %v1815_v26 = vpop.permute.xlu2 %1814  ;;  %v1795_v49 = vpop.permute.xlu1 %1794 }
 0x272   :  { %1843 = vst.msk [vmem:[%s3772_s4 + $0x30] sm:$0x1] %vm1842_vm13, %v1815_v26  ;;  %v1793_v12 = vpop.permute.xlu0 %1792 }
 0x273   :  { %1832 = vst.msk [vmem:[%s3772_s4 + $0x8] sm:$0xf] %vm1829_vm11, %v1795_v49 }
 0x274   :  { %1831 = vst.msk [vmem:[%s3772_s4 + $0x4] sm:$0xf] %vm1829_vm11, %v1793_v12 }
 0x279   :  { %v1801_v21 = vpop.permute.xlu1 %1800 }
 0x27a   :  { %1835 = vst.msk [vmem:[%s3772_s4 + $0x14] sm:$0xf] %vm1829_vm11, %v1801_v21  ;;  %v1799_v14 = vpop.permute.xlu0 %1798 }
 0x27b   :  { %1834 = vst.msk [vmem:[%s3772_s4 + $0x10] sm:$0xf] %vm1829_vm11, %v1799_v14 }
 0x281   :  { %v1807_v22 = vpop.permute.xlu1 %1806 }
 0x282   :  { %1838 = vst.msk [vmem:[%s3772_s4 + $0x20] sm:$0xf] %vm1829_vm11, %v1807_v22  ;;  %v1805_v47 = vpop.permute.xlu0 %1804 }
 0x283   :  { %1837 = vst.msk [vmem:[%s3772_s4 + $0x1c] sm:$0xf] %vm1829_vm11, %v1805_v47 }
 0x289   :  { %v1813_v46 = vpop.permute.xlu1 %1812 }
 0x28a   :  { %1841 = vst.msk [vmem:[%s3772_s4 + $0x2c] sm:$0xf] %vm1829_vm11, %v1813_v46  ;;  %v1811_v35 = vpop.permute.xlu0 %1810 }
 0x28b   :  { %1840 = vst.msk [vmem:[%s3772_s4 + $0x28] sm:$0xf] %vm1829_vm11, %v1811_v35 }

// kernel: mul.11
= control target key start
LH: loop header
LB: loop body
LE: loop exit
PB: predicated region body
PF: predicated region fallthrough
CT: control target
= control target key end

     0   :  { %s46_s22 = smov 12  ;;  %vm38_vm0 = vcmask 1043458   ;;  %s55_s23 = smov 3  ;;  %vm40_vm1 = vcmask 261120   ;;  %vm52_vm2 = vcmask 1048320   ;;  %vm64_vm3 = vcmask 785920   ;;  %s138_s0 = inlined_call_operand.vmem [shape: f32[2,2,2,2,32,1], index: 0, kind: input, shape index: {}]   ;;  %s139_s1 = inlined_call_operand.vmem [shape: f32[4,128], index: 1, kind: output, shape index: {}]  }
   0x1   :  { %v84_v0 = vld [vmem:[%s138_s0 + $0xe] sm:$0x3]  ;;  %v86_v1 = vld [vmem:[%s138_s0 + $0xa] sm:$0x3]  ;;  %v88_v2 = vld [vmem:[%s138_s0 + $0x6] sm:$0x3] }
   0x2   :  { %7 = vst [vmem:[#allocation1 + $0x38] sm:$0x3] %v84_v0  ;;  %v90_v3 = vld [vmem:[%s138_s0 + $0x2] sm:$0x3]  ;;  %v85_v4 = vld [vmem:[%s138_s0 + $0xc] sm:$0x3] }
   0x3   :  { %15 = vst [vmem:[#allocation1 + $0x28] sm:$0x3] %v86_v1  ;;  %v87_v5 = vld [vmem:[%s138_s0 + $0x8] sm:$0x3]  ;;  %v89_v6 = vld [vmem:[%s138_s0 + $0x4] sm:$0x3] }
   0x4   :  { %23 = vst [vmem:[#allocation1 + $0x18] sm:$0x3] %v88_v2  ;;  %v32_v7 = vld [vmem:[%s138_s0] sm:$0x3]  ;;  %s43_s0 = smov 3  ;;  %s58_s24 = smov 12 }
   0x5   :  { %31 = vst [vmem:[#allocation1 + $0x8] sm:$0x3] %v90_v3  ;;  %s67_s25 = smov 3  ;;  %s70_s26 = smov 12  ;;  %vm76_vm4 = vcmask 523520  }
   0x6   :  { %11 = vst [vmem:[#allocation1 + $0x30] sm:$0x3] %v85_v4  ;;  %s34_s27 = smov 3  ;;  %s94_s28 = smov 96  }
   0x7   :  { %19 = vst [vmem:[#allocation1 + $0x20] sm:$0x3] %v87_v5  ;;  %s36_s29 = smov 12  ;;  %s95_s30 = smov 32  }
   0x8   :  { %27 = vst [vmem:[#allocation1 + $0x10] sm:$0x3] %v89_v6  ;;  %s96_s2 = smov 64  }
   0x9   :  { %33 = vst [vmem:[#allocation1] sm:$0x3] %v32_v7 }
   0xc   :  { %v44_v8 = vld [vmem:[#allocation1 + $0x9] ss:$16 sm:%s43_s0]   ;;  %v56_v11 = vld [vmem:[#allocation1 + $0x8] ss:$16 sm:%s55_s23]  }
   0xd   :  { %v47_v9 = vld [vmem:[#allocation1 + $0x9] ss:$16 sm:%s46_s22]   ;;  %v59_v12 = vld [vmem:[#allocation1 + $0x8] ss:$16 sm:%s58_s24]  }
   0xe   :  { %v49_v10 = vsel %vm38_vm0, %v47_v9, %v44_v8  ;;  %v61_v19 = vsel %vm38_vm0, %v59_v12, %v56_v11 }
   0xf   :  { %50 = vrot.lane.b32.xlu0 %v49_v10, %s94_s28 }
  0x10   :  { %v68_v13 = vld [vmem:[#allocation1 + $0x1] ss:$16 sm:%s67_s25]   ;;  %v35_v15 = vld [vmem:[#allocation1] ss:$16 sm:%s34_s27]  }
  0x11   :  { %v71_v14 = vld [vmem:[#allocation1 + $0x1] ss:$16 sm:%s70_s26]   ;;  %v37_v17 = vld [vmem:[#allocation1] ss:$16 sm:%s36_s29]  }
  0x12   :  { %v73_v16 = vsel %vm38_vm0, %v71_v14, %v68_v13  ;;  %v39_v18 = vsel %vm38_vm0, %v37_v17, %v35_v15 }
  0x13   :  { %74 = vrot.lane.b32.xlu1 %v73_v16, %s95_s30  ;;  %41 = vst.msk [vmem:[#allocation0] sm:$0xf] %vm40_vm1, %v39_v18  }
  0x17   :  { %62 = vrot.lane.b32.xlu0 %v61_v19, %s96_s2 }
  0x81   :  { %v51_v20 = vpop.permute.xlu0 %50  }
  0x82   :  { %53 = vst.msk [vmem:[#allocation0] sm:$0xf] %vm52_vm2, %v51_v20  }
  0x85   :  { %v75_v21 = vpop.permute.xlu1 %74  }
  0x89   :  { %v63_v22 = vpop.permute.xlu0 %62  }
  0x8a   :  { %65 = vst.msk [vmem:[#allocation0] sm:$0xf] %vm64_vm3, %v63_v22  }
  0x8b   :  { %77 = vst.msk [vmem:[#allocation0] sm:$0xf] %vm76_vm4, %v75_v21  }
  0x92   :  { %v80_v23 = vld [vmem:[#allocation0] sm:$0xf] }
  0x93   :  { %83 = vst [vmem:[%s139_s1] sm:$0xf] %v80_v23 }

// kernel: generator_forward.5
= control target key start
LH: loop header
LB: loop body
LE: loop exit
PB: predicated region body
PF: predicated region fallthrough
CT: control target
= control target key end

     0   :  { %vm1008_vm0 = vcmask 1043456   ;;  %vm1014_vm1 = vcmask 64516   ;;  %s2488_s1 = inlined_call_operand.vmem [shape: bf16[512,392], index: 1, kind: input, shape index: {}]   ;;  %s2489_s0 = inlined_call_operand.vmem [shape: bf16[4,512], index: 0, kind: input, shape index: {}]   ;;  %s2490_s2 = inlined_call_operand.vmem [shape: f32[4,392], index: 2, kind: output, shape index: {}]  }
   0x1   :  { %v1135_v0 = vld [vmem:[%s2488_s1 + $0xe0] sm:$0xf]  ;;  %v1563_v1 = vld [vmem:[%s2488_s1 + $0xec] sm:$0xf0]  ;;  %vm1015_vm2 = vmor %vm1014_vm1, %vm1008_vm0 }
   0x2   :  { %v1263_v2 = vld [vmem:[%s2488_s1 + $0x1e0] sm:$0xf]  ;;  %v1136_v3 = vor.u32 %v1563_v1, %v1135_v0  ;;  %v1595_v4 = vld [vmem:[%s2488_s1 + $0x1ec] sm:$0xf0] }
   0x3   :  { %v1391_v5 = vld [vmem:[%s2488_s1 + $0x2e0] sm:$0xf]  ;;  %v1627_v6 = vld [vmem:[%s2488_s1 + $0x2ec] sm:$0xf0]  ;;  %v1264_v7 = vor.u32 %v1595_v4, %v1263_v2 }
   0x4   :  { %v1392_v8 = vor.u32 %v1627_v6, %v1391_v5  ;;  %v1519_v9 = vld [vmem:[%s2488_s1 + $0x3e0] sm:$0xf]  ;;  %v1659_v10 = vld [vmem:[%s2488_s1 + $0x3ec] sm:$0xf0]  ;;  %790 = vmatpush.bf16.msra.mxu0 %v1136_v3 }
   0x5   :  { %v1119_v11 = vld [vmem:[%s2488_s1 + $0xc0] sm:$0xf]  ;;  %v1520_v12 = vor.u32 %v1659_v10, %v1519_v9  ;;  %v1559_v13 = vld [vmem:[%s2488_s1 + $0xcc] sm:$0xf0]  ;;  %803 = vmatpush.bf16.msra.mxu1 %v1264_v7 }
   0x6   :  { %v1247_v14 = vld [vmem:[%s2488_s1 + $0x1c0] sm:$0xf]  ;;  %v1591_v15 = vld [vmem:[%s2488_s1 + $0x1cc] sm:$0xf0]  ;;  %816 = vmatpush.bf16.msra.mxu2 %v1392_v8  ;;  %v1120_v16 = vor.u32 %v1559_v13, %v1119_v11 }
   0x7   :  { %v1248_v17 = vor.u32 %v1591_v15, %v1247_v14  ;;  %v1375_v18 = vld [vmem:[%s2488_s1 + $0x2c0] sm:$0xf]  ;;  %v1623_v19 = vld [vmem:[%s2488_s1 + $0x2cc] sm:$0xf0]  ;;  %829 = vmatpush.bf16.msra.mxu3 %v1520_v12 }
   0x8   :  { %v1503_v20 = vld [vmem:[%s2488_s1 + $0x3c0] sm:$0xf]  ;;  %v1376_v21 = vor.u32 %v1623_v19, %v1375_v18  ;;  %v1655_v22 = vld [vmem:[%s2488_s1 + $0x3cc] sm:$0xf0]  ;;  %791 = vmatpush.bf16.msra.mxu0 %v1120_v16 }
   0x9   :  { %v1103_v23 = vld [vmem:[%s2488_s1 + $0xa0] sm:$0xf]  ;;  %v1555_v24 = vld [vmem:[%s2488_s1 + $0xac] sm:$0xf0]  ;;  %v1504_v25 = vor.u32 %v1655_v22, %v1503_v20  ;;  %804 = vmatpush.bf16.msra.mxu1 %v1248_v17 }
   0xa   :  { %v1231_v26 = vld [vmem:[%s2488_s1 + $0x1a0] sm:$0xf]  ;;  %v1587_v27 = vld [vmem:[%s2488_s1 + $0x1ac] sm:$0xf0]  ;;  %v1104_v29 = vor.u32 %v1555_v24, %v1103_v23  ;;  %817 = vmatpush.bf16.msra.mxu2 %v1376_v21 }
   0xb   :  { %v1359_v28 = vld [vmem:[%s2488_s1 + $0x2a0] sm:$0xf]  ;;  %v1619_v30 = vld [vmem:[%s2488_s1 + $0x2ac] sm:$0xf0]  ;;  %v1232_v33 = vor.u32 %v1587_v27, %v1231_v26  ;;  %830 = vmatpush.bf16.msra.mxu3 %v1504_v25 }
   0xc   :  { %v1487_v31 = vld [vmem:[%s2488_s1 + $0x3a0] sm:$0xf]  ;;  %v1651_v32 = vld [vmem:[%s2488_s1 + $0x3ac] sm:$0xf0]  ;;  %v1360_v34 = vor.u32 %v1619_v30, %v1359_v28  ;;  %792 = vmatpush.bf16.msra.mxu0 %v1104_v29  ;;  %v1561_v28 = vld [vmem:[%s2488_s1 + $0xe4] sm:$0xf] }
   0xd   :  { %v1087_v35 = vld [vmem:[%s2488_s1 + $0x80] sm:$0xf]  ;;  %v1551_v36 = vld [vmem:[%s2488_s1 + $0x8c] sm:$0xf0]  ;;  %v1488_v38 = vor.u32 %v1651_v32, %v1487_v31  ;;  %805 = vmatpush.bf16.msra.mxu1 %v1232_v33  ;;  %v1137_v29 = vld [vmem:[%s2488_s1 + $0xf0] sm:$0xf0] }
   0xe   :  { %v1215_v37 = vld [vmem:[%s2488_s1 + $0x180] sm:$0xf]  ;;  %v1583_v39 = vld [vmem:[%s2488_s1 + $0x18c] sm:$0xf0]  ;;  %v1088_v44 = vor.u32 %v1551_v36, %v1087_v35  ;;  %818 = vmatpush.bf16.msra.mxu2 %v1360_v34  ;;  %v1593_v30 = vld [vmem:[%s2488_s1 + $0x1e4] sm:$0xf] }
   0xf   :  { %v1343_v40 = vld [vmem:[%s2488_s1 + $0x280] sm:$0xf]  ;;  %v1615_v41 = vld [vmem:[%s2488_s1 + $0x28c] sm:$0xf0]  ;;  %v1216_v45 = vor.u32 %v1583_v39, %v1215_v37  ;;  %831 = vmatpush.bf16.msra.mxu3 %v1488_v38  ;;  %v1265_v32 = vld [vmem:[%s2488_s1 + $0x1f0] sm:$0xf0] }
  0x10   :  { %v1471_v42 = vld [vmem:[%s2488_s1 + $0x380] sm:$0xf]  ;;  %v1647_v43 = vld [vmem:[%s2488_s1 + $0x38c] sm:$0xf0]  ;;  %v1344_v46 = vor.u32 %v1615_v41, %v1343_v40  ;;  %793 = vmatpush.bf16.msra.mxu0 %v1088_v44  ;;  %v1625_v33 = vld [vmem:[%s2488_s1 + $0x2e4] sm:$0xf]  ;;  %v1140_v40 = vor.u32 %v1561_v28, %v1137_v29  ;;  %v1268_v41 = vor.u32 %v1593_v30, %v1265_v32 }
  0x11   :  { %v1071_v47 = vld [vmem:[%s2488_s1 + $0x60] sm:$0xf]  ;;  %v1547_v48 = vld [vmem:[%s2488_s1 + $0x6c] sm:$0xf0]  ;;  %v1472_v50 = vor.u32 %v1647_v43, %v1471_v42  ;;  %806 = vmatpush.bf16.msra.mxu1 %v1216_v45  ;;  %v1393_v34 = vld [vmem:[%s2488_s1 + $0x2f0] sm:$0xf0] }
  0x12   :  { %v1199_v49 = vld [vmem:[%s2488_s1 + $0x160] sm:$0xf]  ;;  %v1579_v51 = vld [vmem:[%s2488_s1 + $0x16c] sm:$0xf0]  ;;  %v1072_v56 = vor.u32 %v1547_v48, %v1071_v47  ;;  %819 = vmatpush.bf16.msra.mxu2 %v1344_v46  ;;  %v1657_v37 = vld [vmem:[%s2488_s1 + $0x3e4] sm:$0xf]  ;;  %v1396_v42 = vor.u32 %v1625_v33, %v1393_v34 }
  0x13   :  { %v1327_v52 = vld [vmem:[%s2488_s1 + $0x260] sm:$0xf]  ;;  %v1611_v53 = vld [vmem:[%s2488_s1 + $0x26c] sm:$0xf0]  ;;  %v1200_v57 = vor.u32 %v1579_v51, %v1199_v49  ;;  %832 = vmatpush.bf16.msra.mxu3 %v1472_v50  ;;  %v1521_v38 = vld [vmem:[%s2488_s1 + $0x3f0] sm:$0xf0] }
  0x14   :  { %v1455_v54 = vld [vmem:[%s2488_s1 + $0x360] sm:$0xf]  ;;  %v1643_v55 = vld [vmem:[%s2488_s1 + $0x36c] sm:$0xf0]  ;;  %v1328_v58 = vor.u32 %v1611_v53, %v1327_v52  ;;  %794 = vmatpush.bf16.msra.mxu0 %v1072_v56  ;;  %v1557_v43 = vld [vmem:[%s2488_s1 + $0xc4] sm:$0xf]  ;;  %v1524_v46 = vor.u32 %v1657_v37, %v1521_v38 }
  0x15   :  { %v1055_v59 = vld [vmem:[%s2488_s1 + $0x40] sm:$0xf]  ;;  %v1543_v60 = vld [vmem:[%s2488_s1 + $0x4c] sm:$0xf0]  ;;  %v1456_v62 = vor.u32 %v1643_v55, %v1455_v54  ;;  %807 = vmatpush.bf16.msra.mxu1 %v1200_v57  ;;  %v1121_v44 = vld [vmem:[%s2488_s1 + $0xd0] sm:$0xf0] }
  0x16   :  { %v1183_v61 = vld [vmem:[%s2488_s1 + $0x140] sm:$0xf]  ;;  %v1575_v63 = vld [vmem:[%s2488_s1 + $0x14c] sm:$0xf0]  ;;  %v1056_v4 = vor.u32 %v1543_v60, %v1055_v59  ;;  %820 = vmatpush.bf16.msra.mxu2 %v1328_v58  ;;  %v1589_v45 = vld [vmem:[%s2488_s1 + $0x1c4] sm:$0xf]  ;;  %v1124_v53 = vor.u32 %v1557_v43, %v1121_v44 }
  0x17   :  { %v1311_v0 = vld [vmem:[%s2488_s1 + $0x240] sm:$0xf]  ;;  %v1607_v1 = vld [vmem:[%s2488_s1 + $0x24c] sm:$0xf0]  ;;  %v1184_v5 = vor.u32 %v1575_v63, %v1183_v61  ;;  %833 = vmatpush.bf16.msra.mxu3 %v1456_v62  ;;  %v1249_v47 = vld [vmem:[%s2488_s1 + $0x1d0] sm:$0xf0] }
  0x18   :  { %v1439_v2 = vld [vmem:[%s2488_s1 + $0x340] sm:$0xf]  ;;  %v1639_v3 = vld [vmem:[%s2488_s1 + $0x34c] sm:$0xf0]  ;;  %v1312_v6 = vor.u32 %v1607_v1, %v1311_v0  ;;  %795 = vmatpush.bf16.msra.mxu0 %v1056_v4  ;;  %v1621_v48 = vld [vmem:[%s2488_s1 + $0x2c4] sm:$0xf]  ;;  %v1252_v54 = vor.u32 %v1589_v45, %v1249_v47 }
  0x19   :  { %v1039_v7 = vld [vmem:[%s2488_s1 + $0x20] sm:$0xf]  ;;  %v1539_v8 = vld [vmem:[%s2488_s1 + $0x2c] sm:$0xf0]  ;;  %v1440_v10 = vor.u32 %v1639_v3, %v1439_v2  ;;  %808 = vmatpush.bf16.msra.mxu1 %v1184_v5  ;;  %v1377_v49 = vld [vmem:[%s2488_s1 + $0x2d0] sm:$0xf0] }
  0x1a   :  { %v1167_v9 = vld [vmem:[%s2488_s1 + $0x120] sm:$0xf]  ;;  %v1571_v11 = vld [vmem:[%s2488_s1 + $0x12c] sm:$0xf0]  ;;  %v1040_v16 = vor.u32 %v1539_v8, %v1039_v7  ;;  %821 = vmatpush.bf16.msra.mxu2 %v1312_v6  ;;  %v1653_v50 = vld [vmem:[%s2488_s1 + $0x3c4] sm:$0xf]  ;;  %v1380_v55 = vor.u32 %v1621_v48, %v1377_v49 }
  0x1b   :  { %v1295_v12 = vld [vmem:[%s2488_s1 + $0x220] sm:$0xf]  ;;  %v1603_v13 = vld [vmem:[%s2488_s1 + $0x22c] sm:$0xf0]  ;;  %v1168_v19 = vor.u32 %v1571_v11, %v1167_v9  ;;  %834 = vmatpush.bf16.msra.mxu3 %v1440_v10  ;;  %v1505_v51 = vld [vmem:[%s2488_s1 + $0x3d0] sm:$0xf0] }
  0x1c   :  { %v1423_v14 = vld [vmem:[%s2488_s1 + $0x320] sm:$0xf]  ;;  %v1635_v15 = vld [vmem:[%s2488_s1 + $0x32c] sm:$0xf0]  ;;  %v1296_v20 = vor.u32 %v1603_v13, %v1295_v12  ;;  %796 = vmatpush.bf16.msra.mxu0 %v1040_v16  ;;  %v1553_v56 = vld [vmem:[%s2488_s1 + $0xa4] sm:$0xf]  ;;  %v1508_v59 = vor.u32 %v1653_v50, %v1505_v51 }
  0x1d   :  { %v1023_v17 = vld [vmem:[%s2488_s1] sm:$0xf]  ;;  %v1535_v18 = vld [vmem:[%s2488_s1 + $0xc] sm:$0xf0]  ;;  %v1424_v24 = vor.u32 %v1635_v15, %v1423_v14  ;;  %809 = vmatpush.bf16.msra.mxu1 %v1168_v19  ;;  %v1105_v57 = vld [vmem:[%s2488_s1 + $0xb0] sm:$0xf0] }
  0x1e   :  { %v1151_v21 = vld [vmem:[%s2488_s1 + $0x100] sm:$0xf]  ;;  %v1567_v22 = vld [vmem:[%s2488_s1 + $0x10c] sm:$0xf0]  ;;  %v1024_v31 = vor.u32 %v1535_v18, %v1023_v17  ;;  %822 = vmatpush.bf16.msra.mxu2 %v1296_v20  ;;  %v1585_v58 = vld [vmem:[%s2488_s1 + $0x1a4] sm:$0xf]  ;;  %v1108_v1 = vor.u32 %v1553_v56, %v1105_v57 }
  0x1f   :  { %v1279_v23 = vld [vmem:[%s2488_s1 + $0x200] sm:$0xf]  ;;  %v1599_v25 = vld [vmem:[%s2488_s1 + $0x20c] sm:$0xf0]  ;;  %v1152_v35 = vor.u32 %v1567_v22, %v1151_v21  ;;  %835 = vmatpush.bf16.msra.mxu3 %v1424_v24  ;;  %v1233_v60 = vld [vmem:[%s2488_s1 + $0x1b0] sm:$0xf0] }
  0x20   :  { %v1407_v26 = vld [vmem:[%s2488_s1 + $0x300] sm:$0xf]  ;;  %v1631_v27 = vld [vmem:[%s2488_s1 + $0x30c] sm:$0xf0]  ;;  %v1280_v36 = vor.u32 %v1599_v25, %v1279_v23  ;;  %797 = vmatpush.bf16.msra.mxu0 %v1024_v31  ;;  %v1617_v61 = vld [vmem:[%s2488_s1 + $0x2a4] sm:$0xf]  ;;  %v1236_v4 = vor.u32 %v1585_v58, %v1233_v60 }
  0x21   :  { %v1408_v39 = vor.u32 %v1631_v27, %v1407_v26  ;;  %810 = vmatpush.bf16.msra.mxu1 %v1152_v35  ;;  %v11_v52 = vld [vmem:[%s2489_s0] sm:$0xff]  ;;  %v1361_v62 = vld [vmem:[%s2488_s1 + $0x2b0] sm:$0xf0] }
  0x22   :  { %823 = vmatpush.bf16.msra.mxu2 %v1280_v36  ;;  %141 = vst [vmem:[#allocation1] ss:$4 sm:$0xff] %v11_v52  ;;  %v1649_v63 = vld [vmem:[%s2488_s1 + $0x3a4] sm:$0xf]  ;;  %v1489_v0 = vld [vmem:[%s2488_s1 + $0x3b0] sm:$0xf0]  ;;  %v1364_v5 = vor.u32 %v1617_v61, %v1361_v62 }
  0x23   :  { %836 = vmatpush.bf16.msra.mxu3 %v1408_v39  ;;  %v1549_v2 = vld [vmem:[%s2488_s1 + $0x84] sm:$0xf]  ;;  %v1089_v3 = vld [vmem:[%s2488_s1 + $0x90] sm:$0xf0]  ;;  %v1492_v9 = vor.u32 %v1649_v63, %v1489_v0 }
  0x24   :  { %842 = vmatpush.bf16.msrb.mxu0 %v1140_v40  ;;  %v1581_v6 = vld [vmem:[%s2488_s1 + $0x184] sm:$0xf]  ;;  %v1217_v7 = vld [vmem:[%s2488_s1 + $0x190] sm:$0xf0]  ;;  %v1092_v15 = vor.u32 %v1549_v2, %v1089_v3  ;;  %v1564_v2 = vld [vmem:[%s2488_s1 + $0xf4] sm:$0xf0] }
  0x25   :  { %855 = vmatpush.bf16.msrb.mxu1 %v1268_v41  ;;  %v1613_v8 = vld [vmem:[%s2488_s1 + $0x284] sm:$0xf]  ;;  %v1345_v10 = vld [vmem:[%s2488_s1 + $0x290] sm:$0xf0]  ;;  %v1220_v18 = vor.u32 %v1581_v6, %v1217_v7  ;;  %v1271_v3 = vld [vmem:[%s2488_s1 + $0x1e8] sm:$0xf] }
  0x26   :  { %868 = vmatpush.bf16.msrb.mxu2 %v1396_v42  ;;  %v1645_v11 = vld [vmem:[%s2488_s1 + $0x384] sm:$0xf]  ;;  %v1473_v12 = vld [vmem:[%s2488_s1 + $0x390] sm:$0xf0]  ;;  %v1348_v19 = vor.u32 %v1613_v8, %v1345_v10  ;;  %v1399_v6 = vld [vmem:[%s2488_s1 + $0x2e8] sm:$0xf] }
  0x27   :  { %881 = vmatpush.bf16.msrb.mxu3 %v1524_v46  ;;  %v1545_v20 = vld [vmem:[%s2488_s1 + $0x64] sm:$0xf]  ;;  %v1073_v21 = vld [vmem:[%s2488_s1 + $0x70] sm:$0xf0]  ;;  %v1476_v23 = vor.u32 %v1645_v11, %v1473_v12  ;;  %v1628_v7 = vld [vmem:[%s2488_s1 + $0x2f4] sm:$0xf0] }
  0x28   :  { %843 = vmatpush.bf16.msrb.mxu0 %v1124_v53  ;;  %v1577_v22 = vld [vmem:[%s2488_s1 + $0x164] sm:$0xf]  ;;  %v1201_v24 = vld [vmem:[%s2488_s1 + $0x170] sm:$0xf0]  ;;  %v1076_v29 = vor.u32 %v1545_v20, %v1073_v21  ;;  %v1527_v10 = vld [vmem:[%s2488_s1 + $0x3e8] sm:$0xf] }
  0x29   :  { %856 = vmatpush.bf16.msrb.mxu1 %v1252_v54  ;;  %v1975_v13 = vld.sshfl [vmem:[#allocation1 + $0x10] sm:$0xff pattern:$0x73625140]  ;;  %v1977_v14 = vld.sshfl [vmem:[#allocation1 + $0x18] sm:$0xff pattern:$0x73625140]  ;;  %v1204_v30 = vor.u32 %v1577_v22, %v1201_v24 }
  0x2a   :  { %869 = vmatpush.bf16.msrb.mxu2 %v1380_v55  ;;  %v1980_v16 = vld.sshfl [vmem:[#allocation1] sm:$0xff pattern:$0x73625140]  ;;  %v1982_v17 = vld.sshfl [vmem:[#allocation1 + $0x8] sm:$0xff pattern:$0x73625140]  ;;  %837 = vmatmul.bf16.vlgmr.msra.gmra.mxu3 %v1977_v14 }
  0x2b   :  { %882 = vmatpush.bf16.msrb.mxu3 %v1508_v59  ;;  %824 = vmatmul.bf16.vlgmr.msra.gmra.mxu2 %v1975_v13  ;;  %v1609_v25 = vld [vmem:[%s2488_s1 + $0x264] sm:$0xf]  ;;  %v1329_v26 = vld [vmem:[%s2488_s1 + $0x270] sm:$0xf0]  ;;  %v1660_v11 = vld [vmem:[%s2488_s1 + $0x3f4] sm:$0xf0] }
  0x2c   :  { %844 = vmatpush.bf16.msrb.mxu0 %v1108_v1  ;;  %v1641_v27 = vld [vmem:[%s2488_s1 + $0x364] sm:$0xf]  ;;  %v1457_v28 = vld [vmem:[%s2488_s1 + $0x370] sm:$0xf0]  ;;  %811 = vmatmul.bf16.vlgmr.msra.gmra.mxu1 %v1982_v17  ;;  %v1332_v31 = vor.u32 %v1609_v25, %v1329_v26  ;;  %v1143_v1 = vld [vmem:[%s2488_s1 + $0xe8] sm:$0xf] }
  0x2d   :  { %857 = vmatpush.bf16.msrb.mxu1 %v1236_v4  ;;  %798 = vmatmul.bf16.vlgmr.msra.gmra.mxu0 %v1980_v16  ;;  %v1541_v32 = vld [vmem:[%s2488_s1 + $0x44] sm:$0xf]  ;;  %v1057_v33 = vld [vmem:[%s2488_s1 + $0x50] sm:$0xf0]  ;;  %v1460_v35 = vor.u32 %v1641_v27, %v1457_v28  ;;  %v1127_v20 = vld [vmem:[%s2488_s1 + $0xc8] sm:$0xf] }
  0x2e   :  { %870 = vmatpush.bf16.msrb.mxu2 %v1364_v5  ;;  %v1573_v34 = vld [vmem:[%s2488_s1 + $0x144] sm:$0xf]  ;;  %v1185_v36 = vld [vmem:[%s2488_s1 + $0x150] sm:$0xf0]  ;;  %v1060_v41 = vor.u32 %v1541_v32, %v1057_v33  ;;  %v1596_v5 = vld [vmem:[%s2488_s1 + $0x1f4] sm:$0xf0] }
  0x2f   :  { %883 = vmatpush.bf16.msrb.mxu3 %v1492_v9  ;;  %v1605_v37 = vld [vmem:[%s2488_s1 + $0x244] sm:$0xf]  ;;  %v1313_v38 = vld [vmem:[%s2488_s1 + $0x250] sm:$0xf0]  ;;  %v1188_v42 = vor.u32 %v1573_v34, %v1185_v36  ;;  %v1560_v21 = vld [vmem:[%s2488_s1 + $0xd4] sm:$0xf0] }
  0x30   :  { %845 = vmatpush.bf16.msrb.mxu0 %v1092_v15  ;;  %v1637_v39 = vld [vmem:[%s2488_s1 + $0x344] sm:$0xf]  ;;  %v1441_v40 = vld [vmem:[%s2488_s1 + $0x350] sm:$0xf0]  ;;  %v1316_v43 = vor.u32 %v1605_v37, %v1313_v38  ;;  %v1144_v15 = vor.u32 %v1564_v2, %v1143_v1  ;;  %v1255_v22 = vld [vmem:[%s2488_s1 + $0x1c8] sm:$0xf] }
  0x31   :  { %858 = vmatpush.bf16.msrb.mxu1 %v1220_v18  ;;  %v1537_v44 = vld [vmem:[%s2488_s1 + $0x24] sm:$0xf]  ;;  %v1041_v45 = vld [vmem:[%s2488_s1 + $0x30] sm:$0xf0]  ;;  %v1444_v47 = vor.u32 %v1637_v39, %v1441_v40  ;;  %v1272_v18 = vor.u32 %v1596_v5, %v1271_v3  ;;  %v1592_v24 = vld [vmem:[%s2488_s1 + $0x1d4] sm:$0xf0] }
  0x32   :  { %871 = vmatpush.bf16.msrb.mxu2 %v1348_v19  ;;  %v1569_v46 = vld [vmem:[%s2488_s1 + $0x124] sm:$0xf]  ;;  %v1169_v48 = vld [vmem:[%s2488_s1 + $0x130] sm:$0xf0]  ;;  %v1044_v53 = vor.u32 %v1537_v44, %v1041_v45  ;;  %v1400_v19 = vor.u32 %v1628_v7, %v1399_v6  ;;  %v1383_v25 = vld [vmem:[%s2488_s1 + $0x2c8] sm:$0xf] }
  0x33   :  { %884 = vmatpush.bf16.msrb.mxu3 %v1476_v23  ;;  %v1601_v49 = vld [vmem:[%s2488_s1 + $0x224] sm:$0xf]  ;;  %v1297_v50 = vld [vmem:[%s2488_s1 + $0x230] sm:$0xf0]  ;;  %v1172_v56 = vor.u32 %v1569_v46, %v1169_v48  ;;  %v1528_v23 = vor.u32 %v1660_v11, %v1527_v10  ;;  %v1624_v26 = vld [vmem:[%s2488_s1 + $0x2d4] sm:$0xf0] }
  0x34   :  { %846 = vmatpush.bf16.msrb.mxu0 %v1076_v29  ;;  %v1633_v51 = vld [vmem:[%s2488_s1 + $0x324] sm:$0xf]  ;;  %v1425_v52 = vld [vmem:[%s2488_s1 + $0x330] sm:$0xf0]  ;;  %v1300_v57 = vor.u32 %v1601_v49, %v1297_v50  ;;  %v1511_v27 = vld [vmem:[%s2488_s1 + $0x3c8] sm:$0xf]  ;;  %v1128_v29 = vor.u32 %v1560_v21, %v1127_v20 }
  0x35   :  { %859 = vmatpush.bf16.msrb.mxu1 %v1204_v30  ;;  %v1533_v54 = vld [vmem:[%s2488_s1 + $0x4] sm:$0xf]  ;;  %v1025_v55 = vld [vmem:[%s2488_s1 + $0x10] sm:$0xf0]  ;;  %v1428_v61 = vor.u32 %v1633_v51, %v1425_v52  ;;  %v1656_v28 = vld [vmem:[%s2488_s1 + $0x3d4] sm:$0xf0]  ;;  %v1256_v30 = vor.u32 %v1592_v24, %v1255_v22 }
  0x36   :  { %872 = vmatpush.bf16.msrb.mxu2 %v1332_v31  ;;  %v1565_v58 = vld [vmem:[%s2488_s1 + $0x104] sm:$0xf]  ;;  %v1153_v59 = vld [vmem:[%s2488_s1 + $0x110] sm:$0xf0]  ;;  %v1028_v4 = vor.u32 %v1533_v54, %v1025_v55  ;;  %v1384_v31 = vor.u32 %v1624_v26, %v1383_v25  ;;  %v1111_v32 = vld [vmem:[%s2488_s1 + $0xa8] sm:$0xf] }
  0x37   :  { %885 = vmatpush.bf16.msrb.mxu3 %v1460_v35  ;;  %v1597_v60 = vld [vmem:[%s2488_s1 + $0x204] sm:$0xf]  ;;  %v1281_v62 = vld [vmem:[%s2488_s1 + $0x210] sm:$0xf0]  ;;  %v1156_v8 = vor.u32 %v1565_v58, %v1153_v59  ;;  %v1556_v33 = vld [vmem:[%s2488_s1 + $0xb4] sm:$0xf0]  ;;  %v1512_v35 = vor.u32 %v1656_v28, %v1511_v27 }
  0x38   :  { %847 = vmatpush.bf16.msrb.mxu0 %v1060_v41  ;;  %v1629_v63 = vld [vmem:[%s2488_s1 + $0x304] sm:$0xf]  ;;  %v1409_v0 = vld [vmem:[%s2488_s1 + $0x310] sm:$0xf0]  ;;  %v1284_v9 = vor.u32 %v1597_v60, %v1281_v62  ;;  %v1239_v34 = vld [vmem:[%s2488_s1 + $0x1a8] sm:$0xf]  ;;  %v1112_v41 = vor.u32 %v1556_v33, %v1111_v32 }
  0x39   :  { %860 = vmatpush.bf16.msrb.mxu1 %v1188_v42  ;;  %v1412_v12 = vor.u32 %v1629_v63, %v1409_v0  ;;  %v1588_v36 = vld [vmem:[%s2488_s1 + $0x1b4] sm:$0xf0]  ;;  %v1367_v37 = vld [vmem:[%s2488_s1 + $0x2a8] sm:$0xf] }
  0x3a   :  { %873 = vmatpush.bf16.msrb.mxu2 %v1316_v43  ;;  %v1620_v38 = vld [vmem:[%s2488_s1 + $0x2b4] sm:$0xf0]  ;;  %v1495_v39 = vld [vmem:[%s2488_s1 + $0x3a8] sm:$0xf]  ;;  %v1240_v42 = vor.u32 %v1588_v36, %v1239_v34 }
  0x3b   :  { %886 = vmatpush.bf16.msrb.mxu3 %v1444_v47  ;;  %v1652_v40 = vld [vmem:[%s2488_s1 + $0x3b4] sm:$0xf0]  ;;  %v1368_v43 = vor.u32 %v1620_v38, %v1367_v37  ;;  %v1095_v44 = vld [vmem:[%s2488_s1 + $0x88] sm:$0xf] }
  0x3c   :  { %848 = vmatpush.bf16.msrb.mxu0 %v1044_v53  ;;  %v1552_v45 = vld [vmem:[%s2488_s1 + $0x94] sm:$0xf0]  ;;  %v1223_v46 = vld [vmem:[%s2488_s1 + $0x188] sm:$0xf]  ;;  %v1496_v47 = vor.u32 %v1652_v40, %v1495_v39 }
  0x3d   :  { %861 = vmatpush.bf16.msrb.mxu1 %v1172_v56  ;;  %v1584_v48 = vld [vmem:[%s2488_s1 + $0x194] sm:$0xf0]  ;;  %v1351_v49 = vld [vmem:[%s2488_s1 + $0x288] sm:$0xf]  ;;  %v1096_v53 = vor.u32 %v1552_v45, %v1095_v44  ;;  %v1273_v45 = vld [vmem:[%s2488_s1 + $0x1f8] sm:$0xf0] }
  0x3e   :  { %874 = vmatpush.bf16.msrb.mxu2 %v1300_v57  ;;  %v1616_v50 = vld [vmem:[%s2488_s1 + $0x294] sm:$0xf0]  ;;  %v1479_v51 = vld [vmem:[%s2488_s1 + $0x388] sm:$0xf]  ;;  %v1224_v54 = vor.u32 %v1584_v48, %v1223_v46  ;;  %v1626_v46 = vld [vmem:[%s2488_s1 + $0x2ec] sm:$0xf] }
  0x3f   :  { %887 = vmatpush.bf16.msrb.mxu3 %v1428_v61  ;;  %v1648_v52 = vld [vmem:[%s2488_s1 + $0x394] sm:$0xf0]  ;;  %v1352_v55 = vor.u32 %v1616_v50, %v1351_v49  ;;  %v1079_v56 = vld [vmem:[%s2488_s1 + $0x68] sm:$0xf]  ;;  %v1658_v50 = vld [vmem:[%s2488_s1 + $0x3ec] sm:$0xf] }
  0x40   :  { %849 = vmatpush.bf16.msrb.mxu0 %v1028_v4  ;;  %v1548_v57 = vld [vmem:[%s2488_s1 + $0x74] sm:$0xf0]  ;;  %v1207_v58 = vld [vmem:[%s2488_s1 + $0x168] sm:$0xf]  ;;  %v1480_v59 = vor.u32 %v1648_v52, %v1479_v51  ;;  %v1529_v51 = vld [vmem:[%s2488_s1 + $0x3f8] sm:$0xf0] }
  0x41   :  { %862 = vmatpush.bf16.msrb.mxu1 %v1156_v8  ;;  %v1580_v60 = vld [vmem:[%s2488_s1 + $0x174] sm:$0xf0]  ;;  %v1335_v61 = vld [vmem:[%s2488_s1 + $0x268] sm:$0xf]  ;;  %v1080_v1 = vor.u32 %v1548_v57, %v1079_v56  ;;  %v1558_v56 = vld [vmem:[%s2488_s1 + $0xcc] sm:$0xf] }
  0x42   :  { %875 = vmatpush.bf16.msrb.mxu2 %v1284_v9  ;;  %v1612_v62 = vld [vmem:[%s2488_s1 + $0x274] sm:$0xf0]  ;;  %v1463_v63 = vld [vmem:[%s2488_s1 + $0x368] sm:$0xf]  ;;  %v1208_v2 = vor.u32 %v1580_v60, %v1207_v58  ;;  %v1129_v57 = vld [vmem:[%s2488_s1 + $0xd8] sm:$0xf0] }
  0x43   :  { %888 = vmatpush.bf16.msrb.mxu3 %v1412_v12  ;;  %850 = vmatmul.bf16.vlgmr.msrb.gmra.mxu0 %v1980_v16  ;;  %v1644_v0 = vld [vmem:[%s2488_s1 + $0x374] sm:$0xf0]  ;;  %v1336_v3 = vor.u32 %v1612_v62, %v1335_v61  ;;  %v1063_v4 = vld [vmem:[%s2488_s1 + $0x48] sm:$0xf]  ;;  %v1590_v58 = vld [vmem:[%s2488_s1 + $0x1cc] sm:$0xf] }
  0x44   :  { %894 = vmatpush.bf16.msra.mxu0 %v1144_v15  ;;  %863 = vmatmul.bf16.vlgmr.msrb.gmra.mxu1 %v1982_v17  ;;  %v1544_v5 = vld [vmem:[%s2488_s1 + $0x54] sm:$0xf0]  ;;  %v1191_v6 = vld [vmem:[%s2488_s1 + $0x148] sm:$0xf]  ;;  %v1464_v7 = vor.u32 %v1644_v0, %v1463_v63  ;;  %v1257_v60 = vld [vmem:[%s2488_s1 + $0x1d8] sm:$0xf0] }
  0x45   :  { %907 = vmatpush.bf16.msra.mxu1 %v1272_v18  ;;  %876 = vmatmul.bf16.vlgmr.msrb.gmra.mxu2 %v1975_v13  ;;  %v1576_v8 = vld [vmem:[%s2488_s1 + $0x154] sm:$0xf0]  ;;  %v1319_v9 = vld [vmem:[%s2488_s1 + $0x248] sm:$0xf]  ;;  %v1064_v15 = vor.u32 %v1544_v5, %v1063_v4  ;;  %v1622_v61 = vld [vmem:[%s2488_s1 + $0x2cc] sm:$0xf] }
  0x46   :  { %920 = vmatpush.bf16.msra.mxu2 %v1400_v19  ;;  %889 = vmatmul.bf16.vlgmr.msrb.gmra.mxu3 %v1977_v14  ;;  %v1608_v10 = vld [vmem:[%s2488_s1 + $0x254] sm:$0xf0]  ;;  %v1447_v11 = vld [vmem:[%s2488_s1 + $0x348] sm:$0xf]  ;;  %v1192_v18 = vor.u32 %v1576_v8, %v1191_v6  ;;  %v1385_v62 = vld [vmem:[%s2488_s1 + $0x2d8] sm:$0xf0] }
  0x47   :  { %933 = vmatpush.bf16.msra.mxu3 %v1528_v23  ;;  %v1640_v12 = vld [vmem:[%s2488_s1 + $0x354] sm:$0xf0]  ;;  %v1320_v19 = vor.u32 %v1608_v10, %v1319_v9  ;;  %v1047_v20 = vld [vmem:[%s2488_s1 + $0x28] sm:$0xf]  ;;  %v1654_v63 = vld [vmem:[%s2488_s1 + $0x3cc] sm:$0xf] }
  0x48   :  { %895 = vmatpush.bf16.msra.mxu0 %v1128_v29  ;;  %v1540_v21 = vld [vmem:[%s2488_s1 + $0x34] sm:$0xf0]  ;;  %v1175_v22 = vld [vmem:[%s2488_s1 + $0x128] sm:$0xf]  ;;  %v1448_v23 = vor.u32 %v1640_v12, %v1447_v11  ;;  %v1513_v0 = vld [vmem:[%s2488_s1 + $0x3d8] sm:$0xf0] }
  0x49   :  { %908 = vmatpush.bf16.msra.mxu1 %v1256_v30  ;;  %v1572_v24 = vld [vmem:[%s2488_s1 + $0x134] sm:$0xf0]  ;;  %v1303_v25 = vld [vmem:[%s2488_s1 + $0x228] sm:$0xf]  ;;  %v1048_v29 = vor.u32 %v1540_v21, %v1047_v20  ;;  %v1554_v4 = vld [vmem:[%s2488_s1 + $0xac] sm:$0xf] }
  0x4a   :  { %921 = vmatpush.bf16.msra.mxu2 %v1384_v31  ;;  %v1604_v26 = vld [vmem:[%s2488_s1 + $0x234] sm:$0xf0]  ;;  %v1431_v27 = vld [vmem:[%s2488_s1 + $0x328] sm:$0xf]  ;;  %v1176_v32 = vor.u32 %v1572_v24, %v1175_v22  ;;  %v1113_v5 = vld [vmem:[%s2488_s1 + $0xb8] sm:$0xf0] }
  0x4b   :  { %934 = vmatpush.bf16.msra.mxu3 %v1512_v35  ;;  %v1636_v28 = vld [vmem:[%s2488_s1 + $0x334] sm:$0xf0]  ;;  %v1031_v30 = vld [vmem:[%s2488_s1 + $0x8] sm:$0xf]  ;;  %v1304_v33 = vor.u32 %v1604_v26, %v1303_v25  ;;  %v1586_v6 = vld [vmem:[%s2488_s1 + $0x1ac] sm:$0xf] }
  0x4c   :  { %896 = vmatpush.bf16.msra.mxu0 %v1112_v41  ;;  %v1536_v31 = vld [vmem:[%s2488_s1 + $0x14] sm:$0xf0]  ;;  %v1159_v34 = vld [vmem:[%s2488_s1 + $0x108] sm:$0xf]  ;;  %v1432_v37 = vor.u32 %v1636_v28, %v1431_v27  ;;  %v1562_v41 = vld [vmem:[%s2488_s1 + $0xec] sm:$0xf] }
  0x4d   :  { %909 = vmatpush.bf16.msra.mxu1 %v1240_v42  ;;  %v1568_v35 = vld [vmem:[%s2488_s1 + $0x114] sm:$0xf0]  ;;  %v1287_v36 = vld [vmem:[%s2488_s1 + $0x208] sm:$0xf]  ;;  %v1145_v42 = vld [vmem:[%s2488_s1 + $0xf8] sm:$0xf0]  ;;  %v1032_v44 = vor.u32 %v1536_v31, %v1031_v30 }
  0x4e   :  { %922 = vmatpush.bf16.msra.mxu2 %v1368_v43  ;;  %v1600_v38 = vld [vmem:[%s2488_s1 + $0x214] sm:$0xf0]  ;;  %v1415_v39 = vld [vmem:[%s2488_s1 + $0x308] sm:$0xf]  ;;  %v1594_v43 = vld [vmem:[%s2488_s1 + $0x1ec] sm:$0xf]  ;;  %v1160_v48 = vor.u32 %v1568_v35, %v1159_v34 }
  0x4f   :  { %935 = vmatpush.bf16.msra.mxu3 %v1496_v47  ;;  %v1632_v40 = vld [vmem:[%s2488_s1 + $0x314] sm:$0xf0]  ;;  %v1401_v47 = vld [vmem:[%s2488_s1 + $0x2f8] sm:$0xf0]  ;;  %v1288_v49 = vor.u32 %v1600_v38, %v1287_v36  ;;  %v1618_v9 = vld [vmem:[%s2488_s1 + $0x2ac] sm:$0xf] }
  0x50   :  { %897 = vmatpush.bf16.msra.mxu0 %v1096_v53  ;;  %v1416_v52 = vor.u32 %v1632_v40, %v1415_v39  ;;  %v1148_v53 = vor.u32 %v1562_v41, %v1145_v42  ;;  %v1241_v8 = vld [vmem:[%s2488_s1 + $0x1b8] sm:$0xf0]  ;;  %v1650_v11 = vld [vmem:[%s2488_s1 + $0x3ac] sm:$0xf] }
  0x51   :  { %910 = vmatpush.bf16.msra.mxu1 %v1224_v54  ;;  %v1276_v54 = vor.u32 %v1594_v43, %v1273_v45  ;;  %v1369_v10 = vld [vmem:[%s2488_s1 + $0x2b8] sm:$0xf0]  ;;  %v1550_v20 = vld [vmem:[%s2488_s1 + $0x8c] sm:$0xf] }
  0x52   :  { %923 = vmatpush.bf16.msra.mxu2 %v1352_v55  ;;  %v1404_v55 = vor.u32 %v1626_v46, %v1401_v47  ;;  %v1497_v12 = vld [vmem:[%s2488_s1 + $0x3b8] sm:$0xf0]  ;;  %v1582_v22 = vld [vmem:[%s2488_s1 + $0x18c] sm:$0xf] }
  0x53   :  { %936 = vmatpush.bf16.msra.mxu3 %v1480_v59  ;;  %v1532_v59 = vor.u32 %v1658_v50, %v1529_v51  ;;  %v1097_v21 = vld [vmem:[%s2488_s1 + $0x98] sm:$0xf0]  ;;  %v1614_v25 = vld [vmem:[%s2488_s1 + $0x28c] sm:$0xf] }
  0x54   :  { %898 = vmatpush.bf16.msra.mxu0 %v1080_v1  ;;  %v1132_v1 = vor.u32 %v1558_v56, %v1129_v57  ;;  %v1225_v24 = vld [vmem:[%s2488_s1 + $0x198] sm:$0xf0]  ;;  %v1646_v27 = vld [vmem:[%s2488_s1 + $0x38c] sm:$0xf] }
  0x55   :  { %911 = vmatpush.bf16.msra.mxu1 %v1208_v2  ;;  %v1260_v2 = vor.u32 %v1590_v58, %v1257_v60  ;;  %v1353_v26 = vld [vmem:[%s2488_s1 + $0x298] sm:$0xf0]  ;;  %v1228_v30 = vor.u32 %v1582_v22, %v1225_v24  ;;  %v1578_v34 = vld [vmem:[%s2488_s1 + $0x16c] sm:$0xf] }
  0x56   :  { %924 = vmatpush.bf16.msra.mxu2 %v1336_v3  ;;  %v1388_v3 = vor.u32 %v1622_v61, %v1385_v62  ;;  %v1481_v28 = vld [vmem:[%s2488_s1 + $0x398] sm:$0xf0]  ;;  %v1356_v31 = vor.u32 %v1614_v25, %v1353_v26  ;;  %v1642_v39 = vld [vmem:[%s2488_s1 + $0x36c] sm:$0xf] }
  0x57   :  { %937 = vmatpush.bf16.msra.mxu3 %v1464_v7  ;;  %v1516_v7 = vor.u32 %v1654_v63, %v1513_v0  ;;  %v1484_v35 = vor.u32 %v1646_v27, %v1481_v28  ;;  %v1209_v36 = vld [vmem:[%s2488_s1 + $0x178] sm:$0xf0]  ;;  %v1574_v46 = vld [vmem:[%s2488_s1 + $0x14c] sm:$0xf] }
  0x58   :  { %899 = vmatpush.bf16.msra.mxu0 %v1064_v15  ;;  %v1116_v15 = vor.u32 %v1554_v4, %v1113_v5  ;;  %v1337_v38 = vld [vmem:[%s2488_s1 + $0x278] sm:$0xf0]  ;;  %v1212_v42 = vor.u32 %v1578_v34, %v1209_v36  ;;  %v1638_v51 = vld [vmem:[%s2488_s1 + $0x34c] sm:$0xf] }
  0x59   :  { %912 = vmatpush.bf16.msra.mxu1 %v1192_v18  ;;  %v1244_v18 = vor.u32 %v1586_v6, %v1241_v8  ;;  %v1465_v40 = vld [vmem:[%s2488_s1 + $0x378] sm:$0xf0]  ;;  %v1538_v56 = vld [vmem:[%s2488_s1 + $0x2c] sm:$0xf] }
  0x5a   :  { %925 = vmatpush.bf16.msra.mxu2 %v1320_v19  ;;  %v1372_v19 = vor.u32 %v1618_v9, %v1369_v10  ;;  %v1065_v45 = vld [vmem:[%s2488_s1 + $0x58] sm:$0xf0]  ;;  %v1468_v47 = vor.u32 %v1642_v39, %v1465_v40  ;;  %v1570_v58 = vld [vmem:[%s2488_s1 + $0x12c] sm:$0xf] }
  0x5b   :  { %938 = vmatpush.bf16.msra.mxu3 %v1448_v23  ;;  %v1500_v23 = vor.u32 %v1650_v11, %v1497_v12  ;;  %v1321_v50 = vld [vmem:[%s2488_s1 + $0x258] sm:$0xf0]  ;;  %v1602_v61 = vld [vmem:[%s2488_s1 + $0x22c] sm:$0xf] }
  0x5c   :  { %900 = vmatpush.bf16.msra.mxu0 %v1048_v29  ;;  %v1100_v29 = vor.u32 %v1550_v20, %v1097_v21  ;;  %v1049_v57 = vld [vmem:[%s2488_s1 + $0x38] sm:$0xf0]  ;;  %v1634_v63 = vld [vmem:[%s2488_s1 + $0x32c] sm:$0xf] }
  0x5d   :  { %913 = vmatpush.bf16.msra.mxu1 %v1176_v32  ;;  %v1546_v32 = vld [vmem:[%s2488_s1 + $0x6c] sm:$0xf]  ;;  %v1177_v60 = vld [vmem:[%s2488_s1 + $0x138] sm:$0xf0] }
  0x5e   :  { %926 = vmatpush.bf16.msra.mxu2 %v1304_v33  ;;  %v1081_v33 = vld [vmem:[%s2488_s1 + $0x78] sm:$0xf0]  ;;  %v1534_v4 = vld [vmem:[%s2488_s1 + $0xc] sm:$0xf] }
  0x5f   :  { %939 = vmatpush.bf16.msra.mxu3 %v1432_v37  ;;  %v1610_v37 = vld [vmem:[%s2488_s1 + $0x26c] sm:$0xf]  ;;  %v1084_v41 = vor.u32 %v1546_v32, %v1081_v33  ;;  %v1305_v62 = vld [vmem:[%s2488_s1 + $0x238] sm:$0xf0] }
  0x60   :  { %901 = vmatpush.bf16.msra.mxu0 %v1032_v44  ;;  %v1340_v43 = vor.u32 %v1610_v37, %v1337_v38  ;;  %v1542_v44 = vld [vmem:[%s2488_s1 + $0x4c] sm:$0xf]  ;;  %v1433_v0 = vld [vmem:[%s2488_s1 + $0x338] sm:$0xf0] }
  0x61   :  { %914 = vmatpush.bf16.msra.mxu1 %v1160_v48  ;;  %v1193_v48 = vld [vmem:[%s2488_s1 + $0x158] sm:$0xf0]  ;;  %v1566_v6 = vld [vmem:[%s2488_s1 + $0x10c] sm:$0xf] }
  0x62   :  { %927 = vmatpush.bf16.msra.mxu2 %v1288_v49  ;;  %v1606_v49 = vld [vmem:[%s2488_s1 + $0x24c] sm:$0xf]  ;;  %v1033_v5 = vld [vmem:[%s2488_s1 + $0x18] sm:$0xf0] }
  0x63   :  { %940 = vmatpush.bf16.msra.mxu3 %v1416_v52  ;;  %902 = vmatmul.bf16.vlgmr.msra.gmra.mxu0 %v1980_v16  ;;  %v1449_v52 = vld [vmem:[%s2488_s1 + $0x358] sm:$0xf0]  ;;  %v1598_v9 = vld [vmem:[%s2488_s1 + $0x20c] sm:$0xf] }
  0x64   :  { %946 = vmatpush.bf16.msrb.mxu0 %v1148_v53  ;;  %915 = vmatmul.bf16.vlgmr.msra.gmra.mxu1 %v1982_v17  ;;  %v1068_v53 = vor.u32 %v1542_v44, %v1065_v45  ;;  %v1161_v8 = vld [vmem:[%s2488_s1 + $0x118] sm:$0xf0]  ;;  %v1630_v11 = vld [vmem:[%s2488_s1 + $0x30c] sm:$0xf] }
  0x65   :  { %959 = vmatpush.bf16.msrb.mxu1 %v1276_v54  ;;  %928 = vmatmul.bf16.vlgmr.msra.gmra.mxu2 %v1975_v13  ;;  %v1196_v54 = vor.u32 %v1574_v46, %v1193_v48  ;;  %v1289_v10 = vld [vmem:[%s2488_s1 + $0x218] sm:$0xf0] }
  0x66   :  { %972 = vmatpush.bf16.msrb.mxu2 %v1404_v55  ;;  %941 = vmatmul.bf16.vlgmr.msra.gmra.mxu3 %v1977_v14  ;;  %v1324_v55 = vor.u32 %v1606_v49, %v1321_v50  ;;  %v1417_v12 = vld [vmem:[%s2488_s1 + $0x318] sm:$0xf0] }
  0x67   :  { %985 = vmatpush.bf16.msrb.mxu3 %v1532_v59  ;;  %v1452_v59 = vor.u32 %v1638_v51, %v1449_v52  ;;  %v1420_v20 = vor.u32 %v1630_v11, %v1417_v12 }
  0x68   :  { %947 = vmatpush.bf16.msrb.mxu0 %v1132_v1  ;;  %v1052_v1 = vor.u32 %v1538_v56, %v1049_v57 }
  0x69   :  { %960 = vmatpush.bf16.msrb.mxu1 %v1260_v2  ;;  %v1180_v2 = vor.u32 %v1570_v58, %v1177_v60 }
  0x6a   :  { %973 = vmatpush.bf16.msrb.mxu2 %v1388_v3  ;;  %v1308_v3 = vor.u32 %v1602_v61, %v1305_v62 }
  0x6b   :  { %986 = vmatpush.bf16.msrb.mxu3 %v1516_v7  ;;  %v1436_v7 = vor.u32 %v1634_v63, %v1433_v0 }
  0x6c   :  { %948 = vmatpush.bf16.msrb.mxu0 %v1116_v15  ;;  %v1036_v15 = vor.u32 %v1534_v4, %v1033_v5 }
  0x6d   :  { %961 = vmatpush.bf16.msrb.mxu1 %v1244_v18  ;;  %v1164_v18 = vor.u32 %v1566_v6, %v1161_v8 }
  0x6e   :  { %974 = vmatpush.bf16.msrb.mxu2 %v1372_v19  ;;  %v1292_v19 = vor.u32 %v1598_v9, %v1289_v10 }
  0x6f   :  { %987 = vmatpush.bf16.msrb.mxu3 %v1500_v23 }
  0x70   :  { %949 = vmatpush.bf16.msrb.mxu0 %v1100_v29 }
  0x71   :  { %962 = vmatpush.bf16.msrb.mxu1 %v1228_v30 }
  0x72   :  { %975 = vmatpush.bf16.msrb.mxu2 %v1356_v31 }
  0x73   :  { %988 = vmatpush.bf16.msrb.mxu3 %v1484_v35 }
  0x74   :  { %950 = vmatpush.bf16.msrb.mxu0 %v1084_v41 }
  0x75   :  { %963 = vmatpush.bf16.msrb.mxu1 %v1212_v42 }
  0x76   :  { %976 = vmatpush.bf16.msrb.mxu2 %v1340_v43 }
  0x77   :  { %989 = vmatpush.bf16.msrb.mxu3 %v1468_v47 }
  0x78   :  { %951 = vmatpush.bf16.msrb.mxu0 %v1068_v53 }
  0x79   :  { %964 = vmatpush.bf16.msrb.mxu1 %v1196_v54 }
  0x7a   :  { %977 = vmatpush.bf16.msrb.mxu2 %v1324_v55 }
  0x7b   :  { %990 = vmatpush.bf16.msrb.mxu3 %v1452_v59 }
  0x7c   :  { %952 = vmatpush.bf16.msrb.mxu0 %v1052_v1 }
  0x7d   :  { %965 = vmatpush.bf16.msrb.mxu1 %v1180_v2 }
  0x7e   :  { %978 = vmatpush.bf16.msrb.mxu2 %v1308_v3 }
  0x7f   :  { %991 = vmatpush.bf16.msrb.mxu3 %v1436_v7 }
  0x80   :  { %953 = vmatpush.bf16.msrb.mxu0 %v1036_v15 }
  0x81   :  { %966 = vmatpush.bf16.msrb.mxu1 %v1164_v18 }
  0x82   :  { %979 = vmatpush.bf16.msrb.mxu2 %v1292_v19 }
  0x83   :  { %992 = vmatpush.bf16.msrb.mxu3 %v1420_v20  ;;  %954 = vmatmul.bf16.vlgmr.msrb.gmra.mxu0 %v1980_v16 }
  0x84   :  { %967 = vmatmul.bf16.vlgmr.msrb.gmra.mxu1 %v1982_v17 }
  0x85   :  { %980 = vmatmul.bf16.vlgmr.msrb.gmra.mxu2 %v1975_v13 }
  0x86   :  { %993 = vmatmul.bf16.vlgmr.msrb.gmra.mxu3 %v1977_v14 }
  0xa9   :  { %v812_v22 = vpop.f32.mrf.mxu1 }
  0xaa   :  { %v799_v21 = vpop.f32.mrf.mxu0 }
  0xab   :  { %v813_v29 = vadd.f32 %v812_v22, %v799_v21 }
  0xad   :  { %v838_v24 = vpop.f32.mrf.mxu3 }
  0xae   :  { %v825_v23 = vpop.f32.mrf.mxu2 }
  0xaf   :  { %v826_v33 = vadd.f32 %v825_v23, %v813_v29 }
  0xb1   :  { %v814_v26 = vpop.f32.mrf.mxu1  ;;  %v839_v35 = vadd.f32 %v838_v24, %v826_v33 }
  0xb2   :  { %v801_v25 = vpop.f32.mrf.mxu0 }
  0xb5   :  { %v840_v28 = vpop.f32.mrf.mxu3 }
  0xb6   :  { %v827_v27 = vpop.f32.mrf.mxu2 }
  0xc0   :  { %v851_v30 = vpop.f32.mrf.mxu0 }
  0xc1   :  { %v864_v31 = vpop.f32.mrf.mxu1 }
  0xc2   :  { %v865_v32 = vadd.f32 %v864_v31, %v851_v30 }
  0xc8   :  { %v877_v16 = vpop.f32.mrf.mxu2  ;;  %v853_v36 = vpop.f32.mrf.mxu0 }
  0xc9   :  { %v878_v34 = vadd.f32 %v877_v16, %v865_v32  ;;  %v890_v17 = vpop.f32.mrf.mxu3  ;;  %v866_v14 = vpop.f32.mrf.mxu1 }
  0xcb   :  { %v891_v13 = vadd.f32 %v890_v17, %v878_v34 }
  0xcd   :  { %1661 = vtanh.f32 %v891_v13 }
  0xce   :  { %1663 = vtanh.f32 %v839_v35 }
  0xd0   :  { %v879_v37 = vpop.f32.mrf.mxu2 }
  0xd1   :  { %v892_v38 = vpop.f32.mrf.mxu3 }
  0xd3   :  { %v1662_v39 = vpop.eup %1661 }
  0xd4   :  { %v1006_v40 = vrot.slane %v1662_v39, 4  ;;  %v1664_v41 = vpop.eup %1663 }
  0xd6   :  { %v1009_v42 = vsel %vm1008_vm0, %v1664_v41, %v1006_v40 }
  0xd7   :  { %1013 = vst [vmem:[%s2490_s2] sm:$0xff] %v1009_v42 }
  0xe0   :  { %v903_v43 = vpop.f32.mrf.mxu0 }
  0xe1   :  { %v916_v44 = vpop.f32.mrf.mxu1 }
  0xe2   :  { %v917_v53 = vadd.f32 %v916_v44, %v903_v43 }
  0xe8   :  { %v929_v45 = vpop.f32.mrf.mxu2  ;;  %v905_v47 = vpop.f32.mrf.mxu0 }
  0xe9   :  { %v942_v46 = vpop.f32.mrf.mxu3  ;;  %v918_v48 = vpop.f32.mrf.mxu1  ;;  %v930_v55 = vadd.f32 %v929_v45, %v917_v53 }
  0xeb   :  { %v943_v61 = vadd.f32 %v942_v46, %v930_v55 }
  0xf0   :  { %v931_v49 = vpop.f32.mrf.mxu2 }
  0xf1   :  { %v944_v50 = vpop.f32.mrf.mxu3 }
 0x100   :  { %v955_v51 = vpop.f32.mrf.mxu0 }
 0x101   :  { %v968_v52 = vpop.f32.mrf.mxu1 }
 0x102   :  { %v969_v54 = vadd.f32 %v968_v52, %v955_v51 }
 0x108   :  { %v981_v56 = vpop.f32.mrf.mxu2  ;;  %v957_v59 = vpop.f32.mrf.mxu0 }
 0x109   :  { %v982_v57 = vadd.f32 %v981_v56, %v969_v54  ;;  %v994_v58 = vpop.f32.mrf.mxu3  ;;  %v970_v60 = vpop.f32.mrf.mxu1 }
 0x10b   :  { %v995_v62 = vadd.f32 %v994_v58, %v982_v57 }
 0x10d   :  { %1665 = vtanh.f32 %v995_v62 }
 0x10e   :  { %1667 = vtanh.f32 %v943_v61 }
 0x110   :  { %v983_v63 = vpop.f32.mrf.mxu2 }
 0x111   :  { %v996_v0 = vpop.f32.mrf.mxu3 }
 0x113   :  { %v1666_v1 = vpop.eup %1665 }
 0x114   :  { %v1007_v2 = vrot.slane %v1666_v1, 4  ;;  %v1668_v3 = vpop.eup %1667 }
 0x116   :  { %v1010_v4 = vsel %vm1008_vm0, %v1668_v3, %v1007_v2 }
 0x117   :  { %1016 = vst.msk [vmem:[%s2490_s2 + $0x8] sm:$0xff] %vm1015_vm2, %v1010_v4 }

</bundles_post_ra>
